<compile_context>
chip_gen: v7x
topology: tpu7x:2x2x1
jax: 0.10.0
libtpu: 0.0.40
codegen_flags: <defaults>
</compile_context>

<pallas_src>
import functools
import math

import jax
import jax.numpy as jnp
from jax import lax
from jax.experimental import pallas as pl
from jax.experimental.pallas import tpu as pltpu

# ----------------------------- hyper-parameters ------------------------------
FEATURE_DIMS = [10, 12, 8, 6, 14, 9, 7, 11]   # F = 8 sparse fields
EMBED_DIM = 8                                 # E
ATTEN_DIM = 64                                # AutoInt attention embed dim
NUM_HEADS = 2
HEAD_DIM = ATTEN_DIM // NUM_HEADS
NUM_ATTN_LAYERS = 3
NUM_SHARED_EXPERTS = 2
NUM_SPECIFIC_EXPERTS = 2
EXPERTS_DIMS = [[32, 32], [32, 32]]           # 2 PLE layers
TOWER_DIMS = [[16], [16]]
TASK_TYPES = ["binary", "regression"]
TIME_DIM = 9
BATCH = 8

NUM_FIELDS = len(FEATURE_DIMS)
EMBED_OUTPUT_DIM = NUM_FIELDS * EMBED_DIM
TASK_NUM = len(TASK_TYPES)
LAYER_NUM = len(EXPERTS_DIMS)
TOTAL_VOCAB = sum(FEATURE_DIMS)               # 77
VPAD = 128                                    # vocab padded to the 128-lane width
BN_SCALE = 1.0 / math.sqrt(1.0 + 1e-5)        # eval-mode BatchNorm1d with default stats

_VMEM = pl.BlockSpec(memory_space=pltpu.MemorySpace.VMEM)


# ------------------------------ the fused kernel ------------------------------
def _mtcctr_kernel(*args, names):
    # args = (gidx_col, gidx_row, *weights, out_res0, out_res1, out_final)
    in_refs = args[:-3]
    out0_ref, out1_ref, out2_ref = args[-3:]
    gidx_col_ref, gidx_row_ref = in_refs[0], in_refs[1]
    wr = dict(zip(names, in_refs[2:]))

    f32 = jnp.float32
    B, F = gidx_row_ref.shape
    E, A, D = EMBED_DIM, ATTEN_DIM, HEAD_DIM
    BF = B * F

    def mm(a, b):
        return jnp.dot(a, b, preferred_element_type=f32)

    def softmax(z):
        z = z - jnp.max(z, axis=-1, keepdims=True)
        e = jnp.exp(z)
        return e * pl.reciprocal(jnp.sum(e, axis=-1, keepdims=True), approx=True)

    # ---------- embedding / FeaturesLinear lookups (one-hot matmuls in VMEM) ----------
    # token-major one-hot: rows are (b, f); feeds the AutoInt per-field slab.
    onehot_tok = (lax.broadcasted_iota(jnp.int32, (BF, VPAD), 1)
                  == gidx_col_ref[...]).astype(f32)                          # (BF, VPAD)
    embed_flat = mm(onehot_tok, wr["emb_tab"][...])                          # (BF, E)

    # batch-major wide one-hot: one lane-dense matmul directly yields the flattened
    # (B, F*E) expert input and the FeaturesLinear sum (no (BF,E)->(B,F*E) relayout).
    target = mm(gidx_row_ref[...], wr["rep"][...])                           # (B, F*VPAD)
    onehot_wide = (jnp.abs(target - wr["within"][...]) < 0.5).astype(f32)    # (B, F*VPAD)
    wide = mm(onehot_wide, wr["t_wide"][...])                                # (B, F*E + 1)
    experts_input = wide[:, :EMBED_OUTPUT_DIM]                               # (B, F*E)
    lin = wide[:, EMBED_OUTPUT_DIM:EMBED_OUTPUT_DIM + 1] + wr["lin_bias"][...]  # (B, 1)

    # ----------------------------------- AutoInt -----------------------------------
    cross = mm(embed_flat, wr["atten_w"][...]) + wr["atten_b"][...]          # (BF, A)
    vres = mm(embed_flat, wr["vres_w"][...]) + wr["vres_b"][...]             # (BF, A)
    scale = 1.0 / math.sqrt(D)
    for l in range(NUM_ATTN_LAYERS):
        wpack = wr[f"mha{l}_wqkvo"][...]                                     # (A, 4A) = [Wq|Wk|Wv|Wo]
        qkv = mm(cross, wpack[:, :3 * A]) + wr[f"mha{l}_bqkv"][...]          # (BF, 3A), fused QKV
        wo = wpack[:, 3 * A:]                                                # (A, A)
        acc = wr[f"mha{l}_bo"][...]                                          # (1, A)
        for h in range(NUM_HEADS):
            q_h = qkv[:, h * D:(h + 1) * D]                                  # (BF, D)
            k_h = qkv[:, A + h * D:A + (h + 1) * D]
            v_h = qkv[:, 2 * A + h * D:2 * A + (h + 1) * D]
            # all-pairs scores + block-diagonal mask == per-sample attention over fields
            s = pl.dot(q_h, k_h, trans_b=True) * scale + wr["attn_mask"][...]
            p = softmax(s)                                                   # (BF, BF)
            ctx = mm(p, v_h)                                                 # (BF, D)
            acc = acc + mm(ctx, wo[h * D:(h + 1) * D, :])                    # output projection
        cross = acc
    relu_x = jnp.maximum(cross + vres, 0.0)                                  # (BF, A)
    # attn_fc (F*A -> 1) without a (B,F,A)->(B,F*A) reshape: per-token dot + field pooling.
    att_tok = jnp.sum(relu_x * wr["fc_w_tiled"][...], axis=1, keepdims=True)  # (BF, 1)
    att = mm(wr["pool"][...], att_tok) + wr["fc_b"][...]                     # (B, 1)

    # --------------------------------- PLE / CGC ---------------------------------
    fea = [experts_input for _ in range(TASK_NUM + 1)]                       # task0, task1, shared
    for i in range(LAYER_NUM):
        eo = EXPERTS_DIMS[i][-1]                                             # per-expert output width
        n_layers = len(EXPERTS_DIMS[i])

        def expert_pack(x, prefix, nl):
            h = x
            for li in range(nl):
                h = jnp.maximum(
                    mm(h, wr[f"{prefix}_w{li}"][...]) + wr[f"{prefix}_b{li}"][...], 0.0)
            return h                                                         # (B, n_exp*eo), lane-packed

        shared_out = expert_pack(fea[TASK_NUM], f"ple{i}_sh", n_layers)
        shared_blocks = [shared_out[:, k * eo:(k + 1) * eo]
                         for k in range(NUM_SHARED_EXPERTS)]
        task_outs = []
        new_fea = []
        for j in range(TASK_NUM):
            tout = expert_pack(fea[j], f"ple{i}_t{j}", n_layers)
            task_outs.append(tout)
            task_blocks = [tout[:, k * eo:(k + 1) * eo]
                           for k in range(NUM_SPECIFIC_EXPERTS)]
            gate = softmax(mm(fea[j], wr[f"ple{i}_t{j}_gw"][...])
                           + wr[f"ple{i}_t{j}_gb"][...])                     # (B, K)
            blocks = task_blocks + shared_blocks
            nf = gate[:, 0:1] * blocks[0]
            for k in range(1, len(blocks)):
                nf = nf + gate[:, k:k + 1] * blocks[k]
            new_fea.append(nf)
        gate_s = softmax(mm(fea[TASK_NUM], wr[f"ple{i}_sh_gw"][...])
                         + wr[f"ple{i}_sh_gb"][...])
        if i != LAYER_NUM - 1:
            blocks = [t[:, k * eo:(k + 1) * eo]
                      for t in task_outs for k in range(NUM_SPECIFIC_EXPERTS)]
            blocks = blocks + shared_blocks
        else:
            blocks = shared_blocks
        ns = gate_s[:, 0:1] * blocks[0]
        for k in range(1, len(blocks)):
            ns = ns + gate_s[:, k:k + 1] * blocks[k]
        fea = new_fea + [ns]

    # --------------------------- towers / guide / united ---------------------------
    t0 = jnp.maximum(mm(fea[0], wr["tower0_w"][...]) + wr["tower0_b"][...], 0.0)
    t1 = jnp.maximum(mm(fea[1], wr["tower1_w"][...]) + wr["tower1_b"][...], 0.0)
    guide = jax.nn.sigmoid(mm(fea[0], wr["guide_w"][...]) + wr["guide_b"][...])   # (B, 1)
    ctr_guide = guide * t0                                                        # (B, T0)
    united_t = jnp.maximum(
        mm(fea[TASK_NUM], wr["united_w_fea"][...])
        + mm(ctr_guide, wr["united_w_guide"][...]) + wr["united_b"][...], 0.0)    # (B, T1)

    # -------------------------------- output heads --------------------------------
    def head(name, tower_in, final_sigmoid):
        h = (lin * wr[f"{name}_w_lin"][...] + att * wr[f"{name}_w_att"][...]
             + mm(tower_in, wr[f"{name}_w_t"][...]) + wr[f"{name}_b1"][...])
        y = mm(h, wr[f"{name}_w2"][...]) + wr[f"{name}_b2"][...]
        return jax.nn.sigmoid(y) if final_sigmoid else y

    res0 = head("out0", t0, True)          # (B, 1)
    res1 = head("out1", t1, False)         # (B, TIME_DIM)
    united = head("outu", united_t, False)  # (B, TIME_DIM)
    out0_ref[...] = res0
    out1_ref[...] = res1
    out2_ref[...] = res1 - united


# ------------------------------ weight packing --------------------------------
def _block_diag(mats):
    rows = sum(m.shape[0] for m in mats)
    cols = sum(m.shape[1] for m in mats)
    out = jnp.zeros((rows, cols), jnp.float32)
    r = c = 0
    for m in mats:
        out = out.at[r:r + m.shape[0], c:c + m.shape[1]].set(m)
        r += m.shape[0]
        c += m.shape[1]
    return out


def pack_experts(expert_mlps):
    """Pack K same-shape expert MLPs: layer-0 weights lane-concatenated, later layers
    block-diagonal.  Folds the eval-mode BatchNorm scale into W and b."""
    packed = []
    for li in range(len(expert_mlps[0])):
        ws = [e[li][0] * BN_SCALE for e in expert_mlps]
        bs = [e[li][1] * BN_SCALE for e in expert_mlps]
        w = jnp.concatenate(ws, axis=1) if li == 0 else _block_diag(ws)
        b = jnp.concatenate(bs, axis=0).reshape(1, -1)
        packed.append((w, b))
    return packed


def prepare_packed(params, batch):
    """Pre-shape / pre-fuse every weight once, so the kernel is pure matmul+VPU work."""
    F, E, A = NUM_FIELDS, EMBED_DIM, ATTEN_DIM
    bf = batch * F
    pk = {}

    # --- embedding / FeaturesLinear tables (one-hot matmul form) ---
    emb = params["emb_table"]                         # (V, E)
    linw = params["lin_table"]                        # (V, 1)
    pk["emb_tab"] = jnp.zeros((VPAD, E), jnp.float32).at[:TOTAL_VOCAB].set(emb)
    t_wide = jnp.zeros((F * VPAD, F * E + 1), jnp.float32)
    for f in range(F):
        t_wide = t_wide.at[f * VPAD:f * VPAD + TOTAL_VOCAB, f * E:(f + 1) * E].set(emb)
        t_wide = t_wide.at[f * VPAD:f * VPAD + TOTAL_VOCAB, F * E].set(linw[:, 0])
    pk["t_wide"] = t_wide
    rep = jnp.zeros((F, F * VPAD), jnp.float32)
    for f in range(F):
        rep = rep.at[f, f * VPAD:(f + 1) * VPAD].set(1.0)
    pk["rep"] = rep
    pk["within"] = jnp.tile(jnp.arange(VPAD, dtype=jnp.float32), (1, F))     # (1, F*VPAD)
    pk["lin_bias"] = params["lin_bias"].reshape(1, 1)

    # --- AutoInt ---
    afi = params["afi"]
    pk["atten_w"] = afi["atten_w"]
    pk["atten_b"] = afi["atten_b"].reshape(1, -1)
    pk["vres_w"] = afi["vres_w"]
    pk["vres_b"] = afi["vres_b"].reshape(1, -1)
    pk["fc_w_tiled"] = jnp.tile(afi["fc_w"].reshape(F, A), (batch, 1))       # (B*F, A)
    pk["fc_b"] = afi["fc_b"].reshape(1, 1)
    for l, layer in enumerate(afi["mha"]):
        wqkv = jnp.concatenate([layer["wq"], layer["wk"], layer["wv"]], axis=1)  # (A, 3A)
        pk[f"mha{l}_wqkvo"] = jnp.concatenate([wqkv, layer["wo"]], axis=1)       # (A, 4A) = 256 lanes
        pk[f"mha{l}_bqkv"] = jnp.concatenate(
            [layer["bq"], layer["bk"], layer["bv"]]).reshape(1, -1)
        pk[f"mha{l}_bo"] = layer["bo"].reshape(1, -1)
    # block-diagonal mask: 0 within a sample's F fields, -1e30 across samples
    mask = jnp.full((bf, bf), -1e30, jnp.float32)
    for b in range(batch):
        mask = mask.at[b * F:(b + 1) * F, b * F:(b + 1) * F].set(0.0)
    pk["attn_mask"] = mask
    # field-pooling matrix (B, B*F)
    pool = jnp.zeros((batch, bf), jnp.float32)
    for b in range(batch):
        pool = pool.at[b, b * F:(b + 1) * F].set(1.0)
    pk["pool"] = pool

    # --- PLE experts / gates ---
    for i in range(LAYER_NUM):
        ple = params["ple"][i]
        for li, (w, b) in enumerate(pack_experts(ple["shared_experts"])):
            pk[f"ple{i}_sh_w{li}"] = w
            pk[f"ple{i}_sh_b{li}"] = b
        for j in range(TASK_NUM):
            for li, (w, b) in enumerate(pack_experts(ple["task_experts"][j])):
                pk[f"ple{i}_t{j}_w{li}"] = w
                pk[f"ple{i}_t{j}_b{li}"] = b
            gw, gb = ple["task_gates"][j]
            pk[f"ple{i}_t{j}_gw"] = gw
            pk[f"ple{i}_t{j}_gb"] = gb.reshape(1, -1)
        gw, gb = ple["shared_gate"]
        pk[f"ple{i}_sh_gw"] = gw
        pk[f"ple{i}_sh_gb"] = gb.reshape(1, -1)

    # --- towers / guide / united tower (BN folded) ---
    for t in range(TASK_NUM):
        (w, b), = params["towers"][t]
        pk[f"tower{t}_w"] = w * BN_SCALE
        pk[f"tower{t}_b"] = (b * BN_SCALE).reshape(1, -1)
    (wu, bu), = params["united_tower"]
    e_last = EXPERTS_DIMS[-1][-1]
    pk["united_w_fea"] = wu[:e_last, :] * BN_SCALE
    pk["united_w_guide"] = wu[e_last:, :] * BN_SCALE
    pk["united_b"] = (bu * BN_SCALE).reshape(1, -1)
    pk["guide_w"] = params["guide_w"]
    pk["guide_b"] = params["guide_b"].reshape(1, -1)

    # --- output heads: first-layer weights row-split into [lin | att | tower] ---
    for name in ("out0", "out1", "outu"):
        (wa, ba), (wb, bb) = params[name]
        pk[f"{name}_w_lin"] = wa[0:1, :]
        pk[f"{name}_w_att"] = wa[1:2, :]
        pk[f"{name}_w_t"] = wa[2:, :]
        pk[f"{name}_b1"] = ba.reshape(1, -1)
        pk[f"{name}_w2"] = wb
        pk[f"{name}_b2"] = bb.reshape(1, -1)
    return pk


def build_forward(params, batch):
    packed = prepare_packed(params, batch)
    names = tuple(packed.keys())
    weights = [packed[k] for k in names]
    n_in = 2 + len(weights)

    fused = pl.pallas_call(
        functools.partial(_mtcctr_kernel, names=names),
        in_specs=[_VMEM] * n_in,
        out_specs=(_VMEM, _VMEM, _VMEM),
        out_shape=(
            jax.ShapeDtypeStruct((batch, 1), jnp.float32),
            jax.ShapeDtypeStruct((batch, TIME_DIM), jnp.float32),
            jax.ShapeDtypeStruct((batch, TIME_DIM), jnp.float32),
        ),
    )

    offsets = params["offsets"]

    @jax.jit
    def forward(x_idx):
        gidx = x_idx + offsets[None, :]                              # (B, F) global ids
        gidx_col = gidx.reshape(batch * NUM_FIELDS, 1)               # int32, token-major
        gidx_row = gidx.astype(jnp.float32)                          # (B, F)
        res0, res1, final = fused(gidx_col, gidx_row, *weights)
        return [res0[:, 0], res1, final]

    return forward


# ------------------------------- param init ----------------------------------
def make_params(key):
    keys = iter(jax.random.split(key, 256))

    def nk():
        return next(keys)

    def lin_init(fan_in, fan_out):
        w = jax.random.normal(nk(), (fan_in, fan_out), jnp.float32) / math.sqrt(fan_in)
        bias = jax.random.normal(nk(), (fan_out,), jnp.float32) * 0.01
        return w, bias

    offsets = jnp.asarray([0] + list(jnp.cumsum(jnp.asarray(FEATURE_DIMS))[:-1]), jnp.int32)

    params = {
        "offsets": offsets,
        "emb_table": jax.random.normal(nk(), (TOTAL_VOCAB, EMBED_DIM), jnp.float32) * 0.1,
        "lin_table": jax.random.normal(nk(), (TOTAL_VOCAB, 1), jnp.float32) * 0.1,
        "lin_bias": jnp.zeros((1,), jnp.float32),
    }

    # AutoInt
    afi = {}
    afi["atten_w"], afi["atten_b"] = lin_init(EMBED_DIM, ATTEN_DIM)
    afi["vres_w"], afi["vres_b"] = lin_init(EMBED_DIM, ATTEN_DIM)
    afi["fc_w"], afi["fc_b"] = lin_init(NUM_FIELDS * ATTEN_DIM, 1)
    afi["mha"] = []
    for _ in range(NUM_ATTN_LAYERS):
        layer = {}
        layer["wq"], layer["bq"] = lin_init(ATTEN_DIM, ATTEN_DIM)
        layer["wk"], layer["bk"] = lin_init(ATTEN_DIM, ATTEN_DIM)
        layer["wv"], layer["bv"] = lin_init(ATTEN_DIM, ATTEN_DIM)
        layer["wo"], layer["bo"] = lin_init(ATTEN_DIM, ATTEN_DIM)
        afi["mha"].append(layer)
    params["afi"] = afi

    def make_mlp(in_dim, dims):
        layers = []
        d = in_dim
        for out_dim in dims:
            layers.append(lin_init(d, out_dim))
            d = out_dim
        return layers

    # PLE layers
    ple = []
    for i in range(LAYER_NUM):
        in_dim = EMBED_OUTPUT_DIM if i == 0 else EXPERTS_DIMS[i - 1][-1]
        layer = {
            "shared_experts": [make_mlp(in_dim, EXPERTS_DIMS[i]) for _ in range(NUM_SHARED_EXPERTS)],
            "task_experts": [
                [make_mlp(in_dim, EXPERTS_DIMS[i]) for _ in range(NUM_SPECIFIC_EXPERTS)]
                for _ in range(TASK_NUM)
            ],
            "task_gates": [
                lin_init(in_dim, NUM_SHARED_EXPERTS + NUM_SPECIFIC_EXPERTS) for _ in range(TASK_NUM)
            ],
        }
        if i != LAYER_NUM - 1:
            layer["shared_gate"] = lin_init(in_dim, NUM_SHARED_EXPERTS + TASK_NUM * NUM_SPECIFIC_EXPERTS)
        else:
            layer["shared_gate"] = lin_init(in_dim, NUM_SHARED_EXPERTS)
        ple.append(layer)
    params["ple"] = ple

    e_last = EXPERTS_DIMS[-1][-1]
    params["towers"] = [make_mlp(e_last, TOWER_DIMS[0]) for _ in range(TASK_NUM)]
    params["united_tower"] = make_mlp(e_last + TOWER_DIMS[0][-1], TOWER_DIMS[1])
    params["guide_w"], params["guide_b"] = lin_init(e_last, 1)

    params["out0"] = [lin_init(2 + TOWER_DIMS[0][-1], 8), lin_init(8, 1)]                        # binary
    params["out1"] = [lin_init(2 + TOWER_DIMS[0][-1], TIME_DIM), lin_init(TIME_DIM, TIME_DIM)]   # regression
    params["outu"] = [lin_init(2 + TOWER_DIMS[1][-1], TIME_DIM), lin_init(TIME_DIM, TIME_DIM)]
    return params


# ----------------------------------- main -------------------------------------
if __name__ == "__main__":
    root = jax.random.PRNGKey(0)
    pkey, xkey = jax.random.split(root)
    params = make_params(pkey)
    forward = build_forward(params, BATCH)

    # x: (B, F) sparse feature indices, one id per field
    xkeys = jax.random.split(xkey, NUM_FIELDS)
    cols = [
        jax.random.randint(xkeys[f], (BATCH,), 0, FEATURE_DIMS[f], dtype=jnp.int32)
        for f in range(NUM_FIELDS)
    ]
    x = jnp.stack(cols, axis=1)   # (B, F) int32

    outputs = forward(x)
    outputs = [jax.block_until_ready(o) for o in outputs]

    assert outputs[0].shape == (BATCH,)
    assert outputs[1].shape == (BATCH, TIME_DIM)
    assert outputs[2].shape == (BATCH, TIME_DIM)
    assert all(bool(jnp.all(jnp.isfinite(o))) for o in outputs)

    print("KERNEL_OK")
</pallas_src>

<mosaic_0001>
module attributes {stable_mosaic.version = 11 : i64} {
  func.func @_mtcctr_kernel(%arg0: memref<64x1xi32, #tpu.memory_space<vmem>>, %arg1: memref<8x8xf32, #tpu.memory_space<vmem>>, %arg2: memref<128x8xf32, #tpu.memory_space<vmem>>, %arg3: memref<1024x65xf32, #tpu.memory_space<vmem>>, %arg4: memref<8x1024xf32, #tpu.memory_space<vmem>>, %arg5: memref<1x1024xf32, #tpu.memory_space<vmem>>, %arg6: memref<1x1xf32, #tpu.memory_space<vmem>>, %arg7: memref<8x64xf32, #tpu.memory_space<vmem>>, %arg8: memref<1x64xf32, #tpu.memory_space<vmem>>, %arg9: memref<8x64xf32, #tpu.memory_space<vmem>>, %arg10: memref<1x64xf32, #tpu.memory_space<vmem>>, %arg11: memref<64x64xf32, #tpu.memory_space<vmem>>, %arg12: memref<1x1xf32, #tpu.memory_space<vmem>>, %arg13: memref<64x256xf32, #tpu.memory_space<vmem>>, %arg14: memref<1x192xf32, #tpu.memory_space<vmem>>, %arg15: memref<1x64xf32, #tpu.memory_space<vmem>>, %arg16: memref<64x256xf32, #tpu.memory_space<vmem>>, %arg17: memref<1x192xf32, #tpu.memory_space<vmem>>, %arg18: memref<1x64xf32, #tpu.memory_space<vmem>>, %arg19: memref<64x256xf32, #tpu.memory_space<vmem>>, %arg20: memref<1x192xf32, #tpu.memory_space<vmem>>, %arg21: memref<1x64xf32, #tpu.memory_space<vmem>>, %arg22: memref<64x64xf32, #tpu.memory_space<vmem>>, %arg23: memref<8x64xf32, #tpu.memory_space<vmem>>, %arg24: memref<64x64xf32, #tpu.memory_space<vmem>>, %arg25: memref<1x64xf32, #tpu.memory_space<vmem>>, %arg26: memref<64x64xf32, #tpu.memory_space<vmem>>, %arg27: memref<1x64xf32, #tpu.memory_space<vmem>>, %arg28: memref<64x64xf32, #tpu.memory_space<vmem>>, %arg29: memref<1x64xf32, #tpu.memory_space<vmem>>, %arg30: memref<64x64xf32, #tpu.memory_space<vmem>>, %arg31: memref<1x64xf32, #tpu.memory_space<vmem>>, %arg32: memref<64x4xf32, #tpu.memory_space<vmem>>, %arg33: memref<1x4xf32, #tpu.memory_space<vmem>>, %arg34: memref<64x64xf32, #tpu.memory_space<vmem>>, %arg35: memref<1x64xf32, #tpu.memory_space<vmem>>, %arg36: memref<64x64xf32, #tpu.memory_space<vmem>>, %arg37: memref<1x64xf32, #tpu.memory_space<vmem>>, %arg38: memref<64x4xf32, #tpu.memory_space<vmem>>, %arg39: memref<1x4xf32, #tpu.memory_space<vmem>>, %arg40: memref<64x6xf32, #tpu.memory_space<vmem>>, %arg41: memref<1x6xf32, #tpu.memory_space<vmem>>, %arg42: memref<32x64xf32, #tpu.memory_space<vmem>>, %arg43: memref<1x64xf32, #tpu.memory_space<vmem>>, %arg44: memref<64x64xf32, #tpu.memory_space<vmem>>, %arg45: memref<1x64xf32, #tpu.memory_space<vmem>>, %arg46: memref<32x64xf32, #tpu.memory_space<vmem>>, %arg47: memref<1x64xf32, #tpu.memory_space<vmem>>, %arg48: memref<64x64xf32, #tpu.memory_space<vmem>>, %arg49: memref<1x64xf32, #tpu.memory_space<vmem>>, %arg50: memref<32x4xf32, #tpu.memory_space<vmem>>, %arg51: memref<1x4xf32, #tpu.memory_space<vmem>>, %arg52: memref<32x64xf32, #tpu.memory_space<vmem>>, %arg53: memref<1x64xf32, #tpu.memory_space<vmem>>, %arg54: memref<64x64xf32, #tpu.memory_space<vmem>>, %arg55: memref<1x64xf32, #tpu.memory_space<vmem>>, %arg56: memref<32x4xf32, #tpu.memory_space<vmem>>, %arg57: memref<1x4xf32, #tpu.memory_space<vmem>>, %arg58: memref<32x2xf32, #tpu.memory_space<vmem>>, %arg59: memref<1x2xf32, #tpu.memory_space<vmem>>, %arg60: memref<32x16xf32, #tpu.memory_space<vmem>>, %arg61: memref<1x16xf32, #tpu.memory_space<vmem>>, %arg62: memref<32x16xf32, #tpu.memory_space<vmem>>, %arg63: memref<1x16xf32, #tpu.memory_space<vmem>>, %arg64: memref<32x16xf32, #tpu.memory_space<vmem>>, %arg65: memref<16x16xf32, #tpu.memory_space<vmem>>, %arg66: memref<1x16xf32, #tpu.memory_space<vmem>>, %arg67: memref<32x1xf32, #tpu.memory_space<vmem>>, %arg68: memref<1x1xf32, #tpu.memory_space<vmem>>, %arg69: memref<1x8xf32, #tpu.memory_space<vmem>>, %arg70: memref<1x8xf32, #tpu.memory_space<vmem>>, %arg71: memref<16x8xf32, #tpu.memory_space<vmem>>, %arg72: memref<1x8xf32, #tpu.memory_space<vmem>>, %arg73: memref<8x1xf32, #tpu.memory_space<vmem>>, %arg74: memref<1x1xf32, #tpu.memory_space<vmem>>, %arg75: memref<1x9xf32, #tpu.memory_space<vmem>>, %arg76: memref<1x9xf32, #tpu.memory_space<vmem>>, %arg77: memref<16x9xf32, #tpu.memory_space<vmem>>, %arg78: memref<1x9xf32, #tpu.memory_space<vmem>>, %arg79: memref<9x9xf32, #tpu.memory_space<vmem>>, %arg80: memref<1x9xf32, #tpu.memory_space<vmem>>, %arg81: memref<1x9xf32, #tpu.memory_space<vmem>>, %arg82: memref<1x9xf32, #tpu.memory_space<vmem>>, %arg83: memref<16x9xf32, #tpu.memory_space<vmem>>, %arg84: memref<1x9xf32, #tpu.memory_space<vmem>>, %arg85: memref<9x9xf32, #tpu.memory_space<vmem>>, %arg86: memref<1x9xf32, #tpu.memory_space<vmem>>, %arg87: memref<8x1xf32, #tpu.memory_space<vmem>>, %arg88: memref<8x9xf32, #tpu.memory_space<vmem>>, %arg89: memref<8x9xf32, #tpu.memory_space<vmem>>) attributes {dimension_semantics = [], scalar_prefetch = 0 : i64, scratch_operands = 0 : i64, tpu.core_type = #tpu.core_type<tc>} {
    %0 = tpu.iota {dimensions = array<i32: 1>} : vector<64x128xi32>
    %c0 = arith.constant 0 : index
    %c0_0 = arith.constant 0 : index
    %1 = vector.load %arg0[%c0, %c0_0] : memref<64x1xi32, #tpu.memory_space<vmem>>, vector<64x1xi32>
    %2 = vector.broadcast %1 : vector<64x1xi32> to vector<64x128xi32>
    %3 = arith.cmpi eq, %0, %2 : vector<64x128xi32>
    %4 = arith.extui %3 : vector<64x128xi1> to vector<64x128xi32>
    %5 = arith.sitofp %4 : vector<64x128xi32> to vector<64x128xf32>
    %c0_1 = arith.constant 0 : index
    %c0_2 = arith.constant 0 : index
    %6 = vector.load %arg2[%c0_1, %c0_2] : memref<128x8xf32, #tpu.memory_space<vmem>>, vector<128x8xf32>
    %cst = arith.constant dense<0.000000e+00> : vector<64x8xf32>
    %7 = tpu.matmul %5, %6, %cst {dimension_numbers = #tpu.dot_dimension_numbers<[1], [0], [0], [1], [0, 0, 1, 1], [], []>} : vector<64x128xf32>, vector<128x8xf32>, vector<64x8xf32> -> vector<64x8xf32>
    %c0_3 = arith.constant 0 : index
    %c0_4 = arith.constant 0 : index
    %8 = vector.load %arg1[%c0_3, %c0_4] : memref<8x8xf32, #tpu.memory_space<vmem>>, vector<8x8xf32>
    %c0_5 = arith.constant 0 : index
    %c0_6 = arith.constant 0 : index
    %9 = vector.load %arg4[%c0_5, %c0_6] : memref<8x1024xf32, #tpu.memory_space<vmem>>, vector<8x1024xf32>
    %cst_7 = arith.constant dense<0.000000e+00> : vector<8x1024xf32>
    %10 = tpu.matmul %8, %9, %cst_7 {dimension_numbers = #tpu.dot_dimension_numbers<[1], [0], [0], [1], [0, 0, 1, 1], [], []>} : vector<8x8xf32>, vector<8x1024xf32>, vector<8x1024xf32> -> vector<8x1024xf32>
    %c0_8 = arith.constant 0 : index
    %c0_9 = arith.constant 0 : index
    %11 = vector.load %arg5[%c0_8, %c0_9] : memref<1x1024xf32, #tpu.memory_space<vmem>>, vector<1x1024xf32>
    %12 = vector.broadcast %11 : vector<1x1024xf32> to vector<8x1024xf32>
    %13 = arith.subf %10, %12 : vector<8x1024xf32>
    %14 = math.absf %13 : vector<8x1024xf32>
    %cst_10 = arith.constant 5.000000e-01 : f32
    %15 = vector.broadcast %cst_10 : f32 to vector<8x1024xf32>
    %16 = arith.cmpf olt, %14, %15 : vector<8x1024xf32>
    %17 = arith.extui %16 : vector<8x1024xi1> to vector<8x1024xi32>
    %18 = arith.sitofp %17 : vector<8x1024xi32> to vector<8x1024xf32>
    %c0_11 = arith.constant 0 : index
    %c0_12 = arith.constant 0 : index
    %19 = vector.load %arg3[%c0_11, %c0_12] : memref<1024x65xf32, #tpu.memory_space<vmem>>, vector<1024x65xf32>
    %cst_13 = arith.constant dense<0.000000e+00> : vector<8x65xf32>
    %20 = tpu.matmul %18, %19, %cst_13 {dimension_numbers = #tpu.dot_dimension_numbers<[1], [0], [0], [1], [0, 0, 1, 1], [], []>} : vector<8x1024xf32>, vector<1024x65xf32>, vector<8x65xf32> -> vector<8x65xf32>
    %21 = vector.extract_strided_slice %20 {offsets = [0, 0], sizes = [8, 64], strides = [1, 1]} : vector<8x65xf32> to vector<8x64xf32>
    %22 = vector.extract_strided_slice %20 {offsets = [0, 64], sizes = [8, 1], strides = [1, 1]} : vector<8x65xf32> to vector<8x1xf32>
    %c0_14 = arith.constant 0 : index
    %c0_15 = arith.constant 0 : index
    %23 = vector.load %arg6[%c0_14, %c0_15] : memref<1x1xf32, #tpu.memory_space<vmem>>, vector<1x1xf32>
    %24 = vector.broadcast %23 : vector<1x1xf32> to vector<8x1xf32>
    %25 = arith.addf %22, %24 : vector<8x1xf32>
    %c0_16 = arith.constant 0 : index
    %c0_17 = arith.constant 0 : index
    %26 = vector.load %arg7[%c0_16, %c0_17] : memref<8x64xf32, #tpu.memory_space<vmem>>, vector<8x64xf32>
    %cst_18 = arith.constant dense<0.000000e+00> : vector<64x64xf32>
    %27 = tpu.matmul %7, %26, %cst_18 {dimension_numbers = #tpu.dot_dimension_numbers<[1], [0], [0], [1], [0, 0, 1, 1], [], []>} : vector<64x8xf32>, vector<8x64xf32>, vector<64x64xf32> -> vector<64x64xf32>
    %c0_19 = arith.constant 0 : index
    %c0_20 = arith.constant 0 : index
    %28 = vector.load %arg8[%c0_19, %c0_20] : memref<1x64xf32, #tpu.memory_space<vmem>>, vector<1x64xf32>
    %29 = vector.broadcast %28 : vector<1x64xf32> to vector<64x64xf32>
    %30 = arith.addf %27, %29 : vector<64x64xf32>
    %c0_21 = arith.constant 0 : index
    %c0_22 = arith.constant 0 : index
    %31 = vector.load %arg9[%c0_21, %c0_22] : memref<8x64xf32, #tpu.memory_space<vmem>>, vector<8x64xf32>
    %cst_23 = arith.constant dense<0.000000e+00> : vector<64x64xf32>
    %32 = tpu.matmul %7, %31, %cst_23 {dimension_numbers = #tpu.dot_dimension_numbers<[1], [0], [0], [1], [0, 0, 1, 1], [], []>} : vector<64x8xf32>, vector<8x64xf32>, vector<64x64xf32> -> vector<64x64xf32>
    %c0_24 = arith.constant 0 : index
    %c0_25 = arith.constant 0 : index
    %33 = vector.load %arg10[%c0_24, %c0_25] : memref<1x64xf32, #tpu.memory_space<vmem>>, vector<1x64xf32>
    %34 = vector.broadcast %33 : vector<1x64xf32> to vector<64x64xf32>
    %35 = arith.addf %32, %34 : vector<64x64xf32>
    %c0_26 = arith.constant 0 : index
    %c0_27 = arith.constant 0 : index
    %36 = vector.load %arg13[%c0_26, %c0_27] : memref<64x256xf32, #tpu.memory_space<vmem>>, vector<64x256xf32>
    %37 = vector.extract_strided_slice %36 {offsets = [0, 0], sizes = [64, 192], strides = [1, 1]} : vector<64x256xf32> to vector<64x192xf32>
    %cst_28 = arith.constant dense<0.000000e+00> : vector<64x192xf32>
    %38 = tpu.matmul %30, %37, %cst_28 {dimension_numbers = #tpu.dot_dimension_numbers<[1], [0], [0], [1], [0, 0, 1, 1], [], []>} : vector<64x64xf32>, vector<64x192xf32>, vector<64x192xf32> -> vector<64x192xf32>
    %c0_29 = arith.constant 0 : index
    %c0_30 = arith.constant 0 : index
    %39 = vector.load %arg14[%c0_29, %c0_30] : memref<1x192xf32, #tpu.memory_space<vmem>>, vector<1x192xf32>
    %40 = vector.broadcast %39 : vector<1x192xf32> to vector<64x192xf32>
    %41 = arith.addf %38, %40 : vector<64x192xf32>
    %42 = vector.extract_strided_slice %36 {offsets = [0, 192], sizes = [64, 64], strides = [1, 1]} : vector<64x256xf32> to vector<64x64xf32>
    %c0_31 = arith.constant 0 : index
    %c0_32 = arith.constant 0 : index
    %43 = vector.load %arg15[%c0_31, %c0_32] : memref<1x64xf32, #tpu.memory_space<vmem>>, vector<1x64xf32>
    %44 = vector.extract_strided_slice %41 {offsets = [0, 0], sizes = [64, 32], strides = [1, 1]} : vector<64x192xf32> to vector<64x32xf32>
    %45 = vector.extract_strided_slice %41 {offsets = [0, 64], sizes = [64, 32], strides = [1, 1]} : vector<64x192xf32> to vector<64x32xf32>
    %46 = vector.extract_strided_slice %41 {offsets = [0, 128], sizes = [64, 32], strides = [1, 1]} : vector<64x192xf32> to vector<64x32xf32>
    %cst_33 = arith.constant dense<0.000000e+00> : vector<64x64xf32>
    %47 = tpu.matmul %44, %45, %cst_33 {dimension_numbers = #tpu.dot_dimension_numbers<[1], [1], [0], [0], [0, 0, 1, 0], [], []>} : vector<64x32xf32>, vector<64x32xf32>, vector<64x64xf32> -> vector<64x64xf32>
    %cst_34 = arith.constant 0.176776692 : f32
    %48 = vector.broadcast %cst_34 : f32 to vector<64x64xf32>
    %49 = arith.mulf %47, %48 : vector<64x64xf32>
    %c0_35 = arith.constant 0 : index
    %c0_36 = arith.constant 0 : index
    %50 = vector.load %arg22[%c0_35, %c0_36] : memref<64x64xf32, #tpu.memory_space<vmem>>, vector<64x64xf32>
    %51 = arith.addf %49, %50 : vector<64x64xf32>
    %cst_37 = arith.constant dense<0xFF800000> : vector<64xf32>
    %52 = vector.multi_reduction <maximumf>, %51, %cst_37 [1] : vector<64x64xf32> to vector<64xf32>
    %53 = vector.shape_cast %52 : vector<64xf32> to vector<64x1xf32>
    %54 = vector.broadcast %53 : vector<64x1xf32> to vector<64x64xf32>
    %55 = arith.subf %51, %54 : vector<64x64xf32>
    %56 = math.exp %55 : vector<64x64xf32>
    %cst_38 = arith.constant dense<0.000000e+00> : vector<64xf32>
    %57 = vector.multi_reduction <add>, %56, %cst_38 [1] : vector<64x64xf32> to vector<64xf32>
    %58 = vector.shape_cast %57 : vector<64xf32> to vector<64x1xf32>
    %59 = tpu.reciprocal %58 {approx = true} : vector<64x1xf32> -> vector<64x1xf32>
    %60 = vector.broadcast %59 : vector<64x1xf32> to vector<64x64xf32>
    %61 = arith.mulf %56, %60 : vector<64x64xf32>
    %cst_39 = arith.constant dense<0.000000e+00> : vector<64x32xf32>
    %62 = tpu.matmul %61, %46, %cst_39 {dimension_numbers = #tpu.dot_dimension_numbers<[1], [0], [0], [1], [0, 0, 1, 1], [], []>} : vector<64x64xf32>, vector<64x32xf32>, vector<64x32xf32> -> vector<64x32xf32>
    %63 = vector.extract_strided_slice %42 {offsets = [0, 0], sizes = [32, 64], strides = [1, 1]} : vector<64x64xf32> to vector<32x64xf32>
    %cst_40 = arith.constant dense<0.000000e+00> : vector<64x64xf32>
    %64 = tpu.matmul %62, %63, %cst_40 {dimension_numbers = #tpu.dot_dimension_numbers<[1], [0], [0], [1], [0, 0, 1, 1], [], []>} : vector<64x32xf32>, vector<32x64xf32>, vector<64x64xf32> -> vector<64x64xf32>
    %65 = vector.broadcast %43 : vector<1x64xf32> to vector<64x64xf32>
    %66 = arith.addf %65, %64 : vector<64x64xf32>
    %67 = vector.extract_strided_slice %41 {offsets = [0, 32], sizes = [64, 32], strides = [1, 1]} : vector<64x192xf32> to vector<64x32xf32>
    %68 = vector.extract_strided_slice %41 {offsets = [0, 96], sizes = [64, 32], strides = [1, 1]} : vector<64x192xf32> to vector<64x32xf32>
    %69 = vector.extract_strided_slice %41 {offsets = [0, 160], sizes = [64, 32], strides = [1, 1]} : vector<64x192xf32> to vector<64x32xf32>
    %cst_41 = arith.constant dense<0.000000e+00> : vector<64x64xf32>
    %70 = tpu.matmul %67, %68, %cst_41 {dimension_numbers = #tpu.dot_dimension_numbers<[1], [1], [0], [0], [0, 0, 1, 0], [], []>} : vector<64x32xf32>, vector<64x32xf32>, vector<64x64xf32> -> vector<64x64xf32>
    %cst_42 = arith.constant 0.176776692 : f32
    %71 = vector.broadcast %cst_42 : f32 to vector<64x64xf32>
    %72 = arith.mulf %70, %71 : vector<64x64xf32>
    %c0_43 = arith.constant 0 : index
    %c0_44 = arith.constant 0 : index
    %73 = vector.load %arg22[%c0_43, %c0_44] : memref<64x64xf32, #tpu.memory_space<vmem>>, vector<64x64xf32>
    %74 = arith.addf %72, %73 : vector<64x64xf32>
    %cst_45 = arith.constant dense<0xFF800000> : vector<64xf32>
    %75 = vector.multi_reduction <maximumf>, %74, %cst_45 [1] : vector<64x64xf32> to vector<64xf32>
    %76 = vector.shape_cast %75 : vector<64xf32> to vector<64x1xf32>
    %77 = vector.broadcast %76 : vector<64x1xf32> to vector<64x64xf32>
    %78 = arith.subf %74, %77 : vector<64x64xf32>
    %79 = math.exp %78 : vector<64x64xf32>
    %cst_46 = arith.constant dense<0.000000e+00> : vector<64xf32>
    %80 = vector.multi_reduction <add>, %79, %cst_46 [1] : vector<64x64xf32> to vector<64xf32>
    %81 = vector.shape_cast %80 : vector<64xf32> to vector<64x1xf32>
    %82 = tpu.reciprocal %81 {approx = true} : vector<64x1xf32> -> vector<64x1xf32>
    %83 = vector.broadcast %82 : vector<64x1xf32> to vector<64x64xf32>
    %84 = arith.mulf %79, %83 : vector<64x64xf32>
    %cst_47 = arith.constant dense<0.000000e+00> : vector<64x32xf32>
    %85 = tpu.matmul %84, %69, %cst_47 {dimension_numbers = #tpu.dot_dimension_numbers<[1], [0], [0], [1], [0, 0, 1, 1], [], []>} : vector<64x64xf32>, vector<64x32xf32>, vector<64x32xf32> -> vector<64x32xf32>
    %86 = vector.extract_strided_slice %42 {offsets = [32, 0], sizes = [32, 64], strides = [1, 1]} : vector<64x64xf32> to vector<32x64xf32>
    %cst_48 = arith.constant dense<0.000000e+00> : vector<64x64xf32>
    %87 = tpu.matmul %85, %86, %cst_48 {dimension_numbers = #tpu.dot_dimension_numbers<[1], [0], [0], [1], [0, 0, 1, 1], [], []>} : vector<64x32xf32>, vector<32x64xf32>, vector<64x64xf32> -> vector<64x64xf32>
    %88 = arith.addf %66, %87 : vector<64x64xf32>
    %c0_49 = arith.constant 0 : index
    %c0_50 = arith.constant 0 : index
    %89 = vector.load %arg16[%c0_49, %c0_50] : memref<64x256xf32, #tpu.memory_space<vmem>>, vector<64x256xf32>
    %90 = vector.extract_strided_slice %89 {offsets = [0, 0], sizes = [64, 192], strides = [1, 1]} : vector<64x256xf32> to vector<64x192xf32>
    %cst_51 = arith.constant dense<0.000000e+00> : vector<64x192xf32>
    %91 = tpu.matmul %88, %90, %cst_51 {dimension_numbers = #tpu.dot_dimension_numbers<[1], [0], [0], [1], [0, 0, 1, 1], [], []>} : vector<64x64xf32>, vector<64x192xf32>, vector<64x192xf32> -> vector<64x192xf32>
    %c0_52 = arith.constant 0 : index
    %c0_53 = arith.constant 0 : index
    %92 = vector.load %arg17[%c0_52, %c0_53] : memref<1x192xf32, #tpu.memory_space<vmem>>, vector<1x192xf32>
    %93 = vector.broadcast %92 : vector<1x192xf32> to vector<64x192xf32>
    %94 = arith.addf %91, %93 : vector<64x192xf32>
    %95 = vector.extract_strided_slice %89 {offsets = [0, 192], sizes = [64, 64], strides = [1, 1]} : vector<64x256xf32> to vector<64x64xf32>
    %c0_54 = arith.constant 0 : index
    %c0_55 = arith.constant 0 : index
    %96 = vector.load %arg18[%c0_54, %c0_55] : memref<1x64xf32, #tpu.memory_space<vmem>>, vector<1x64xf32>
    %97 = vector.extract_strided_slice %94 {offsets = [0, 0], sizes = [64, 32], strides = [1, 1]} : vector<64x192xf32> to vector<64x32xf32>
    %98 = vector.extract_strided_slice %94 {offsets = [0, 64], sizes = [64, 32], strides = [1, 1]} : vector<64x192xf32> to vector<64x32xf32>
    %99 = vector.extract_strided_slice %94 {offsets = [0, 128], sizes = [64, 32], strides = [1, 1]} : vector<64x192xf32> to vector<64x32xf32>
    %cst_56 = arith.constant dense<0.000000e+00> : vector<64x64xf32>
    %100 = tpu.matmul %97, %98, %cst_56 {dimension_numbers = #tpu.dot_dimension_numbers<[1], [1], [0], [0], [0, 0, 1, 0], [], []>} : vector<64x32xf32>, vector<64x32xf32>, vector<64x64xf32> -> vector<64x64xf32>
    %cst_57 = arith.constant 0.176776692 : f32
    %101 = vector.broadcast %cst_57 : f32 to vector<64x64xf32>
    %102 = arith.mulf %100, %101 : vector<64x64xf32>
    %c0_58 = arith.constant 0 : index
    %c0_59 = arith.constant 0 : index
    %103 = vector.load %arg22[%c0_58, %c0_59] : memref<64x64xf32, #tpu.memory_space<vmem>>, vector<64x64xf32>
    %104 = arith.addf %102, %103 : vector<64x64xf32>
    %cst_60 = arith.constant dense<0xFF800000> : vector<64xf32>
    %105 = vector.multi_reduction <maximumf>, %104, %cst_60 [1] : vector<64x64xf32> to vector<64xf32>
    %106 = vector.shape_cast %105 : vector<64xf32> to vector<64x1xf32>
    %107 = vector.broadcast %106 : vector<64x1xf32> to vector<64x64xf32>
    %108 = arith.subf %104, %107 : vector<64x64xf32>
    %109 = math.exp %108 : vector<64x64xf32>
    %cst_61 = arith.constant dense<0.000000e+00> : vector<64xf32>
    %110 = vector.multi_reduction <add>, %109, %cst_61 [1] : vector<64x64xf32> to vector<64xf32>
    %111 = vector.shape_cast %110 : vector<64xf32> to vector<64x1xf32>
    %112 = tpu.reciprocal %111 {approx = true} : vector<64x1xf32> -> vector<64x1xf32>
    %113 = vector.broadcast %112 : vector<64x1xf32> to vector<64x64xf32>
    %114 = arith.mulf %109, %113 : vector<64x64xf32>
    %cst_62 = arith.constant dense<0.000000e+00> : vector<64x32xf32>
    %115 = tpu.matmul %114, %99, %cst_62 {dimension_numbers = #tpu.dot_dimension_numbers<[1], [0], [0], [1], [0, 0, 1, 1], [], []>} : vector<64x64xf32>, vector<64x32xf32>, vector<64x32xf32> -> vector<64x32xf32>
    %116 = vector.extract_strided_slice %95 {offsets = [0, 0], sizes = [32, 64], strides = [1, 1]} : vector<64x64xf32> to vector<32x64xf32>
    %cst_63 = arith.constant dense<0.000000e+00> : vector<64x64xf32>
    %117 = tpu.matmul %115, %116, %cst_63 {dimension_numbers = #tpu.dot_dimension_numbers<[1], [0], [0], [1], [0, 0, 1, 1], [], []>} : vector<64x32xf32>, vector<32x64xf32>, vector<64x64xf32> -> vector<64x64xf32>
    %118 = vector.broadcast %96 : vector<1x64xf32> to vector<64x64xf32>
    %119 = arith.addf %118, %117 : vector<64x64xf32>
    %120 = vector.extract_strided_slice %94 {offsets = [0, 32], sizes = [64, 32], strides = [1, 1]} : vector<64x192xf32> to vector<64x32xf32>
    %121 = vector.extract_strided_slice %94 {offsets = [0, 96], sizes = [64, 32], strides = [1, 1]} : vector<64x192xf32> to vector<64x32xf32>
    %122 = vector.extract_strided_slice %94 {offsets = [0, 160], sizes = [64, 32], strides = [1, 1]} : vector<64x192xf32> to vector<64x32xf32>
    %cst_64 = arith.constant dense<0.000000e+00> : vector<64x64xf32>
    %123 = tpu.matmul %120, %121, %cst_64 {dimension_numbers = #tpu.dot_dimension_numbers<[1], [1], [0], [0], [0, 0, 1, 0], [], []>} : vector<64x32xf32>, vector<64x32xf32>, vector<64x64xf32> -> vector<64x64xf32>
    %cst_65 = arith.constant 0.176776692 : f32
    %124 = vector.broadcast %cst_65 : f32 to vector<64x64xf32>
    %125 = arith.mulf %123, %124 : vector<64x64xf32>
    %c0_66 = arith.constant 0 : index
    %c0_67 = arith.constant 0 : index
    %126 = vector.load %arg22[%c0_66, %c0_67] : memref<64x64xf32, #tpu.memory_space<vmem>>, vector<64x64xf32>
    %127 = arith.addf %125, %126 : vector<64x64xf32>
    %cst_68 = arith.constant dense<0xFF800000> : vector<64xf32>
    %128 = vector.multi_reduction <maximumf>, %127, %cst_68 [1] : vector<64x64xf32> to vector<64xf32>
    %129 = vector.shape_cast %128 : vector<64xf32> to vector<64x1xf32>
    %130 = vector.broadcast %129 : vector<64x1xf32> to vector<64x64xf32>
    %131 = arith.subf %127, %130 : vector<64x64xf32>
    %132 = math.exp %131 : vector<64x64xf32>
    %cst_69 = arith.constant dense<0.000000e+00> : vector<64xf32>
    %133 = vector.multi_reduction <add>, %132, %cst_69 [1] : vector<64x64xf32> to vector<64xf32>
    %134 = vector.shape_cast %133 : vector<64xf32> to vector<64x1xf32>
    %135 = tpu.reciprocal %134 {approx = true} : vector<64x1xf32> -> vector<64x1xf32>
    %136 = vector.broadcast %135 : vector<64x1xf32> to vector<64x64xf32>
    %137 = arith.mulf %132, %136 : vector<64x64xf32>
    %cst_70 = arith.constant dense<0.000000e+00> : vector<64x32xf32>
    %138 = tpu.matmul %137, %122, %cst_70 {dimension_numbers = #tpu.dot_dimension_numbers<[1], [0], [0], [1], [0, 0, 1, 1], [], []>} : vector<64x64xf32>, vector<64x32xf32>, vector<64x32xf32> -> vector<64x32xf32>
    %139 = vector.extract_strided_slice %95 {offsets = [32, 0], sizes = [32, 64], strides = [1, 1]} : vector<64x64xf32> to vector<32x64xf32>
    %cst_71 = arith.constant dense<0.000000e+00> : vector<64x64xf32>
    %140 = tpu.matmul %138, %139, %cst_71 {dimension_numbers = #tpu.dot_dimension_numbers<[1], [0], [0], [1], [0, 0, 1, 1], [], []>} : vector<64x32xf32>, vector<32x64xf32>, vector<64x64xf32> -> vector<64x64xf32>
    %141 = arith.addf %119, %140 : vector<64x64xf32>
    %c0_72 = arith.constant 0 : index
    %c0_73 = arith.constant 0 : index
    %142 = vector.load %arg19[%c0_72, %c0_73] : memref<64x256xf32, #tpu.memory_space<vmem>>, vector<64x256xf32>
    %143 = vector.extract_strided_slice %142 {offsets = [0, 0], sizes = [64, 192], strides = [1, 1]} : vector<64x256xf32> to vector<64x192xf32>
    %cst_74 = arith.constant dense<0.000000e+00> : vector<64x192xf32>
    %144 = tpu.matmul %141, %143, %cst_74 {dimension_numbers = #tpu.dot_dimension_numbers<[1], [0], [0], [1], [0, 0, 1, 1], [], []>} : vector<64x64xf32>, vector<64x192xf32>, vector<64x192xf32> -> vector<64x192xf32>
    %c0_75 = arith.constant 0 : index
    %c0_76 = arith.constant 0 : index
    %145 = vector.load %arg20[%c0_75, %c0_76] : memref<1x192xf32, #tpu.memory_space<vmem>>, vector<1x192xf32>
    %146 = vector.broadcast %145 : vector<1x192xf32> to vector<64x192xf32>
    %147 = arith.addf %144, %146 : vector<64x192xf32>
    %148 = vector.extract_strided_slice %142 {offsets = [0, 192], sizes = [64, 64], strides = [1, 1]} : vector<64x256xf32> to vector<64x64xf32>
    %c0_77 = arith.constant 0 : index
    %c0_78 = arith.constant 0 : index
    %149 = vector.load %arg21[%c0_77, %c0_78] : memref<1x64xf32, #tpu.memory_space<vmem>>, vector<1x64xf32>
    %150 = vector.extract_strided_slice %147 {offsets = [0, 0], sizes = [64, 32], strides = [1, 1]} : vector<64x192xf32> to vector<64x32xf32>
    %151 = vector.extract_strided_slice %147 {offsets = [0, 64], sizes = [64, 32], strides = [1, 1]} : vector<64x192xf32> to vector<64x32xf32>
    %152 = vector.extract_strided_slice %147 {offsets = [0, 128], sizes = [64, 32], strides = [1, 1]} : vector<64x192xf32> to vector<64x32xf32>
    %cst_79 = arith.constant dense<0.000000e+00> : vector<64x64xf32>
    %153 = tpu.matmul %150, %151, %cst_79 {dimension_numbers = #tpu.dot_dimension_numbers<[1], [1], [0], [0], [0, 0, 1, 0], [], []>} : vector<64x32xf32>, vector<64x32xf32>, vector<64x64xf32> -> vector<64x64xf32>
    %cst_80 = arith.constant 0.176776692 : f32
    %154 = vector.broadcast %cst_80 : f32 to vector<64x64xf32>
    %155 = arith.mulf %153, %154 : vector<64x64xf32>
    %c0_81 = arith.constant 0 : index
    %c0_82 = arith.constant 0 : index
    %156 = vector.load %arg22[%c0_81, %c0_82] : memref<64x64xf32, #tpu.memory_space<vmem>>, vector<64x64xf32>
    %157 = arith.addf %155, %156 : vector<64x64xf32>
    %cst_83 = arith.constant dense<0xFF800000> : vector<64xf32>
    %158 = vector.multi_reduction <maximumf>, %157, %cst_83 [1] : vector<64x64xf32> to vector<64xf32>
    %159 = vector.shape_cast %158 : vector<64xf32> to vector<64x1xf32>
    %160 = vector.broadcast %159 : vector<64x1xf32> to vector<64x64xf32>
    %161 = arith.subf %157, %160 : vector<64x64xf32>
    %162 = math.exp %161 : vector<64x64xf32>
    %cst_84 = arith.constant dense<0.000000e+00> : vector<64xf32>
    %163 = vector.multi_reduction <add>, %162, %cst_84 [1] : vector<64x64xf32> to vector<64xf32>
    %164 = vector.shape_cast %163 : vector<64xf32> to vector<64x1xf32>
    %165 = tpu.reciprocal %164 {approx = true} : vector<64x1xf32> -> vector<64x1xf32>
    %166 = vector.broadcast %165 : vector<64x1xf32> to vector<64x64xf32>
    %167 = arith.mulf %162, %166 : vector<64x64xf32>
    %cst_85 = arith.constant dense<0.000000e+00> : vector<64x32xf32>
    %168 = tpu.matmul %167, %152, %cst_85 {dimension_numbers = #tpu.dot_dimension_numbers<[1], [0], [0], [1], [0, 0, 1, 1], [], []>} : vector<64x64xf32>, vector<64x32xf32>, vector<64x32xf32> -> vector<64x32xf32>
    %169 = vector.extract_strided_slice %148 {offsets = [0, 0], sizes = [32, 64], strides = [1, 1]} : vector<64x64xf32> to vector<32x64xf32>
    %cst_86 = arith.constant dense<0.000000e+00> : vector<64x64xf32>
    %170 = tpu.matmul %168, %169, %cst_86 {dimension_numbers = #tpu.dot_dimension_numbers<[1], [0], [0], [1], [0, 0, 1, 1], [], []>} : vector<64x32xf32>, vector<32x64xf32>, vector<64x64xf32> -> vector<64x64xf32>
    %171 = vector.broadcast %149 : vector<1x64xf32> to vector<64x64xf32>
    %172 = arith.addf %171, %170 : vector<64x64xf32>
    %173 = vector.extract_strided_slice %147 {offsets = [0, 32], sizes = [64, 32], strides = [1, 1]} : vector<64x192xf32> to vector<64x32xf32>
    %174 = vector.extract_strided_slice %147 {offsets = [0, 96], sizes = [64, 32], strides = [1, 1]} : vector<64x192xf32> to vector<64x32xf32>
    %175 = vector.extract_strided_slice %147 {offsets = [0, 160], sizes = [64, 32], strides = [1, 1]} : vector<64x192xf32> to vector<64x32xf32>
    %cst_87 = arith.constant dense<0.000000e+00> : vector<64x64xf32>
    %176 = tpu.matmul %173, %174, %cst_87 {dimension_numbers = #tpu.dot_dimension_numbers<[1], [1], [0], [0], [0, 0, 1, 0], [], []>} : vector<64x32xf32>, vector<64x32xf32>, vector<64x64xf32> -> vector<64x64xf32>
    %cst_88 = arith.constant 0.176776692 : f32
    %177 = vector.broadcast %cst_88 : f32 to vector<64x64xf32>
    %178 = arith.mulf %176, %177 : vector<64x64xf32>
    %c0_89 = arith.constant 0 : index
    %c0_90 = arith.constant 0 : index
    %179 = vector.load %arg22[%c0_89, %c0_90] : memref<64x64xf32, #tpu.memory_space<vmem>>, vector<64x64xf32>
    %180 = arith.addf %178, %179 : vector<64x64xf32>
    %cst_91 = arith.constant dense<0xFF800000> : vector<64xf32>
    %181 = vector.multi_reduction <maximumf>, %180, %cst_91 [1] : vector<64x64xf32> to vector<64xf32>
    %182 = vector.shape_cast %181 : vector<64xf32> to vector<64x1xf32>
    %183 = vector.broadcast %182 : vector<64x1xf32> to vector<64x64xf32>
    %184 = arith.subf %180, %183 : vector<64x64xf32>
    %185 = math.exp %184 : vector<64x64xf32>
    %cst_92 = arith.constant dense<0.000000e+00> : vector<64xf32>
    %186 = vector.multi_reduction <add>, %185, %cst_92 [1] : vector<64x64xf32> to vector<64xf32>
    %187 = vector.shape_cast %186 : vector<64xf32> to vector<64x1xf32>
    %188 = tpu.reciprocal %187 {approx = true} : vector<64x1xf32> -> vector<64x1xf32>
    %189 = vector.broadcast %188 : vector<64x1xf32> to vector<64x64xf32>
    %190 = arith.mulf %185, %189 : vector<64x64xf32>
    %cst_93 = arith.constant dense<0.000000e+00> : vector<64x32xf32>
    %191 = tpu.matmul %190, %175, %cst_93 {dimension_numbers = #tpu.dot_dimension_numbers<[1], [0], [0], [1], [0, 0, 1, 1], [], []>} : vector<64x64xf32>, vector<64x32xf32>, vector<64x32xf32> -> vector<64x32xf32>
    %192 = vector.extract_strided_slice %148 {offsets = [32, 0], sizes = [32, 64], strides = [1, 1]} : vector<64x64xf32> to vector<32x64xf32>
    %cst_94 = arith.constant dense<0.000000e+00> : vector<64x64xf32>
    %193 = tpu.matmul %191, %192, %cst_94 {dimension_numbers = #tpu.dot_dimension_numbers<[1], [0], [0], [1], [0, 0, 1, 1], [], []>} : vector<64x32xf32>, vector<32x64xf32>, vector<64x64xf32> -> vector<64x64xf32>
    %194 = arith.addf %172, %193 : vector<64x64xf32>
    %195 = arith.addf %194, %35 : vector<64x64xf32>
    %cst_95 = arith.constant 0.000000e+00 : f32
    %196 = vector.broadcast %cst_95 : f32 to vector<64x64xf32>
    %197 = arith.maximumf %195, %196 : vector<64x64xf32>
    %c0_96 = arith.constant 0 : index
    %c0_97 = arith.constant 0 : index
    %198 = vector.load %arg11[%c0_96, %c0_97] : memref<64x64xf32, #tpu.memory_space<vmem>>, vector<64x64xf32>
    %199 = arith.mulf %197, %198 : vector<64x64xf32>
    %cst_98 = arith.constant dense<0.000000e+00> : vector<64xf32>
    %200 = vector.multi_reduction <add>, %199, %cst_98 [1] : vector<64x64xf32> to vector<64xf32>
    %201 = vector.shape_cast %200 : vector<64xf32> to vector<64x1xf32>
    %c0_99 = arith.constant 0 : index
    %c0_100 = arith.constant 0 : index
    %202 = vector.load %arg23[%c0_99, %c0_100] : memref<8x64xf32, #tpu.memory_space<vmem>>, vector<8x64xf32>
    %cst_101 = arith.constant dense<0.000000e+00> : vector<8x1xf32>
    %203 = tpu.matmul %202, %201, %cst_101 {dimension_numbers = #tpu.dot_dimension_numbers<[1], [0], [0], [1], [0, 0, 1, 1], [], []>} : vector<8x64xf32>, vector<64x1xf32>, vector<8x1xf32> -> vector<8x1xf32>
    %c0_102 = arith.constant 0 : index
    %c0_103 = arith.constant 0 : index
    %204 = vector.load %arg12[%c0_102, %c0_103] : memref<1x1xf32, #tpu.memory_space<vmem>>, vector<1x1xf32>
    %205 = vector.broadcast %204 : vector<1x1xf32> to vector<8x1xf32>
    %206 = arith.addf %203, %205 : vector<8x1xf32>
    %c0_104 = arith.constant 0 : index
    %c0_105 = arith.constant 0 : index
    %207 = vector.load %arg24[%c0_104, %c0_105] : memref<64x64xf32, #tpu.memory_space<vmem>>, vector<64x64xf32>
    %cst_106 = arith.constant dense<0.000000e+00> : vector<8x64xf32>
    %208 = tpu.matmul %21, %207, %cst_106 {dimension_numbers = #tpu.dot_dimension_numbers<[1], [0], [0], [1], [0, 0, 1, 1], [], []>} : vector<8x64xf32>, vector<64x64xf32>, vector<8x64xf32> -> vector<8x64xf32>
    %c0_107 = arith.constant 0 : index
    %c0_108 = arith.constant 0 : index
    %209 = vector.load %arg25[%c0_107, %c0_108] : memref<1x64xf32, #tpu.memory_space<vmem>>, vector<1x64xf32>
    %210 = vector.broadcast %209 : vector<1x64xf32> to vector<8x64xf32>
    %211 = arith.addf %208, %210 : vector<8x64xf32>
    %cst_109 = arith.constant 0.000000e+00 : f32
    %212 = vector.broadcast %cst_109 : f32 to vector<8x64xf32>
    %213 = arith.maximumf %211, %212 : vector<8x64xf32>
    %c0_110 = arith.constant 0 : index
    %c0_111 = arith.constant 0 : index
    %214 = vector.load %arg26[%c0_110, %c0_111] : memref<64x64xf32, #tpu.memory_space<vmem>>, vector<64x64xf32>
    %cst_112 = arith.constant dense<0.000000e+00> : vector<8x64xf32>
    %215 = tpu.matmul %213, %214, %cst_112 {dimension_numbers = #tpu.dot_dimension_numbers<[1], [0], [0], [1], [0, 0, 1, 1], [], []>} : vector<8x64xf32>, vector<64x64xf32>, vector<8x64xf32> -> vector<8x64xf32>
    %c0_113 = arith.constant 0 : index
    %c0_114 = arith.constant 0 : index
    %216 = vector.load %arg27[%c0_113, %c0_114] : memref<1x64xf32, #tpu.memory_space<vmem>>, vector<1x64xf32>
    %217 = vector.broadcast %216 : vector<1x64xf32> to vector<8x64xf32>
    %218 = arith.addf %215, %217 : vector<8x64xf32>
    %cst_115 = arith.constant 0.000000e+00 : f32
    %219 = vector.broadcast %cst_115 : f32 to vector<8x64xf32>
    %220 = arith.maximumf %218, %219 : vector<8x64xf32>
    %221 = vector.extract_strided_slice %220 {offsets = [0, 0], sizes = [8, 32], strides = [1, 1]} : vector<8x64xf32> to vector<8x32xf32>
    %222 = vector.extract_strided_slice %220 {offsets = [0, 32], sizes = [8, 32], strides = [1, 1]} : vector<8x64xf32> to vector<8x32xf32>
    %c0_116 = arith.constant 0 : index
    %c0_117 = arith.constant 0 : index
    %223 = vector.load %arg28[%c0_116, %c0_117] : memref<64x64xf32, #tpu.memory_space<vmem>>, vector<64x64xf32>
    %cst_118 = arith.constant dense<0.000000e+00> : vector<8x64xf32>
    %224 = tpu.matmul %21, %223, %cst_118 {dimension_numbers = #tpu.dot_dimension_numbers<[1], [0], [0], [1], [0, 0, 1, 1], [], []>} : vector<8x64xf32>, vector<64x64xf32>, vector<8x64xf32> -> vector<8x64xf32>
    %c0_119 = arith.constant 0 : index
    %c0_120 = arith.constant 0 : index
    %225 = vector.load %arg29[%c0_119, %c0_120] : memref<1x64xf32, #tpu.memory_space<vmem>>, vector<1x64xf32>
    %226 = vector.broadcast %225 : vector<1x64xf32> to vector<8x64xf32>
    %227 = arith.addf %224, %226 : vector<8x64xf32>
    %cst_121 = arith.constant 0.000000e+00 : f32
    %228 = vector.broadcast %cst_121 : f32 to vector<8x64xf32>
    %229 = arith.maximumf %227, %228 : vector<8x64xf32>
    %c0_122 = arith.constant 0 : index
    %c0_123 = arith.constant 0 : index
    %230 = vector.load %arg30[%c0_122, %c0_123] : memref<64x64xf32, #tpu.memory_space<vmem>>, vector<64x64xf32>
    %cst_124 = arith.constant dense<0.000000e+00> : vector<8x64xf32>
    %231 = tpu.matmul %229, %230, %cst_124 {dimension_numbers = #tpu.dot_dimension_numbers<[1], [0], [0], [1], [0, 0, 1, 1], [], []>} : vector<8x64xf32>, vector<64x64xf32>, vector<8x64xf32> -> vector<8x64xf32>
    %c0_125 = arith.constant 0 : index
    %c0_126 = arith.constant 0 : index
    %232 = vector.load %arg31[%c0_125, %c0_126] : memref<1x64xf32, #tpu.memory_space<vmem>>, vector<1x64xf32>
    %233 = vector.broadcast %232 : vector<1x64xf32> to vector<8x64xf32>
    %234 = arith.addf %231, %233 : vector<8x64xf32>
    %cst_127 = arith.constant 0.000000e+00 : f32
    %235 = vector.broadcast %cst_127 : f32 to vector<8x64xf32>
    %236 = arith.maximumf %234, %235 : vector<8x64xf32>
    %237 = vector.extract_strided_slice %236 {offsets = [0, 0], sizes = [8, 32], strides = [1, 1]} : vector<8x64xf32> to vector<8x32xf32>
    %238 = vector.extract_strided_slice %236 {offsets = [0, 32], sizes = [8, 32], strides = [1, 1]} : vector<8x64xf32> to vector<8x32xf32>
    %c0_128 = arith.constant 0 : index
    %c0_129 = arith.constant 0 : index
    %239 = vector.load %arg32[%c0_128, %c0_129] : memref<64x4xf32, #tpu.memory_space<vmem>>, vector<64x4xf32>
    %cst_130 = arith.constant dense<0.000000e+00> : vector<8x4xf32>
    %240 = tpu.matmul %21, %239, %cst_130 {dimension_numbers = #tpu.dot_dimension_numbers<[1], [0], [0], [1], [0, 0, 1, 1], [], []>} : vector<8x64xf32>, vector<64x4xf32>, vector<8x4xf32> -> vector<8x4xf32>
    %c0_131 = arith.constant 0 : index
    %c0_132 = arith.constant 0 : index
    %241 = vector.load %arg33[%c0_131, %c0_132] : memref<1x4xf32, #tpu.memory_space<vmem>>, vector<1x4xf32>
    %242 = vector.broadcast %241 : vector<1x4xf32> to vector<8x4xf32>
    %243 = arith.addf %240, %242 : vector<8x4xf32>
    %cst_133 = arith.constant dense<0xFF800000> : vector<8xf32>
    %244 = vector.multi_reduction <maximumf>, %243, %cst_133 [1] : vector<8x4xf32> to vector<8xf32>
    %245 = vector.shape_cast %244 : vector<8xf32> to vector<8x1xf32>
    %246 = vector.broadcast %245 : vector<8x1xf32> to vector<8x4xf32>
    %247 = arith.subf %243, %246 : vector<8x4xf32>
    %248 = math.exp %247 : vector<8x4xf32>
    %cst_134 = arith.constant dense<0.000000e+00> : vector<8xf32>
    %249 = vector.multi_reduction <add>, %248, %cst_134 [1] : vector<8x4xf32> to vector<8xf32>
    %250 = vector.shape_cast %249 : vector<8xf32> to vector<8x1xf32>
    %251 = tpu.reciprocal %250 {approx = true} : vector<8x1xf32> -> vector<8x1xf32>
    %252 = vector.broadcast %251 : vector<8x1xf32> to vector<8x4xf32>
    %253 = arith.mulf %248, %252 : vector<8x4xf32>
    %254 = vector.extract_strided_slice %253 {offsets = [0, 0], sizes = [8, 1], strides = [1, 1]} : vector<8x4xf32> to vector<8x1xf32>
    %255 = vector.broadcast %254 : vector<8x1xf32> to vector<8x32xf32>
    %256 = arith.mulf %255, %237 : vector<8x32xf32>
    %257 = vector.extract_strided_slice %253 {offsets = [0, 1], sizes = [8, 1], strides = [1, 1]} : vector<8x4xf32> to vector<8x1xf32>
    %258 = vector.broadcast %257 : vector<8x1xf32> to vector<8x32xf32>
    %259 = arith.mulf %258, %238 : vector<8x32xf32>
    %260 = arith.addf %256, %259 : vector<8x32xf32>
    %261 = vector.extract_strided_slice %253 {offsets = [0, 2], sizes = [8, 1], strides = [1, 1]} : vector<8x4xf32> to vector<8x1xf32>
    %262 = vector.broadcast %261 : vector<8x1xf32> to vector<8x32xf32>
    %263 = arith.mulf %262, %221 : vector<8x32xf32>
    %264 = arith.addf %260, %263 : vector<8x32xf32>
    %265 = vector.extract_strided_slice %253 {offsets = [0, 3], sizes = [8, 1], strides = [1, 1]} : vector<8x4xf32> to vector<8x1xf32>
    %266 = vector.broadcast %265 : vector<8x1xf32> to vector<8x32xf32>
    %267 = arith.mulf %266, %222 : vector<8x32xf32>
    %268 = arith.addf %264, %267 : vector<8x32xf32>
    %c0_135 = arith.constant 0 : index
    %c0_136 = arith.constant 0 : index
    %269 = vector.load %arg34[%c0_135, %c0_136] : memref<64x64xf32, #tpu.memory_space<vmem>>, vector<64x64xf32>
    %cst_137 = arith.constant dense<0.000000e+00> : vector<8x64xf32>
    %270 = tpu.matmul %21, %269, %cst_137 {dimension_numbers = #tpu.dot_dimension_numbers<[1], [0], [0], [1], [0, 0, 1, 1], [], []>} : vector<8x64xf32>, vector<64x64xf32>, vector<8x64xf32> -> vector<8x64xf32>
    %c0_138 = arith.constant 0 : index
    %c0_139 = arith.constant 0 : index
    %271 = vector.load %arg35[%c0_138, %c0_139] : memref<1x64xf32, #tpu.memory_space<vmem>>, vector<1x64xf32>
    %272 = vector.broadcast %271 : vector<1x64xf32> to vector<8x64xf32>
    %273 = arith.addf %270, %272 : vector<8x64xf32>
    %cst_140 = arith.constant 0.000000e+00 : f32
    %274 = vector.broadcast %cst_140 : f32 to vector<8x64xf32>
    %275 = arith.maximumf %273, %274 : vector<8x64xf32>
    %c0_141 = arith.constant 0 : index
    %c0_142 = arith.constant 0 : index
    %276 = vector.load %arg36[%c0_141, %c0_142] : memref<64x64xf32, #tpu.memory_space<vmem>>, vector<64x64xf32>
    %cst_143 = arith.constant dense<0.000000e+00> : vector<8x64xf32>
    %277 = tpu.matmul %275, %276, %cst_143 {dimension_numbers = #tpu.dot_dimension_numbers<[1], [0], [0], [1], [0, 0, 1, 1], [], []>} : vector<8x64xf32>, vector<64x64xf32>, vector<8x64xf32> -> vector<8x64xf32>
    %c0_144 = arith.constant 0 : index
    %c0_145 = arith.constant 0 : index
    %278 = vector.load %arg37[%c0_144, %c0_145] : memref<1x64xf32, #tpu.memory_space<vmem>>, vector<1x64xf32>
    %279 = vector.broadcast %278 : vector<1x64xf32> to vector<8x64xf32>
    %280 = arith.addf %277, %279 : vector<8x64xf32>
    %cst_146 = arith.constant 0.000000e+00 : f32
    %281 = vector.broadcast %cst_146 : f32 to vector<8x64xf32>
    %282 = arith.maximumf %280, %281 : vector<8x64xf32>
    %283 = vector.extract_strided_slice %282 {offsets = [0, 0], sizes = [8, 32], strides = [1, 1]} : vector<8x64xf32> to vector<8x32xf32>
    %284 = vector.extract_strided_slice %282 {offsets = [0, 32], sizes = [8, 32], strides = [1, 1]} : vector<8x64xf32> to vector<8x32xf32>
    %c0_147 = arith.constant 0 : index
    %c0_148 = arith.constant 0 : index
    %285 = vector.load %arg38[%c0_147, %c0_148] : memref<64x4xf32, #tpu.memory_space<vmem>>, vector<64x4xf32>
    %cst_149 = arith.constant dense<0.000000e+00> : vector<8x4xf32>
    %286 = tpu.matmul %21, %285, %cst_149 {dimension_numbers = #tpu.dot_dimension_numbers<[1], [0], [0], [1], [0, 0, 1, 1], [], []>} : vector<8x64xf32>, vector<64x4xf32>, vector<8x4xf32> -> vector<8x4xf32>
    %c0_150 = arith.constant 0 : index
    %c0_151 = arith.constant 0 : index
    %287 = vector.load %arg39[%c0_150, %c0_151] : memref<1x4xf32, #tpu.memory_space<vmem>>, vector<1x4xf32>
    %288 = vector.broadcast %287 : vector<1x4xf32> to vector<8x4xf32>
    %289 = arith.addf %286, %288 : vector<8x4xf32>
    %cst_152 = arith.constant dense<0xFF800000> : vector<8xf32>
    %290 = vector.multi_reduction <maximumf>, %289, %cst_152 [1] : vector<8x4xf32> to vector<8xf32>
    %291 = vector.shape_cast %290 : vector<8xf32> to vector<8x1xf32>
    %292 = vector.broadcast %291 : vector<8x1xf32> to vector<8x4xf32>
    %293 = arith.subf %289, %292 : vector<8x4xf32>
    %294 = math.exp %293 : vector<8x4xf32>
    %cst_153 = arith.constant dense<0.000000e+00> : vector<8xf32>
    %295 = vector.multi_reduction <add>, %294, %cst_153 [1] : vector<8x4xf32> to vector<8xf32>
    %296 = vector.shape_cast %295 : vector<8xf32> to vector<8x1xf32>
    %297 = tpu.reciprocal %296 {approx = true} : vector<8x1xf32> -> vector<8x1xf32>
    %298 = vector.broadcast %297 : vector<8x1xf32> to vector<8x4xf32>
    %299 = arith.mulf %294, %298 : vector<8x4xf32>
    %300 = vector.extract_strided_slice %299 {offsets = [0, 0], sizes = [8, 1], strides = [1, 1]} : vector<8x4xf32> to vector<8x1xf32>
    %301 = vector.broadcast %300 : vector<8x1xf32> to vector<8x32xf32>
    %302 = arith.mulf %301, %283 : vector<8x32xf32>
    %303 = vector.extract_strided_slice %299 {offsets = [0, 1], sizes = [8, 1], strides = [1, 1]} : vector<8x4xf32> to vector<8x1xf32>
    %304 = vector.broadcast %303 : vector<8x1xf32> to vector<8x32xf32>
    %305 = arith.mulf %304, %284 : vector<8x32xf32>
    %306 = arith.addf %302, %305 : vector<8x32xf32>
    %307 = vector.extract_strided_slice %299 {offsets = [0, 2], sizes = [8, 1], strides = [1, 1]} : vector<8x4xf32> to vector<8x1xf32>
    %308 = vector.broadcast %307 : vector<8x1xf32> to vector<8x32xf32>
    %309 = arith.mulf %308, %221 : vector<8x32xf32>
    %310 = arith.addf %306, %309 : vector<8x32xf32>
    %311 = vector.extract_strided_slice %299 {offsets = [0, 3], sizes = [8, 1], strides = [1, 1]} : vector<8x4xf32> to vector<8x1xf32>
    %312 = vector.broadcast %311 : vector<8x1xf32> to vector<8x32xf32>
    %313 = arith.mulf %312, %222 : vector<8x32xf32>
    %314 = arith.addf %310, %313 : vector<8x32xf32>
    %c0_154 = arith.constant 0 : index
    %c0_155 = arith.constant 0 : index
    %315 = vector.load %arg40[%c0_154, %c0_155] : memref<64x6xf32, #tpu.memory_space<vmem>>, vector<64x6xf32>
    %cst_156 = arith.constant dense<0.000000e+00> : vector<8x6xf32>
    %316 = tpu.matmul %21, %315, %cst_156 {dimension_numbers = #tpu.dot_dimension_numbers<[1], [0], [0], [1], [0, 0, 1, 1], [], []>} : vector<8x64xf32>, vector<64x6xf32>, vector<8x6xf32> -> vector<8x6xf32>
    %c0_157 = arith.constant 0 : index
    %c0_158 = arith.constant 0 : index
    %317 = vector.load %arg41[%c0_157, %c0_158] : memref<1x6xf32, #tpu.memory_space<vmem>>, vector<1x6xf32>
    %318 = vector.broadcast %317 : vector<1x6xf32> to vector<8x6xf32>
    %319 = arith.addf %316, %318 : vector<8x6xf32>
    %cst_159 = arith.constant dense<0xFF800000> : vector<8xf32>
    %320 = vector.multi_reduction <maximumf>, %319, %cst_159 [1] : vector<8x6xf32> to vector<8xf32>
    %321 = vector.shape_cast %320 : vector<8xf32> to vector<8x1xf32>
    %322 = vector.broadcast %321 : vector<8x1xf32> to vector<8x6xf32>
    %323 = arith.subf %319, %322 : vector<8x6xf32>
    %324 = math.exp %323 : vector<8x6xf32>
    %cst_160 = arith.constant dense<0.000000e+00> : vector<8xf32>
    %325 = vector.multi_reduction <add>, %324, %cst_160 [1] : vector<8x6xf32> to vector<8xf32>
    %326 = vector.shape_cast %325 : vector<8xf32> to vector<8x1xf32>
    %327 = tpu.reciprocal %326 {approx = true} : vector<8x1xf32> -> vector<8x1xf32>
    %328 = vector.broadcast %327 : vector<8x1xf32> to vector<8x6xf32>
    %329 = arith.mulf %324, %328 : vector<8x6xf32>
    %330 = vector.extract_strided_slice %236 {offsets = [0, 0], sizes = [8, 32], strides = [1, 1]} : vector<8x64xf32> to vector<8x32xf32>
    %331 = vector.extract_strided_slice %236 {offsets = [0, 32], sizes = [8, 32], strides = [1, 1]} : vector<8x64xf32> to vector<8x32xf32>
    %332 = vector.extract_strided_slice %282 {offsets = [0, 0], sizes = [8, 32], strides = [1, 1]} : vector<8x64xf32> to vector<8x32xf32>
    %333 = vector.extract_strided_slice %282 {offsets = [0, 32], sizes = [8, 32], strides = [1, 1]} : vector<8x64xf32> to vector<8x32xf32>
    %334 = vector.extract_strided_slice %329 {offsets = [0, 0], sizes = [8, 1], strides = [1, 1]} : vector<8x6xf32> to vector<8x1xf32>
    %335 = vector.broadcast %334 : vector<8x1xf32> to vector<8x32xf32>
    %336 = arith.mulf %335, %330 : vector<8x32xf32>
    %337 = vector.extract_strided_slice %329 {offsets = [0, 1], sizes = [8, 1], strides = [1, 1]} : vector<8x6xf32> to vector<8x1xf32>
    %338 = vector.broadcast %337 : vector<8x1xf32> to vector<8x32xf32>
    %339 = arith.mulf %338, %331 : vector<8x32xf32>
    %340 = arith.addf %336, %339 : vector<8x32xf32>
    %341 = vector.extract_strided_slice %329 {offsets = [0, 2], sizes = [8, 1], strides = [1, 1]} : vector<8x6xf32> to vector<8x1xf32>
    %342 = vector.broadcast %341 : vector<8x1xf32> to vector<8x32xf32>
    %343 = arith.mulf %342, %332 : vector<8x32xf32>
    %344 = arith.addf %340, %343 : vector<8x32xf32>
    %345 = vector.extract_strided_slice %329 {offsets = [0, 3], sizes = [8, 1], strides = [1, 1]} : vector<8x6xf32> to vector<8x1xf32>
    %346 = vector.broadcast %345 : vector<8x1xf32> to vector<8x32xf32>
    %347 = arith.mulf %346, %333 : vector<8x32xf32>
    %348 = arith.addf %344, %347 : vector<8x32xf32>
    %349 = vector.extract_strided_slice %329 {offsets = [0, 4], sizes = [8, 1], strides = [1, 1]} : vector<8x6xf32> to vector<8x1xf32>
    %350 = vector.broadcast %349 : vector<8x1xf32> to vector<8x32xf32>
    %351 = arith.mulf %350, %221 : vector<8x32xf32>
    %352 = arith.addf %348, %351 : vector<8x32xf32>
    %353 = vector.extract_strided_slice %329 {offsets = [0, 5], sizes = [8, 1], strides = [1, 1]} : vector<8x6xf32> to vector<8x1xf32>
    %354 = vector.broadcast %353 : vector<8x1xf32> to vector<8x32xf32>
    %355 = arith.mulf %354, %222 : vector<8x32xf32>
    %356 = arith.addf %352, %355 : vector<8x32xf32>
    %c0_161 = arith.constant 0 : index
    %c0_162 = arith.constant 0 : index
    %357 = vector.load %arg42[%c0_161, %c0_162] : memref<32x64xf32, #tpu.memory_space<vmem>>, vector<32x64xf32>
    %cst_163 = arith.constant dense<0.000000e+00> : vector<8x64xf32>
    %358 = tpu.matmul %356, %357, %cst_163 {dimension_numbers = #tpu.dot_dimension_numbers<[1], [0], [0], [1], [0, 0, 1, 1], [], []>} : vector<8x32xf32>, vector<32x64xf32>, vector<8x64xf32> -> vector<8x64xf32>
    %c0_164 = arith.constant 0 : index
    %c0_165 = arith.constant 0 : index
    %359 = vector.load %arg43[%c0_164, %c0_165] : memref<1x64xf32, #tpu.memory_space<vmem>>, vector<1x64xf32>
    %360 = vector.broadcast %359 : vector<1x64xf32> to vector<8x64xf32>
    %361 = arith.addf %358, %360 : vector<8x64xf32>
    %cst_166 = arith.constant 0.000000e+00 : f32
    %362 = vector.broadcast %cst_166 : f32 to vector<8x64xf32>
    %363 = arith.maximumf %361, %362 : vector<8x64xf32>
    %c0_167 = arith.constant 0 : index
    %c0_168 = arith.constant 0 : index
    %364 = vector.load %arg44[%c0_167, %c0_168] : memref<64x64xf32, #tpu.memory_space<vmem>>, vector<64x64xf32>
    %cst_169 = arith.constant dense<0.000000e+00> : vector<8x64xf32>
    %365 = tpu.matmul %363, %364, %cst_169 {dimension_numbers = #tpu.dot_dimension_numbers<[1], [0], [0], [1], [0, 0, 1, 1], [], []>} : vector<8x64xf32>, vector<64x64xf32>, vector<8x64xf32> -> vector<8x64xf32>
    %c0_170 = arith.constant 0 : index
    %c0_171 = arith.constant 0 : index
    %366 = vector.load %arg45[%c0_170, %c0_171] : memref<1x64xf32, #tpu.memory_space<vmem>>, vector<1x64xf32>
    %367 = vector.broadcast %366 : vector<1x64xf32> to vector<8x64xf32>
    %368 = arith.addf %365, %367 : vector<8x64xf32>
    %cst_172 = arith.constant 0.000000e+00 : f32
    %369 = vector.broadcast %cst_172 : f32 to vector<8x64xf32>
    %370 = arith.maximumf %368, %369 : vector<8x64xf32>
    %371 = vector.extract_strided_slice %370 {offsets = [0, 0], sizes = [8, 32], strides = [1, 1]} : vector<8x64xf32> to vector<8x32xf32>
    %372 = vector.extract_strided_slice %370 {offsets = [0, 32], sizes = [8, 32], strides = [1, 1]} : vector<8x64xf32> to vector<8x32xf32>
    %c0_173 = arith.constant 0 : index
    %c0_174 = arith.constant 0 : index
    %373 = vector.load %arg46[%c0_173, %c0_174] : memref<32x64xf32, #tpu.memory_space<vmem>>, vector<32x64xf32>
    %cst_175 = arith.constant dense<0.000000e+00> : vector<8x64xf32>
    %374 = tpu.matmul %268, %373, %cst_175 {dimension_numbers = #tpu.dot_dimension_numbers<[1], [0], [0], [1], [0, 0, 1, 1], [], []>} : vector<8x32xf32>, vector<32x64xf32>, vector<8x64xf32> -> vector<8x64xf32>
    %c0_176 = arith.constant 0 : index
    %c0_177 = arith.constant 0 : index
    %375 = vector.load %arg47[%c0_176, %c0_177] : memref<1x64xf32, #tpu.memory_space<vmem>>, vector<1x64xf32>
    %376 = vector.broadcast %375 : vector<1x64xf32> to vector<8x64xf32>
    %377 = arith.addf %374, %376 : vector<8x64xf32>
    %cst_178 = arith.constant 0.000000e+00 : f32
    %378 = vector.broadcast %cst_178 : f32 to vector<8x64xf32>
    %379 = arith.maximumf %377, %378 : vector<8x64xf32>
    %c0_179 = arith.constant 0 : index
    %c0_180 = arith.constant 0 : index
    %380 = vector.load %arg48[%c0_179, %c0_180] : memref<64x64xf32, #tpu.memory_space<vmem>>, vector<64x64xf32>
    %cst_181 = arith.constant dense<0.000000e+00> : vector<8x64xf32>
    %381 = tpu.matmul %379, %380, %cst_181 {dimension_numbers = #tpu.dot_dimension_numbers<[1], [0], [0], [1], [0, 0, 1, 1], [], []>} : vector<8x64xf32>, vector<64x64xf32>, vector<8x64xf32> -> vector<8x64xf32>
    %c0_182 = arith.constant 0 : index
    %c0_183 = arith.constant 0 : index
    %382 = vector.load %arg49[%c0_182, %c0_183] : memref<1x64xf32, #tpu.memory_space<vmem>>, vector<1x64xf32>
    %383 = vector.broadcast %382 : vector<1x64xf32> to vector<8x64xf32>
    %384 = arith.addf %381, %383 : vector<8x64xf32>
    %cst_184 = arith.constant 0.000000e+00 : f32
    %385 = vector.broadcast %cst_184 : f32 to vector<8x64xf32>
    %386 = arith.maximumf %384, %385 : vector<8x64xf32>
    %387 = vector.extract_strided_slice %386 {offsets = [0, 0], sizes = [8, 32], strides = [1, 1]} : vector<8x64xf32> to vector<8x32xf32>
    %388 = vector.extract_strided_slice %386 {offsets = [0, 32], sizes = [8, 32], strides = [1, 1]} : vector<8x64xf32> to vector<8x32xf32>
    %c0_185 = arith.constant 0 : index
    %c0_186 = arith.constant 0 : index
    %389 = vector.load %arg50[%c0_185, %c0_186] : memref<32x4xf32, #tpu.memory_space<vmem>>, vector<32x4xf32>
    %cst_187 = arith.constant dense<0.000000e+00> : vector<8x4xf32>
    %390 = tpu.matmul %268, %389, %cst_187 {dimension_numbers = #tpu.dot_dimension_numbers<[1], [0], [0], [1], [0, 0, 1, 1], [], []>} : vector<8x32xf32>, vector<32x4xf32>, vector<8x4xf32> -> vector<8x4xf32>
    %c0_188 = arith.constant 0 : index
    %c0_189 = arith.constant 0 : index
    %391 = vector.load %arg51[%c0_188, %c0_189] : memref<1x4xf32, #tpu.memory_space<vmem>>, vector<1x4xf32>
    %392 = vector.broadcast %391 : vector<1x4xf32> to vector<8x4xf32>
    %393 = arith.addf %390, %392 : vector<8x4xf32>
    %cst_190 = arith.constant dense<0xFF800000> : vector<8xf32>
    %394 = vector.multi_reduction <maximumf>, %393, %cst_190 [1] : vector<8x4xf32> to vector<8xf32>
    %395 = vector.shape_cast %394 : vector<8xf32> to vector<8x1xf32>
    %396 = vector.broadcast %395 : vector<8x1xf32> to vector<8x4xf32>
    %397 = arith.subf %393, %396 : vector<8x4xf32>
    %398 = math.exp %397 : vector<8x4xf32>
    %cst_191 = arith.constant dense<0.000000e+00> : vector<8xf32>
    %399 = vector.multi_reduction <add>, %398, %cst_191 [1] : vector<8x4xf32> to vector<8xf32>
    %400 = vector.shape_cast %399 : vector<8xf32> to vector<8x1xf32>
    %401 = tpu.reciprocal %400 {approx = true} : vector<8x1xf32> -> vector<8x1xf32>
    %402 = vector.broadcast %401 : vector<8x1xf32> to vector<8x4xf32>
    %403 = arith.mulf %398, %402 : vector<8x4xf32>
    %404 = vector.extract_strided_slice %403 {offsets = [0, 0], sizes = [8, 1], strides = [1, 1]} : vector<8x4xf32> to vector<8x1xf32>
    %405 = vector.broadcast %404 : vector<8x1xf32> to vector<8x32xf32>
    %406 = arith.mulf %405, %387 : vector<8x32xf32>
    %407 = vector.extract_strided_slice %403 {offsets = [0, 1], sizes = [8, 1], strides = [1, 1]} : vector<8x4xf32> to vector<8x1xf32>
    %408 = vector.broadcast %407 : vector<8x1xf32> to vector<8x32xf32>
    %409 = arith.mulf %408, %388 : vector<8x32xf32>
    %410 = arith.addf %406, %409 : vector<8x32xf32>
    %411 = vector.extract_strided_slice %403 {offsets = [0, 2], sizes = [8, 1], strides = [1, 1]} : vector<8x4xf32> to vector<8x1xf32>
    %412 = vector.broadcast %411 : vector<8x1xf32> to vector<8x32xf32>
    %413 = arith.mulf %412, %371 : vector<8x32xf32>
    %414 = arith.addf %410, %413 : vector<8x32xf32>
    %415 = vector.extract_strided_slice %403 {offsets = [0, 3], sizes = [8, 1], strides = [1, 1]} : vector<8x4xf32> to vector<8x1xf32>
    %416 = vector.broadcast %415 : vector<8x1xf32> to vector<8x32xf32>
    %417 = arith.mulf %416, %372 : vector<8x32xf32>
    %418 = arith.addf %414, %417 : vector<8x32xf32>
    %c0_192 = arith.constant 0 : index
    %c0_193 = arith.constant 0 : index
    %419 = vector.load %arg52[%c0_192, %c0_193] : memref<32x64xf32, #tpu.memory_space<vmem>>, vector<32x64xf32>
    %cst_194 = arith.constant dense<0.000000e+00> : vector<8x64xf32>
    %420 = tpu.matmul %314, %419, %cst_194 {dimension_numbers = #tpu.dot_dimension_numbers<[1], [0], [0], [1], [0, 0, 1, 1], [], []>} : vector<8x32xf32>, vector<32x64xf32>, vector<8x64xf32> -> vector<8x64xf32>
    %c0_195 = arith.constant 0 : index
    %c0_196 = arith.constant 0 : index
    %421 = vector.load %arg53[%c0_195, %c0_196] : memref<1x64xf32, #tpu.memory_space<vmem>>, vector<1x64xf32>
    %422 = vector.broadcast %421 : vector<1x64xf32> to vector<8x64xf32>
    %423 = arith.addf %420, %422 : vector<8x64xf32>
    %cst_197 = arith.constant 0.000000e+00 : f32
    %424 = vector.broadcast %cst_197 : f32 to vector<8x64xf32>
    %425 = arith.maximumf %423, %424 : vector<8x64xf32>
    %c0_198 = arith.constant 0 : index
    %c0_199 = arith.constant 0 : index
    %426 = vector.load %arg54[%c0_198, %c0_199] : memref<64x64xf32, #tpu.memory_space<vmem>>, vector<64x64xf32>
    %cst_200 = arith.constant dense<0.000000e+00> : vector<8x64xf32>
    %427 = tpu.matmul %425, %426, %cst_200 {dimension_numbers = #tpu.dot_dimension_numbers<[1], [0], [0], [1], [0, 0, 1, 1], [], []>} : vector<8x64xf32>, vector<64x64xf32>, vector<8x64xf32> -> vector<8x64xf32>
    %c0_201 = arith.constant 0 : index
    %c0_202 = arith.constant 0 : index
    %428 = vector.load %arg55[%c0_201, %c0_202] : memref<1x64xf32, #tpu.memory_space<vmem>>, vector<1x64xf32>
    %429 = vector.broadcast %428 : vector<1x64xf32> to vector<8x64xf32>
    %430 = arith.addf %427, %429 : vector<8x64xf32>
    %cst_203 = arith.constant 0.000000e+00 : f32
    %431 = vector.broadcast %cst_203 : f32 to vector<8x64xf32>
    %432 = arith.maximumf %430, %431 : vector<8x64xf32>
    %433 = vector.extract_strided_slice %432 {offsets = [0, 0], sizes = [8, 32], strides = [1, 1]} : vector<8x64xf32> to vector<8x32xf32>
    %434 = vector.extract_strided_slice %432 {offsets = [0, 32], sizes = [8, 32], strides = [1, 1]} : vector<8x64xf32> to vector<8x32xf32>
    %c0_204 = arith.constant 0 : index
    %c0_205 = arith.constant 0 : index
    %435 = vector.load %arg56[%c0_204, %c0_205] : memref<32x4xf32, #tpu.memory_space<vmem>>, vector<32x4xf32>
    %cst_206 = arith.constant dense<0.000000e+00> : vector<8x4xf32>
    %436 = tpu.matmul %314, %435, %cst_206 {dimension_numbers = #tpu.dot_dimension_numbers<[1], [0], [0], [1], [0, 0, 1, 1], [], []>} : vector<8x32xf32>, vector<32x4xf32>, vector<8x4xf32> -> vector<8x4xf32>
    %c0_207 = arith.constant 0 : index
    %c0_208 = arith.constant 0 : index
    %437 = vector.load %arg57[%c0_207, %c0_208] : memref<1x4xf32, #tpu.memory_space<vmem>>, vector<1x4xf32>
    %438 = vector.broadcast %437 : vector<1x4xf32> to vector<8x4xf32>
    %439 = arith.addf %436, %438 : vector<8x4xf32>
    %cst_209 = arith.constant dense<0xFF800000> : vector<8xf32>
    %440 = vector.multi_reduction <maximumf>, %439, %cst_209 [1] : vector<8x4xf32> to vector<8xf32>
    %441 = vector.shape_cast %440 : vector<8xf32> to vector<8x1xf32>
    %442 = vector.broadcast %441 : vector<8x1xf32> to vector<8x4xf32>
    %443 = arith.subf %439, %442 : vector<8x4xf32>
    %444 = math.exp %443 : vector<8x4xf32>
    %cst_210 = arith.constant dense<0.000000e+00> : vector<8xf32>
    %445 = vector.multi_reduction <add>, %444, %cst_210 [1] : vector<8x4xf32> to vector<8xf32>
    %446 = vector.shape_cast %445 : vector<8xf32> to vector<8x1xf32>
    %447 = tpu.reciprocal %446 {approx = true} : vector<8x1xf32> -> vector<8x1xf32>
    %448 = vector.broadcast %447 : vector<8x1xf32> to vector<8x4xf32>
    %449 = arith.mulf %444, %448 : vector<8x4xf32>
    %450 = vector.extract_strided_slice %449 {offsets = [0, 0], sizes = [8, 1], strides = [1, 1]} : vector<8x4xf32> to vector<8x1xf32>
    %451 = vector.broadcast %450 : vector<8x1xf32> to vector<8x32xf32>
    %452 = arith.mulf %451, %433 : vector<8x32xf32>
    %453 = vector.extract_strided_slice %449 {offsets = [0, 1], sizes = [8, 1], strides = [1, 1]} : vector<8x4xf32> to vector<8x1xf32>
    %454 = vector.broadcast %453 : vector<8x1xf32> to vector<8x32xf32>
    %455 = arith.mulf %454, %434 : vector<8x32xf32>
    %456 = arith.addf %452, %455 : vector<8x32xf32>
    %457 = vector.extract_strided_slice %449 {offsets = [0, 2], sizes = [8, 1], strides = [1, 1]} : vector<8x4xf32> to vector<8x1xf32>
    %458 = vector.broadcast %457 : vector<8x1xf32> to vector<8x32xf32>
    %459 = arith.mulf %458, %371 : vector<8x32xf32>
    %460 = arith.addf %456, %459 : vector<8x32xf32>
    %461 = vector.extract_strided_slice %449 {offsets = [0, 3], sizes = [8, 1], strides = [1, 1]} : vector<8x4xf32> to vector<8x1xf32>
    %462 = vector.broadcast %461 : vector<8x1xf32> to vector<8x32xf32>
    %463 = arith.mulf %462, %372 : vector<8x32xf32>
    %464 = arith.addf %460, %463 : vector<8x32xf32>
    %c0_211 = arith.constant 0 : index
    %c0_212 = arith.constant 0 : index
    %465 = vector.load %arg58[%c0_211, %c0_212] : memref<32x2xf32, #tpu.memory_space<vmem>>, vector<32x2xf32>
    %cst_213 = arith.constant dense<0.000000e+00> : vector<8x2xf32>
    %466 = tpu.matmul %356, %465, %cst_213 {dimension_numbers = #tpu.dot_dimension_numbers<[1], [0], [0], [1], [0, 0, 1, 1], [], []>} : vector<8x32xf32>, vector<32x2xf32>, vector<8x2xf32> -> vector<8x2xf32>
    %c0_214 = arith.constant 0 : index
    %c0_215 = arith.constant 0 : index
    %467 = vector.load %arg59[%c0_214, %c0_215] : memref<1x2xf32, #tpu.memory_space<vmem>>, vector<1x2xf32>
    %468 = vector.broadcast %467 : vector<1x2xf32> to vector<8x2xf32>
    %469 = arith.addf %466, %468 : vector<8x2xf32>
    %cst_216 = arith.constant dense<0xFF800000> : vector<8xf32>
    %470 = vector.multi_reduction <maximumf>, %469, %cst_216 [1] : vector<8x2xf32> to vector<8xf32>
    %471 = vector.shape_cast %470 : vector<8xf32> to vector<8x1xf32>
    %472 = vector.broadcast %471 : vector<8x1xf32> to vector<8x2xf32>
    %473 = arith.subf %469, %472 : vector<8x2xf32>
    %474 = math.exp %473 : vector<8x2xf32>
    %cst_217 = arith.constant dense<0.000000e+00> : vector<8xf32>
    %475 = vector.multi_reduction <add>, %474, %cst_217 [1] : vector<8x2xf32> to vector<8xf32>
    %476 = vector.shape_cast %475 : vector<8xf32> to vector<8x1xf32>
    %477 = tpu.reciprocal %476 {approx = true} : vector<8x1xf32> -> vector<8x1xf32>
    %478 = vector.broadcast %477 : vector<8x1xf32> to vector<8x2xf32>
    %479 = arith.mulf %474, %478 : vector<8x2xf32>
    %480 = vector.extract_strided_slice %479 {offsets = [0, 0], sizes = [8, 1], strides = [1, 1]} : vector<8x2xf32> to vector<8x1xf32>
    %481 = vector.broadcast %480 : vector<8x1xf32> to vector<8x32xf32>
    %482 = arith.mulf %481, %371 : vector<8x32xf32>
    %483 = vector.extract_strided_slice %479 {offsets = [0, 1], sizes = [8, 1], strides = [1, 1]} : vector<8x2xf32> to vector<8x1xf32>
    %484 = vector.broadcast %483 : vector<8x1xf32> to vector<8x32xf32>
    %485 = arith.mulf %484, %372 : vector<8x32xf32>
    %486 = arith.addf %482, %485 : vector<8x32xf32>
    %c0_218 = arith.constant 0 : index
    %c0_219 = arith.constant 0 : index
    %487 = vector.load %arg60[%c0_218, %c0_219] : memref<32x16xf32, #tpu.memory_space<vmem>>, vector<32x16xf32>
    %cst_220 = arith.constant dense<0.000000e+00> : vector<8x16xf32>
    %488 = tpu.matmul %418, %487, %cst_220 {dimension_numbers = #tpu.dot_dimension_numbers<[1], [0], [0], [1], [0, 0, 1, 1], [], []>} : vector<8x32xf32>, vector<32x16xf32>, vector<8x16xf32> -> vector<8x16xf32>
    %c0_221 = arith.constant 0 : index
    %c0_222 = arith.constant 0 : index
    %489 = vector.load %arg61[%c0_221, %c0_222] : memref<1x16xf32, #tpu.memory_space<vmem>>, vector<1x16xf32>
    %490 = vector.broadcast %489 : vector<1x16xf32> to vector<8x16xf32>
    %491 = arith.addf %488, %490 : vector<8x16xf32>
    %cst_223 = arith.constant 0.000000e+00 : f32
    %492 = vector.broadcast %cst_223 : f32 to vector<8x16xf32>
    %493 = arith.maximumf %491, %492 : vector<8x16xf32>
    %c0_224 = arith.constant 0 : index
    %c0_225 = arith.constant 0 : index
    %494 = vector.load %arg62[%c0_224, %c0_225] : memref<32x16xf32, #tpu.memory_space<vmem>>, vector<32x16xf32>
    %cst_226 = arith.constant dense<0.000000e+00> : vector<8x16xf32>
    %495 = tpu.matmul %464, %494, %cst_226 {dimension_numbers = #tpu.dot_dimension_numbers<[1], [0], [0], [1], [0, 0, 1, 1], [], []>} : vector<8x32xf32>, vector<32x16xf32>, vector<8x16xf32> -> vector<8x16xf32>
    %c0_227 = arith.constant 0 : index
    %c0_228 = arith.constant 0 : index
    %496 = vector.load %arg63[%c0_227, %c0_228] : memref<1x16xf32, #tpu.memory_space<vmem>>, vector<1x16xf32>
    %497 = vector.broadcast %496 : vector<1x16xf32> to vector<8x16xf32>
    %498 = arith.addf %495, %497 : vector<8x16xf32>
    %cst_229 = arith.constant 0.000000e+00 : f32
    %499 = vector.broadcast %cst_229 : f32 to vector<8x16xf32>
    %500 = arith.maximumf %498, %499 : vector<8x16xf32>
    %c0_230 = arith.constant 0 : index
    %c0_231 = arith.constant 0 : index
    %501 = vector.load %arg67[%c0_230, %c0_231] : memref<32x1xf32, #tpu.memory_space<vmem>>, vector<32x1xf32>
    %cst_232 = arith.constant dense<0.000000e+00> : vector<8x1xf32>
    %502 = tpu.matmul %418, %501, %cst_232 {dimension_numbers = #tpu.dot_dimension_numbers<[1], [0], [0], [1], [0, 0, 1, 1], [], []>} : vector<8x32xf32>, vector<32x1xf32>, vector<8x1xf32> -> vector<8x1xf32>
    %c0_233 = arith.constant 0 : index
    %c0_234 = arith.constant 0 : index
    %503 = vector.load %arg68[%c0_233, %c0_234] : memref<1x1xf32, #tpu.memory_space<vmem>>, vector<1x1xf32>
    %504 = vector.broadcast %503 : vector<1x1xf32> to vector<8x1xf32>
    %505 = arith.addf %502, %504 : vector<8x1xf32>
    %506 = arith.negf %505 : vector<8x1xf32>
    %507 = math.exp %506 : vector<8x1xf32>
    %cst_235 = arith.constant 1.000000e+00 : f32
    %508 = vector.broadcast %cst_235 : f32 to vector<8x1xf32>
    %509 = arith.addf %508, %507 : vector<8x1xf32>
    %510 = arith.divf %508, %509 : vector<8x1xf32>
    %511 = vector.broadcast %510 : vector<8x1xf32> to vector<8x16xf32>
    %512 = arith.mulf %511, %493 : vector<8x16xf32>
    %c0_236 = arith.constant 0 : index
    %c0_237 = arith.constant 0 : index
    %513 = vector.load %arg64[%c0_236, %c0_237] : memref<32x16xf32, #tpu.memory_space<vmem>>, vector<32x16xf32>
    %cst_238 = arith.constant dense<0.000000e+00> : vector<8x16xf32>
    %514 = tpu.matmul %486, %513, %cst_238 {dimension_numbers = #tpu.dot_dimension_numbers<[1], [0], [0], [1], [0, 0, 1, 1], [], []>} : vector<8x32xf32>, vector<32x16xf32>, vector<8x16xf32> -> vector<8x16xf32>
    %c0_239 = arith.constant 0 : index
    %c0_240 = arith.constant 0 : index
    %515 = vector.load %arg65[%c0_239, %c0_240] : memref<16x16xf32, #tpu.memory_space<vmem>>, vector<16x16xf32>
    %cst_241 = arith.constant dense<0.000000e+00> : vector<8x16xf32>
    %516 = tpu.matmul %512, %515, %cst_241 {dimension_numbers = #tpu.dot_dimension_numbers<[1], [0], [0], [1], [0, 0, 1, 1], [], []>} : vector<8x16xf32>, vector<16x16xf32>, vector<8x16xf32> -> vector<8x16xf32>
    %517 = arith.addf %514, %516 : vector<8x16xf32>
    %c0_242 = arith.constant 0 : index
    %c0_243 = arith.constant 0 : index
    %518 = vector.load %arg66[%c0_242, %c0_243] : memref<1x16xf32, #tpu.memory_space<vmem>>, vector<1x16xf32>
    %519 = vector.broadcast %518 : vector<1x16xf32> to vector<8x16xf32>
    %520 = arith.addf %517, %519 : vector<8x16xf32>
    %cst_244 = arith.constant 0.000000e+00 : f32
    %521 = vector.broadcast %cst_244 : f32 to vector<8x16xf32>
    %522 = arith.maximumf %520, %521 : vector<8x16xf32>
    %c0_245 = arith.constant 0 : index
    %c0_246 = arith.constant 0 : index
    %523 = vector.load %arg69[%c0_245, %c0_246] : memref<1x8xf32, #tpu.memory_space<vmem>>, vector<1x8xf32>
    %524 = vector.broadcast %25 : vector<8x1xf32> to vector<8x8xf32>
    %525 = vector.broadcast %523 : vector<1x8xf32> to vector<8x8xf32>
    %526 = arith.mulf %524, %525 : vector<8x8xf32>
    %c0_247 = arith.constant 0 : index
    %c0_248 = arith.constant 0 : index
    %527 = vector.load %arg70[%c0_247, %c0_248] : memref<1x8xf32, #tpu.memory_space<vmem>>, vector<1x8xf32>
    %528 = vector.broadcast %206 : vector<8x1xf32> to vector<8x8xf32>
    %529 = vector.broadcast %527 : vector<1x8xf32> to vector<8x8xf32>
    %530 = arith.mulf %528, %529 : vector<8x8xf32>
    %531 = arith.addf %526, %530 : vector<8x8xf32>
    %c0_249 = arith.constant 0 : index
    %c0_250 = arith.constant 0 : index
    %532 = vector.load %arg71[%c0_249, %c0_250] : memref<16x8xf32, #tpu.memory_space<vmem>>, vector<16x8xf32>
    %cst_251 = arith.constant dense<0.000000e+00> : vector<8x8xf32>
    %533 = tpu.matmul %493, %532, %cst_251 {dimension_numbers = #tpu.dot_dimension_numbers<[1], [0], [0], [1], [0, 0, 1, 1], [], []>} : vector<8x16xf32>, vector<16x8xf32>, vector<8x8xf32> -> vector<8x8xf32>
    %534 = arith.addf %531, %533 : vector<8x8xf32>
    %c0_252 = arith.constant 0 : index
    %c0_253 = arith.constant 0 : index
    %535 = vector.load %arg72[%c0_252, %c0_253] : memref<1x8xf32, #tpu.memory_space<vmem>>, vector<1x8xf32>
    %536 = vector.broadcast %535 : vector<1x8xf32> to vector<8x8xf32>
    %537 = arith.addf %534, %536 : vector<8x8xf32>
    %c0_254 = arith.constant 0 : index
    %c0_255 = arith.constant 0 : index
    %538 = vector.load %arg73[%c0_254, %c0_255] : memref<8x1xf32, #tpu.memory_space<vmem>>, vector<8x1xf32>
    %cst_256 = arith.constant dense<0.000000e+00> : vector<8x1xf32>
    %539 = tpu.matmul %537, %538, %cst_256 {dimension_numbers = #tpu.dot_dimension_numbers<[1], [0], [0], [1], [0, 0, 1, 1], [], []>} : vector<8x8xf32>, vector<8x1xf32>, vector<8x1xf32> -> vector<8x1xf32>
    %c0_257 = arith.constant 0 : index
    %c0_258 = arith.constant 0 : index
    %540 = vector.load %arg74[%c0_257, %c0_258] : memref<1x1xf32, #tpu.memory_space<vmem>>, vector<1x1xf32>
    %541 = vector.broadcast %540 : vector<1x1xf32> to vector<8x1xf32>
    %542 = arith.addf %539, %541 : vector<8x1xf32>
    %543 = arith.negf %542 : vector<8x1xf32>
    %544 = math.exp %543 : vector<8x1xf32>
    %cst_259 = arith.constant 1.000000e+00 : f32
    %545 = vector.broadcast %cst_259 : f32 to vector<8x1xf32>
    %546 = arith.addf %545, %544 : vector<8x1xf32>
    %547 = arith.divf %545, %546 : vector<8x1xf32>
    %c0_260 = arith.constant 0 : index
    %c0_261 = arith.constant 0 : index
    %548 = vector.load %arg75[%c0_260, %c0_261] : memref<1x9xf32, #tpu.memory_space<vmem>>, vector<1x9xf32>
    %549 = vector.broadcast %25 : vector<8x1xf32> to vector<8x9xf32>
    %550 = vector.broadcast %548 : vector<1x9xf32> to vector<8x9xf32>
    %551 = arith.mulf %549, %550 : vector<8x9xf32>
    %c0_262 = arith.constant 0 : index
    %c0_263 = arith.constant 0 : index
    %552 = vector.load %arg76[%c0_262, %c0_263] : memref<1x9xf32, #tpu.memory_space<vmem>>, vector<1x9xf32>
    %553 = vector.broadcast %206 : vector<8x1xf32> to vector<8x9xf32>
    %554 = vector.broadcast %552 : vector<1x9xf32> to vector<8x9xf32>
    %555 = arith.mulf %553, %554 : vector<8x9xf32>
    %556 = arith.addf %551, %555 : vector<8x9xf32>
    %c0_264 = arith.constant 0 : index
    %c0_265 = arith.constant 0 : index
    %557 = vector.load %arg77[%c0_264, %c0_265] : memref<16x9xf32, #tpu.memory_space<vmem>>, vector<16x9xf32>
    %cst_266 = arith.constant dense<0.000000e+00> : vector<8x9xf32>
    %558 = tpu.matmul %500, %557, %cst_266 {dimension_numbers = #tpu.dot_dimension_numbers<[1], [0], [0], [1], [0, 0, 1, 1], [], []>} : vector<8x16xf32>, vector<16x9xf32>, vector<8x9xf32> -> vector<8x9xf32>
    %559 = arith.addf %556, %558 : vector<8x9xf32>
    %c0_267 = arith.constant 0 : index
    %c0_268 = arith.constant 0 : index
    %560 = vector.load %arg78[%c0_267, %c0_268] : memref<1x9xf32, #tpu.memory_space<vmem>>, vector<1x9xf32>
    %561 = vector.broadcast %560 : vector<1x9xf32> to vector<8x9xf32>
    %562 = arith.addf %559, %561 : vector<8x9xf32>
    %c0_269 = arith.constant 0 : index
    %c0_270 = arith.constant 0 : index
    %563 = vector.load %arg79[%c0_269, %c0_270] : memref<9x9xf32, #tpu.memory_space<vmem>>, vector<9x9xf32>
    %cst_271 = arith.constant dense<0.000000e+00> : vector<8x9xf32>
    %564 = tpu.matmul %562, %563, %cst_271 {dimension_numbers = #tpu.dot_dimension_numbers<[1], [0], [0], [1], [0, 0, 1, 1], [], []>} : vector<8x9xf32>, vector<9x9xf32>, vector<8x9xf32> -> vector<8x9xf32>
    %c0_272 = arith.constant 0 : index
    %c0_273 = arith.constant 0 : index
    %565 = vector.load %arg80[%c0_272, %c0_273] : memref<1x9xf32, #tpu.memory_space<vmem>>, vector<1x9xf32>
    %566 = vector.broadcast %565 : vector<1x9xf32> to vector<8x9xf32>
    %567 = arith.addf %564, %566 : vector<8x9xf32>
    %c0_274 = arith.constant 0 : index
    %c0_275 = arith.constant 0 : index
    %568 = vector.load %arg81[%c0_274, %c0_275] : memref<1x9xf32, #tpu.memory_space<vmem>>, vector<1x9xf32>
    %569 = vector.broadcast %25 : vector<8x1xf32> to vector<8x9xf32>
    %570 = vector.broadcast %568 : vector<1x9xf32> to vector<8x9xf32>
    %571 = arith.mulf %569, %570 : vector<8x9xf32>
    %c0_276 = arith.constant 0 : index
    %c0_277 = arith.constant 0 : index
    %572 = vector.load %arg82[%c0_276, %c0_277] : memref<1x9xf32, #tpu.memory_space<vmem>>, vector<1x9xf32>
    %573 = vector.broadcast %206 : vector<8x1xf32> to vector<8x9xf32>
    %574 = vector.broadcast %572 : vector<1x9xf32> to vector<8x9xf32>
    %575 = arith.mulf %573, %574 : vector<8x9xf32>
    %576 = arith.addf %571, %575 : vector<8x9xf32>
    %c0_278 = arith.constant 0 : index
    %c0_279 = arith.constant 0 : index
    %577 = vector.load %arg83[%c0_278, %c0_279] : memref<16x9xf32, #tpu.memory_space<vmem>>, vector<16x9xf32>
    %cst_280 = arith.constant dense<0.000000e+00> : vector<8x9xf32>
    %578 = tpu.matmul %522, %577, %cst_280 {dimension_numbers = #tpu.dot_dimension_numbers<[1], [0], [0], [1], [0, 0, 1, 1], [], []>} : vector<8x16xf32>, vector<16x9xf32>, vector<8x9xf32> -> vector<8x9xf32>
    %579 = arith.addf %576, %578 : vector<8x9xf32>
    %c0_281 = arith.constant 0 : index
    %c0_282 = arith.constant 0 : index
    %580 = vector.load %arg84[%c0_281, %c0_282] : memref<1x9xf32, #tpu.memory_space<vmem>>, vector<1x9xf32>
    %581 = vector.broadcast %580 : vector<1x9xf32> to vector<8x9xf32>
    %582 = arith.addf %579, %581 : vector<8x9xf32>
    %c0_283 = arith.constant 0 : index
    %c0_284 = arith.constant 0 : index
    %583 = vector.load %arg85[%c0_283, %c0_284] : memref<9x9xf32, #tpu.memory_space<vmem>>, vector<9x9xf32>
    %cst_285 = arith.constant dense<0.000000e+00> : vector<8x9xf32>
    %584 = tpu.matmul %582, %583, %cst_285 {dimension_numbers = #tpu.dot_dimension_numbers<[1], [0], [0], [1], [0, 0, 1, 1], [], []>} : vector<8x9xf32>, vector<9x9xf32>, vector<8x9xf32> -> vector<8x9xf32>
    %c0_286 = arith.constant 0 : index
    %c0_287 = arith.constant 0 : index
    %585 = vector.load %arg86[%c0_286, %c0_287] : memref<1x9xf32, #tpu.memory_space<vmem>>, vector<1x9xf32>
    %586 = vector.broadcast %585 : vector<1x9xf32> to vector<8x9xf32>
    %587 = arith.addf %584, %586 : vector<8x9xf32>
    %c0_288 = arith.constant 0 : index
    %c0_289 = arith.constant 0 : index
    %588 = vector.load %arg87[%c0_288, %c0_289] : memref<8x1xf32, #tpu.memory_space<vmem>>, vector<8x1xf32>
    tpu.vector_store %arg87[%c0_288, %c0_289], %547 {strides = array<i32>} : memref<8x1xf32, #tpu.memory_space<vmem>>, vector<8x1xf32>,
    %c0_290 = arith.constant 0 : index
    %c0_291 = arith.constant 0 : index
    %589 = vector.load %arg88[%c0_290, %c0_291] : memref<8x9xf32, #tpu.memory_space<vmem>>, vector<8x9xf32>
    tpu.vector_store %arg88[%c0_290, %c0_291], %567 {strides = array<i32>} : memref<8x9xf32, #tpu.memory_space<vmem>>, vector<8x9xf32>,
    %590 = arith.subf %567, %587 : vector<8x9xf32>
    %c0_292 = arith.constant 0 : index
    %c0_293 = arith.constant 0 : index
    %591 = vector.load %arg89[%c0_292, %c0_293] : memref<8x9xf32, #tpu.memory_space<vmem>>, vector<8x9xf32>
    tpu.vector_store %arg89[%c0_292, %c0_293], %590 {strides = array<i32>} : memref<8x9xf32, #tpu.memory_space<vmem>>, vector<8x9xf32>,
    return
  }
}

</mosaic_0001>

<bundles_post_ra>
// kernel: forward.1
= control target key start
LH: loop header
LB: loop body
LE: loop exit
PB: predicated region body
PF: predicated region fallthrough
CT: control target
= control target key end

     0   :  { %s14358_s6 = smov 1   ;;  %s14359_s10 = smov 2   ;;  %s16915_s0 = inlined_call_operand.smem [shape: u32[90], index: -1, kind: input, shape index: {}] }
   0x1   :  { %s14541_s5 = sld [smem:[%s16915_s0]]   ;;  %s14360_s14 = smov 3  }
   0x2   :  { %s14546_s9 = sld [smem:[%s16915_s0 + %s14358_s6]]   ;;  %s14361_s18 = smov 4  }
   0x3   :  { %s14551_s13 = sld [smem:[%s16915_s0 + %s14359_s10]]   ;;  %s14362_s22 = smov 5  }
   0x4   :  { %s14556_s17 = sld [smem:[%s16915_s0 + %s14360_s14]]   ;;  %s14363_s26 = smov 6  }
   0x5   :  { %s14561_s21 = sld [smem:[%s16915_s0 + %s14361_s18]]   ;;  %s14364_s30 = smov 7  }
   0x6   :  { %s14566_s25 = sld [smem:[%s16915_s0 + %s14362_s22]]   ;;  %s14365_s4 = smov 8  }
   0x7   :  { %16981 = sst [smem:[#allocation143_spill]] %s14541_s5  ;;  %s14366_s10 = smov 9  }
   0x8   :  { %16982 = sst [smem:[#allocation144_spill]] %s14546_s9  ;;  %s14367_s15 = smov 10  }
   0x9   :  { %16983 = sst [smem:[#allocation145_spill]] %s14551_s13  ;;  %s14368_s20 = smov 11  }
   0xa   :  { %s9343_s29 = sld [smem:[%s16915_s0 + %s14363_s26]]   ;;  %s14369_s26 = smov 13  }
   0xb   :  { %16984 = sst [smem:[#allocation146_spill]] %s14561_s21  ;;  %s14370_s1 = smov 14  }
   0xc   :  { %s14574_s3 = sld [smem:[%s16915_s0 + %s14364_s30]]   ;;  %s14371_s7 = smov 15  }
   0xd   :  { %s14579_s8 = sld [smem:[%s16915_s0 + %s14365_s4]]   ;;  %s14374_s27 = smov 18  }
   0xe   :  { %s14584_s14 = sld [smem:[%s16915_s0 + %s14366_s10]]   ;;  %s14375_s4 = smov 19  }
   0xf   :  { %s14589_s19 = sld [smem:[%s16915_s0 + %s14367_s15]]   ;;  %s14372_s15 = smov 16  }
  0x10   :  { %s14594_s24 = sld [smem:[%s16915_s0 + %s14368_s20]]   ;;  %v185_v0 = vstv %s9343_s29  ;;  %s14373_s29 = smov 17  }
  0x11   :  { %s14599_s30 = sld [smem:[%s16915_s0 + %s14369_s26]]   ;;  %186 = vst [vmem:[#allocation2] sm:$0x1] %v185_v0  ;;  %s14445_s22 = smov 68  }
  0x12   :  { %16985 = sst [smem:[#allocation147_spill]] %s14574_s3 }
  0x13   :  { %s14604_s6 = sld [smem:[%s16915_s0 + %s14370_s1]]  }
  0x14   :  { %16986 = sst [smem:[#allocation148_spill]] %s14584_s14 }
  0x15   :  { %s14609_s12 = sld [smem:[%s16915_s0 + %s14371_s7]]  }
  0x16   :  { %16987 = sst [smem:[#allocation149_spill]] %s14594_s24 }
  0x17   :  { %s14614_s20 = sld [smem:[%s16915_s0 + %s14372_s15]]   ;;  %s14376_s15 = smov 20  }
  0x18   :  { %s14619_s26 = sld [smem:[%s16915_s0 + %s14373_s29]]   ;;  %s14377_s29 = smov 21  }
  0x19   :  { %16988 = sst [smem:[#allocation150_spill]] %s14604_s6 }
  0x1a   :  { %s14624_s2 = sld [smem:[%s16915_s0 + %s14374_s27]]   ;;  %s14378_s27 = smov 22  }
  0x1b   :  { %s14629_s11 = sld [smem:[%s16915_s0 + %s14375_s4]]   ;;  %s14379_s4 = smov 23  }
  0x1c   :  { %s14634_s9 = sld [smem:[%s16915_s0 + %s14376_s15]]   ;;  %s14380_s15 = smov 24  }
  0x1d   :  { %16989 = sst [smem:[#allocation151_spill]] %s14614_s20 }
  0x1e   :  { %s14639_s5 = sld [smem:[%s16915_s0 + %s14377_s29]]   ;;  %s14381_s29 = smov 25  }
  0x1f   :  { %s14654_s20 = sld [smem:[%s16915_s0 + %s14380_s15]]   ;;  %s14384_s15 = smov 28  }
  0x20   :  { %16990 = sst [smem:[#allocation152_spill]] %s14624_s2 }
  0x21   :  { %16991 = sst [smem:[#allocation153_spill]] %s14629_s11 }
  0x22   :  { %s14644_s2 = sld [smem:[%s16915_s0 + %s14378_s27]]   ;;  %s14382_s27 = smov 26  }
  0x23   :  { %s14649_s11 = sld [smem:[%s16915_s0 + %s14379_s4]]   ;;  %s14383_s4 = smov 27  }
  0x24   :  { %16992 = sst [smem:[#allocation154_spill]] %s14639_s5 }
  0x25   :  { %s14659_s5 = sld [smem:[%s16915_s0 + %s14381_s29]]   ;;  %s14385_s29 = smov 29  }
  0x26   :  { %s14664_s6 = sld [smem:[%s16915_s0 + %s14382_s27]]   ;;  %s14386_s27 = smov 30  }
  0x27   :  { %s14674_s24 = sld [smem:[%s16915_s0 + %s14384_s15]]   ;;  %s14388_s15 = smov 32  }
  0x28   :  { %s14684_s14 = sld [smem:[%s16915_s0 + %s14386_s27]]   ;;  %s14390_s27 = smov 34  }
  0x29   :  { %16993 = sst [smem:[#allocation155_spill]] %s14649_s11 }
  0x2a   :  { %s14669_s11 = sld [smem:[%s16915_s0 + %s14383_s4]]   ;;  %s14387_s4 = smov 31  }
  0x2b   :  { %16994 = sst [smem:[#allocation156_spill]] %s14659_s5 }
  0x2c   :  { %s14679_s5 = sld [smem:[%s16915_s0 + %s14385_s29]]   ;;  %s14389_s29 = smov 33  }
  0x2d   :  { %s14694_s3 = sld [smem:[%s16915_s0 + %s14388_s15]]   ;;  %s14392_s15 = smov 36  }
  0x2e   :  { %s14704_s21 = sld [smem:[%s16915_s0 + %s14390_s27]]   ;;  %s14394_s27 = smov 38  }
  0x2f   :  { %s14714_s13 = sld [smem:[%s16915_s0 + %s14392_s15]]   ;;  %s14396_s15 = smov 40  }
  0x30   :  { %16995 = sst [smem:[#allocation157_spill]] %s14669_s11 }
  0x31   :  { %s14689_s11 = sld [smem:[%s16915_s0 + %s14387_s4]]   ;;  %s14391_s4 = smov 35  }
  0x32   :  { %16996 = sst [smem:[#allocation158_spill]] %s14679_s5 }
  0x33   :  { %16998 = sst [smem:[#allocation160_spill]] %s14694_s3  ;;  %s14446_s3 = smov 74  }
  0x34   :  { %s14699_s5 = sld [smem:[%s16915_s0 + %s14389_s29]]   ;;  %s14393_s29 = smov 37  }
  0x35   :  { %17000 = sst [smem:[#allocation162_spill]] %s14704_s21 }
  0x36   :  { %17002 = sst [smem:[#allocation164_spill]] %s14714_s13 }
  0x37   :  { %16997 = sst [smem:[#allocation159_spill]] %s14689_s11 }
  0x38   :  { %s14709_s11 = sld [smem:[%s16915_s0 + %s14391_s4]]   ;;  %s14395_s4 = smov 39  }
  0x39   :  { %s14724_s21 = sld [smem:[%s16915_s0 + %s14394_s27]]   ;;  %s14398_s27 = smov 42  }
  0x3a   :  { %16999 = sst [smem:[#allocation161_spill]] %s14699_s5 }
  0x3b   :  { %s14719_s5 = sld [smem:[%s16915_s0 + %s14393_s29]]   ;;  %s14397_s29 = smov 41  }
  0x3c   :  { %s14734_s13 = sld [smem:[%s16915_s0 + %s14396_s15]]   ;;  %s14400_s15 = smov 44  }
  0x3d   :  { %s9411_s1 = sld [smem:[%s16915_s0 + %s14446_s3]]  }
  0x3e   :  { %17001 = sst [smem:[#allocation163_spill]] %s14709_s11 }
  0x3f   :  { %17004 = sst [smem:[#allocation166_spill]] %s14724_s21 }
  0x40   :  { %s14729_s11 = sld [smem:[%s16915_s0 + %s14395_s4]]   ;;  %s14399_s4 = smov 43  }
  0x41   :  { %17003 = sst [smem:[#allocation165_spill]] %s14719_s5 }
  0x42   :  { %17006 = sst [smem:[#allocation168_spill]] %s14734_s13 }
  0x43   :  { %s14739_s5 = sld [smem:[%s16915_s0 + %s14397_s29]]   ;;  %s14401_s29 = smov 45   ;;  %v191_v3 = vstv %s9411_s1 }
  0x44   :  { %s14744_s21 = sld [smem:[%s16915_s0 + %s14398_s27]]   ;;  %s14402_s27 = smov 46   ;;  %192 = vst [vmem:[#allocation5] sm:$0x1] %v191_v3 }
  0x45   :  { %s14754_s13 = sld [smem:[%s16915_s0 + %s14400_s15]]   ;;  %s14404_s15 = smov 48  }
  0x46   :  { %17005 = sst [smem:[#allocation167_spill]] %s14729_s11 }
  0x47   :  { %s14749_s11 = sld [smem:[%s16915_s0 + %s14399_s4]]   ;;  %s14403_s4 = smov 47  }
  0x49   :  { %17007 = sst [smem:[#allocation169_spill]] %s14739_s5 }
  0x4a   :  { %17008 = sst [smem:[#allocation170_spill]] %s14744_s21 }
  0x4b   :  { %17010 = sst [smem:[#allocation172_spill]] %s14754_s13 }
  0x4c   :  { %s14759_s5 = sld [smem:[%s16915_s0 + %s14401_s29]]   ;;  %s14405_s29 = smov 49  }
  0x4d   :  { %17009 = sst [smem:[#allocation171_spill]] %s14749_s11 }
  0x4e   :  { %s14764_s21 = sld [smem:[%s16915_s0 + %s14402_s27]]   ;;  %s14406_s27 = smov 50  }
  0x4f   :  { %s14769_s11 = sld [smem:[%s16915_s0 + %s14403_s4]]   ;;  %s14407_s4 = smov 51  }
  0x50   :  { %s14774_s13 = sld [smem:[%s16915_s0 + %s14404_s15]]   ;;  %s14408_s15 = smov 52  }
  0x52   :  { %17011 = sst [smem:[#allocation173_spill]] %s14759_s5 }
  0x53   :  { %s14779_s5 = sld [smem:[%s16915_s0 + %s14405_s29]]   ;;  %s14409_s29 = smov 53  }
  0x54   :  { %17012 = sst [smem:[#allocation174_spill]] %s14764_s21 }
  0x55   :  { %17013 = sst [smem:[#allocation175_spill]] %s14769_s11 }
  0x56   :  { %17014 = sst [smem:[#allocation176_spill]] %s14774_s13 }
  0x57   :  { %s14784_s21 = sld [smem:[%s16915_s0 + %s14406_s27]]   ;;  %s14410_s27 = smov 54  }
  0x58   :  { %s14789_s11 = sld [smem:[%s16915_s0 + %s14407_s4]]   ;;  %s14411_s4 = smov 55  }
  0x59   :  { %17015 = sst [smem:[#allocation177_spill]] %s14779_s5 }
  0x5a   :  { %s14794_s13 = sld [smem:[%s16915_s0 + %s14408_s15]]   ;;  %s14412_s15 = smov 56  }
  0x5b   :  { %s14799_s5 = sld [smem:[%s16915_s0 + %s14409_s29]]   ;;  %s14413_s29 = smov 57  }
  0x5d   :  { %17016 = sst [smem:[#allocation178_spill]] %s14784_s21 }
  0x5e   :  { %17017 = sst [smem:[#allocation179_spill]] %s14789_s11 }
  0x5f   :  { %s14804_s21 = sld [smem:[%s16915_s0 + %s14410_s27]]   ;;  %s14414_s27 = smov 58  }
  0x60   :  { %17018 = sst [smem:[#allocation180_spill]] %s14794_s13 }
  0x61   :  { %17019 = sst [smem:[#allocation181_spill]] %s14799_s5 }
  0x62   :  { %s14809_s11 = sld [smem:[%s16915_s0 + %s14411_s4]]   ;;  %s14415_s4 = smov 59  }
  0x63   :  { %s14814_s13 = sld [smem:[%s16915_s0 + %s14412_s15]]   ;;  %s14416_s15 = smov 60  }
  0x64   :  { %s14819_s5 = sld [smem:[%s16915_s0 + %s14413_s29]]   ;;  %s14417_s29 = smov 61  }
  0x65   :  { %17020 = sst [smem:[#allocation182_spill]] %s14804_s21 }
  0x66   :  { %s14824_s21 = sld [smem:[%s16915_s0 + %s14414_s27]]   ;;  %s14418_s27 = smov 62  }
  0x68   :  { %17021 = sst [smem:[#allocation183_spill]] %s14809_s11 }
  0x69   :  { %17022 = sst [smem:[#allocation184_spill]] %s14814_s13 }
  0x6a   :  { %17023 = sst [smem:[#allocation185_spill]] %s14819_s5 }
  0x6b   :  { %s14829_s11 = sld [smem:[%s16915_s0 + %s14415_s4]]   ;;  %s14419_s4 = smov 63  }
  0x6c   :  { %17024 = sst [smem:[#allocation186_spill]] %s14824_s21 }
  0x6d   :  { %s14834_s13 = sld [smem:[%s16915_s0 + %s14416_s15]]   ;;  %s14420_s15 = smov 64  }
  0x6e   :  { %s14839_s5 = sld [smem:[%s16915_s0 + %s14417_s29]]   ;;  %s14421_s29 = smov 65  }
  0x6f   :  { %s14844_s21 = sld [smem:[%s16915_s0 + %s14418_s27]]   ;;  %s14422_s27 = smov 66  }
  0x71   :  { %17025 = sst [smem:[#allocation187_spill]] %s14829_s11 }
  0x72   :  { %s14849_s11 = sld [smem:[%s16915_s0 + %s14419_s4]]   ;;  %s14423_s4 = smov 67  }
  0x73   :  { %17026 = sst [smem:[#allocation188_spill]] %s14834_s13 }
  0x74   :  { %17027 = sst [smem:[#allocation189_spill]] %s14839_s5 }
  0x75   :  { %17028 = sst [smem:[#allocation190_spill]] %s14844_s21 }
  0x76   :  { %s14854_s13 = sld [smem:[%s16915_s0 + %s14420_s15]]   ;;  %s14424_s15 = smov 69  }
  0x77   :  { %s14859_s5 = sld [smem:[%s16915_s0 + %s14421_s29]]   ;;  %s14425_s29 = smov 70  }
  0x78   :  { %17029 = sst [smem:[#allocation191_spill]] %s14849_s11 }
  0x79   :  { %s14864_s21 = sld [smem:[%s16915_s0 + %s14422_s27]]   ;;  %s14426_s27 = smov 71  }
  0x7a   :  { %s14869_s11 = sld [smem:[%s16915_s0 + %s14423_s4]]   ;;  %s14427_s4 = smov 72  }
  0x7c   :  { %17030 = sst [smem:[#allocation192_spill]] %s14854_s13 }
  0x7d   :  { %17031 = sst [smem:[#allocation193_spill]] %s14859_s5 }
  0x7e   :  { %s14874_s13 = sld [smem:[%s16915_s0 + %s14424_s15]]   ;;  %s14428_s15 = smov 73  }
  0x7f   :  { %17032 = sst [smem:[#allocation194_spill]] %s14864_s21 }
  0x80   :  { %17033 = sst [smem:[#allocation195_spill]] %s14869_s11 }
  0x81   :  { %s14879_s5 = sld [smem:[%s16915_s0 + %s14425_s29]]   ;;  %s14429_s29 = smov 75  }
  0x82   :  { %s14884_s21 = sld [smem:[%s16915_s0 + %s14426_s27]]   ;;  %s14430_s27 = smov 76  }
  0x83   :  { %s14889_s11 = sld [smem:[%s16915_s0 + %s14427_s4]]   ;;  %s14431_s4 = smov 77  }
  0x84   :  { %17034 = sst [smem:[#allocation196_spill]] %s14874_s13 }
  0x85   :  { %s14894_s13 = sld [smem:[%s16915_s0 + %s14428_s15]]   ;;  %s14432_s15 = smov 78  }
  0x87   :  { %17035 = sst [smem:[#allocation197_spill]] %s14879_s5 }
  0x88   :  { %17036 = sst [smem:[#allocation198_spill]] %s14884_s21 }
  0x89   :  { %17037 = sst [smem:[#allocation199_spill]] %s14889_s11 }
  0x8a   :  { %s14899_s5 = sld [smem:[%s16915_s0 + %s14429_s29]]   ;;  %s14433_s29 = smov 79  }
  0x8b   :  { %17038 = sst [smem:[#allocation200_spill]] %s14894_s13 }
  0x8c   :  { %s14904_s21 = sld [smem:[%s16915_s0 + %s14430_s27]]   ;;  %s14434_s27 = smov 80  }
  0x8d   :  { %s14909_s11 = sld [smem:[%s16915_s0 + %s14431_s4]]   ;;  %s14435_s4 = smov 81  }
  0x8e   :  { %s14914_s13 = sld [smem:[%s16915_s0 + %s14432_s15]]   ;;  %s14436_s15 = smov 82  }
  0x90   :  { %17039 = sst [smem:[#allocation201_spill]] %s14899_s5 }
  0x91   :  { %s14919_s5 = sld [smem:[%s16915_s0 + %s14433_s29]]   ;;  %s14437_s29 = smov 83  }
  0x92   :  { %17040 = sst [smem:[#allocation202_spill]] %s14904_s21 }
  0x93   :  { %17041 = sst [smem:[#allocation203_spill]] %s14909_s11 }
  0x94   :  { %17042 = sst [smem:[#allocation204_spill]] %s14914_s13 }
  0x95   :  { %s14924_s21 = sld [smem:[%s16915_s0 + %s14434_s27]]   ;;  %s14438_s27 = smov 84  }
  0x96   :  { %s14929_s11 = sld [smem:[%s16915_s0 + %s14435_s4]]   ;;  %s14439_s4 = smov 85  }
  0x97   :  { %17043 = sst [smem:[#allocation205_spill]] %s14919_s5 }
  0x98   :  { %s14934_s13 = sld [smem:[%s16915_s0 + %s14436_s15]]   ;;  %s14440_s15 = smov 86  }
  0x99   :  { %s14939_s5 = sld [smem:[%s16915_s0 + %s14437_s29]]   ;;  %s14441_s29 = smov 87  }
  0x9b   :  { %17044 = sst [smem:[#allocation206_spill]] %s14924_s21 }
  0x9c   :  { %17045 = sst [smem:[#allocation207_spill]] %s14929_s11 }
  0x9d   :  { %s14944_s21 = sld [smem:[%s16915_s0 + %s14438_s27]]   ;;  %s14442_s27 = smov 88  }
  0x9e   :  { %17046 = sst [smem:[#allocation208_spill]] %s14934_s13 }
  0x9f   :  { %17047 = sst [smem:[#allocation209_spill]] %s14939_s5 }
  0xa0   :  { %s14949_s11 = sld [smem:[%s16915_s0 + %s14439_s4]]   ;;  %s14443_s4 = smov 89  }
  0xa1   :  { %s14954_s13 = sld [smem:[%s16915_s0 + %s14440_s15]]   ;;  %s14444_s15 = smov 12  }
  0xa2   :  { %s14959_s5 = sld [smem:[%s16915_s0 + %s14441_s29]]  }
  0xa3   :  { %17048 = sst [smem:[#allocation210_spill]] %s14944_s21 }
  0xa4   :  { %s14964_s21 = sld [smem:[%s16915_s0 + %s14442_s27]]  }
  0xa6   :  { %17049 = sst [smem:[#allocation211_spill]] %s14949_s11 }
  0xa7   :  { %17050 = sst [smem:[#allocation212_spill]] %s14954_s13 }
  0xa8   :  { %17051 = sst [smem:[#allocation213_spill]] %s14959_s5 }
  0xa9   :  { %s14969_s11 = sld [smem:[%s16915_s0 + %s14443_s4]]  }
  0xaa   :  { %s9349_s13 = sld [smem:[%s16915_s0 + %s14444_s15]]  }
  0xab   :  { %s9405_s5 = sld [smem:[%s16915_s0 + %s14445_s22]]  }
  0xb0   :  { %v187_v1 = vstv %s9349_s13 }
  0xb1   :  { %188 = vst [vmem:[#allocation3] sm:$0x1] %v187_v1  ;;  %v189_v2 = vstv %s9405_s5 }
  0xb2   :  { %190 = vst [vmem:[#allocation4] sm:$0x1] %v189_v2 }
  0xb3   :  { %193 = vsyncpa [#allocation7], 0 }
  0xb4   :  { %194 = vsyncpa [#allocation10], 0 }
  0xb5   :  { %195 = vsyncpa [#allocation13], 0 }
  0xb6   :  { %196 = vsyncpa [#allocation16], 0 }
  0xb7   :  { %197 = vsyncpa [#allocation19], 0 }
  0xb8   :  { %198 = vsyncpa [#allocation22], 0 }
  0xb9   :  { %199 = vsyncpa [#allocation25], 0 }
  0xba   :  { %200 = vsyncpa [#allocation28], 0 }
  0xbb   :  { %201 = vsyncpa [#allocation31], 0 }
  0xbc   :  { %202 = vsyncpa [#allocation34], 0 }
  0xbd   :  { %203 = vsyncpa [#allocation37], 0 }
  0xbe   :  { %204 = vsyncpa [#allocation40], 0 }
  0xbf   :  { %205 = vsyncpa [#allocation43], 0 }
  0xc0   :  { %206 = vsyncpa [#allocation46], 0 }
  0xc1   :  { %207 = vsyncpa [#allocation49], 0 }
  0xc2   :  { %208 = vsyncpa [#allocation52], 0 }
  0xc3   :  { %209 = vsyncpa [#allocation55], 0 }
  0xc4   :  { %210 = vsyncpa [#allocation58], 0 }
  0xc5   :  { %211 = vsyncpa [#allocation61], 0 }
  0xc6   :  { %212 = vsyncpa [#allocation64], 0 }
  0xc7   :  { %213 = vsyncpa [#allocation67], 0 }
  0xc8   :  { %214 = vsyncpa [#allocation70], 0 }
  0xc9   :  { %215 = vsyncpa [#allocation73], 0 }
  0xca   :  { %216 = vsyncpa [#allocation76], 0 }
  0xcb   :  { %217 = vsyncpa [#allocation79], 0 }
  0xcc   :  { %218 = vsyncpa [#allocation82], 0 }
  0xcd   :  { %219 = vsyncpa [#allocation85], 0 }
  0xce   :  { %220 = vsyncpa [#allocation88], 0 }
  0xcf   :  { %221 = vsyncpa [#allocation91], 0 }
  0xd0   :  { %222 = vsyncpa [#allocation94], 0 }
  0xd1   :  { %223 = vsyncpa [#allocation97], 0 }
  0xd2   :  { %224 = vsyncpa [#allocation100], 0 }
  0xd3   :  { %225 = vsyncpa [#allocation103], 0 }
  0xd4   :  { %226 = vsyncpa [#allocation8], 0 }
  0xd5   :  { %227 = vsyncpa [#allocation107], 0  ;;  %s14447_s0 = smov [#allocation9]   ;;  %s14448_s13 = smov [#allocation12]  }
  0xd6   :  { %s249_s5 = sshll.u32 %s14447_s0, 4  ;;  %s272_s3 = sshll.u32 %s14448_s13, 4  ;;  %s250_s5 = int_to_ptr.vmem [resolvable:$true] %s249_s5  ;;  %s273_s3 = int_to_ptr.vmem [resolvable:$true] %s272_s3 }
  0xd7   :  { %s12814_s4 = scalar_lea.hbm %s14556_s17, 16384 }
  0xd8   :  { %p12815_p0 = scmp.ne.s32.totalorder %s14556_s17, %s12814_s4  ;;  %p12818_p1 = scmp.lt.u32.totalorder %s12814_s4, %s14556_s17 }
  0xda   :  { %p12820_p2 = pnand %p12818_p1, %p12815_p0 }
  0xdc   :  { %12823 = shalt.err (!%p12820_p2)
}
  0xdd   :  { %s12824_s7 = scalar_lea.vmem %s250_s5, 16384  ;;  %p12829_p4 = scmp.lt.s32.totalorder %s250_s5, %s250_s5 }
  0xde   :  { %p12825_p3 = scmp.ne.s32.totalorder %s250_s5, %s12824_s7  ;;  %p12830_p5 = scmp.lt.s32.totalorder %s12824_s7, %s12824_s7 }
  0xe0   :  { %p12831_p6 = por %p12830_p5, %p12829_p4 }
  0xe2   :  { %p12832_p7 = pnand %p12831_p6, %p12825_p3 }
  0xe4   :  { %12835 = shalt.err (!%p12832_p7)
}
  0xe5   :  { %s14449_s10 = smov 128   ;;  %s14450_s15 = smov 8  }
  0xe6   :  { %255 = dma.hbm_to_vmem [thread:$0]  %s14556_s17, 16384, %s250_s5, [#allocation10], %s14449_s10, %s14449_s10, %s14450_s15  }
  0xe7   :  { %s12836_s16 = scalar_lea.hbm %s14566_s25, 128 }
  0xe8   :  { %p12837_p8 = scmp.ne.s32.totalorder %s14566_s25, %s12836_s16  ;;  %p12840_p9 = scmp.lt.u32.totalorder %s12836_s16, %s14566_s25 }
  0xea   :  { %p12842_p10 = pnand %p12840_p9, %p12837_p8 }
  0xec   :  { %12845 = shalt.err (!%p12842_p10)
}
  0xed   :  { %s12846_s18 = scalar_lea.vmem %s273_s3, 128  ;;  %p12851_p12 = scmp.lt.s32.totalorder %s273_s3, %s273_s3 }
  0xee   :  { %p12847_p11 = scmp.ne.s32.totalorder %s273_s3, %s12846_s18  ;;  %p12852_p13 = scmp.lt.s32.totalorder %s12846_s18, %s12846_s18 }
  0xf0   :  { %p12853_p0 = por %p12852_p13, %p12851_p12 }
  0xf2   :  { %p12854_p1 = pnand %p12853_p0, %p12847_p11 }
  0xf4   :  { %12857 = shalt.err (!%p12854_p1)
}
  0xf5   :  { %275 = dma.hbm_to_vmem [thread:$0]  %s14566_s25, 128, %s273_s3, [#allocation13]  }
  0xf6   :  { %s14451_s22 = smov [#allocation15]   ;;  %s14452_s17 = smov [#allocation18]  }
  0xf7   :  { %s294_s29 = sshll.u32 %s14451_s22, 4  ;;  %s314_s23 = sshll.u32 %s14452_s17, 4  ;;  %s295_s29 = int_to_ptr.vmem [resolvable:$true] %s294_s29  ;;  %s315_s23 = int_to_ptr.vmem [resolvable:$true] %s314_s23 }
  0xf8   :  { %s12858_s28 = scalar_lea.hbm %s14579_s8, 16 }
  0xf9   :  { %p12859_p2 = scmp.ne.s32.totalorder %s14579_s8, %s12858_s28  ;;  %p12862_p3 = scmp.lt.u32.totalorder %s12858_s28, %s14579_s8 }
  0xfb   :  { %p12864_p4 = pnand %p12862_p3, %p12859_p2 }
  0xfd   :  { %12867 = shalt.err (!%p12864_p4)
}
  0xfe   :  { %s12868_s27 = scalar_lea.vmem %s295_s29, 16  ;;  %s12872_s1 = scalar_lea.vmem %s295_s29, 32 }
  0xff   :  { %p12869_p5 = scmp.ne.s32.totalorder %s295_s29, %s12868_s27  ;;  %p12873_p6 = scmp.lt.s32.totalorder %s295_s29, %s295_s29 }
 0x100   :  { %p12874_p7 = scmp.lt.s32.totalorder %s12872_s1, %s12868_s27 }
 0x102   :  { %p12875_p8 = por %p12874_p7, %p12873_p6 }
 0x104   :  { %p12876_p9 = pnand %p12875_p8, %p12869_p5 }
 0x106   :  { %12879 = shalt.err (!%p12876_p9)
}
 0x107   :  { %297 = dma.hbm_to_vmem [thread:$0]  %s14579_s8, 16, %s295_s29, [#allocation16]  }
 0x108   :  { %s12880_s25 = scalar_lea.hbm %s14589_s19, 16 }
 0x109   :  { %p12881_p10 = scmp.ne.s32.totalorder %s14589_s19, %s12880_s25  ;;  %p12884_p11 = scmp.lt.u32.totalorder %s12880_s25, %s14589_s19 }
 0x10b   :  { %p12886_p12 = pnand %p12884_p11, %p12881_p10 }
 0x10d   :  { %12889 = shalt.err (!%p12886_p12)
}
 0x10e   :  { %s12890_s0 = scalar_lea.vmem %s315_s23, 16  ;;  %s12894_s5 = scalar_lea.vmem %s315_s23, 32 }
 0x10f   :  { %p12891_p13 = scmp.ne.s32.totalorder %s315_s23, %s12890_s0  ;;  %p12895_p0 = scmp.lt.s32.totalorder %s315_s23, %s315_s23 }
 0x110   :  { %p12896_p1 = scmp.lt.s32.totalorder %s12894_s5, %s12890_s0 }
 0x112   :  { %p12897_p2 = por %p12896_p1, %p12895_p0 }
 0x114   :  { %p12898_p3 = pnand %p12897_p2, %p12891_p13 }
 0x116   :  { %12901 = shalt.err (!%p12898_p3)
}
 0x117   :  { %317 = dma.hbm_to_vmem [thread:$0]  %s14589_s19, 16, %s315_s23, [#allocation19]  }
 0x118   :  { %s14453_s13 = smov [#allocation21]   ;;  %s12902_s3 = scalar_lea.hbm %s14599_s30, 2048 }
 0x119   :  { %s337_s8 = sshll.u32 %s14453_s13, 4  ;;  %p12903_p4 = scmp.ne.s32.totalorder %s14599_s30, %s12902_s3  ;;  %s338_s8 = int_to_ptr.vmem [resolvable:$true] %s337_s8 }
 0x11a   :  { %p12906_p5 = scmp.lt.u32.totalorder %s12902_s3, %s14599_s30 }
 0x11c   :  { %p12908_p6 = pnand %p12906_p5, %p12903_p4 }
 0x11e   :  { %12911 = shalt.err (!%p12908_p6)
}
 0x11f   :  { %s12912_s4 = scalar_lea.vmem %s338_s8, 2048  ;;  %p12917_p8 = scmp.lt.s32.totalorder %s338_s8, %s338_s8 }
 0x120   :  { %p12913_p7 = scmp.ne.s32.totalorder %s338_s8, %s12912_s4  ;;  %p12918_p9 = scmp.lt.s32.totalorder %s12912_s4, %s12912_s4 }
 0x122   :  { %p12919_p10 = por %p12918_p9, %p12917_p8 }
 0x124   :  { %p12920_p11 = pnand %p12919_p10, %p12913_p7 }
 0x126   :  { %12923 = shalt.err (!%p12920_p11)
}
 0x127   :  { %s14454_s7 = smov 256   ;;  %s14455_s19 = smov 16  }
 0x128   :  { %343 = dma.hbm_to_vmem [thread:$0]  %s14599_s30, 2048, %s338_s8, [#allocation22], %s14454_s7, %s14454_s7, %s14455_s19  }
 0x129   :  { %s14456_s16 = smov [#allocation24]   ;;  %s14457_s22 = smov [#allocation27]  }
 0x12a   :  { %s360_s18 = sshll.u32 %s14456_s16, 4  ;;  %s382_s29 = sshll.u32 %s14457_s22, 4  ;;  %s361_s18 = int_to_ptr.vmem [resolvable:$true] %s360_s18  ;;  %s383_s29 = int_to_ptr.vmem [resolvable:$true] %s382_s29 }
 0x12b   :  { %s12924_s17 = scalar_lea.hbm %s14609_s12, 16 }
 0x12c   :  { %p12925_p12 = scmp.ne.s32.totalorder %s14609_s12, %s12924_s17  ;;  %p12928_p13 = scmp.lt.u32.totalorder %s12924_s17, %s14609_s12 }
 0x12e   :  { %p12930_p0 = pnand %p12928_p13, %p12925_p12 }
 0x130   :  { %12933 = shalt.err (!%p12930_p0)
}
 0x131   :  { %s12934_s23 = scalar_lea.vmem %s361_s18, 16  ;;  %s12938_s28 = scalar_lea.vmem %s361_s18, 32 }
 0x132   :  { %p12935_p1 = scmp.ne.s32.totalorder %s361_s18, %s12934_s23  ;;  %p12939_p2 = scmp.lt.s32.totalorder %s361_s18, %s361_s18 }
 0x133   :  { %p12940_p3 = scmp.lt.s32.totalorder %s12938_s28, %s12934_s23 }
 0x135   :  { %p12941_p4 = por %p12940_p3, %p12939_p2 }
 0x137   :  { %p12942_p5 = pnand %p12941_p4, %p12935_p1 }
 0x139   :  { %12945 = shalt.err (!%p12942_p5)
}
 0x13a   :  { %363 = dma.hbm_to_vmem [thread:$0]  %s14609_s12, 16, %s361_s18, [#allocation25]  }
 0x13b   :  { %s12946_s30 = scalar_lea.hbm %s14619_s26, 32 }
 0x13c   :  { %p12947_p6 = scmp.ne.s32.totalorder %s14619_s26, %s12946_s30  ;;  %p12950_p7 = scmp.lt.u32.totalorder %s12946_s30, %s14619_s26 }
 0x13e   :  { %p12952_p8 = pnand %p12950_p7, %p12947_p6 }
 0x140   :  { %12955 = shalt.err (!%p12952_p8)
}
 0x141   :  { %s12956_s27 = scalar_lea.vmem %s383_s29, 32  ;;  %p12961_p10 = scmp.lt.s32.totalorder %s383_s29, %s383_s29 }
 0x142   :  { %p12957_p9 = scmp.ne.s32.totalorder %s383_s29, %s12956_s27  ;;  %p12962_p11 = scmp.lt.s32.totalorder %s12956_s27, %s12956_s27 }
 0x144   :  { %p12963_p12 = por %p12962_p11, %p12961_p10 }
 0x146   :  { %p12964_p13 = pnand %p12963_p12, %p12957_p9 }
 0x148   :  { %12967 = shalt.err (!%p12964_p13)
}
 0x149   :  { %385 = dma.hbm_to_vmem [thread:$0]  %s14619_s26, 32, %s383_s29, [#allocation28]  }
 0x14a   :  { %s14458_s1 = smov [#allocation30]   ;;  %s14459_s25 = smov [#allocation33]  }
 0x14b   :  { %s404_s12 = sshll.u32 %s14458_s1, 4  ;;  %s423_s0 = sshll.u32 %s14459_s25, 4  ;;  %s405_s12 = int_to_ptr.vmem [resolvable:$true] %s404_s12  ;;  %s424_s0 = int_to_ptr.vmem [resolvable:$true] %s423_s0 }
 0x14c   :  { %s12968_s5 = scalar_lea.hbm %s14634_s9, 32 }
 0x14d   :  { %p12969_p0 = scmp.ne.s32.totalorder %s14634_s9, %s12968_s5  ;;  %p12972_p1 = scmp.lt.u32.totalorder %s12968_s5, %s14634_s9 }
 0x14f   :  { %p12974_p2 = pnand %p12972_p1, %p12969_p0 }
 0x151   :  { %12977 = shalt.err (!%p12974_p2)
}
 0x152   :  { %s12978_s13 = scalar_lea.vmem %s405_s12, 32  ;;  %p12983_p4 = scmp.lt.s32.totalorder %s405_s12, %s405_s12 }
 0x153   :  { %p12979_p3 = scmp.ne.s32.totalorder %s405_s12, %s12978_s13  ;;  %p12984_p5 = scmp.lt.s32.totalorder %s12978_s13, %s12978_s13 }
 0x155   :  { %p12985_p6 = por %p12984_p5, %p12983_p4 }
 0x157   :  { %p12986_p7 = pnand %p12985_p6, %p12979_p3 }
 0x159   :  { %12989 = shalt.err (!%p12986_p7)
}
 0x15a   :  { %407 = dma.hbm_to_vmem [thread:$0]  %s14634_s9, 32, %s405_s12, [#allocation31]  }
 0x15b   :  { %s12990_s26 = scalar_lea.hbm %s14644_s2, 1024 }
 0x15c   :  { %p12991_p8 = scmp.ne.s32.totalorder %s14644_s2, %s12990_s26  ;;  %p12994_p9 = scmp.lt.u32.totalorder %s12990_s26, %s14644_s2 }
 0x15e   :  { %p12996_p10 = pnand %p12994_p9, %p12991_p8 }
 0x160   :  { %12999 = shalt.err (!%p12996_p10)
}
 0x161   :  { %s13000_s8 = scalar_lea.vmem %s424_s0, 1024  ;;  %p13005_p12 = scmp.lt.s32.totalorder %s424_s0, %s424_s0 }
 0x162   :  { %p13001_p11 = scmp.ne.s32.totalorder %s424_s0, %s13000_s8  ;;  %p13006_p13 = scmp.lt.s32.totalorder %s13000_s8, %s13000_s8 }
 0x164   :  { %p13007_p0 = por %p13006_p13, %p13005_p12 }
 0x166   :  { %p13008_p1 = pnand %p13007_p0, %p13001_p11 }
 0x168   :  { %13011 = shalt.err (!%p13008_p1)
}
 0x169   :  { %429 = dma.hbm_to_vmem [thread:$0]  %s14644_s2, 1024, %s424_s0, [#allocation34], %s14449_s10, %s14449_s10, %s14450_s15  }
 0x16a   :  { %s14460_s9 = smov [#allocation36]   ;;  %s14461_s4 = smov [#allocation39]  }
 0x16b   :  { %s445_s3 = sshll.u32 %s14460_s9, 4  ;;  %s467_s16 = sshll.u32 %s14461_s4, 4  ;;  %s446_s3 = int_to_ptr.vmem [resolvable:$true] %s445_s3  ;;  %s468_s16 = int_to_ptr.vmem [resolvable:$true] %s467_s16 }
 0x16c   :  { %s13012_s18 = scalar_lea.hbm %s14654_s20, 1024 }
 0x16d   :  { %p13013_p2 = scmp.ne.s32.totalorder %s14654_s20, %s13012_s18  ;;  %p13016_p3 = scmp.lt.u32.totalorder %s13012_s18, %s14654_s20 }
 0x16f   :  { %p13018_p4 = pnand %p13016_p3, %p13013_p2 }
 0x171   :  { %13021 = shalt.err (!%p13018_p4)
}
 0x172   :  { %s13022_s22 = scalar_lea.vmem %s446_s3, 1024  ;;  %p13027_p6 = scmp.lt.s32.totalorder %s446_s3, %s446_s3 }
 0x173   :  { %p13023_p5 = scmp.ne.s32.totalorder %s446_s3, %s13022_s22  ;;  %p13028_p7 = scmp.lt.s32.totalorder %s13022_s22, %s13022_s22 }
 0x175   :  { %p13029_p8 = por %p13028_p7, %p13027_p6 }
 0x177   :  { %p13030_p9 = pnand %p13029_p8, %p13023_p5 }
 0x179   :  { %13033 = shalt.err (!%p13030_p9)
}
 0x17a   :  { %451 = dma.hbm_to_vmem [thread:$0]  %s14654_s20, 1024, %s446_s3, [#allocation37], %s14449_s10, %s14449_s10, %s14450_s15  }
 0x17b   :  { %s13034_s2 = scalar_lea.hbm %s14664_s6, 1024 }
 0x17c   :  { %p13035_p10 = scmp.ne.s32.totalorder %s14664_s6, %s13034_s2  ;;  %p13038_p11 = scmp.lt.u32.totalorder %s13034_s2, %s14664_s6 }
 0x17e   :  { %p13040_p12 = pnand %p13038_p11, %p13035_p10 }
 0x180   :  { %13043 = shalt.err (!%p13040_p12)
}
 0x181   :  { %s13044_s29 = scalar_lea.vmem %s468_s16, 1024  ;;  %p13049_p0 = scmp.lt.s32.totalorder %s468_s16, %s468_s16 }
 0x182   :  { %p13045_p13 = scmp.ne.s32.totalorder %s468_s16, %s13044_s29  ;;  %p13050_p1 = scmp.lt.s32.totalorder %s13044_s29, %s13044_s29 }
 0x184   :  { %p13051_p2 = por %p13050_p1, %p13049_p0 }
 0x186   :  { %p13052_p3 = pnand %p13051_p2, %p13045_p13 }
 0x188   :  { %13055 = shalt.err (!%p13052_p3)
}
 0x189   :  { %473 = dma.hbm_to_vmem [thread:$0]  %s14664_s6, 1024, %s468_s16, [#allocation40], %s14449_s10, %s14449_s10, %s14450_s15  }
 0x18a   :  { %s14462_s20 = smov [#allocation42]   ;;  %s14463_s23 = smov [#allocation45]  }
 0x18b   :  { %s489_s17 = sshll.u32 %s14462_s20, 4  ;;  %s511_s28 = sshll.u32 %s14463_s23, 4  ;;  %s490_s17 = int_to_ptr.vmem [resolvable:$true] %s489_s17  ;;  %s512_s28 = int_to_ptr.vmem [resolvable:$true] %s511_s28 }
 0x18c   :  { %s13056_s30 = scalar_lea.hbm %s14674_s24, 1024 }
 0x18d   :  { %p13057_p4 = scmp.ne.s32.totalorder %s14674_s24, %s13056_s30  ;;  %p13060_p5 = scmp.lt.u32.totalorder %s13056_s30, %s14674_s24 }
 0x18f   :  { %p13062_p6 = pnand %p13060_p5, %p13057_p4 }
 0x191   :  { %13065 = shalt.err (!%p13062_p6)
}
 0x192   :  { %s13066_s27 = scalar_lea.vmem %s490_s17, 1024  ;;  %p13071_p8 = scmp.lt.s32.totalorder %s490_s17, %s490_s17 }
 0x193   :  { %p13067_p7 = scmp.ne.s32.totalorder %s490_s17, %s13066_s27  ;;  %p13072_p9 = scmp.lt.s32.totalorder %s13066_s27, %s13066_s27 }
 0x195   :  { %p13073_p10 = por %p13072_p9, %p13071_p8 }
 0x197   :  { %p13074_p11 = pnand %p13073_p10, %p13067_p7 }
 0x199   :  { %13077 = shalt.err (!%p13074_p11)
}
 0x19a   :  { %495 = dma.hbm_to_vmem [thread:$0]  %s14674_s24, 1024, %s490_s17, [#allocation43], %s14449_s10, %s14449_s10, %s14450_s15  }
 0x19b   :  { %s13078_s6 = scalar_lea.hbm %s14684_s14, 1024 }
 0x19c   :  { %p13079_p12 = scmp.ne.s32.totalorder %s14684_s14, %s13078_s6  ;;  %p13082_p13 = scmp.lt.u32.totalorder %s13078_s6, %s14684_s14 }
 0x19e   :  { %p13084_p0 = pnand %p13082_p13, %p13079_p12 }
 0x1a0   :  { %13087 = shalt.err (!%p13084_p0)
}
 0x1a1   :  { %s13088_s1 = scalar_lea.vmem %s512_s28, 1024  ;;  %p13093_p2 = scmp.lt.s32.totalorder %s512_s28, %s512_s28 }
 0x1a2   :  { %p13089_p1 = scmp.ne.s32.totalorder %s512_s28, %s13088_s1  ;;  %p13094_p3 = scmp.lt.s32.totalorder %s13088_s1, %s13088_s1 }
 0x1a4   :  { %p13095_p4 = por %p13094_p3, %p13093_p2 }
 0x1a6   :  { %p13096_p5 = pnand %p13095_p4, %p13089_p1 }
 0x1a8   :  { %13099 = shalt.err (!%p13096_p5)
}
 0x1a9   :  { %s17052_s12 = sld [smem:[#allocation160_spill]]  ;;  %s14464_s24 = smov [#allocation48]  }
 0x1aa   :  { %517 = dma.hbm_to_vmem [thread:$0]  %s14684_s14, 1024, %s512_s28, [#allocation46], %s14449_s10, %s14449_s10, %s14450_s15  }
 0x1ab   :  { %s533_s25 = sshll.u32 %s14464_s24, 4  ;;  %s14465_s0 = smov [#allocation51]   ;;  %s534_s25 = int_to_ptr.vmem [resolvable:$true] %s533_s25 }
 0x1ac   :  { %s555_s5 = sshll.u32 %s14465_s0, 4  ;;  %s556_s5 = int_to_ptr.vmem [resolvable:$true] %s555_s5 }
 0x1af   :  { %s13100_s13 = scalar_lea.hbm %s17052_s12, 1024 }
 0x1b0   :  { %p13101_p6 = scmp.ne.s32.totalorder %s17052_s12, %s13100_s13  ;;  %p13104_p7 = scmp.lt.u32.totalorder %s13100_s13, %s17052_s12 }
 0x1b2   :  { %p13106_p8 = pnand %p13104_p7, %p13101_p6 }
 0x1b4   :  { %13109 = shalt.err (!%p13106_p8)
}
 0x1b5   :  { %s13110_s26 = scalar_lea.vmem %s534_s25, 1024  ;;  %p13115_p10 = scmp.lt.s32.totalorder %s534_s25, %s534_s25 }
 0x1b6   :  { %p13111_p9 = scmp.ne.s32.totalorder %s534_s25, %s13110_s26  ;;  %p13116_p11 = scmp.lt.s32.totalorder %s13110_s26, %s13110_s26 }
 0x1b8   :  { %p13117_p12 = por %p13116_p11, %p13115_p10 }
 0x1ba   :  { %p13118_p13 = pnand %p13117_p12, %p13111_p9 }
 0x1bc   :  { %13121 = shalt.err (!%p13118_p13)
}
 0x1bd   :  { %s17053_s14 = sld [smem:[#allocation162_spill]] }
 0x1be   :  { %539 = dma.hbm_to_vmem [thread:$0]  %s17052_s12, 1024, %s534_s25, [#allocation49], %s14449_s10, %s14449_s10, %s14450_s15  }
 0x1c3   :  { %s13122_s8 = scalar_lea.hbm %s17053_s14, 1024 }
 0x1c4   :  { %p13123_p0 = scmp.ne.s32.totalorder %s17053_s14, %s13122_s8  ;;  %p13126_p1 = scmp.lt.u32.totalorder %s13122_s8, %s17053_s14 }
 0x1c6   :  { %p13128_p2 = pnand %p13126_p1, %p13123_p0 }
 0x1c8   :  { %13131 = shalt.err (!%p13128_p2)
}
 0x1c9   :  { %s13132_s9 = scalar_lea.vmem %s556_s5, 1024  ;;  %p13137_p4 = scmp.lt.s32.totalorder %s556_s5, %s556_s5 }
 0x1ca   :  { %p13133_p3 = scmp.ne.s32.totalorder %s556_s5, %s13132_s9  ;;  %p13138_p5 = scmp.lt.s32.totalorder %s13132_s9, %s13132_s9 }
 0x1cc   :  { %p13139_p6 = por %p13138_p5, %p13137_p4 }
 0x1ce   :  { %p13140_p7 = pnand %p13139_p6, %p13133_p3 }
 0x1d0   :  { %13143 = shalt.err (!%p13140_p7)
}
 0x1d1   :  { %s17054_s3 = sld [smem:[#allocation164_spill]]  ;;  %s14466_s4 = smov [#allocation54]  }
 0x1d2   :  { %561 = dma.hbm_to_vmem [thread:$0]  %s17053_s14, 1024, %s556_s5, [#allocation52], %s14449_s10, %s14449_s10, %s14450_s15  }
 0x1d3   :  { %s577_s16 = sshll.u32 %s14466_s4, 4  ;;  %s14467_s18 = smov [#allocation57]   ;;  %s578_s16 = int_to_ptr.vmem [resolvable:$true] %s577_s16 }
 0x1d4   :  { %s599_s22 = sshll.u32 %s14467_s18, 4  ;;  %s600_s22 = int_to_ptr.vmem [resolvable:$true] %s599_s22 }
 0x1d7   :  { %s13144_s2 = scalar_lea.hbm %s17054_s3, 1024 }
 0x1d8   :  { %p13145_p8 = scmp.ne.s32.totalorder %s17054_s3, %s13144_s2  ;;  %p13148_p9 = scmp.lt.u32.totalorder %s13144_s2, %s17054_s3 }
 0x1da   :  { %p13150_p10 = pnand %p13148_p9, %p13145_p8 }
 0x1dc   :  { %13153 = shalt.err (!%p13150_p10)
}
 0x1dd   :  { %s13154_s29 = scalar_lea.vmem %s578_s16, 1024  ;;  %p13159_p12 = scmp.lt.s32.totalorder %s578_s16, %s578_s16 }
 0x1de   :  { %p13155_p11 = scmp.ne.s32.totalorder %s578_s16, %s13154_s29  ;;  %p13160_p13 = scmp.lt.s32.totalorder %s13154_s29, %s13154_s29 }
 0x1e0   :  { %p13161_p0 = por %p13160_p13, %p13159_p12 }
 0x1e2   :  { %p13162_p1 = pnand %p13161_p0, %p13155_p11 }
 0x1e4   :  { %13165 = shalt.err (!%p13162_p1)
}
 0x1e5   :  { %s17055_s20 = sld [smem:[#allocation166_spill]] }
 0x1e6   :  { %583 = dma.hbm_to_vmem [thread:$0]  %s17054_s3, 1024, %s578_s16, [#allocation55], %s14449_s10, %s14449_s10, %s14450_s15  }
 0x1eb   :  { %s13166_s17 = scalar_lea.hbm %s17055_s20, 1024 }
 0x1ec   :  { %p13167_p2 = scmp.ne.s32.totalorder %s17055_s20, %s13166_s17  ;;  %p13170_p3 = scmp.lt.u32.totalorder %s13166_s17, %s17055_s20 }
 0x1ee   :  { %p13172_p4 = pnand %p13170_p3, %p13167_p2 }
 0x1f0   :  { %13175 = shalt.err (!%p13172_p4)
}
 0x1f1   :  { %s13176_s23 = scalar_lea.vmem %s600_s22, 1024  ;;  %p13181_p6 = scmp.lt.s32.totalorder %s600_s22, %s600_s22 }
 0x1f2   :  { %p13177_p5 = scmp.ne.s32.totalorder %s600_s22, %s13176_s23  ;;  %p13182_p7 = scmp.lt.s32.totalorder %s13176_s23, %s13176_s23 }
 0x1f4   :  { %p13183_p8 = por %p13182_p7, %p13181_p6 }
 0x1f6   :  { %p13184_p9 = pnand %p13183_p8, %p13177_p5 }
 0x1f8   :  { %13187 = shalt.err (!%p13184_p9)
}
 0x1f9   :  { %s17056_s28 = sld [smem:[#allocation168_spill]]  ;;  %s14468_s30 = smov [#allocation60]  }
 0x1fa   :  { %605 = dma.hbm_to_vmem [thread:$0]  %s17055_s20, 1024, %s600_s22, [#allocation58], %s14449_s10, %s14449_s10, %s14450_s15  }
 0x1fb   :  { %s621_s27 = sshll.u32 %s14468_s30, 4  ;;  %s14469_s6 = smov [#allocation63]   ;;  %s622_s27 = int_to_ptr.vmem [resolvable:$true] %s621_s27 }
 0x1fc   :  { %s643_s1 = sshll.u32 %s14469_s6, 4  ;;  %s644_s1 = int_to_ptr.vmem [resolvable:$true] %s643_s1 }
 0x1ff   :  { %s13188_s12 = scalar_lea.hbm %s17056_s28, 1024 }
 0x200   :  { %p13189_p10 = scmp.ne.s32.totalorder %s17056_s28, %s13188_s12  ;;  %p13192_p11 = scmp.lt.u32.totalorder %s13188_s12, %s17056_s28 }
 0x202   :  { %p13194_p12 = pnand %p13192_p11, %p13189_p10 }
 0x204   :  { %13197 = shalt.err (!%p13194_p12)
}
 0x205   :  { %s13198_s24 = scalar_lea.vmem %s622_s27, 1024  ;;  %p13203_p0 = scmp.lt.s32.totalorder %s622_s27, %s622_s27 }
 0x206   :  { %p13199_p13 = scmp.ne.s32.totalorder %s622_s27, %s13198_s24  ;;  %p13204_p1 = scmp.lt.s32.totalorder %s13198_s24, %s13198_s24 }
 0x208   :  { %p13205_p2 = por %p13204_p1, %p13203_p0 }
 0x20a   :  { %p13206_p3 = pnand %p13205_p2, %p13199_p13 }
 0x20c   :  { %13209 = shalt.err (!%p13206_p3)
}
 0x20d   :  { %s17057_s25 = sld [smem:[#allocation170_spill]] }
 0x20e   :  { %627 = dma.hbm_to_vmem [thread:$0]  %s17056_s28, 1024, %s622_s27, [#allocation61], %s14449_s10, %s14449_s10, %s14450_s15  }
 0x213   :  { %s13210_s0 = scalar_lea.hbm %s17057_s25, 512 }
 0x214   :  { %p13211_p4 = scmp.ne.s32.totalorder %s17057_s25, %s13210_s0  ;;  %p13214_p5 = scmp.lt.u32.totalorder %s13210_s0, %s17057_s25 }
 0x216   :  { %p13216_p6 = pnand %p13214_p5, %p13211_p4 }
 0x218   :  { %13219 = shalt.err (!%p13216_p6)
}
 0x219   :  { %s13220_s5 = scalar_lea.vmem %s644_s1, 512  ;;  %p13225_p8 = scmp.lt.s32.totalorder %s644_s1, %s644_s1 }
 0x21a   :  { %p13221_p7 = scmp.ne.s32.totalorder %s644_s1, %s13220_s5  ;;  %p13226_p9 = scmp.lt.s32.totalorder %s13220_s5, %s13220_s5 }
 0x21c   :  { %p13227_p10 = por %p13226_p9, %p13225_p8 }
 0x21e   :  { %p13228_p11 = pnand %p13227_p10, %p13221_p7 }
 0x220   :  { %13231 = shalt.err (!%p13228_p11)
}
 0x221   :  { %s17058_s13 = sld [smem:[#allocation172_spill]]  ;;  %s14470_s26 = smov [#allocation66]  }
 0x222   :  { %649 = dma.hbm_to_vmem [thread:$0]  %s17057_s25, 512, %s644_s1, [#allocation64], %s14449_s10, %s14449_s10, %s14450_s15  }
 0x223   :  { %s665_s14 = sshll.u32 %s14470_s26, 4  ;;  %s14471_s8 = smov [#allocation69]   ;;  %s666_s14 = int_to_ptr.vmem [resolvable:$true] %s665_s14 }
 0x224   :  { %s687_s9 = sshll.u32 %s14471_s8, 4  ;;  %s688_s9 = int_to_ptr.vmem [resolvable:$true] %s687_s9 }
 0x227   :  { %s13232_s3 = scalar_lea.hbm %s17058_s13, 1024 }
 0x228   :  { %p13233_p12 = scmp.ne.s32.totalorder %s17058_s13, %s13232_s3  ;;  %p13236_p13 = scmp.lt.u32.totalorder %s13232_s3, %s17058_s13 }
 0x22a   :  { %p13238_p0 = pnand %p13236_p13, %p13233_p12 }
 0x22c   :  { %13241 = shalt.err (!%p13238_p0)
}
 0x22d   :  { %s13242_s4 = scalar_lea.vmem %s666_s14, 1024  ;;  %p13247_p2 = scmp.lt.s32.totalorder %s666_s14, %s666_s14 }
 0x22e   :  { %p13243_p1 = scmp.ne.s32.totalorder %s666_s14, %s13242_s4  ;;  %p13248_p3 = scmp.lt.s32.totalorder %s13242_s4, %s13242_s4 }
 0x230   :  { %p13249_p4 = por %p13248_p3, %p13247_p2 }
 0x232   :  { %p13250_p5 = pnand %p13249_p4, %p13243_p1 }
 0x234   :  { %13253 = shalt.err (!%p13250_p5)
}
 0x235   :  { %s17059_s16 = sld [smem:[#allocation174_spill]] }
 0x236   :  { %671 = dma.hbm_to_vmem [thread:$0]  %s17058_s13, 1024, %s666_s14, [#allocation67], %s14449_s10, %s14449_s10, %s14450_s15  }
 0x23b   :  { %s13254_s18 = scalar_lea.hbm %s17059_s16, 512 }
 0x23c   :  { %p13255_p6 = scmp.ne.s32.totalorder %s17059_s16, %s13254_s18  ;;  %p13258_p7 = scmp.lt.u32.totalorder %s13254_s18, %s17059_s16 }
 0x23e   :  { %p13260_p8 = pnand %p13258_p7, %p13255_p6 }
 0x240   :  { %13263 = shalt.err (!%p13260_p8)
}
 0x241   :  { %s13264_s22 = scalar_lea.vmem %s688_s9, 512  ;;  %p13269_p10 = scmp.lt.s32.totalorder %s688_s9, %s688_s9 }
 0x242   :  { %p13265_p9 = scmp.ne.s32.totalorder %s688_s9, %s13264_s22  ;;  %p13270_p11 = scmp.lt.s32.totalorder %s13264_s22, %s13264_s22 }
 0x244   :  { %p13271_p12 = por %p13270_p11, %p13269_p10 }
 0x246   :  { %p13272_p13 = pnand %p13271_p12, %p13265_p9 }
 0x248   :  { %13275 = shalt.err (!%p13272_p13)
}
 0x249   :  { %s17060_s2 = sld [smem:[#allocation177_spill]]  ;;  %s14472_s29 = smov [#allocation72]  }
 0x24a   :  { %693 = dma.hbm_to_vmem [thread:$0]  %s17059_s16, 512, %s688_s9, [#allocation70], %s14449_s10, %s14449_s10, %s14450_s15  }
 0x24b   :  { %s712_s20 = sshll.u32 %s14472_s29, 4  ;;  %s14473_s17 = smov [#allocation75]   ;;  %s713_s20 = int_to_ptr.vmem [resolvable:$true] %s712_s20 }
 0x24c   :  { %s734_s23 = sshll.u32 %s14473_s17, 4  ;;  %s735_s23 = int_to_ptr.vmem [resolvable:$true] %s734_s23 }
 0x24f   :  { %s13276_s28 = scalar_lea.hbm %s17060_s2, 16 }
 0x250   :  { %p13277_p0 = scmp.ne.s32.totalorder %s17060_s2, %s13276_s28  ;;  %p13280_p1 = scmp.lt.u32.totalorder %s13276_s28, %s17060_s2 }
 0x252   :  { %p13282_p2 = pnand %p13280_p1, %p13277_p0 }
 0x254   :  { %13285 = shalt.err (!%p13282_p2)
}
 0x255   :  { %s13286_s30 = scalar_lea.vmem %s713_s20, 16  ;;  %s13290_s27 = scalar_lea.vmem %s713_s20, 32 }
 0x256   :  { %p13287_p3 = scmp.ne.s32.totalorder %s713_s20, %s13286_s30  ;;  %p13291_p4 = scmp.lt.s32.totalorder %s713_s20, %s713_s20 }
 0x257   :  { %p13292_p5 = scmp.lt.s32.totalorder %s13290_s27, %s13286_s30 }
 0x259   :  { %p13293_p6 = por %p13292_p5, %p13291_p4 }
 0x25b   :  { %p13294_p7 = pnand %p13293_p6, %p13287_p3 }
 0x25d   :  { %13297 = shalt.err (!%p13294_p7)
}
 0x25e   :  { %s17061_s6 = sld [smem:[#allocation179_spill]] }
 0x25f   :  { %715 = dma.hbm_to_vmem [thread:$0]  %s17060_s2, 16, %s713_s20, [#allocation73]  }
 0x264   :  { %s13298_s1 = scalar_lea.hbm %s17061_s6, 16 }
 0x265   :  { %p13299_p8 = scmp.ne.s32.totalorder %s17061_s6, %s13298_s1  ;;  %p13302_p9 = scmp.lt.u32.totalorder %s13298_s1, %s17061_s6 }
 0x267   :  { %p13304_p10 = pnand %p13302_p9, %p13299_p8 }
 0x269   :  { %13307 = shalt.err (!%p13304_p10)
}
 0x26a   :  { %s13308_s12 = scalar_lea.vmem %s735_s23, 16  ;;  %s13312_s24 = scalar_lea.vmem %s735_s23, 32 }
 0x26b   :  { %p13309_p11 = scmp.ne.s32.totalorder %s735_s23, %s13308_s12  ;;  %p13313_p12 = scmp.lt.s32.totalorder %s735_s23, %s735_s23 }
 0x26c   :  { %p13314_p13 = scmp.lt.s32.totalorder %s13312_s24, %s13308_s12 }
 0x26e   :  { %p13315_p0 = por %p13314_p13, %p13313_p12 }
 0x270   :  { %p13316_p1 = pnand %p13315_p0, %p13309_p11 }
 0x272   :  { %13319 = shalt.err (!%p13316_p1)
}
 0x273   :  { %s17062_s25 = sld [smem:[#allocation181_spill]]  ;;  %s14474_s0 = smov [#allocation78]  }
 0x274   :  { %737 = dma.hbm_to_vmem [thread:$0]  %s17061_s6, 16, %s735_s23, [#allocation76]  }
 0x275   :  { %s756_s5 = sshll.u32 %s14474_s0, 4  ;;  %s14475_s13 = smov [#allocation81]   ;;  %s757_s5 = int_to_ptr.vmem [resolvable:$true] %s756_s5 }
 0x276   :  { %s777_s26 = sshll.u32 %s14475_s13, 4  ;;  %s778_s26 = int_to_ptr.vmem [resolvable:$true] %s777_s26 }
 0x279   :  { %s13320_s14 = scalar_lea.hbm %s17062_s25, 16 }
 0x27a   :  { %p13321_p2 = scmp.ne.s32.totalorder %s17062_s25, %s13320_s14  ;;  %p13324_p3 = scmp.lt.u32.totalorder %s13320_s14, %s17062_s25 }
 0x27c   :  { %p13326_p4 = pnand %p13324_p3, %p13321_p2 }
 0x27e   :  { %13329 = shalt.err (!%p13326_p4)
}
 0x27f   :  { %s13330_s8 = scalar_lea.vmem %s757_s5, 16  ;;  %s13334_s9 = scalar_lea.vmem %s757_s5, 32 }
 0x280   :  { %p13331_p5 = scmp.ne.s32.totalorder %s757_s5, %s13330_s8  ;;  %p13335_p6 = scmp.lt.s32.totalorder %s757_s5, %s757_s5 }
 0x281   :  { %p13336_p7 = scmp.lt.s32.totalorder %s13334_s9, %s13330_s8 }
 0x283   :  { %p13337_p8 = por %p13336_p7, %p13335_p6 }
 0x285   :  { %p13338_p9 = pnand %p13337_p8, %p13331_p5 }
 0x287   :  { %13341 = shalt.err (!%p13338_p9)
}
 0x288   :  { %s17063_s3 = sld [smem:[#allocation184_spill]] }
 0x289   :  { %759 = dma.hbm_to_vmem [thread:$0]  %s17062_s25, 16, %s757_s5, [#allocation79]  }
 0x28e   :  { %s13342_s4 = scalar_lea.hbm %s17063_s3, 512 }
 0x28f   :  { %p13343_p10 = scmp.ne.s32.totalorder %s17063_s3, %s13342_s4  ;;  %p13346_p11 = scmp.lt.u32.totalorder %s13342_s4, %s17063_s3 }
 0x291   :  { %p13348_p12 = pnand %p13346_p11, %p13343_p10 }
 0x293   :  { %13351 = shalt.err (!%p13348_p12)
}
 0x294   :  { %s13352_s16 = scalar_lea.vmem %s778_s26, 512  ;;  %p13357_p0 = scmp.lt.s32.totalorder %s778_s26, %s778_s26 }
 0x295   :  { %p13353_p13 = scmp.ne.s32.totalorder %s778_s26, %s13352_s16  ;;  %p13358_p1 = scmp.lt.s32.totalorder %s13352_s16, %s13352_s16 }
 0x297   :  { %p13359_p2 = por %p13358_p1, %p13357_p0 }
 0x299   :  { %p13360_p3 = pnand %p13359_p2, %p13353_p13 }
 0x29b   :  { %13363 = shalt.err (!%p13360_p3)
}
 0x29c   :  { %s17064_s18 = sld [smem:[#allocation186_spill]]  ;;  %s14476_s22 = smov [#allocation84]  }
 0x29d   :  { %783 = dma.hbm_to_vmem [thread:$0]  %s17063_s3, 512, %s778_s26, [#allocation82], %s14449_s10, %s14449_s10, %s14450_s15  }
 0x29e   :  { %s799_s2 = sshll.u32 %s14476_s22, 4  ;;  %s14477_s29 = smov [#allocation87]   ;;  %s800_s2 = int_to_ptr.vmem [resolvable:$true] %s799_s2 }
 0x29f   :  { %s821_s20 = sshll.u32 %s14477_s29, 4  ;;  %s822_s20 = int_to_ptr.vmem [resolvable:$true] %s821_s20 }
 0x2a2   :  { %s13364_s17 = scalar_lea.hbm %s17064_s18, 512 }
 0x2a3   :  { %p13365_p4 = scmp.ne.s32.totalorder %s17064_s18, %s13364_s17  ;;  %p13368_p5 = scmp.lt.u32.totalorder %s13364_s17, %s17064_s18 }
 0x2a5   :  { %p13370_p6 = pnand %p13368_p5, %p13365_p4 }
 0x2a7   :  { %13373 = shalt.err (!%p13370_p6)
}
 0x2a8   :  { %s13374_s23 = scalar_lea.vmem %s800_s2, 512  ;;  %p13379_p8 = scmp.lt.s32.totalorder %s800_s2, %s800_s2 }
 0x2a9   :  { %p13375_p7 = scmp.ne.s32.totalorder %s800_s2, %s13374_s23  ;;  %p13380_p9 = scmp.lt.s32.totalorder %s13374_s23, %s13374_s23 }
 0x2ab   :  { %p13381_p10 = por %p13380_p9, %p13379_p8 }
 0x2ad   :  { %p13382_p11 = pnand %p13381_p10, %p13375_p7 }
 0x2af   :  { %13385 = shalt.err (!%p13382_p11)
}
 0x2b0   :  { %s17065_s28 = sld [smem:[#allocation188_spill]] }
 0x2b1   :  { %805 = dma.hbm_to_vmem [thread:$0]  %s17064_s18, 512, %s800_s2, [#allocation85], %s14449_s10, %s14449_s10, %s14450_s15  }
 0x2b6   :  { %s13386_s30 = scalar_lea.hbm %s17065_s28, 512 }
 0x2b7   :  { %p13387_p12 = scmp.ne.s32.totalorder %s17065_s28, %s13386_s30  ;;  %p13390_p13 = scmp.lt.u32.totalorder %s13386_s30, %s17065_s28 }
 0x2b9   :  { %p13392_p0 = pnand %p13390_p13, %p13387_p12 }
 0x2bb   :  { %13395 = shalt.err (!%p13392_p0)
}
 0x2bc   :  { %s13396_s27 = scalar_lea.vmem %s822_s20, 512  ;;  %p13401_p2 = scmp.lt.s32.totalorder %s822_s20, %s822_s20 }
 0x2bd   :  { %p13397_p1 = scmp.ne.s32.totalorder %s822_s20, %s13396_s27  ;;  %p13402_p3 = scmp.lt.s32.totalorder %s13396_s27, %s13396_s27 }
 0x2bf   :  { %p13403_p4 = por %p13402_p3, %p13401_p2 }
 0x2c1   :  { %p13404_p5 = pnand %p13403_p4, %p13397_p1 }
 0x2c3   :  { %13407 = shalt.err (!%p13404_p5)
}
 0x2c4   :  { %s17066_s6 = sld [smem:[#allocation190_spill]]  ;;  %s14478_s1 = smov [#allocation90]  }
 0x2c5   :  { %827 = dma.hbm_to_vmem [thread:$0]  %s17065_s28, 512, %s822_s20, [#allocation88], %s14449_s10, %s14449_s10, %s14450_s15  }
 0x2c6   :  { %s843_s12 = sshll.u32 %s14478_s1, 4  ;;  %s14479_s24 = smov [#allocation93]   ;;  %s844_s12 = int_to_ptr.vmem [resolvable:$true] %s843_s12 }
 0x2c7   :  { %s867_s25 = sshll.u32 %s14479_s24, 4  ;;  %s868_s25 = int_to_ptr.vmem [resolvable:$true] %s867_s25 }
 0x2ca   :  { %s13408_s0 = scalar_lea.hbm %s17066_s6, 512 }
 0x2cb   :  { %p13409_p6 = scmp.ne.s32.totalorder %s17066_s6, %s13408_s0  ;;  %p13412_p7 = scmp.lt.u32.totalorder %s13408_s0, %s17066_s6 }
 0x2cd   :  { %p13414_p8 = pnand %p13412_p7, %p13409_p6 }
 0x2cf   :  { %13417 = shalt.err (!%p13414_p8)
}
 0x2d0   :  { %s13418_s5 = scalar_lea.vmem %s844_s12, 512  ;;  %p13423_p10 = scmp.lt.s32.totalorder %s844_s12, %s844_s12 }
 0x2d1   :  { %p13419_p9 = scmp.ne.s32.totalorder %s844_s12, %s13418_s5  ;;  %p13424_p11 = scmp.lt.s32.totalorder %s13418_s5, %s13418_s5 }
 0x2d3   :  { %p13425_p12 = por %p13424_p11, %p13423_p10 }
 0x2d5   :  { %p13426_p13 = pnand %p13425_p12, %p13419_p9 }
 0x2d7   :  { %13429 = shalt.err (!%p13426_p13)
}
 0x2d8   :  { %s17067_s13 = sld [smem:[#allocation193_spill]] }
 0x2d9   :  { %849 = dma.hbm_to_vmem [thread:$0]  %s17066_s6, 512, %s844_s12, [#allocation91], %s14449_s10, %s14449_s10, %s14450_s15  }
 0x2de   :  { %s13430_s26 = scalar_lea.hbm %s17067_s13, 256 }
 0x2df   :  { %p13431_p0 = scmp.ne.s32.totalorder %s17067_s13, %s13430_s26  ;;  %p13434_p1 = scmp.lt.u32.totalorder %s13430_s26, %s17067_s13 }
 0x2e1   :  { %p13436_p2 = pnand %p13434_p1, %p13431_p0 }
 0x2e3   :  { %13439 = shalt.err (!%p13436_p2)
}
 0x2e4   :  { %s13440_s14 = scalar_lea.vmem %s868_s25, 256  ;;  %p13445_p4 = scmp.lt.s32.totalorder %s868_s25, %s868_s25 }
 0x2e5   :  { %p13441_p3 = scmp.ne.s32.totalorder %s868_s25, %s13440_s14  ;;  %p13446_p5 = scmp.lt.s32.totalorder %s13440_s14, %s13440_s14 }
 0x2e7   :  { %p13447_p6 = por %p13446_p5, %p13445_p4 }
 0x2e9   :  { %p13448_p7 = pnand %p13447_p6, %p13441_p3 }
 0x2eb   :  { %13451 = shalt.err (!%p13448_p7)
}
 0x2ec   :  { %s17068_s8 = sld [smem:[#allocation196_spill]]  ;;  %s14480_s9 = smov [#allocation96]  }
 0x2ed   :  { %873 = dma.hbm_to_vmem [thread:$0]  %s17067_s13, 256, %s868_s25, [#allocation94], %s14449_s10, %s14449_s10, %s14450_s15  }
 0x2ee   :  { %s894_s3 = sshll.u32 %s14480_s9, 4  ;;  %s14481_s4 = smov [#allocation99]   ;;  %s895_s3 = int_to_ptr.vmem [resolvable:$true] %s894_s3 }
 0x2ef   :  { %s913_s16 = sshll.u32 %s14481_s4, 4  ;;  %s914_s16 = int_to_ptr.vmem [resolvable:$true] %s913_s16 }
 0x2f2   :  { %s13452_s18 = scalar_lea.hbm %s17068_s8, 16 }
 0x2f3   :  { %p13453_p8 = scmp.ne.s32.totalorder %s17068_s8, %s13452_s18  ;;  %p13456_p9 = scmp.lt.u32.totalorder %s13452_s18, %s17068_s8 }
 0x2f5   :  { %p13458_p10 = pnand %p13456_p9, %p13453_p8 }
 0x2f7   :  { %13461 = shalt.err (!%p13458_p10)
}
 0x2f8   :  { %s13462_s22 = scalar_lea.vmem %s895_s3, 16  ;;  %s13466_s2 = scalar_lea.vmem %s895_s3, 32 }
 0x2f9   :  { %p13463_p11 = scmp.ne.s32.totalorder %s895_s3, %s13462_s22  ;;  %p13467_p12 = scmp.lt.s32.totalorder %s895_s3, %s895_s3 }
 0x2fa   :  { %p13468_p13 = scmp.lt.s32.totalorder %s13466_s2, %s13462_s22 }
 0x2fc   :  { %p13469_p0 = por %p13468_p13, %p13467_p12 }
 0x2fe   :  { %p13470_p1 = pnand %p13469_p0, %p13463_p11 }
 0x300   :  { %13473 = shalt.err (!%p13470_p1)
}
 0x301   :  { %s17069_s29 = sld [smem:[#allocation198_spill]] }
 0x302   :  { %897 = dma.hbm_to_vmem [thread:$0]  %s17068_s8, 16, %s895_s3, [#allocation97]  }
 0x307   :  { %s13474_s20 = scalar_lea.hbm %s17069_s29, 256 }
 0x308   :  { %p13475_p2 = scmp.ne.s32.totalorder %s17069_s29, %s13474_s20  ;;  %p13478_p3 = scmp.lt.u32.totalorder %s13474_s20, %s17069_s29 }
 0x30a   :  { %p13480_p4 = pnand %p13478_p3, %p13475_p2 }
 0x30c   :  { %13483 = shalt.err (!%p13480_p4)
}
 0x30d   :  { %s13484_s17 = scalar_lea.vmem %s914_s16, 256  ;;  %p13489_p6 = scmp.lt.s32.totalorder %s914_s16, %s914_s16 }
 0x30e   :  { %p13485_p5 = scmp.ne.s32.totalorder %s914_s16, %s13484_s17  ;;  %p13490_p7 = scmp.lt.s32.totalorder %s13484_s17, %s13484_s17 }
 0x310   :  { %p13491_p8 = por %p13490_p7, %p13489_p6 }
 0x312   :  { %p13492_p9 = pnand %p13491_p8, %p13485_p5 }
 0x314   :  { %13495 = shalt.err (!%p13492_p9)
}
 0x315   :  { %s17070_s23 = sld [smem:[#allocation200_spill]]  ;;  %s14482_s28 = smov [#allocation102]  }
 0x316   :  { %919 = dma.hbm_to_vmem [thread:$0]  %s17069_s29, 256, %s914_s16, [#allocation100], %s14449_s10, %s14449_s10, %s14450_s15  }
 0x317   :  { %s936_s30 = sshll.u32 %s14482_s28, 4  ;;  %s14483_s27 = smov [#allocation6]   ;;  %s937_s30 = int_to_ptr.vmem [resolvable:$true] %s936_s30 }
 0x318   :  { %s237_s6 = sshll.u32 %s14483_s27, 4  ;;  %s238_s6 = int_to_ptr.vmem [resolvable:$true] %s237_s6 }
 0x31b   :  { %s13496_s1 = scalar_lea.hbm %s17070_s23, 128 }
 0x31c   :  { %p13497_p10 = scmp.ne.s32.totalorder %s17070_s23, %s13496_s1  ;;  %p13500_p11 = scmp.lt.u32.totalorder %s13496_s1, %s17070_s23 }
 0x31e   :  { %p13502_p12 = pnand %p13500_p11, %p13497_p10 }
 0x320   :  { %13505 = shalt.err (!%p13502_p12)
}
 0x321   :  { %s13506_s12 = scalar_lea.vmem %s937_s30, 128  ;;  %p13511_p0 = scmp.lt.s32.totalorder %s937_s30, %s937_s30 }
 0x322   :  { %p13507_p13 = scmp.ne.s32.totalorder %s937_s30, %s13506_s12  ;;  %p13512_p1 = scmp.lt.s32.totalorder %s13506_s12, %s13506_s12 }
 0x324   :  { %p13513_p2 = por %p13512_p1, %p13511_p0 }
 0x326   :  { %p13514_p3 = pnand %p13513_p2, %p13507_p13 }
 0x328   :  { %13517 = shalt.err (!%p13514_p3)
}
 0x329   :  { %s17071_s24 = sld [smem:[#allocation145_spill]] }
 0x32a   :  { %939 = dma.hbm_to_vmem [thread:$0]  %s17070_s23, 128, %s937_s30, [#allocation103]  }
 0x32f   :  { %s13518_s25 = scalar_lea.hbm %s17071_s24, 2048 }
 0x330   :  { %p13519_p4 = scmp.ne.s32.totalorder %s17071_s24, %s13518_s25  ;;  %p13522_p5 = scmp.lt.u32.totalorder %s13518_s25, %s17071_s24 }
 0x332   :  { %p13524_p6 = pnand %p13522_p5, %p13519_p4 }
 0x334   :  { %13527 = shalt.err (!%p13524_p6)
}
 0x335   :  { %s13528_s0 = scalar_lea.vmem %s238_s6, 2048  ;;  %p13533_p8 = scmp.lt.s32.totalorder %s238_s6, %s238_s6 }
 0x336   :  { %p13529_p7 = scmp.ne.s32.totalorder %s238_s6, %s13528_s0  ;;  %p13534_p9 = scmp.lt.s32.totalorder %s13528_s0, %s13528_s0 }
 0x338   :  { %p13535_p10 = por %p13534_p9, %p13533_p8 }
 0x33a   :  { %p13536_p11 = pnand %p13535_p10, %p13529_p7 }
 0x33c   :  { %13539 = shalt.err (!%p13536_p11)
}
 0x33d   :  { %s17072_s5 = sld [smem:[#allocation146_spill]]  ;;  %s14484_s13 = smov [#allocation11]  }
 0x33e   :  { %243 = dma.hbm_to_vmem [thread:$0]  %s17071_s24, 2048, %s238_s6, [#allocation7], %s14449_s10, %s14449_s10, %s14450_s15  }
 0x33f   :  { %s262_s26 = sshll.u32 %s14484_s13, 4  ;;  %s14485_s14 = smov [#allocation14]   ;;  %s263_s26 = int_to_ptr.vmem [resolvable:$true] %s262_s26 }
 0x340   :  { %s284_s8 = sshll.u32 %s14485_s14, 4  ;;  %s285_s8 = int_to_ptr.vmem [resolvable:$true] %s284_s8 }
 0x343   :  { %s13540_s9 = scalar_lea.hbm %s17072_s5, 1024 }
 0x344   :  { %p13541_p12 = scmp.ne.s32.totalorder %s17072_s5, %s13540_s9  ;;  %p13544_p13 = scmp.lt.u32.totalorder %s13540_s9, %s17072_s5 }
 0x346   :  { %p13546_p0 = pnand %p13544_p13, %p13541_p12 }
 0x348   :  { %13549 = shalt.err (!%p13546_p0)
}
 0x349   :  { %s13550_s3 = scalar_lea.vmem %s263_s26, 1024  ;;  %p13555_p2 = scmp.lt.s32.totalorder %s263_s26, %s263_s26 }
 0x34a   :  { %p13551_p1 = scmp.ne.s32.totalorder %s263_s26, %s13550_s3  ;;  %p13556_p3 = scmp.lt.s32.totalorder %s13550_s3, %s13550_s3 }
 0x34c   :  { %p13557_p4 = por %p13556_p3, %p13555_p2 }
 0x34e   :  { %p13558_p5 = pnand %p13557_p4, %p13551_p1 }
 0x350   :  { %13561 = shalt.err (!%p13558_p5)
}
 0x351   :  { %s17073_s4 = sld [smem:[#allocation147_spill]] }
 0x352   :  { %265 = dma.hbm_to_vmem [thread:$0]  %s17072_s5, 1024, %s263_s26, [#allocation10]  }
 0x357   :  { %s13562_s16 = scalar_lea.hbm %s17073_s4, 128 }
 0x358   :  { %p13563_p6 = scmp.ne.s32.totalorder %s17073_s4, %s13562_s16  ;;  %p13566_p7 = scmp.lt.u32.totalorder %s13562_s16, %s17073_s4 }
 0x35a   :  { %p13568_p8 = pnand %p13566_p7, %p13563_p6 }
 0x35c   :  { %13571 = shalt.err (!%p13568_p8)
}
 0x35d   :  { %s13572_s18 = scalar_lea.vmem %s285_s8, 128  ;;  %p13577_p10 = scmp.lt.s32.totalorder %s285_s8, %s285_s8 }
 0x35e   :  { %p13573_p9 = scmp.ne.s32.totalorder %s285_s8, %s13572_s18  ;;  %p13578_p11 = scmp.lt.s32.totalorder %s13572_s18, %s13572_s18 }
 0x360   :  { %p13579_p12 = por %p13578_p11, %p13577_p10 }
 0x362   :  { %p13580_p13 = pnand %p13579_p12, %p13573_p9 }
 0x364   :  { %13583 = shalt.err (!%p13580_p13)
}
 0x365   :  { %s17074_s22 = sld [smem:[#allocation148_spill]]  ;;  %s14486_s2 = smov [#allocation17]  }
 0x366   :  { %287 = dma.hbm_to_vmem [thread:$0]  %s17073_s4, 128, %s285_s8, [#allocation13]  }
 0x367   :  { %s304_s29 = sshll.u32 %s14486_s2, 4  ;;  %s14487_s20 = smov [#allocation20]   ;;  %s305_s29 = int_to_ptr.vmem [resolvable:$true] %s304_s29 }
 0x368   :  { %s323_s17 = sshll.u32 %s14487_s20, 4  ;;  %s324_s17 = int_to_ptr.vmem [resolvable:$true] %s323_s17 }
 0x36b   :  { %s13584_s23 = scalar_lea.hbm %s17074_s22, 128 }
 0x36c   :  { %p13585_p0 = scmp.ne.s32.totalorder %s17074_s22, %s13584_s23  ;;  %p13588_p1 = scmp.lt.u32.totalorder %s13584_s23, %s17074_s22 }
 0x36e   :  { %p13590_p2 = pnand %p13588_p1, %p13585_p0 }
 0x370   :  { %13593 = shalt.err (!%p13590_p2)
}
 0x371   :  { %s13594_s28 = scalar_lea.vmem %s305_s29, 128  ;;  %p13599_p4 = scmp.lt.s32.totalorder %s305_s29, %s305_s29 }
 0x372   :  { %p13595_p3 = scmp.ne.s32.totalorder %s305_s29, %s13594_s28  ;;  %p13600_p5 = scmp.lt.s32.totalorder %s13594_s28, %s13594_s28 }
 0x374   :  { %p13601_p6 = por %p13600_p5, %p13599_p4 }
 0x376   :  { %p13602_p7 = pnand %p13601_p6, %p13595_p3 }
 0x378   :  { %13605 = shalt.err (!%p13602_p7)
}
 0x379   :  { %s17075_s30 = sld [smem:[#allocation149_spill]] }
 0x37a   :  { %307 = dma.hbm_to_vmem [thread:$0]  %s17074_s22, 128, %s305_s29, [#allocation16]  }
 0x37f   :  { %s13606_s27 = scalar_lea.hbm %s17075_s30, 1024 }
 0x380   :  { %p13607_p8 = scmp.ne.s32.totalorder %s17075_s30, %s13606_s27  ;;  %p13610_p9 = scmp.lt.u32.totalorder %s13606_s27, %s17075_s30 }
 0x382   :  { %p13612_p10 = pnand %p13610_p9, %p13607_p8 }
 0x384   :  { %13615 = shalt.err (!%p13612_p10)
}
 0x385   :  { %s13616_s6 = scalar_lea.vmem %s324_s17, 1024  ;;  %p13621_p12 = scmp.lt.s32.totalorder %s324_s17, %s324_s17 }
 0x386   :  { %p13617_p11 = scmp.ne.s32.totalorder %s324_s17, %s13616_s6  ;;  %p13622_p13 = scmp.lt.s32.totalorder %s13616_s6, %s13616_s6 }
 0x388   :  { %p13623_p0 = por %p13622_p13, %p13621_p12 }
 0x38a   :  { %p13624_p1 = pnand %p13623_p0, %p13617_p11 }
 0x38c   :  { %13627 = shalt.err (!%p13624_p1)
}
 0x38d   :  { %s17076_s1 = sld [smem:[#allocation150_spill]]  ;;  %s14488_s12 = smov [#allocation23]  }
 0x38e   :  { %329 = dma.hbm_to_vmem [thread:$0]  %s17075_s30, 1024, %s324_s17, [#allocation19], %s14449_s10, %s14449_s10, %s14450_s15  }
 0x38f   :  { %s350_s24 = sshll.u32 %s14488_s12, 4  ;;  %s14489_s25 = smov [#allocation26]   ;;  %s351_s24 = int_to_ptr.vmem [resolvable:$true] %s350_s24 }
 0x390   :  { %s369_s0 = sshll.u32 %s14489_s25, 4  ;;  %s370_s0 = int_to_ptr.vmem [resolvable:$true] %s369_s0 }
 0x393   :  { %s13628_s5 = scalar_lea.hbm %s17076_s1, 32 }
 0x394   :  { %p13629_p2 = scmp.ne.s32.totalorder %s17076_s1, %s13628_s5  ;;  %p13632_p3 = scmp.lt.u32.totalorder %s13628_s5, %s17076_s1 }
 0x396   :  { %p13634_p4 = pnand %p13632_p3, %p13629_p2 }
 0x398   :  { %13637 = shalt.err (!%p13634_p4)
}
 0x399   :  { %s13638_s13 = scalar_lea.vmem %s351_s24, 32  ;;  %p13643_p6 = scmp.lt.s32.totalorder %s351_s24, %s351_s24 }
 0x39a   :  { %p13639_p5 = scmp.ne.s32.totalorder %s351_s24, %s13638_s13  ;;  %p13644_p7 = scmp.lt.s32.totalorder %s13638_s13, %s13638_s13 }
 0x39c   :  { %p13645_p8 = por %p13644_p7, %p13643_p6 }
 0x39e   :  { %p13646_p9 = pnand %p13645_p8, %p13639_p5 }
 0x3a0   :  { %13649 = shalt.err (!%p13646_p9)
}
 0x3a1   :  { %s17077_s26 = sld [smem:[#allocation151_spill]] }
 0x3a2   :  { %353 = dma.hbm_to_vmem [thread:$0]  %s17076_s1, 32, %s351_s24, [#allocation22]  }
 0x3a7   :  { %s13650_s14 = scalar_lea.hbm %s17077_s26, 2048 }
 0x3a8   :  { %p13651_p10 = scmp.ne.s32.totalorder %s17077_s26, %s13650_s14  ;;  %p13654_p11 = scmp.lt.u32.totalorder %s13650_s14, %s17077_s26 }
 0x3aa   :  { %p13656_p12 = pnand %p13654_p11, %p13651_p10 }
 0x3ac   :  { %13659 = shalt.err (!%p13656_p12)
}
 0x3ad   :  { %s13660_s8 = scalar_lea.vmem %s370_s0, 2048  ;;  %p13665_p0 = scmp.lt.s32.totalorder %s370_s0, %s370_s0 }
 0x3ae   :  { %p13661_p13 = scmp.ne.s32.totalorder %s370_s0, %s13660_s8  ;;  %p13666_p1 = scmp.lt.s32.totalorder %s13660_s8, %s13660_s8 }
 0x3b0   :  { %p13667_p2 = por %p13666_p1, %p13665_p0 }
 0x3b2   :  { %p13668_p3 = pnand %p13667_p2, %p13661_p13 }
 0x3b4   :  { %13671 = shalt.err (!%p13668_p3)
}
 0x3b5   :  { %s17078_s9 = sld [smem:[#allocation152_spill]]  ;;  %s14490_s3 = smov [#allocation29]  }
 0x3b6   :  { %375 = dma.hbm_to_vmem [thread:$0]  %s17077_s26, 2048, %s370_s0, [#allocation25], %s14454_s7, %s14454_s7, %s14455_s19  }
 0x3b7   :  { %s392_s4 = sshll.u32 %s14490_s3, 4  ;;  %s14491_s16 = smov [#allocation32]   ;;  %s393_s4 = int_to_ptr.vmem [resolvable:$true] %s392_s4 }
 0x3b8   :  { %s414_s18 = sshll.u32 %s14491_s16, 4  ;;  %s415_s18 = int_to_ptr.vmem [resolvable:$true] %s414_s18 }
 0x3bb   :  { %s13672_s22 = scalar_lea.hbm %s17078_s9, 16 }
 0x3bc   :  { %p13673_p4 = scmp.ne.s32.totalorder %s17078_s9, %s13672_s22  ;;  %p13676_p5 = scmp.lt.u32.totalorder %s13672_s22, %s17078_s9 }
 0x3be   :  { %p13678_p6 = pnand %p13676_p5, %p13673_p4 }
 0x3c0   :  { %13681 = shalt.err (!%p13678_p6)
}
 0x3c1   :  { %s13682_s2 = scalar_lea.vmem %s393_s4, 16  ;;  %s13686_s29 = scalar_lea.vmem %s393_s4, 32 }
 0x3c2   :  { %p13683_p7 = scmp.ne.s32.totalorder %s393_s4, %s13682_s2  ;;  %p13687_p8 = scmp.lt.s32.totalorder %s393_s4, %s393_s4 }
 0x3c3   :  { %p13688_p9 = scmp.lt.s32.totalorder %s13686_s29, %s13682_s2 }
 0x3c5   :  { %p13689_p10 = por %p13688_p9, %p13687_p8 }
 0x3c7   :  { %p13690_p11 = pnand %p13689_p10, %p13683_p7 }
 0x3c9   :  { %13693 = shalt.err (!%p13690_p11)
}
 0x3ca   :  { %s17079_s7 = sld [smem:[#allocation154_spill]] }
 0x3cb   :  { %395 = dma.hbm_to_vmem [thread:$0]  %s17078_s9, 16, %s393_s4, [#allocation28]  }
 0x3d0   :  { %s13694_s19 = scalar_lea.hbm %s17079_s7, 16 }
 0x3d1   :  { %p13695_p12 = scmp.ne.s32.totalorder %s17079_s7, %s13694_s19  ;;  %p13698_p13 = scmp.lt.u32.totalorder %s13694_s19, %s17079_s7 }
 0x3d3   :  { %p13700_p0 = pnand %p13698_p13, %p13695_p12 }
 0x3d5   :  { %13703 = shalt.err (!%p13700_p0)
}
 0x3d6   :  { %s13704_s20 = scalar_lea.vmem %s415_s18, 16  ;;  %s13708_s17 = scalar_lea.vmem %s415_s18, 32 }
 0x3d7   :  { %p13705_p1 = scmp.ne.s32.totalorder %s415_s18, %s13704_s20  ;;  %p13709_p2 = scmp.lt.s32.totalorder %s415_s18, %s415_s18 }
 0x3d8   :  { %p13710_p3 = scmp.lt.s32.totalorder %s13708_s17, %s13704_s20 }
 0x3da   :  { %p13711_p4 = por %p13710_p3, %p13709_p2 }
 0x3dc   :  { %p13712_p5 = pnand %p13711_p4, %p13705_p1 }
 0x3de   :  { %13715 = shalt.err (!%p13712_p5)
}
 0x3df   :  { %s17080_s23 = sld [smem:[#allocation155_spill]]  ;;  %s14492_s28 = smov [#allocation35]  }
 0x3e0   :  { %417 = dma.hbm_to_vmem [thread:$0]  %s17079_s7, 16, %s415_s18, [#allocation31]  }
 0x3e1   :  { %s436_s30 = sshll.u32 %s14492_s28, 4  ;;  %s14493_s27 = smov [#allocation38]   ;;  %s437_s30 = int_to_ptr.vmem [resolvable:$true] %s436_s30 }
 0x3e2   :  { %s458_s6 = sshll.u32 %s14493_s27, 4  ;;  %s459_s6 = int_to_ptr.vmem [resolvable:$true] %s458_s6 }
 0x3e5   :  { %s13716_s1 = scalar_lea.hbm %s17080_s23, 128 }
 0x3e6   :  { %p13717_p6 = scmp.ne.s32.totalorder %s17080_s23, %s13716_s1  ;;  %p13720_p7 = scmp.lt.u32.totalorder %s13716_s1, %s17080_s23 }
 0x3e8   :  { %p13722_p8 = pnand %p13720_p7, %p13717_p6 }
 0x3ea   :  { %13725 = shalt.err (!%p13722_p8)
}
 0x3eb   :  { %s13726_s12 = scalar_lea.vmem %s437_s30, 128  ;;  %p13731_p10 = scmp.lt.s32.totalorder %s437_s30, %s437_s30 }
 0x3ec   :  { %p13727_p9 = scmp.ne.s32.totalorder %s437_s30, %s13726_s12  ;;  %p13732_p11 = scmp.lt.s32.totalorder %s13726_s12, %s13726_s12 }
 0x3ee   :  { %p13733_p12 = por %p13732_p11, %p13731_p10 }
 0x3f0   :  { %p13734_p13 = pnand %p13733_p12, %p13727_p9 }
 0x3f2   :  { %13737 = shalt.err (!%p13734_p13)
}
 0x3f3   :  { %s17081_s24 = sld [smem:[#allocation156_spill]] }
 0x3f4   :  { %439 = dma.hbm_to_vmem [thread:$0]  %s17080_s23, 128, %s437_s30, [#allocation34]  }
 0x3f9   :  { %s13738_s25 = scalar_lea.hbm %s17081_s24, 16 }
 0x3fa   :  { %p13739_p0 = scmp.ne.s32.totalorder %s17081_s24, %s13738_s25  ;;  %p13742_p1 = scmp.lt.u32.totalorder %s13738_s25, %s17081_s24 }
 0x3fc   :  { %p13744_p2 = pnand %p13742_p1, %p13739_p0 }
 0x3fe   :  { %13747 = shalt.err (!%p13744_p2)
}
 0x3ff   :  { %s13748_s0 = scalar_lea.vmem %s459_s6, 16  ;;  %s13752_s5 = scalar_lea.vmem %s459_s6, 32 }
 0x400   :  { %p13749_p3 = scmp.ne.s32.totalorder %s459_s6, %s13748_s0  ;;  %p13753_p4 = scmp.lt.s32.totalorder %s459_s6, %s459_s6 }
 0x401   :  { %p13754_p5 = scmp.lt.s32.totalorder %s13752_s5, %s13748_s0 }
 0x403   :  { %p13755_p6 = por %p13754_p5, %p13753_p4 }
 0x405   :  { %p13756_p7 = pnand %p13755_p6, %p13749_p3 }
 0x407   :  { %13759 = shalt.err (!%p13756_p7)
}
 0x408   :  { %s17082_s13 = sld [smem:[#allocation157_spill]]  ;;  %s14494_s26 = smov [#allocation41]  }
 0x409   :  { %461 = dma.hbm_to_vmem [thread:$0]  %s17081_s24, 16, %s459_s6, [#allocation37]  }
 0x40a   :  { %s480_s14 = sshll.u32 %s14494_s26, 4  ;;  %s14495_s8 = smov [#allocation44]   ;;  %s481_s14 = int_to_ptr.vmem [resolvable:$true] %s480_s14 }
 0x40b   :  { %s502_s9 = sshll.u32 %s14495_s8, 4  ;;  %s503_s9 = int_to_ptr.vmem [resolvable:$true] %s502_s9 }
 0x40e   :  { %s13760_s3 = scalar_lea.hbm %s17082_s13, 16 }
 0x40f   :  { %p13761_p8 = scmp.ne.s32.totalorder %s17082_s13, %s13760_s3  ;;  %p13764_p9 = scmp.lt.u32.totalorder %s13760_s3, %s17082_s13 }
 0x411   :  { %p13766_p10 = pnand %p13764_p9, %p13761_p8 }
 0x413   :  { %13769 = shalt.err (!%p13766_p10)
}
 0x414   :  { %s13770_s4 = scalar_lea.vmem %s481_s14, 16  ;;  %s13774_s16 = scalar_lea.vmem %s481_s14, 32 }
 0x415   :  { %p13771_p11 = scmp.ne.s32.totalorder %s481_s14, %s13770_s4  ;;  %p13775_p12 = scmp.lt.s32.totalorder %s481_s14, %s481_s14 }
 0x416   :  { %p13776_p13 = scmp.lt.s32.totalorder %s13774_s16, %s13770_s4 }
 0x418   :  { %p13777_p0 = por %p13776_p13, %p13775_p12 }
 0x41a   :  { %p13778_p1 = pnand %p13777_p0, %p13771_p11 }
 0x41c   :  { %13781 = shalt.err (!%p13778_p1)
}
 0x41d   :  { %s17083_s18 = sld [smem:[#allocation158_spill]] }
 0x41e   :  { %483 = dma.hbm_to_vmem [thread:$0]  %s17082_s13, 16, %s481_s14, [#allocation40]  }
 0x423   :  { %s13782_s22 = scalar_lea.hbm %s17083_s18, 16 }
 0x424   :  { %p13783_p2 = scmp.ne.s32.totalorder %s17083_s18, %s13782_s22  ;;  %p13786_p3 = scmp.lt.u32.totalorder %s13782_s22, %s17083_s18 }
 0x426   :  { %p13788_p4 = pnand %p13786_p3, %p13783_p2 }
 0x428   :  { %13791 = shalt.err (!%p13788_p4)
}
 0x429   :  { %s13792_s2 = scalar_lea.vmem %s503_s9, 16  ;;  %s13796_s29 = scalar_lea.vmem %s503_s9, 32 }
 0x42a   :  { %p13793_p5 = scmp.ne.s32.totalorder %s503_s9, %s13792_s2  ;;  %p13797_p6 = scmp.lt.s32.totalorder %s503_s9, %s503_s9 }
 0x42b   :  { %p13798_p7 = scmp.lt.s32.totalorder %s13796_s29, %s13792_s2 }
 0x42d   :  { %p13799_p8 = por %p13798_p7, %p13797_p6 }
 0x42f   :  { %p13800_p9 = pnand %p13799_p8, %p13793_p5 }
 0x431   :  { %13803 = shalt.err (!%p13800_p9)
}
 0x432   :  { %s17084_s7 = sld [smem:[#allocation159_spill]]  ;;  %s14496_s19 = smov [#allocation47]  }
 0x433   :  { %505 = dma.hbm_to_vmem [thread:$0]  %s17083_s18, 16, %s503_s9, [#allocation43]  }
 0x434   :  { %s524_s20 = sshll.u32 %s14496_s19, 4  ;;  %s14497_s17 = smov [#allocation50]   ;;  %s525_s20 = int_to_ptr.vmem [resolvable:$true] %s524_s20 }
 0x435   :  { %s546_s23 = sshll.u32 %s14497_s17, 4  ;;  %s547_s23 = int_to_ptr.vmem [resolvable:$true] %s546_s23 }
 0x438   :  { %s13804_s28 = scalar_lea.hbm %s17084_s7, 16 }
 0x439   :  { %p13805_p10 = scmp.ne.s32.totalorder %s17084_s7, %s13804_s28  ;;  %p13808_p11 = scmp.lt.u32.totalorder %s13804_s28, %s17084_s7 }
 0x43b   :  { %p13810_p12 = pnand %p13808_p11, %p13805_p10 }
 0x43d   :  { %13813 = shalt.err (!%p13810_p12)
}
 0x43e   :  { %s13814_s30 = scalar_lea.vmem %s525_s20, 16  ;;  %s13818_s27 = scalar_lea.vmem %s525_s20, 32 }
 0x43f   :  { %p13815_p13 = scmp.ne.s32.totalorder %s525_s20, %s13814_s30  ;;  %p13819_p0 = scmp.lt.s32.totalorder %s525_s20, %s525_s20 }
 0x440   :  { %p13820_p1 = scmp.lt.s32.totalorder %s13818_s27, %s13814_s30 }
 0x442   :  { %p13821_p2 = por %p13820_p1, %p13819_p0 }
 0x444   :  { %p13822_p3 = pnand %p13821_p2, %p13815_p13 }
 0x446   :  { %13825 = shalt.err (!%p13822_p3)
}
 0x447   :  { %s17085_s6 = sld [smem:[#allocation161_spill]] }
 0x448   :  { %527 = dma.hbm_to_vmem [thread:$0]  %s17084_s7, 16, %s525_s20, [#allocation46]  }
 0x44d   :  { %s13826_s1 = scalar_lea.hbm %s17085_s6, 16 }
 0x44e   :  { %p13827_p4 = scmp.ne.s32.totalorder %s17085_s6, %s13826_s1  ;;  %p13830_p5 = scmp.lt.u32.totalorder %s13826_s1, %s17085_s6 }
 0x450   :  { %p13832_p6 = pnand %p13830_p5, %p13827_p4 }
 0x452   :  { %13835 = shalt.err (!%p13832_p6)
}
 0x453   :  { %s13836_s12 = scalar_lea.vmem %s547_s23, 16  ;;  %s13840_s24 = scalar_lea.vmem %s547_s23, 32 }
 0x454   :  { %p13837_p7 = scmp.ne.s32.totalorder %s547_s23, %s13836_s12  ;;  %p13841_p8 = scmp.lt.s32.totalorder %s547_s23, %s547_s23 }
 0x455   :  { %p13842_p9 = scmp.lt.s32.totalorder %s13840_s24, %s13836_s12 }
 0x457   :  { %p13843_p10 = por %p13842_p9, %p13841_p8 }
 0x459   :  { %p13844_p11 = pnand %p13843_p10, %p13837_p7 }
 0x45b   :  { %13847 = shalt.err (!%p13844_p11)
}
 0x45c   :  { %s17086_s25 = sld [smem:[#allocation163_spill]]  ;;  %s14498_s0 = smov [#allocation53]  }
 0x45d   :  { %549 = dma.hbm_to_vmem [thread:$0]  %s17085_s6, 16, %s547_s23, [#allocation49]  }
 0x45e   :  { %s568_s5 = sshll.u32 %s14498_s0, 4  ;;  %s14499_s13 = smov [#allocation56]   ;;  %s569_s5 = int_to_ptr.vmem [resolvable:$true] %s568_s5 }
 0x45f   :  { %s590_s26 = sshll.u32 %s14499_s13, 4  ;;  %s591_s26 = int_to_ptr.vmem [resolvable:$true] %s590_s26 }
 0x462   :  { %s13848_s14 = scalar_lea.hbm %s17086_s25, 16 }
 0x463   :  { %p13849_p12 = scmp.ne.s32.totalorder %s17086_s25, %s13848_s14  ;;  %p13852_p13 = scmp.lt.u32.totalorder %s13848_s14, %s17086_s25 }
 0x465   :  { %p13854_p0 = pnand %p13852_p13, %p13849_p12 }
 0x467   :  { %13857 = shalt.err (!%p13854_p0)
}
 0x468   :  { %s13858_s8 = scalar_lea.vmem %s569_s5, 16  ;;  %s13862_s9 = scalar_lea.vmem %s569_s5, 32 }
 0x469   :  { %p13859_p1 = scmp.ne.s32.totalorder %s569_s5, %s13858_s8  ;;  %p13863_p2 = scmp.lt.s32.totalorder %s569_s5, %s569_s5 }
 0x46a   :  { %p13864_p3 = scmp.lt.s32.totalorder %s13862_s9, %s13858_s8 }
 0x46c   :  { %p13865_p4 = por %p13864_p3, %p13863_p2 }
 0x46e   :  { %p13866_p5 = pnand %p13865_p4, %p13859_p1 }
 0x470   :  { %13869 = shalt.err (!%p13866_p5)
}
 0x471   :  { %s17087_s3 = sld [smem:[#allocation165_spill]] }
 0x472   :  { %571 = dma.hbm_to_vmem [thread:$0]  %s17086_s25, 16, %s569_s5, [#allocation52]  }
 0x477   :  { %s13870_s4 = scalar_lea.hbm %s17087_s3, 16 }
 0x478   :  { %p13871_p6 = scmp.ne.s32.totalorder %s17087_s3, %s13870_s4  ;;  %p13874_p7 = scmp.lt.u32.totalorder %s13870_s4, %s17087_s3 }
 0x47a   :  { %p13876_p8 = pnand %p13874_p7, %p13871_p6 }
 0x47c   :  { %13879 = shalt.err (!%p13876_p8)
}
 0x47d   :  { %s13880_s16 = scalar_lea.vmem %s591_s26, 16  ;;  %s13884_s18 = scalar_lea.vmem %s591_s26, 32 }
 0x47e   :  { %p13881_p9 = scmp.ne.s32.totalorder %s591_s26, %s13880_s16  ;;  %p13885_p10 = scmp.lt.s32.totalorder %s591_s26, %s591_s26 }
 0x47f   :  { %p13886_p11 = scmp.lt.s32.totalorder %s13884_s18, %s13880_s16 }
 0x481   :  { %p13887_p12 = por %p13886_p11, %p13885_p10 }
 0x483   :  { %p13888_p13 = pnand %p13887_p12, %p13881_p9 }
 0x485   :  { %13891 = shalt.err (!%p13888_p13)
}
 0x486   :  { %s17088_s22 = sld [smem:[#allocation167_spill]]  ;;  %s14500_s2 = smov [#allocation59]  }
 0x487   :  { %593 = dma.hbm_to_vmem [thread:$0]  %s17087_s3, 16, %s591_s26, [#allocation55]  }
 0x488   :  { %s612_s29 = sshll.u32 %s14500_s2, 4  ;;  %s14501_s7 = smov [#allocation62]   ;;  %s613_s29 = int_to_ptr.vmem [resolvable:$true] %s612_s29 }
 0x489   :  { %s634_s19 = sshll.u32 %s14501_s7, 4  ;;  %s635_s19 = int_to_ptr.vmem [resolvable:$true] %s634_s19 }
 0x48c   :  { %s13892_s20 = scalar_lea.hbm %s17088_s22, 16 }
 0x48d   :  { %p13893_p0 = scmp.ne.s32.totalorder %s17088_s22, %s13892_s20  ;;  %p13896_p1 = scmp.lt.u32.totalorder %s13892_s20, %s17088_s22 }
 0x48f   :  { %p13898_p2 = pnand %p13896_p1, %p13893_p0 }
 0x491   :  { %13901 = shalt.err (!%p13898_p2)
}
 0x492   :  { %s13902_s17 = scalar_lea.vmem %s613_s29, 16  ;;  %s13906_s23 = scalar_lea.vmem %s613_s29, 32 }
 0x493   :  { %p13903_p3 = scmp.ne.s32.totalorder %s613_s29, %s13902_s17  ;;  %p13907_p4 = scmp.lt.s32.totalorder %s613_s29, %s613_s29 }
 0x494   :  { %p13908_p5 = scmp.lt.s32.totalorder %s13906_s23, %s13902_s17 }
 0x496   :  { %p13909_p6 = por %p13908_p5, %p13907_p4 }
 0x498   :  { %p13910_p7 = pnand %p13909_p6, %p13903_p3 }
 0x49a   :  { %13913 = shalt.err (!%p13910_p7)
}
 0x49b   :  { %s17089_s28 = sld [smem:[#allocation169_spill]] }
 0x49c   :  { %615 = dma.hbm_to_vmem [thread:$0]  %s17088_s22, 16, %s613_s29, [#allocation58]  }
 0x4a1   :  { %s13914_s30 = scalar_lea.hbm %s17089_s28, 16 }
 0x4a2   :  { %p13915_p8 = scmp.ne.s32.totalorder %s17089_s28, %s13914_s30  ;;  %p13918_p9 = scmp.lt.u32.totalorder %s13914_s30, %s17089_s28 }
 0x4a4   :  { %p13920_p10 = pnand %p13918_p9, %p13915_p8 }
 0x4a6   :  { %13923 = shalt.err (!%p13920_p10)
}
 0x4a7   :  { %s13924_s27 = scalar_lea.vmem %s635_s19, 16  ;;  %s13928_s6 = scalar_lea.vmem %s635_s19, 32 }
 0x4a8   :  { %p13925_p11 = scmp.ne.s32.totalorder %s635_s19, %s13924_s27  ;;  %p13929_p12 = scmp.lt.s32.totalorder %s635_s19, %s635_s19 }
 0x4a9   :  { %p13930_p13 = scmp.lt.s32.totalorder %s13928_s6, %s13924_s27 }
 0x4ab   :  { %p13931_p0 = por %p13930_p13, %p13929_p12 }
 0x4ad   :  { %p13932_p1 = pnand %p13931_p0, %p13925_p11 }
 0x4af   :  { %13935 = shalt.err (!%p13932_p1)
}
 0x4b0   :  { %s17090_s1 = sld [smem:[#allocation171_spill]]  ;;  %s14502_s12 = smov [#allocation65]  }
 0x4b1   :  { %637 = dma.hbm_to_vmem [thread:$0]  %s17089_s28, 16, %s635_s19, [#allocation61]  }
 0x4b2   :  { %s656_s24 = sshll.u32 %s14502_s12, 4  ;;  %s14503_s25 = smov [#allocation68]   ;;  %s657_s24 = int_to_ptr.vmem [resolvable:$true] %s656_s24 }
 0x4b3   :  { %s678_s0 = sshll.u32 %s14503_s25, 4  ;;  %s679_s0 = int_to_ptr.vmem [resolvable:$true] %s678_s0 }
 0x4b6   :  { %s13936_s5 = scalar_lea.hbm %s17090_s1, 16 }
 0x4b7   :  { %p13937_p2 = scmp.ne.s32.totalorder %s17090_s1, %s13936_s5  ;;  %p13940_p3 = scmp.lt.u32.totalorder %s13936_s5, %s17090_s1 }
 0x4b9   :  { %p13942_p4 = pnand %p13940_p3, %p13937_p2 }
 0x4bb   :  { %13945 = shalt.err (!%p13942_p4)
}
 0x4bc   :  { %s13946_s13 = scalar_lea.vmem %s657_s24, 16  ;;  %s13950_s26 = scalar_lea.vmem %s657_s24, 32 }
 0x4bd   :  { %p13947_p5 = scmp.ne.s32.totalorder %s657_s24, %s13946_s13  ;;  %p13951_p6 = scmp.lt.s32.totalorder %s657_s24, %s657_s24 }
 0x4be   :  { %p13952_p7 = scmp.lt.s32.totalorder %s13950_s26, %s13946_s13 }
 0x4c0   :  { %p13953_p8 = por %p13952_p7, %p13951_p6 }
 0x4c2   :  { %p13954_p9 = pnand %p13953_p8, %p13947_p5 }
 0x4c4   :  { %13957 = shalt.err (!%p13954_p9)
}
 0x4c5   :  { %s17091_s14 = sld [smem:[#allocation173_spill]] }
 0x4c6   :  { %659 = dma.hbm_to_vmem [thread:$0]  %s17090_s1, 16, %s657_s24, [#allocation64]  }
 0x4cb   :  { %s13958_s8 = scalar_lea.hbm %s17091_s14, 16 }
 0x4cc   :  { %p13959_p10 = scmp.ne.s32.totalorder %s17091_s14, %s13958_s8  ;;  %p13962_p11 = scmp.lt.u32.totalorder %s13958_s8, %s17091_s14 }
 0x4ce   :  { %p13964_p12 = pnand %p13962_p11, %p13959_p10 }
 0x4d0   :  { %13967 = shalt.err (!%p13964_p12)
}
 0x4d1   :  { %s13968_s9 = scalar_lea.vmem %s679_s0, 16  ;;  %s13972_s3 = scalar_lea.vmem %s679_s0, 32 }
 0x4d2   :  { %p13969_p13 = scmp.ne.s32.totalorder %s679_s0, %s13968_s9  ;;  %p13973_p0 = scmp.lt.s32.totalorder %s679_s0, %s679_s0 }
 0x4d3   :  { %p13974_p1 = scmp.lt.s32.totalorder %s13972_s3, %s13968_s9 }
 0x4d5   :  { %p13975_p2 = por %p13974_p1, %p13973_p0 }
 0x4d7   :  { %p13976_p3 = pnand %p13975_p2, %p13969_p13 }
 0x4d9   :  { %13979 = shalt.err (!%p13976_p3)
}
 0x4da   :  { %s17092_s4 = sld [smem:[#allocation175_spill]]  ;;  %s14504_s16 = smov [#allocation71]  }
 0x4db   :  { %681 = dma.hbm_to_vmem [thread:$0]  %s17091_s14, 16, %s679_s0, [#allocation67]  }
 0x4dc   :  { %s700_s18 = sshll.u32 %s14504_s16, 4  ;;  %s14505_s22 = smov [#allocation74]   ;;  %s701_s18 = int_to_ptr.vmem [resolvable:$true] %s700_s18 }
 0x4dd   :  { %s721_s2 = sshll.u32 %s14505_s22, 4  ;;  %s722_s2 = int_to_ptr.vmem [resolvable:$true] %s721_s2 }
 0x4e0   :  { %s13980_s29 = scalar_lea.hbm %s17092_s4, 16 }
 0x4e1   :  { %p13981_p4 = scmp.ne.s32.totalorder %s17092_s4, %s13980_s29  ;;  %p13984_p5 = scmp.lt.u32.totalorder %s13980_s29, %s17092_s4 }
 0x4e3   :  { %p13986_p6 = pnand %p13984_p5, %p13981_p4 }
 0x4e5   :  { %13989 = shalt.err (!%p13986_p6)
}
 0x4e6   :  { %s13990_s7 = scalar_lea.vmem %s701_s18, 16  ;;  %s13994_s19 = scalar_lea.vmem %s701_s18, 32 }
 0x4e7   :  { %p13991_p7 = scmp.ne.s32.totalorder %s701_s18, %s13990_s7  ;;  %p13995_p8 = scmp.lt.s32.totalorder %s701_s18, %s701_s18 }
 0x4e8   :  { %p13996_p9 = scmp.lt.s32.totalorder %s13994_s19, %s13990_s7 }
 0x4ea   :  { %p13997_p10 = por %p13996_p9, %p13995_p8 }
 0x4ec   :  { %p13998_p11 = pnand %p13997_p10, %p13991_p7 }
 0x4ee   :  { %14001 = shalt.err (!%p13998_p11)
}
 0x4ef   :  { %s17093_s20 = sld [smem:[#allocation178_spill]] }
 0x4f0   :  { %703 = dma.hbm_to_vmem [thread:$0]  %s17092_s4, 16, %s701_s18, [#allocation70]  }
 0x4f5   :  { %s14002_s17 = scalar_lea.hbm %s17093_s20, 512 }
 0x4f6   :  { %p14003_p12 = scmp.ne.s32.totalorder %s17093_s20, %s14002_s17  ;;  %p14006_p13 = scmp.lt.u32.totalorder %s14002_s17, %s17093_s20 }
 0x4f8   :  { %p14008_p0 = pnand %p14006_p13, %p14003_p12 }
 0x4fa   :  { %14011 = shalt.err (!%p14008_p0)
}
 0x4fb   :  { %s14012_s23 = scalar_lea.vmem %s722_s2, 512  ;;  %p14017_p2 = scmp.lt.s32.totalorder %s722_s2, %s722_s2 }
 0x4fc   :  { %p14013_p1 = scmp.ne.s32.totalorder %s722_s2, %s14012_s23  ;;  %p14018_p3 = scmp.lt.s32.totalorder %s14012_s23, %s14012_s23 }
 0x4fe   :  { %p14019_p4 = por %p14018_p3, %p14017_p2 }
 0x500   :  { %p14020_p5 = pnand %p14019_p4, %p14013_p1 }
 0x502   :  { %14023 = shalt.err (!%p14020_p5)
}
 0x503   :  { %s17094_s28 = sld [smem:[#allocation180_spill]]  ;;  %s14506_s30 = smov [#allocation77]  }
 0x504   :  { %727 = dma.hbm_to_vmem [thread:$0]  %s17093_s20, 512, %s722_s2, [#allocation73], %s14449_s10, %s14449_s10, %s14450_s15  }
 0x505   :  { %s743_s27 = sshll.u32 %s14506_s30, 4  ;;  %s14507_s6 = smov [#allocation80]   ;;  %s744_s27 = int_to_ptr.vmem [resolvable:$true] %s743_s27 }
 0x506   :  { %s768_s1 = sshll.u32 %s14507_s6, 4  ;;  %s769_s1 = int_to_ptr.vmem [resolvable:$true] %s768_s1 }
 0x509   :  { %s14024_s12 = scalar_lea.hbm %s17094_s28, 512 }
 0x50a   :  { %p14025_p6 = scmp.ne.s32.totalorder %s17094_s28, %s14024_s12  ;;  %p14028_p7 = scmp.lt.u32.totalorder %s14024_s12, %s17094_s28 }
 0x50c   :  { %p14030_p8 = pnand %p14028_p7, %p14025_p6 }
 0x50e   :  { %14033 = shalt.err (!%p14030_p8)
}
 0x50f   :  { %s14034_s24 = scalar_lea.vmem %s744_s27, 512  ;;  %p14039_p10 = scmp.lt.s32.totalorder %s744_s27, %s744_s27 }
 0x510   :  { %p14035_p9 = scmp.ne.s32.totalorder %s744_s27, %s14034_s24  ;;  %p14040_p11 = scmp.lt.s32.totalorder %s14034_s24, %s14034_s24 }
 0x512   :  { %p14041_p12 = por %p14040_p11, %p14039_p10 }
 0x514   :  { %p14042_p13 = pnand %p14041_p12, %p14035_p9 }
 0x516   :  { %14045 = shalt.err (!%p14042_p13)
}
 0x517   :  { %s17095_s25 = sld [smem:[#allocation183_spill]] }
 0x518   :  { %749 = dma.hbm_to_vmem [thread:$0]  %s17094_s28, 512, %s744_s27, [#allocation76], %s14449_s10, %s14449_s10, %s14450_s15  }
 0x51d   :  { %s14046_s0 = scalar_lea.hbm %s17095_s25, 16 }
 0x51e   :  { %p14047_p0 = scmp.ne.s32.totalorder %s17095_s25, %s14046_s0  ;;  %p14050_p1 = scmp.lt.u32.totalorder %s14046_s0, %s17095_s25 }
 0x520   :  { %p14052_p2 = pnand %p14050_p1, %p14047_p0 }
 0x522   :  { %14055 = shalt.err (!%p14052_p2)
}
 0x523   :  { %s14056_s5 = scalar_lea.vmem %s769_s1, 16  ;;  %s14060_s13 = scalar_lea.vmem %s769_s1, 32 }
 0x524   :  { %p14057_p3 = scmp.ne.s32.totalorder %s769_s1, %s14056_s5  ;;  %p14061_p4 = scmp.lt.s32.totalorder %s769_s1, %s769_s1 }
 0x525   :  { %p14062_p5 = scmp.lt.s32.totalorder %s14060_s13, %s14056_s5 }
 0x527   :  { %p14063_p6 = por %p14062_p5, %p14061_p4 }
 0x529   :  { %p14064_p7 = pnand %p14063_p6, %p14057_p3 }
 0x52b   :  { %14067 = shalt.err (!%p14064_p7)
}
 0x52c   :  { %s17096_s26 = sld [smem:[#allocation185_spill]]  ;;  %s14508_s14 = smov [#allocation83]  }
 0x52d   :  { %771 = dma.hbm_to_vmem [thread:$0]  %s17095_s25, 16, %s769_s1, [#allocation79]  }
 0x52e   :  { %s790_s8 = sshll.u32 %s14508_s14, 4  ;;  %s14509_s9 = smov [#allocation86]   ;;  %s791_s8 = int_to_ptr.vmem [resolvable:$true] %s790_s8 }
 0x52f   :  { %s812_s3 = sshll.u32 %s14509_s9, 4  ;;  %s813_s3 = int_to_ptr.vmem [resolvable:$true] %s812_s3 }
 0x532   :  { %s14068_s4 = scalar_lea.hbm %s17096_s26, 16 }
 0x533   :  { %p14069_p8 = scmp.ne.s32.totalorder %s17096_s26, %s14068_s4  ;;  %p14072_p9 = scmp.lt.u32.totalorder %s14068_s4, %s17096_s26 }
 0x535   :  { %p14074_p10 = pnand %p14072_p9, %p14069_p8 }
 0x537   :  { %14077 = shalt.err (!%p14074_p10)
}
 0x538   :  { %s14078_s16 = scalar_lea.vmem %s791_s8, 16  ;;  %s14082_s18 = scalar_lea.vmem %s791_s8, 32 }
 0x539   :  { %p14079_p11 = scmp.ne.s32.totalorder %s791_s8, %s14078_s16  ;;  %p14083_p12 = scmp.lt.s32.totalorder %s791_s8, %s791_s8 }
 0x53a   :  { %p14084_p13 = scmp.lt.s32.totalorder %s14082_s18, %s14078_s16 }
 0x53c   :  { %p14085_p0 = por %p14084_p13, %p14083_p12 }
 0x53e   :  { %p14086_p1 = pnand %p14085_p0, %p14079_p11 }
 0x540   :  { %14089 = shalt.err (!%p14086_p1)
}
 0x541   :  { %s17097_s22 = sld [smem:[#allocation187_spill]] }
 0x542   :  { %793 = dma.hbm_to_vmem [thread:$0]  %s17096_s26, 16, %s791_s8, [#allocation82]  }
 0x547   :  { %s14090_s2 = scalar_lea.hbm %s17097_s22, 16 }
 0x548   :  { %p14091_p2 = scmp.ne.s32.totalorder %s17097_s22, %s14090_s2  ;;  %p14094_p3 = scmp.lt.u32.totalorder %s14090_s2, %s17097_s22 }
 0x54a   :  { %p14096_p4 = pnand %p14094_p3, %p14091_p2 }
 0x54c   :  { %14099 = shalt.err (!%p14096_p4)
}
 0x54d   :  { %s14100_s29 = scalar_lea.vmem %s813_s3, 16  ;;  %s14104_s7 = scalar_lea.vmem %s813_s3, 32 }
 0x54e   :  { %p14101_p5 = scmp.ne.s32.totalorder %s813_s3, %s14100_s29  ;;  %p14105_p6 = scmp.lt.s32.totalorder %s813_s3, %s813_s3 }
 0x54f   :  { %p14106_p7 = scmp.lt.s32.totalorder %s14104_s7, %s14100_s29 }
 0x551   :  { %p14107_p8 = por %p14106_p7, %p14105_p6 }
 0x553   :  { %p14108_p9 = pnand %p14107_p8, %p14101_p5 }
 0x555   :  { %14111 = shalt.err (!%p14108_p9)
}
 0x556   :  { %s17098_s19 = sld [smem:[#allocation189_spill]]  ;;  %s14510_s20 = smov [#allocation89]  }
 0x557   :  { %815 = dma.hbm_to_vmem [thread:$0]  %s17097_s22, 16, %s813_s3, [#allocation85]  }
 0x558   :  { %s834_s17 = sshll.u32 %s14510_s20, 4  ;;  %s14511_s23 = smov [#allocation92]   ;;  %s835_s17 = int_to_ptr.vmem [resolvable:$true] %s834_s17 }
 0x559   :  { %s856_s28 = sshll.u32 %s14511_s23, 4  ;;  %s857_s28 = int_to_ptr.vmem [resolvable:$true] %s856_s28 }
 0x55c   :  { %s14112_s30 = scalar_lea.hbm %s17098_s19, 16 }
 0x55d   :  { %p14113_p10 = scmp.ne.s32.totalorder %s17098_s19, %s14112_s30  ;;  %p14116_p11 = scmp.lt.u32.totalorder %s14112_s30, %s17098_s19 }
 0x55f   :  { %p14118_p12 = pnand %p14116_p11, %p14113_p10 }
 0x561   :  { %14121 = shalt.err (!%p14118_p12)
}
 0x562   :  { %s14122_s27 = scalar_lea.vmem %s835_s17, 16  ;;  %s14126_s6 = scalar_lea.vmem %s835_s17, 32 }
 0x563   :  { %p14123_p13 = scmp.ne.s32.totalorder %s835_s17, %s14122_s27  ;;  %p14127_p0 = scmp.lt.s32.totalorder %s835_s17, %s835_s17 }
 0x564   :  { %p14128_p1 = scmp.lt.s32.totalorder %s14126_s6, %s14122_s27 }
 0x566   :  { %p14129_p2 = por %p14128_p1, %p14127_p0 }
 0x568   :  { %p14130_p3 = pnand %p14129_p2, %p14123_p13 }
 0x56a   :  { %14133 = shalt.err (!%p14130_p3)
}
 0x56b   :  { %s17099_s1 = sld [smem:[#allocation191_spill]] }
 0x56c   :  { %837 = dma.hbm_to_vmem [thread:$0]  %s17098_s19, 16, %s835_s17, [#allocation88]  }
 0x571   :  { %s14134_s12 = scalar_lea.hbm %s17099_s1, 16 }
 0x572   :  { %p14135_p4 = scmp.ne.s32.totalorder %s17099_s1, %s14134_s12  ;;  %p14138_p5 = scmp.lt.u32.totalorder %s14134_s12, %s17099_s1 }
 0x574   :  { %p14140_p6 = pnand %p14138_p5, %p14135_p4 }
 0x576   :  { %14143 = shalt.err (!%p14140_p6)
}
 0x577   :  { %s14144_s24 = scalar_lea.vmem %s857_s28, 16  ;;  %s14148_s25 = scalar_lea.vmem %s857_s28, 32 }
 0x578   :  { %p14145_p7 = scmp.ne.s32.totalorder %s857_s28, %s14144_s24  ;;  %p14149_p8 = scmp.lt.s32.totalorder %s857_s28, %s857_s28 }
 0x579   :  { %p14150_p9 = scmp.lt.s32.totalorder %s14148_s25, %s14144_s24 }
 0x57b   :  { %p14151_p10 = por %p14150_p9, %p14149_p8 }
 0x57d   :  { %p14152_p11 = pnand %p14151_p10, %p14145_p7 }
 0x57f   :  { %14155 = shalt.err (!%p14152_p11)
}
 0x580   :  { %s17100_s0 = sld [smem:[#allocation194_spill]]  ;;  %s14512_s5 = smov [#allocation95]  }
 0x581   :  { %859 = dma.hbm_to_vmem [thread:$0]  %s17099_s1, 16, %s857_s28, [#allocation91]  }
 0x582   :  { %s880_s13 = sshll.u32 %s14512_s5, 4  ;;  %s14513_s26 = smov [#allocation98]   ;;  %s881_s13 = int_to_ptr.vmem [resolvable:$true] %s880_s13 }
 0x583   :  { %s904_s14 = sshll.u32 %s14513_s26, 4  ;;  %s905_s14 = int_to_ptr.vmem [resolvable:$true] %s904_s14 }
 0x586   :  { %s14156_s8 = scalar_lea.hbm %s17100_s0, 16 }
 0x587   :  { %p14157_p12 = scmp.ne.s32.totalorder %s17100_s0, %s14156_s8  ;;  %p14160_p13 = scmp.lt.u32.totalorder %s14156_s8, %s17100_s0 }
 0x589   :  { %p14162_p0 = pnand %p14160_p13, %p14157_p12 }
 0x58b   :  { %14165 = shalt.err (!%p14162_p0)
}
 0x58c   :  { %s14166_s9 = scalar_lea.vmem %s881_s13, 16  ;;  %s14170_s3 = scalar_lea.vmem %s881_s13, 32 }
 0x58d   :  { %p14167_p1 = scmp.ne.s32.totalorder %s881_s13, %s14166_s9  ;;  %p14171_p2 = scmp.lt.s32.totalorder %s881_s13, %s881_s13 }
 0x58e   :  { %p14172_p3 = scmp.lt.s32.totalorder %s14170_s3, %s14166_s9 }
 0x590   :  { %p14173_p4 = por %p14172_p3, %p14171_p2 }
 0x592   :  { %p14174_p5 = pnand %p14173_p4, %p14167_p1 }
 0x594   :  { %14177 = shalt.err (!%p14174_p5)
}
 0x595   :  { %s17101_s4 = sld [smem:[#allocation197_spill]] }
 0x596   :  { %883 = dma.hbm_to_vmem [thread:$0]  %s17100_s0, 16, %s881_s13, [#allocation94]  }
 0x59b   :  { %s14178_s16 = scalar_lea.hbm %s17101_s4, 16 }
 0x59c   :  { %p14179_p6 = scmp.ne.s32.totalorder %s17101_s4, %s14178_s16  ;;  %p14182_p7 = scmp.lt.u32.totalorder %s14178_s16, %s17101_s4 }
 0x59e   :  { %p14184_p8 = pnand %p14182_p7, %p14179_p6 }
 0x5a0   :  { %14187 = shalt.err (!%p14184_p8)
}
 0x5a1   :  { %s14188_s18 = scalar_lea.vmem %s905_s14, 16  ;;  %s14192_s22 = scalar_lea.vmem %s905_s14, 32 }
 0x5a2   :  { %p14189_p9 = scmp.ne.s32.totalorder %s905_s14, %s14188_s18  ;;  %p14193_p10 = scmp.lt.s32.totalorder %s905_s14, %s905_s14 }
 0x5a3   :  { %p14194_p11 = scmp.lt.s32.totalorder %s14192_s22, %s14188_s18 }
 0x5a5   :  { %p14195_p12 = por %p14194_p11, %p14193_p10 }
 0x5a7   :  { %p14196_p13 = pnand %p14195_p12, %p14189_p9 }
 0x5a9   :  { %14199 = shalt.err (!%p14196_p13)
}
 0x5aa   :  { %s17102_s2 = sld [smem:[#allocation199_spill]]  ;;  %s14514_s29 = smov [#allocation101]  }
 0x5ab   :  { %907 = dma.hbm_to_vmem [thread:$0]  %s17101_s4, 16, %s905_s14, [#allocation97]  }
 0x5ac   :  { %s926_s7 = sshll.u32 %s14514_s29, 4  ;;  %s14515_s19 = smov [#allocation104]   ;;  %s927_s7 = int_to_ptr.vmem [resolvable:$true] %s926_s7 }
 0x5ad   :  { %s951_s20 = sshll.u32 %s14515_s19, 4  ;;  %s952_s20 = int_to_ptr.vmem [resolvable:$true] %s951_s20 }
 0x5b0   :  { %s14200_s17 = scalar_lea.hbm %s17102_s2, 16 }
 0x5b1   :  { %p14201_p0 = scmp.ne.s32.totalorder %s17102_s2, %s14200_s17  ;;  %p14204_p1 = scmp.lt.u32.totalorder %s14200_s17, %s17102_s2 }
 0x5b3   :  { %p14206_p2 = pnand %p14204_p1, %p14201_p0 }
 0x5b5   :  { %14209 = shalt.err (!%p14206_p2)
}
 0x5b6   :  { %s14210_s23 = scalar_lea.vmem %s927_s7, 16  ;;  %s14214_s28 = scalar_lea.vmem %s927_s7, 32 }
 0x5b7   :  { %p14211_p3 = scmp.ne.s32.totalorder %s927_s7, %s14210_s23  ;;  %p14215_p4 = scmp.lt.s32.totalorder %s927_s7, %s927_s7 }
 0x5b8   :  { %p14216_p5 = scmp.lt.s32.totalorder %s14214_s28, %s14210_s23 }
 0x5ba   :  { %p14217_p6 = por %p14216_p5, %p14215_p4 }
 0x5bc   :  { %p14218_p7 = pnand %p14217_p6, %p14211_p3 }
 0x5be   :  { %14221 = shalt.err (!%p14218_p7)
}
 0x5bf   :  { %s17103_s30 = sld [smem:[#allocation203_spill]] }
 0x5c0   :  { %929 = dma.hbm_to_vmem [thread:$0]  %s17102_s2, 16, %s927_s7, [#allocation100]  }
 0x5c5   :  { %s14222_s27 = scalar_lea.hbm %s17103_s30, 256 }
 0x5c6   :  { %p14223_p8 = scmp.ne.s32.totalorder %s17103_s30, %s14222_s27  ;;  %p14226_p9 = scmp.lt.u32.totalorder %s14222_s27, %s17103_s30 }
 0x5c8   :  { %p14228_p10 = pnand %p14226_p9, %p14223_p8 }
 0x5ca   :  { %14231 = shalt.err (!%p14228_p10)
}
 0x5cb   :  { %s14232_s6 = scalar_lea.vmem %s952_s20, 256  ;;  %p14237_p12 = scmp.lt.s32.totalorder %s952_s20, %s952_s20 }
 0x5cc   :  { %p14233_p11 = scmp.ne.s32.totalorder %s952_s20, %s14232_s6  ;;  %p14238_p13 = scmp.lt.s32.totalorder %s14232_s6, %s14232_s6 }
 0x5ce   :  { %p14239_p0 = por %p14238_p13, %p14237_p12 }
 0x5d0   :  { %p14240_p1 = pnand %p14239_p0, %p14233_p11 }
 0x5d2   :  { %14243 = shalt.err (!%p14240_p1)
}
 0x5d3   :  { %957 = dma.hbm_to_vmem [thread:$0]  %s17103_s30, 256, %s952_s20, [#allocation103], %s14449_s10, %s14449_s10, %s14450_s15  }
 0x5d4   :  { %14288 = dma.done.wait [#allocation7], 2048  }
 0x5d5   :  { %14289 = vsyncadd [#allocation7], 4294965248 }
 0x5d6   :  { %14290 = dma.done.wait [#allocation10], 17408  }
 0x5d7   :  { %14291 = vsyncadd [#allocation10], 4294949888 }
 0x5d8   :  { %14292 = dma.done.wait [#allocation13], 256  }
 0x5d9   :  { %14293 = vsyncadd [#allocation13], 4294967040 }
 0x5da   :  { %14294 = dma.done.wait [#allocation16], 144  }
 0x5db   :  { %14295 = vsyncadd [#allocation16], 4294967152 }
 0x5dc   :  { %14296 = dma.done.wait [#allocation19], 1040  }
 0x5dd   :  { %14297 = vsyncadd [#allocation19], 4294966256 }
 0x5de   :  { %14298 = dma.done.wait [#allocation22], 2080  }
 0x5df   :  { %14299 = vsyncadd [#allocation22], 4294965216 }
 0x5e0   :  { %14300 = dma.done.wait [#allocation25], 2064  }
 0x5e1   :  { %14301 = vsyncadd [#allocation25], 4294965232 }
 0x5e2   :  { %14302 = dma.done.wait [#allocation28], 48  }
 0x5e3   :  { %14303 = vsyncadd [#allocation28], 4294967248 }
 0x5e4   :  { %14304 = dma.done.wait [#allocation31], 48  }
 0x5e5   :  { %14305 = vsyncadd [#allocation31], 4294967248 }
 0x5e6   :  { %14306 = dma.done.wait [#allocation34], 1152  }
 0x5e7   :  { %14307 = vsyncadd [#allocation34], 4294966144 }
 0x5e8   :  { %14308 = dma.done.wait [#allocation37], 1040  }
 0x5e9   :  { %14309 = vsyncadd [#allocation37], 4294966256 }
 0x5ea   :  { %14310 = dma.done.wait [#allocation40], 1040  }
 0x5eb   :  { %14311 = vsyncadd [#allocation40], 4294966256 }
 0x5ec   :  { %14312 = dma.done.wait [#allocation43], 1040  }
 0x5ed   :  { %14313 = vsyncadd [#allocation43], 4294966256 }
 0x5ee   :  { %14314 = dma.done.wait [#allocation46], 1040  }
 0x5ef   :  { %14315 = vsyncadd [#allocation46], 4294966256 }
 0x5f0   :  { %14316 = dma.done.wait [#allocation49], 1040  }
 0x5f1   :  { %14317 = vsyncadd [#allocation49], 4294966256 }
 0x5f2   :  { %14318 = dma.done.wait [#allocation52], 1040  }
 0x5f3   :  { %14319 = vsyncadd [#allocation52], 4294966256 }
 0x5f4   :  { %14320 = dma.done.wait [#allocation55], 1040  }
 0x5f5   :  { %14321 = vsyncadd [#allocation55], 4294966256 }
 0x5f6   :  { %14322 = dma.done.wait [#allocation58], 1040  }
 0x5f7   :  { %14323 = vsyncadd [#allocation58], 4294966256 }
 0x5f8   :  { %14324 = dma.done.wait [#allocation61], 1040  }
 0x5f9   :  { %14325 = vsyncadd [#allocation61], 4294966256 }
 0x5fa   :  { %14326 = dma.done.wait [#allocation64], 528  }
 0x5fb   :  { %14327 = vsyncadd [#allocation64], 4294966768 }
 0x5fc   :  { %14328 = dma.done.wait [#allocation67], 1040  }
 0x5fd   :  { %14329 = vsyncadd [#allocation67], 4294966256 }
 0x5fe   :  { %14330 = dma.done.wait [#allocation70], 528  }
 0x5ff   :  { %14331 = vsyncadd [#allocation70], 4294966768 }
 0x600   :  { %14332 = dma.done.wait [#allocation73], 528  }
 0x601   :  { %14333 = vsyncadd [#allocation73], 4294966768 }
 0x602   :  { %14334 = dma.done.wait [#allocation76], 528  }
 0x603   :  { %14335 = vsyncadd [#allocation76], 4294966768 }
 0x604   :  { %14336 = dma.done.wait [#allocation79], 32  }
 0x605   :  { %14337 = vsyncadd [#allocation79], 4294967264 }
 0x606   :  { %14338 = dma.done.wait [#allocation82], 528  }
 0x607   :  { %14339 = vsyncadd [#allocation82], 4294966768 }
 0x608   :  { %14340 = dma.done.wait [#allocation85], 528  }
 0x609   :  { %14341 = vsyncadd [#allocation85], 4294966768 }
 0x60a   :  { %14342 = dma.done.wait [#allocation88], 528  }
 0x60b   :  { %14343 = vsyncadd [#allocation88], 4294966768 }
 0x60c   :  { %14344 = dma.done.wait [#allocation91], 528  }
 0x60d   :  { %14345 = vsyncadd [#allocation91], 4294966768 }
 0x60e   :  { %14346 = dma.done.wait [#allocation94], 272  }
 0x60f   :  { %14347 = vsyncadd [#allocation94], 4294967024 }
 0x610   :  { %14348 = dma.done.wait [#allocation97], 32  }
 0x611   :  { %14349 = vsyncadd [#allocation97], 4294967264 }
 0x612   :  { %14350 = dma.done.wait [#allocation100], 272  }
 0x613   :  { %14351 = vsyncadd [#allocation100], 4294967024 }
 0x614   :  { %14352 = dma.done.wait [#allocation103], 384  }
 0x615   :  { %14353 = vsyncadd [#allocation103], 4294966912  ;;  %s17104_s10 = sld [smem:[#allocation143_spill]]  ;;  %s17105_s15 = sld [smem:[#allocation144_spill]]  ;;  %v16977_v4 = vmov 0   ;;  %v16979_v5 = vmov 0.0  }
 0x616   :  { %12307 = vset.pattern.permute.xlu1 %v16977_v4  ;;  %12306 = vset.pattern.permute.xlu0 %v16977_v4  ;;  %v1352_v10 = vld [vmem:[#allocation11 + $0x8] sm:$0xff]  ;;  %v1351_v11 = vld [vmem:[#allocation11] sm:$0xff]  ;;  %vm1359_vm0 = vcmask 64512   ;;  %v1354_v13 = vld [vmem:[#allocation11 + $0x18] sm:$0xff]  ;;  %s14519_s1 = smov 64   ;;  %s14520_s12 = smov 32  }
 0x617   :  { %1427 = vmatprep.mubr.f32.mxu1 %v16979_v5  ;;  %1363 = vmatprep.subr.mxu1 %v1352_v10  ;;  %v1353_v14 = vld [vmem:[#allocation11 + $0x10] sm:$0xff]  ;;  %v1356_v15 = vld [vmem:[#allocation11 + $0x28] sm:$0xff]  ;;  %v1229_v16 = vld [vmem:[#allocation6] sm:$0xff]  ;;  %s14521_s24 = smov 96   ;;  %s17120_s25 = sld [smem:[#allocation153_spill]] }
 0x618   :  { %1364 = vmatpush1.msra.mxu1 %v1351_v11  ;;  %v1230_v19 = vld [vmem:[#allocation6 + $0x8] sm:$0xff]  ;;  %v1231_v21 = vld [vmem:[#allocation6 + $0x10] sm:$0xff]  ;;  %v1232_v22 = vld [vmem:[#allocation6 + $0x18] sm:$0xff]  ;;  %s17129_s0 = sld [smem:[#allocation176_spill]]  ;;  %s17130_s5 = sld [smem:[#allocation182_spill]] }
 0x619   :  { %1434 = vmatprep.subr.mxu1 %v1354_v13  ;;  %v11335_v20 = vpack.c.bf16 %v1230_v19, %v1229_v16  ;;  %v1355_v23 = vld [vmem:[#allocation11 + $0x20] sm:$0xff]  ;;  %v1358_v25 = vld [vmem:[#allocation11 + $0x38] sm:$0xff]  ;;  %v11339_v27 = vpack.c.bf16 %v1232_v22, %v1231_v21  ;;  %v1234_v29 = vld [vmem:[#allocation6 + $0x28] sm:$0xff]  ;;  %s17131_s13 = sld [smem:[#allocation195_spill]]  ;;  %s17132_s26 = sld [smem:[#allocation192_spill]] }
 0x61a   :  { %v1233_v28 = vld [vmem:[#allocation6 + $0x20] sm:$0xff]  ;;  %v1357_v30 = vld [vmem:[#allocation11 + $0x30] sm:$0xff]  ;;  %v1236_v33 = vld [vmem:[#allocation6 + $0x38] sm:$0xff]  ;;  %s17133_s14 = sld [smem:[#allocation202_spill]]  ;;  %s17134_s8 = sld [smem:[#allocation208_spill]] }
 0x61b   :  { %v1175_v6 = vld [vmem:[%s17104_s10 + $0x10] sm:$0xff]  ;;  %v1173_v7 = vld [vmem:[%s17104_s10] sm:$0xff]  ;;  %v1176_v8 = vld [vmem:[%s17104_s10 + $0x18] sm:$0xff]  ;;  %11336 = vmatprep.subr.bf16.mxu0 %v11335_v20  ;;  %v11343_v31 = vpack.c.bf16 %v1234_v29, %v1233_v28  ;;  %s17135_s9 = sld [smem:[#allocation201_spill]]  ;;  %s17136_s3 = sld [smem:[#allocation207_spill]] }
 0x61c   :  { %1188 = vperm.xlu1 %12307, %v1175_v6   ;;  %1182 = vperm.xlu0 %12306, %v1173_v7   ;;  %v1174_v9 = vld [vmem:[%s17104_s10 + $0x8] sm:$0xff]  ;;  %v1350_v12 = vld [vmem:[%s17105_s15] sm:$0xff]  ;;  %v1180_v24 = vld [vmem:[%s17104_s10 + $0x38] sm:$0xff]  ;;  %s17137_s4 = sld [smem:[#allocation209_spill]]  ;;  %s17138_s16 = sld [smem:[#allocation205_spill]] }
 0x61d   :  { %v1178_v17 = vld [vmem:[%s17104_s10 + $0x28] sm:$0xff]  ;;  %v1177_v18 = vld [vmem:[%s17104_s10 + $0x20] sm:$0xff]  ;;  %9443 = vmatmul.mubr.msk.f32.vlgmr.msra.gmra.mrb[0].mxu1 %vm1359_vm0, %v1350_v12  ;;  %v1179_v26 = vld [vmem:[%s17104_s10 + $0x30] sm:$0xff]  ;;  %11338 = vmatpush3.bf16.msra.mxu0 %v11335_v20  ;;  %s17139_s18 = sld [smem:[#allocation213_spill]]  ;;  %s17140_s22 = sld [smem:[#allocation211_spill]] }
 0x61e   :  { %1435 = vmatpush1.msra.mxu1 %v1353_v14  ;;  %1498 = vmatprep.mubr.f32.mxu1 %v16979_v5  ;;  %v1235_v32 = vld [vmem:[#allocation6 + $0x30] sm:$0xff]  ;;  %v1237_v35 = vld [vmem:[#allocation6 + $0x40] sm:$0xff]  ;;  %v1238_v36 = vld [vmem:[#allocation6 + $0x48] sm:$0xff]  ;;  %s17143_s2 = sld [smem:[#allocation204_spill]]  ;;  %s17144_s29 = sld [smem:[#allocation210_spill]] }
 0x61f   :  { %1505 = vmatprep.subr.mxu1 %v1356_v15  ;;  %11340 = vmatprep.subr.bf16.mxu0 %v11339_v27  ;;  %v11347_v34 = vpack.c.bf16 %v1236_v33, %v1235_v32  ;;  %v1745_v37 = vld [vmem:[#allocation9 + $0x80] sm:$0xff]  ;;  %v1746_v38 = vld [vmem:[#allocation9 + $0x88] sm:$0xff]  ;;  %v1747_v43 = vld [vmem:[#allocation9 + $0x90] sm:$0xff]  ;;  %v11351_v44 = vpack.c.bf16 %v1238_v36, %v1237_v35  ;;  %s17145_s7 = sld [smem:[#allocation206_spill]]  ;;  %s14531_s19 = smov [#allocation105]  }
 0x620   :  { %1191 = vperm.xlu1 %12307, %v1176_v8   ;;  %1185 = vperm.xlu0 %12306, %v1174_v9   ;;  %v1729_v39 = vld [vmem:[#allocation9] sm:$0xff]  ;;  %v11367_v40 = vpack.c.bf16 %v1746_v38, %v1745_v37  ;;  %v1730_v41 = vld [vmem:[#allocation9 + $0x8] sm:$0xff]  ;;  %v1748_v45 = vld [vmem:[#allocation9 + $0x98] sm:$0xff]  ;;  %s9281_s20 = sshll.u32 %s14531_s19, 4  ;;  %s9282_s20 = int_to_ptr.vmem [resolvable:$true] %s9281_s20 }
 0x621   :  { %9444 = vmatmul.mubr.msk.f32.vlgmr.msra.gmra.mrb[2].mxu1 %vm1359_vm0, %v1350_v12  ;;  %11342 = vmatpush3.bf16.msra.mxu0 %v11339_v27  ;;  %v11369_v42 = vpack.c.bf16 %v1730_v41, %v1729_v39  ;;  %v1731_v46 = vld [vmem:[#allocation9 + $0x10] sm:$0xff]  ;;  %v1732_v47 = vld [vmem:[#allocation9 + $0x18] sm:$0xff]  ;;  %v11371_v50 = vpack.c.bf16 %v1748_v45, %v1747_v43  ;;  %v1749_v52 = vld [vmem:[#allocation9 + $0xa0] sm:$0xff]  ;;  %v1171_v39 = vlaneseq  ;;  %s14244_s17 = scalar_lea.vmem %s9282_s20, 128  ;;  %p14249_p3 = scmp.lt.s32.totalorder %s9282_s20, %s9282_s20 }
 0x622   :  { %1506 = vmatpush1.msra.mxu1 %v1355_v23  ;;  %1569 = vmatprep.mubr.f32.mxu1 %v16979_v5  ;;  %v1239_v48 = vld [vmem:[#allocation6 + $0x50] sm:$0xff]  ;;  %v1240_v49 = vld [vmem:[#allocation6 + $0x58] sm:$0xff]  ;;  %v11373_v51 = vpack.c.bf16 %v1732_v47, %v1731_v46  ;;  %v1750_v53 = vld [vmem:[#allocation9 + $0xa8] sm:$0xff]  ;;  %v14518_v47 = vmov 1.0   ;;  %p14245_p2 = scmp.ne.s32.totalorder %s9282_s20, %s14244_s17  ;;  %p14250_p4 = scmp.lt.s32.totalorder %s14244_s17, %s14244_s17 }
 0x623   :  { %1576 = vmatprep.subr.mxu1 %v1358_v25  ;;  %11344 = vmatprep.subr.bf16.mxu0 %v11343_v31  ;;  %v11375_v54 = vpack.c.bf16 %v1750_v53, %v1749_v52  ;;  %v1733_v55 = vld [vmem:[#allocation9 + $0x20] sm:$0xff]  ;;  %v1734_v56 = vld [vmem:[#allocation9 + $0x28] sm:$0xff]  ;;  %v11355_v57 = vpack.c.bf16 %v1240_v49, %v1239_v48  ;;  %v1751_v61 = vld [vmem:[#allocation9 + $0xb0] sm:$0xff] }
 0x624   :  { %1197 = vperm.xlu1 %12307, %v1178_v17   ;;  %1194 = vperm.xlu0 %12306, %v1177_v18   ;;  %v1241_v58 = vld [vmem:[#allocation6 + $0x60] sm:$0xff]  ;;  %v1242_v59 = vld [vmem:[#allocation6 + $0x68] sm:$0xff]  ;;  %v11377_v60 = vpack.c.bf16 %v1734_v56, %v1733_v55  ;;  %v1752_v62 = vld [vmem:[#allocation9 + $0xb8] sm:$0xff]  ;;  %p14251_p5 = por %p14250_p4, %p14249_p3 }
 0x625   :  { %9445 = vmatmul.mubr.msk.f32.vlgmr.msra.gmra.mrb[4].mxu1 %vm1359_vm0, %v1350_v12  ;;  %11346 = vmatpush3.bf16.msra.mxu0 %v11343_v31  ;;  %v11379_v63 = vpack.c.bf16 %v1752_v62, %v1751_v61  ;;  %v1735_v0 = vld [vmem:[#allocation9 + $0x30] sm:$0xff]  ;;  %v1736_v1 = vld [vmem:[#allocation9 + $0x38] sm:$0xff]  ;;  %v1753_v2 = vld [vmem:[#allocation9 + $0xc0] sm:$0xff]  ;;  %v11359_v3 = vpack.c.bf16 %v1242_v59, %v1241_v58 }
 0x626   :  { %1577 = vmatpush1.msra.mxu1 %v1357_v30  ;;  %1640 = vmatprep.mubr.f32.mxu1 %v16979_v5  ;;  %v1754_v6 = vld [vmem:[#allocation9 + $0xc8] sm:$0xff]  ;;  %v1243_v7 = vld [vmem:[#allocation6 + $0x70] sm:$0xff]  ;;  %v1244_v8 = vld [vmem:[#allocation6 + $0x78] sm:$0xff]  ;;  %v11381_v9 = vpack.c.bf16 %v1736_v1, %v1735_v0  ;;  %p14252_p6 = pnand %p14251_p5, %p14245_p2 }
 0x627   :  { %11348 = vmatprep.subr.bf16.mxu0 %v11347_v34  ;;  %11368 = vmatprep.subr.bf16.mxu1 %v11367_v40  ;;  %v11383_v10 = vpack.c.bf16 %v1754_v6, %v1753_v2  ;;  %v1737_v11 = vld [vmem:[#allocation9 + $0x40] sm:$0xff]  ;;  %v1755_v13 = vld [vmem:[#allocation9 + $0xd0] sm:$0xff]  ;;  %v1756_v14 = vld [vmem:[#allocation9 + $0xd8] sm:$0xff]  ;;  %v11363_v15 = vpack.c.bf16 %v1244_v8, %v1243_v7  ;;  %v1172_v40 = vand.u32 127, %v1171_v39 }
 0x628   :  { %1203 = vperm.xlu1 %12307, %v1180_v24   ;;  %1200 = vperm.xlu0 %12306, %v1179_v26   ;;  %v1777_v16 = vld [vmem:[#allocation9 + $0x180] sm:$0xff]  ;;  %v1778_v17 = vld [vmem:[#allocation9 + $0x188] sm:$0xff]  ;;  %v11387_v19 = vpack.c.bf16 %v1756_v14, %v1755_v13  ;;  %v1739_v20 = vld [vmem:[#allocation9 + $0x50] sm:$0xff] }
 0x629   :  { %9446 = vmatmul.mubr.msk.f32.vlgmr.msra.gmra.mrb[6].mxu1 %vm1359_vm0, %v1350_v12  ;;  %11350 = vmatpush3.bf16.msra.mxu0 %v11347_v34  ;;  %v1738_v12 = vld [vmem:[#allocation9 + $0x48] sm:$0xff]  ;;  %v1740_v21 = vld [vmem:[#allocation9 + $0x58] sm:$0xff]  ;;  %v1757_v22 = vld [vmem:[#allocation9 + $0xe0] sm:$0xff]  ;;  %v11399_v24 = vpack.c.bf16 %v1778_v17, %v1777_v16 }
 0x62a   :  { %11370 = vmatpush3.bf16.msra.mxu1 %v11369_v42  ;;  %11352 = vmatprep.subr.bf16.mxu0 %v11351_v44  ;;  %v11385_v18 = vpack.c.bf16 %v1738_v12, %v1737_v11  ;;  %v1758_v23 = vld [vmem:[#allocation9 + $0xe8] sm:$0xff]  ;;  %v11389_v25 = vpack.c.bf16 %v1740_v21, %v1739_v20  ;;  %v1741_v27 = vld [vmem:[#allocation9 + $0x60] sm:$0xff]  ;;  %v1759_v30 = vld [vmem:[#allocation9 + $0xf0] sm:$0xff] }
 0x62b   :  { %11372 = vmatprep.subr.bf16.mxu1 %v11371_v50  ;;  %v11391_v26 = vpack.c.bf16 %v1758_v23, %v1757_v22  ;;  %v1742_v28 = vld [vmem:[#allocation9 + $0x68] sm:$0xff]  ;;  %v1760_v31 = vld [vmem:[#allocation9 + $0xf8] sm:$0xff]  ;;  %v1743_v32 = vld [vmem:[#allocation9 + $0x70] sm:$0xff] }
 0x62c   :  { %v11393_v29 = vpack.c.bf16 %v1742_v28, %v1741_v27  ;;  %v11395_v33 = vpack.c.bf16 %v1760_v31, %v1759_v30  ;;  %v1744_v34 = vld [vmem:[#allocation9 + $0x78] sm:$0xff]  ;;  %v1809_v36 = vld [vmem:[#allocation9 + $0x280] sm:$0xff]  ;;  %v1810_v37 = vld [vmem:[#allocation9 + $0x288] sm:$0xff] }
 0x62d   :  { %11354 = vmatpush3.bf16.msra.mxu0 %v11351_v44  ;;  %v11397_v35 = vpack.c.bf16 %v1744_v34, %v1743_v32  ;;  %v11431_v38 = vpack.c.bf16 %v1810_v37, %v1809_v36  ;;  %v1761_v43 = vld [vmem:[#allocation9 + $0x100] sm:$0xff]  ;;  %v1762_v44 = vld [vmem:[#allocation9 + $0x108] sm:$0xff]  ;;  %v1779_v45 = vld [vmem:[#allocation9 + $0x190] sm:$0xff]  ;;  %v15350_v36 = vshrl.u32 %v1171_v39, 7 }
 0x62e   :  { %11374 = vmatpush3.bf16.msra.mxu1 %v11373_v51  ;;  %11356 = vmatprep.subr.bf16.mxu0 %v11355_v57  ;;  %v1780_v46 = vld [vmem:[#allocation9 + $0x198] sm:$0xff]  ;;  %v11401_v48 = vpack.c.bf16 %v1762_v44, %v1761_v43  ;;  %v1763_v52 = vld [vmem:[#allocation9 + $0x110] sm:$0xff]  ;;  %v1782_v55 = vld [vmem:[#allocation9 + $0x1a8] sm:$0xff] }
 0x62f   :  { %11376 = vmatprep.subr.bf16.mxu1 %v11375_v54  ;;  %v11403_v51 = vpack.c.bf16 %v1780_v46, %v1779_v45  ;;  %v1764_v53 = vld [vmem:[#allocation9 + $0x118] sm:$0xff]  ;;  %v1781_v54 = vld [vmem:[#allocation9 + $0x1a0] sm:$0xff]  ;;  %v1766_v61 = vld [vmem:[#allocation9 + $0x128] sm:$0xff]  ;;  %v15353_v37 = vsub.s32 0, %v15350_v36  ;;  %v1663_v44 = vsub.s32 3, %v15350_v36 }
 0x630   :  { %v11405_v56 = vpack.c.bf16 %v1764_v53, %v1763_v52  ;;  %v11407_v59 = vpack.c.bf16 %v1782_v55, %v1781_v54  ;;  %v1783_v62 = vld [vmem:[#allocation9 + $0x1b0] sm:$0xff]  ;;  %v1768_v6 = vld [vmem:[#allocation9 + $0x138] sm:$0xff]  ;;  %v1785_v7 = vld [vmem:[#allocation9 + $0x1c0] sm:$0xff]  ;;  %v1667_v53 = vsub.s32 4, %v15350_v36 }
 0x631   :  { %11358 = vmatpush3.bf16.msra.mxu0 %v11355_v57  ;;  %v1786_v8 = vld [vmem:[#allocation9 + $0x1c8] sm:$0xff]  ;;  %v1769_v12 = vld [vmem:[#allocation9 + $0x140] sm:$0xff]  ;;  %v1787_v14 = vld [vmem:[#allocation9 + $0x1d0] sm:$0xff] }
 0x632   :  { %11378 = vmatpush3.bf16.msra.mxu1 %v11377_v60  ;;  %11360 = vmatprep.subr.bf16.mxu0 %v11359_v3  ;;  %v1765_v60 = vld [vmem:[#allocation9 + $0x120] sm:$0xff]  ;;  %v11415_v11 = vpack.c.bf16 %v1786_v8, %v1785_v7  ;;  %v1770_v13 = vld [vmem:[#allocation9 + $0x148] sm:$0xff]  ;;  %v1792_v27 = vld [vmem:[#allocation9 + $0x1f8] sm:$0xff]  ;;  %v1675_v8 = vsub.s32 6, %v15350_v36 }
 0x633   :  { %11380 = vmatprep.subr.bf16.mxu1 %v11379_v63  ;;  %v1784_v63 = vld [vmem:[#allocation9 + $0x1b8] sm:$0xff]  ;;  %v11409_v0 = vpack.c.bf16 %v1766_v61, %v1765_v60  ;;  %v11417_v16 = vpack.c.bf16 %v1770_v13, %v1769_v12  ;;  %v1789_v20 = vld [vmem:[#allocation9 + $0x1e0] sm:$0xff]  ;;  %v1790_v21 = vld [vmem:[#allocation9 + $0x1e8] sm:$0xff]  ;;  %v1679_v13 = vsub.s32 7, %v15350_v36 }
 0x634   :  { %v11411_v2 = vpack.c.bf16 %v1784_v63, %v1783_v62  ;;  %v11423_v23 = vpack.c.bf16 %v1790_v21, %v1789_v20  ;;  %v1775_v30 = vld [vmem:[#allocation9 + $0x170] sm:$0xff]  ;;  %v1776_v31 = vld [vmem:[#allocation9 + $0x178] sm:$0xff]  ;;  %v1841_v32 = vld [vmem:[#allocation9 + $0x380] sm:$0xff] }
 0x635   :  { %11362 = vmatpush3.bf16.msra.mxu0 %v11359_v3  ;;  %v1767_v3 = vld [vmem:[#allocation9 + $0x130] sm:$0xff]  ;;  %v11429_v34 = vpack.c.bf16 %v1776_v31, %v1775_v30  ;;  %v1793_v46 = vld [vmem:[#allocation9 + $0x200] sm:$0xff]  ;;  %v1812_v52 = vld [vmem:[#allocation9 + $0x298] sm:$0xff] }
 0x636   :  { %11382 = vmatpush3.bf16.msra.mxu1 %v11381_v9  ;;  %11364 = vmatprep.subr.bf16.mxu0 %v11363_v15  ;;  %v1825_v61 = vld [vmem:[#allocation9 + $0x300] sm:$0xff] }
 0x637   :  { %11384 = vmatprep.subr.bf16.mxu1 %v11383_v10  ;;  %v11413_v10 = vpack.c.bf16 %v1768_v6, %v1767_v3  ;;  %v1795_v3 = vld [vmem:[#allocation9 + $0x210] sm:$0xff]  ;;  %v1796_v6 = vld [vmem:[#allocation9 + $0x218] sm:$0xff]  ;;  %v1845_v30 = vld [vmem:[#allocation9 + $0x3a0] sm:$0xff] }
 0x638   :  { %v1801_v63 = vld [vmem:[#allocation9 + $0x240] sm:$0xff] }
 0x639   :  { %11366 = vmatpush3.bf16.msra.mxu0 %v11363_v15  ;;  %v1788_v15 = vld [vmem:[#allocation9 + $0x1d8] sm:$0xff] }
 0x63a   :  { %11386 = vmatpush3.bf16.msra.mxu1 %v11385_v18  ;;  %11400 = vmatprep.subr.bf16.mxu0 %v11399_v24  ;;  %v11419_v17 = vpack.c.bf16 %v1788_v15, %v1787_v14  ;;  %v1771_v18 = vld [vmem:[#allocation9 + $0x150] sm:$0xff]  ;;  %v1773_v24 = vld [vmem:[#allocation9 + $0x160] sm:$0xff] }
 0x63b   :  { %11388 = vmatprep.subr.bf16.mxu1 %v11387_v19  ;;  %v1772_v19 = vld [vmem:[#allocation9 + $0x158] sm:$0xff]  ;;  %v1813_v15 = vld [vmem:[#allocation9 + $0x2a0] sm:$0xff] }
 0x63c   :  { %v11421_v22 = vpack.c.bf16 %v1772_v19, %v1771_v18  ;;  %v11437_v19 = vpack.c.bf16 %v1796_v6, %v1795_v3  ;;  %v1819_v3 = vld [vmem:[#allocation9 + $0x2d0] sm:$0xff]  ;;  %v1820_v6 = vld [vmem:[#allocation9 + $0x2d8] sm:$0xff] }
 0x63e   :  { %11390 = vmatpush3.bf16.msra.mxu1 %v11389_v25  ;;  %v1774_v25 = vld [vmem:[#allocation9 + $0x168] sm:$0xff] }
 0x63f   :  { %11392 = vmatprep.subr.bf16.mxu1 %v11391_v26  ;;  %v1791_v26 = vld [vmem:[#allocation9 + $0x1f0] sm:$0xff]  ;;  %v11425_v28 = vpack.c.bf16 %v1774_v25, %v1773_v24 }
 0x642   :  { %11394 = vmatpush3.bf16.msra.mxu1 %v11393_v29  ;;  %v11427_v29 = vpack.c.bf16 %v1792_v27, %v1791_v26 }
 0x643   :  { %11396 = vmatprep.subr.bf16.mxu1 %v11395_v33  ;;  %v1842_v33 = vld [vmem:[#allocation9 + $0x388] sm:$0xff] }
 0x646   :  { %11398 = vmatpush3.bf16.msra.mxu1 %v11397_v35  ;;  %v11463_v35 = vpack.c.bf16 %v1842_v33, %v1841_v32  ;;  %v1846_v33 = vld [vmem:[#allocation9 + $0x3a8] sm:$0xff] }
 0x647   :  { %11432 = vmatprep.subr.bf16.mxu1 %v11431_v38  ;;  %v1647_v38 = vld [vmem:[#allocation12] sm:$0xff] }
 0x648   :  { %v1664_v55 = vrot.slane %v1647_v38, %v1663_v44  ;;  %v15368_v7 = vrot.slane %v1647_v38, %v1667_v53  ;;  %v15380_v26 = vrot.slane %v1647_v38, %v1675_v8  ;;  %v1680_v32 = vrot.slane %v1647_v38, %v1679_v13  ;;  %v1829_v44 = vld [vmem:[#allocation9 + $0x320] sm:$0xff]  ;;  %v1848_v53 = vld [vmem:[#allocation9 + $0x3b8] sm:$0xff] }
 0x649   :  { %v11451_v13 = vpack.c.bf16 %v1820_v6, %v1819_v3  ;;  %v2403_v3 = vld [vmem:[#allocation21 + $0x30] sm:$0xff]  ;;  %v2406_v6 = vld [vmem:[#allocation21 + $0x48] sm:$0xff] }
 0x69b   :  { %v1189_v41 = vpop.permute.xlu1 %1188  ;;  %v1183_v42 = vpop.permute.xlu0 %1182 }
 0x69c   :  { %vm1205_vm1 = vcmp.eq.s32.totalorder %v1172_v40, %v1183_v42  ;;  %vm1207_vm2 = vcmp.eq.s32.totalorder %v1172_v40, %v1189_v41  ;;  %v1652_v41 = vrot.slane %v1647_v38, %v15353_v37  ;;  %v1659_v42 = vsub.s32 2, %v15350_v36 }
 0x69d   :  { %10435 = vmatprep.mubr.msk.f32.mxu0 %vm1205_vm1, %v14518_v47 }
 0x69f   :  { %v1192_v49 = vpop.permute.xlu1 %1191  ;;  %v1186_v50 = vpop.permute.xlu0 %1185 }
 0x6a0   :  { %vm1206_vm3 = vcmp.eq.s32.totalorder %v1172_v40, %v1186_v50  ;;  %vm1208_vm4 = vcmp.eq.s32.totalorder %v1172_v40, %v1192_v49  ;;  %v1660_v49 = vrot.slane %v1647_v38, %v1659_v42  ;;  %v1794_v50 = vld [vmem:[#allocation9 + $0x208] sm:$0xff] }
 0x6a1   :  { %10436 = vmatmul.mubr.msk.f32.vlgmr.msra.gmra.mrb[0].mxu0 %vm1206_vm3, %v14518_v47  ;;  %v11433_v60 = vpack.c.bf16 %v1794_v50, %v1793_v46  ;;  %v1800_v50 = vld [vmem:[#allocation9 + $0x238] sm:$0xff]  ;;  %vm2588_vm3 = vcmask 261120  }
 0x6a2   :  { %10438 = vmatprep.mubr.msk.f32.mxu0 %vm1207_vm2, %v14518_v47  ;;  %11402 = vmatpush3.bf16.msra.mxu0 %v11401_v48  ;;  %vm2425_vm2 = vcmask 523264  }
 0x6a3   :  { %v1198_v57 = vpop.permute.xlu1 %1197  ;;  %v1195_v58 = vpop.permute.xlu0 %1194  ;;  %11404 = vmatprep.subr.bf16.mxu0 %v11403_v51  ;;  %v1811_v51 = vld [vmem:[#allocation9 + $0x290] sm:$0xff] }
 0x6a4   :  { %vm1209_vm5 = vcmp.eq.s32.totalorder %v1172_v40, %v1195_v58  ;;  %vm1210_vm6 = vcmp.eq.s32.totalorder %v1172_v40, %v1198_v57  ;;  %v11435_v62 = vpack.c.bf16 %v1812_v52, %v1811_v51  ;;  %v1847_v51 = vld [vmem:[#allocation9 + $0x3b0] sm:$0xff] }
 0x6a5   :  { %10439 = vmatmul.mubr.msk.f32.gmra.mrb[2].mxu0 %vm1208_vm4, %v14518_v47  ;;  %vm15529_vm4 = vmpackc.low %vm2588_vm3, %vm2588_vm3 }
 0x6a6   :  { %10441 = vmatprep.mubr.msk.f32.mxu0 %vm1209_vm5, %v14518_v47  ;;  %11406 = vmatpush3.bf16.msra.mxu0 %v11405_v56  ;;  %v1671_v56 = vsub.s32 5, %v15350_v36  ;;  %vm14523_vm5 = vmmov 0  }
 0x6a7   :  { %v1201_v1 = vpop.permute.xlu0 %1200  ;;  %11408 = vmatprep.subr.bf16.mxu0 %v11407_v59  ;;  %v1204_v9 = vpop.permute.xlu1 %1203 }
 0x6a8   :  { %vm1211_vm7 = vcmp.eq.s32.totalorder %v1172_v40, %v1201_v1  ;;  %vm1212_vm8 = vcmp.eq.s32.totalorder %v1172_v40, %v1204_v9  ;;  %v15356_v40 = vsub.s32 1, %v15350_v36  ;;  %v1672_v12 = vrot.slane %v1647_v38, %v1671_v56 }
 0x6a9   :  { %10442 = vmatmul.mubr.msk.f32.gmra.mrb[4].mxu0 %vm1210_vm6, %v14518_v47  ;;  %vm7332_vm6 = vcmask 48128  }
 0x6aa   :  { %10444 = vmatprep.mubr.msk.f32.mxu0 %vm1211_vm7, %v14518_v47  ;;  %11410 = vmatpush3.bf16.msra.mxu0 %v11409_v0  ;;  %v1656_v43 = vrot.slane %v1647_v38, %v15356_v40  ;;  %vm6900_vm7 = vcmask 31744  }
 0x6ab   :  { %11412 = vmatprep.subr.bf16.mxu0 %v11411_v2  ;;  %v1826_v2 = vld [vmem:[#allocation9 + $0x308] sm:$0xff] }
 0x6ac   :  { %v11465_v18 = vpack.c.bf16 %v1826_v2, %v1825_v61  ;;  %v11475_v61 = vpack.c.bf16 %v1848_v53, %v1847_v51  ;;  %v1850_v2 = vld [vmem:[#allocation9 + $0x3c8] sm:$0xff] }
 0x6ad   :  { %10445 = vmatmul.mubr.msk.f32.gmra.mrb[6].mxu0 %vm1212_vm8, %v14518_v47  ;;  %vm8243_vm8 = vcmask 15360  }
 0x6ae   :  { %11414 = vmatpush3.bf16.msra.mxu0 %v11413_v10  ;;  %v1843_v10 = vld [vmem:[#allocation9 + $0x390] sm:$0xff] }
 0x6af   :  { %11416 = vmatprep.subr.bf16.mxu0 %v11415_v11  ;;  %v1844_v11 = vld [vmem:[#allocation9 + $0x398] sm:$0xff] }
 0x6b0   :  { %v11467_v21 = vpack.c.bf16 %v1844_v11, %v1843_v10  ;;  %v1833_v10 = vld [vmem:[#allocation9 + $0x340] sm:$0xff]  ;;  %v1834_v11 = vld [vmem:[#allocation9 + $0x348] sm:$0xff] }
 0x6b2   :  { %11418 = vmatpush3.bf16.msra.mxu0 %v11417_v16  ;;  %v1814_v16 = vld [vmem:[#allocation9 + $0x2a8] sm:$0xff] }
 0x6b3   :  { %11420 = vmatprep.subr.bf16.mxu0 %v11419_v17  ;;  %v11439_v27 = vpack.c.bf16 %v1814_v16, %v1813_v15  ;;  %v1804_v15 = vld [vmem:[#allocation9 + $0x258] sm:$0xff]  ;;  %v1851_v16 = vld [vmem:[#allocation9 + $0x3d0] sm:$0xff] }
 0x6b6   :  { %11422 = vmatpush3.bf16.msra.mxu0 %v11421_v22  ;;  %v1827_v22 = vld [vmem:[#allocation9 + $0x310] sm:$0xff] }
 0x6b7   :  { %11424 = vmatprep.subr.bf16.mxu0 %v11423_v23  ;;  %v1828_v23 = vld [vmem:[#allocation9 + $0x318] sm:$0xff] }
 0x6b8   :  { %v11469_v42 = vpack.c.bf16 %v1828_v23, %v1827_v22  ;;  %v1835_v23 = vld [vmem:[#allocation9 + $0x350] sm:$0xff] }
 0x6ba   :  { %11426 = vmatpush3.bf16.msra.mxu0 %v11425_v28  ;;  %v1797_v28 = vld [vmem:[#allocation9 + $0x220] sm:$0xff] }
 0x6bb   :  { %11428 = vmatprep.subr.bf16.mxu0 %v11427_v29  ;;  %v1798_v29 = vld [vmem:[#allocation9 + $0x228] sm:$0xff] }
 0x6be   :  { %11430 = vmatpush3.bf16.msra.mxu0 %v11429_v34  ;;  %v1815_v34 = vld [vmem:[#allocation9 + $0x2b0] sm:$0xff] }
 0x6bf   :  { %11464 = vmatprep.subr.bf16.mxu0 %v11463_v35  ;;  %v1816_v35 = vld [vmem:[#allocation9 + $0x2b8] sm:$0xff] }
 0x6f0   :  { %v1429_v45 = vpop.f32.mrb[0].mxu1 }
 0x6f1   :  { %v1689_v48 = vsub.f32 %v1429_v45, %v1652_v41  ;;  %v1431_v39 = vpop.f32.mrb[1].mxu1  ;;  %v1830_v45 = vld [vmem:[#allocation9 + $0x328] sm:$0xff] }
 0x6f2   :  { %v1690_v54 = vsub.f32 %v1431_v39, %v1656_v43  ;;  %v11441_v43 = vpack.c.bf16 %v1798_v29, %v1797_v28  ;;  %v11443_v39 = vpack.c.bf16 %v1816_v35, %v1815_v34  ;;  %v1805_v29 = vld [vmem:[#allocation9 + $0x260] sm:$0xff]  ;;  %v1824_v34 = vld [vmem:[#allocation9 + $0x2f8] sm:$0xff] }
 0x6f3   :  { %v1697_v57 = vand.u32 2147483647, %v1689_v48  ;;  %v11471_v48 = vpack.c.bf16 %v1846_v33, %v1845_v30  ;;  %v1806_v30 = vld [vmem:[#allocation9 + $0x268] sm:$0xff]  ;;  %v1823_v33 = vld [vmem:[#allocation9 + $0x2f0] sm:$0xff] }
 0x6f4   :  { %v1698_v58 = vand.u32 2147483647, %v1690_v54  ;;  %v1500_v59 = vpop.f32.mrb[2].mxu1  ;;  %v1817_v54 = vld [vmem:[#allocation9 + $0x2c0] sm:$0xff] }
 0x6f5   :  { %vm15364_vm9 = vcmp.lt.f32.partialorder %v1697_v57, 0.5  ;;  %v1691_v0 = vsub.f32 %v1500_v59, %v1660_v49  ;;  %v1502_v1 = vpop.f32.mrb[3].mxu1  ;;  %v1799_v49 = vld [vmem:[#allocation9 + $0x230] sm:$0xff]  ;;  %v11473_v57 = vpack.c.bf16 %v1830_v45, %v1829_v44  ;;  %v1838_v44 = vld [vmem:[#allocation9 + $0x368] sm:$0xff]  ;;  %v11459_v45 = vpack.c.bf16 %v1824_v34, %v1823_v33 }
 0x6f6   :  { %vm1706_vm10 = vcmp.lt.f32.partialorder %v1698_v58, 0.5  ;;  %v1692_v9 = vsub.f32 %v1502_v1, %v1664_v55  ;;  %v1818_v55 = vld [vmem:[#allocation9 + $0x2c8] sm:$0xff]  ;;  %v11445_v58 = vpack.c.bf16 %v1800_v50, %v1799_v49  ;;  %v1831_v59 = vld [vmem:[#allocation9 + $0x330] sm:$0xff]  ;;  %v1849_v1 = vld [vmem:[#allocation9 + $0x3c0] sm:$0xff] }
 0x6f7   :  { %v1699_v14 = vand.u32 2147483647, %v1691_v0  ;;  %9455 = vmatprep.mubr.msk.f32.mxu1 %vm1706_vm10, %v14518_v47  ;;  %v1802_v0 = vld [vmem:[#allocation9 + $0x248] sm:$0xff]  ;;  %v1856_v49 = vld [vmem:[#allocation9 + $0x3f8] sm:$0xff]  ;;  %vm14530_vm10 = vmmov 1  }
 0x6f8   :  { %v1700_v17 = vand.u32 2147483647, %v1692_v9  ;;  %9456 = vmatmul.mubr.msk.f32.vlgmr.msra.gmra.mrb[8].mxu1 %vm15364_vm9, %v14518_v47  ;;  %v15376_v20 = vpop.f32.mrb[4].mxu1  ;;  %v11449_v9 = vpack.c.bf16 %v1802_v0, %v1801_v63  ;;  %vm8540_vm9 = vcmask 130048  }
 0x6f9   :  { %vm1707_vm11 = vcmp.lt.f32.partialorder %v1699_v14, 0.5  ;;  %11434 = vmatpush3.bf16.msra.mxu1 %v11433_v60  ;;  %v1693_v24 = vsub.f32 %v15376_v20, %v15368_v7  ;;  %v1573_v25 = vpop.f32.mrb[5].mxu1  ;;  %v1832_v60 = vld [vmem:[#allocation9 + $0x338] sm:$0xff]  ;;  %v1803_v14 = vld [vmem:[#allocation9 + $0x250] sm:$0xff] }
 0x6fa   :  { %vm1708_vm12 = vcmp.lt.f32.partialorder %v1700_v17, 0.5  ;;  %11436 = vmatprep.subr.bf16.mxu1 %v11435_v62  ;;  %v1694_v31 = vsub.f32 %v1573_v25, %v1672_v12  ;;  %v11447_v62 = vpack.c.bf16 %v1818_v55, %v1817_v54  ;;  %v11477_v8 = vpack.c.bf16 %v1832_v60, %v1831_v59  ;;  %v1852_v17 = vld [vmem:[#allocation9 + $0x3d8] sm:$0xff]  ;;  %v1839_v54 = vld [vmem:[#allocation9 + $0x370] sm:$0xff] }
 0x6fb   :  { %9457 = vmatprep.mubr.msk.f32.mxu0 %vm1708_vm12, %v14518_v47  ;;  %v11479_v12 = vpack.c.bf16 %v1850_v2, %v1849_v1  ;;  %v11453_v22 = vpack.c.bf16 %v1804_v15, %v1803_v14  ;;  %v1836_v25 = vld [vmem:[#allocation9 + $0x358] sm:$0xff]  ;;  %v1701_v50 = vand.u32 2147483647, %v1693_v24  ;;  %vm9268_vm12 = vcmask 7168  }
 0x6fc   :  { %9458 = vmatmul.mubr.msk.f32.vlgmr.msra.gmra.mrb[8].mxu0 %vm1707_vm11, %v14518_v47  ;;  %v1702_v36 = vand.u32 2147483647, %v1694_v31  ;;  %v15385_v41 = vpop.f32.mrb[6].mxu1  ;;  %v1853_v31 = vld [vmem:[#allocation9 + $0x3e0] sm:$0xff]  ;;  %v11485_v35 = vpack.c.bf16 %v1836_v25, %v1835_v23  ;;  %v1840_v55 = vld [vmem:[#allocation9 + $0x378] sm:$0xff]  ;;  %v2411_v23 = vld [vmem:[#allocation21 + $0x70] sm:$0xff] }
 0x6fd   :  { %11466 = vmatpush3.bf16.msra.mxu0 %v11465_v18  ;;  %11438 = vmatpush3.bf16.msra.mxu1 %v11437_v19  ;;  %v1695_v38 = vsub.f32 %v15385_v41, %v15380_v26  ;;  %v1644_v46 = vpop.f32.mrb[7].mxu1  ;;  %v1821_v18 = vld [vmem:[#allocation9 + $0x2e0] sm:$0xff]  ;;  %v1822_v19 = vld [vmem:[#allocation9 + $0x2e8] sm:$0xff]  ;;  %vm1709_vm15 = vcmp.lt.f32.partialorder %v1701_v50, 0.5  ;;  %v2284_v7 = vld [vmem:[#allocation17] sm:$0xff] }
 0x6fe   :  { %11468 = vmatprep.subr.bf16.mxu0 %v11467_v21  ;;  %11440 = vmatprep.subr.bf16.mxu1 %v11439_v27  ;;  %vm1710_vm13 = vcmp.lt.f32.partialorder %v1702_v36, 0.5  ;;  %v1696_v52 = vsub.f32 %v1644_v46, %v1680_v32  ;;  %v11481_v21 = vpack.c.bf16 %v1834_v11, %v1833_v10  ;;  %v11483_v27 = vpack.c.bf16 %v1852_v17, %v1851_v16  ;;  %v1854_v32 = vld [vmem:[#allocation9 + $0x3e8] sm:$0xff]  ;;  %v1807_v46 = vld [vmem:[#allocation9 + $0x270] sm:$0xff]  ;;  %v2401_v2 = vld [vmem:[#allocation21 + $0x20] sm:$0xff] }
 0x6ff   :  { %9459 = vmatprep.mubr.msk.f32.mxu1 %vm1710_vm13, %v14518_v47  ;;  %v11455_v28 = vpack.c.bf16 %v1822_v19, %v1821_v18  ;;  %v11457_v36 = vpack.c.bf16 %v1806_v30, %v1805_v29  ;;  %v15402_v26 = vld [vmem:[#allocation21 + $0x8] sm:$0xff]  ;;  %v15404_v41 = vld [vmem:[#allocation21 + $0x18] sm:$0xff]  ;;  %vm9004_vm13 = vcmask 72704  }
 0x700   :  { %v1704_v56 = vand.u32 2147483647, %v1696_v52  ;;  %v11495_v60 = vpack.c.bf16 %v15404_v41, %v15402_v26  ;;  %v15428_v18 = vld [vmem:[#allocation21 + $0x68] sm:$0xff]  ;;  %v15430_v19 = vld [vmem:[#allocation21 + $0x78] sm:$0xff] }
 0x701   :  { %11470 = vmatpush3.bf16.msra.mxu0 %v11469_v42  ;;  %11442 = vmatpush3.bf16.msra.mxu1 %v11441_v43  ;;  %v1837_v42 = vld [vmem:[#allocation9 + $0x360] sm:$0xff]  ;;  %v11487_v43 = vpack.c.bf16 %v1854_v32, %v1853_v31 }
 0x702   :  { %11472 = vmatprep.subr.bf16.mxu0 %v11471_v48  ;;  %11444 = vmatprep.subr.bf16.mxu1 %v11443_v39  ;;  %vm1712_vm14 = vcmp.lt.f32.partialorder %v1704_v56, 0.5  ;;  %v1808_v48 = vld [vmem:[#allocation9 + $0x278] sm:$0xff]  ;;  %v1855_v39 = vld [vmem:[#allocation9 + $0x3f0] sm:$0xff]  ;;  %v11489_v51 = vpack.c.bf16 %v1838_v44, %v1837_v42  ;;  %v2147_v56 = vld [vmem:[#allocation14] sm:$0xff] }
 0x703   :  { %9461 = vmatprep.mubr.msk.f32.mxu0 %vm1712_vm14, %v14518_v47  ;;  %v11461_v52 = vpack.c.bf16 %v1808_v48, %v1807_v46  ;;  %v11491_v53 = vpack.c.bf16 %v1856_v49, %v1855_v39  ;;  %v9464_v48 = vld [vmem:[#allocation15] ss:$0 sm:$0xff] }
 0x705   :  { %11474 = vmatpush3.bf16.msra.mxu0 %v11473_v57  ;;  %11446 = vmatpush3.bf16.msra.mxu1 %v11445_v58  ;;  %v1703_v57 = vand.u32 2147483647, %v1695_v38  ;;  %v11493_v58 = vpack.c.bf16 %v1840_v55, %v1839_v54  ;;  %v2397_v38 = vld [vmem:[#allocation21] sm:$0xff] }
 0x706   :  { %11476 = vmatprep.subr.bf16.mxu0 %v11475_v61  ;;  %11448 = vmatprep.subr.bf16.mxu1 %v11447_v62  ;;  %v2399_v61 = vld [vmem:[#allocation21 + $0x10] sm:$0xff]  ;;  %v15410_v62 = vld [vmem:[#allocation21 + $0x38] sm:$0xff] }
 0x707   :  { %vm1711_vm1 = vcmp.lt.f32.partialorder %v1703_v57, 0.5  ;;  %v11497_v0 = vpack.c.bf16 %v2399_v61, %v2397_v38 }
 0x709   :  { %11478 = vmatpush3.bf16.msra.mxu0 %v11477_v8  ;;  %11450 = vmatpush3.bf16.msra.mxu1 %v11449_v9  ;;  %v2408_v8 = vld [vmem:[#allocation21 + $0x58] sm:$0xff]  ;;  %v11501_v9 = vpack.c.bf16 %v2403_v3, %v2401_v2 }
 0x70a   :  { %11480 = vmatprep.subr.bf16.mxu0 %v11479_v12  ;;  %11452 = vmatprep.subr.bf16.mxu1 %v11451_v13  ;;  %v11503_v11 = vpack.c.bf16 %v2408_v8, %v2406_v6  ;;  %v2405_v12 = vld [vmem:[#allocation21 + $0x40] sm:$0xff]  ;;  %v2407_v13 = vld [vmem:[#allocation21 + $0x50] sm:$0xff] }
 0x70b   :  { %v11505_v15 = vpack.c.bf16 %v2407_v13, %v2405_v12 }
 0x70d   :  { %11482 = vmatpush3.bf16.msra.mxu0 %v11481_v21  ;;  %11454 = vmatpush3.bf16.msra.mxu1 %v11453_v22  ;;  %v11507_v21 = vpack.c.bf16 %v15430_v19, %v15428_v18  ;;  %v2409_v22 = vld [vmem:[#allocation21 + $0x60] sm:$0xff] }
 0x70e   :  { %11484 = vmatprep.subr.bf16.mxu0 %v11483_v27  ;;  %11456 = vmatprep.subr.bf16.mxu1 %v11455_v28  ;;  %v11509_v25 = vpack.c.bf16 %v2411_v23, %v2409_v22 }
 0x711   :  { %11486 = vmatpush3.bf16.msra.mxu0 %v11485_v35  ;;  %11458 = vmatpush3.bf16.msra.mxu1 %v11457_v36 }
 0x712   :  { %11488 = vmatprep.subr.bf16.mxu0 %v11487_v43  ;;  %11460 = vmatprep.subr.bf16.mxu1 %v11459_v45 }
 0x715   :  { %11490 = vmatpush3.bf16.msra.mxu0 %v11489_v51  ;;  %11462 = vmatpush3.bf16.msra.mxu1 %v11461_v52 }
 0x716   :  { %11492 = vmatprep.subr.bf16.mxu0 %v11491_v53  ;;  %10447 = vmatprep.subr.mxu1 %v2147_v56 }
 0x718   :  { %9460 = vmatmul.mubr.msk.f32.vlgmr.msra.gmra.mrb[10].mxu1 %vm1709_vm15, %v14518_v47 }
 0x719   :  { %11494 = vmatpush3.bf16.msra.mxu0 %v11493_v58  ;;  %10448 = vmatpush3.msra.mxu1 %v2147_v56 }
 0x71a   :  { %10461 = vmatprep.subr.mxu1 %v2284_v7  ;;  %11496 = vmatprep.subr.bf16.mxu0 %v11495_v60  ;;  %v2413_v60 = vld [vmem:[#allocation23] sm:$0x3] }
 0x71b   :  { %v2418_v61 = vrot.slane %v2413_v60, %v15353_v37 }
 0x71c   :  { %9462 = vmatmul.mubr.msk.f32.vlgmr.msra.gmra.mrb[10].mxu0 %vm1711_vm1, %v14518_v47  ;;  %v15408_v47 = vld [vmem:[#allocation21 + $0x28] sm:$0xff] }
 0x71d   :  { %2514 = vmatprep.mubr.f32.mxu0 %v16979_v5  ;;  %v11499_v1 = vpack.c.bf16 %v15410_v62, %v15408_v47  ;;  %11498 = vmatpush1.bf16.msra.mxu0 %v11497_v0 }
 0x71f   :  { %11500 = vmatprep.subr.bf16.mxu0 %v11499_v1 }
 0x721   :  { %11502 = vmatpush1.bf16.msra.mxu0 %v11501_v9 }
 0x722   :  { %11504 = vmatprep.subr.bf16.mxu0 %v11503_v11 }
 0x725   :  { %11506 = vmatpush1.bf16.msra.mxu0 %v11505_v15 }
 0x726   :  { %11508 = vmatprep.subr.bf16.mxu0 %v11507_v21 }
 0x729   :  { %11510 = vmatpush1.bf16.msra.mxu0 %v11509_v25 }
 0x774   :  { %v10437_v20 = vpop.f32.mrb[0].mxu0 }
 0x775   :  { %v1311_v24 = vpop.f32.mrb[1].mxu0 }
 0x776   :  { %10449 = vmatprep.mubr.msk.f32.mxu1 %vm1359_vm0, %v1311_v24 }
 0x777   :  { %10450 = vmatmul.mubr.msk.f32.vlgmr.msra.gmra.mrb[12].mxu1 %vm1359_vm0, %v10437_v20 }
 0x778   :  { %v10440_v59 = vpop.f32.mrb[2].mxu0  ;;  %10462 = vmatpush3.msra.mxu1 %v2284_v7 }
 0x779   :  { %v1321_v63 = vpop.f32.mrb[3].mxu0 }
 0x77a   :  { %10452 = vmatprep.mubr.msk.f32.mxu1 %vm1359_vm0, %v1321_v63 }
 0x77b   :  { %10453 = vmatmul.mubr.msk.f32.gmra.mrb[14].mxu1 %vm1359_vm0, %v10440_v59 }
 0x77c   :  { %v10443_v10 = vpop.f32.mrb[4].mxu0 }
 0x77d   :  { %v1331_v14 = vpop.f32.mrb[5].mxu0 }
 0x77e   :  { %10455 = vmatprep.mubr.msk.f32.mxu1 %vm1359_vm0, %v1331_v14 }
 0x77f   :  { %10456 = vmatmul.mubr.msk.f32.gmra.mrb[16].mxu1 %vm1359_vm0, %v10443_v10 }
 0x780   :  { %v10446_v16 = vpop.f32.mrb[6].mxu0 }
 0x781   :  { %v1341_v17 = vpop.f32.mrb[7].mxu0 }
 0x782   :  { %10458 = vmatprep.mubr.msk.f32.mxu1 %vm1359_vm0, %v1341_v17 }
 0x783   :  { %10459 = vmatmul.mubr.msk.f32.gmra.mrb[18].mxu1 %vm1359_vm0, %v10446_v16 }
 0x784   :  { %10463 = vmatprep.mubr.msk.f32.mxu1 %vm1359_vm0, %v1311_v24 }
 0x787   :  { %10464 = vmatmul.mubr.msk.f32.vlgmr.msra.gmra.mrb[20].mxu1 %vm1359_vm0, %v10437_v20 }
 0x788   :  { %10466 = vmatprep.mubr.msk.f32.mxu1 %vm1359_vm0, %v1321_v63  ;;  %v2422_v63 = vrot.slane %v2413_v60, %v15356_v40 }
 0x78b   :  { %10467 = vmatmul.mubr.msk.f32.gmra.mrb[22].mxu1 %vm1359_vm0, %v10440_v59 }
 0x78c   :  { %10469 = vmatprep.mubr.msk.f32.mxu1 %vm1359_vm0, %v1331_v14 }
 0x78f   :  { %10470 = vmatmul.mubr.msk.f32.gmra.mrb[24].mxu1 %vm1359_vm0, %v10443_v10 }
 0x790   :  { %10472 = vmatprep.mubr.msk.f32.mxu1 %vm1359_vm0, %v1341_v17 }
 0x793   :  { %10473 = vmatmul.mubr.msk.f32.gmra.mrb[26].mxu1 %vm1359_vm0, %v10446_v16 }
 0x7cb   :  { %v9826_v27 = vpop.f32.mrb[8].mxu1 }
 0x7cc   :  { %v9827_v28 = vpop.f32.mrb[9].mxu1 }
 0x7cd   :  { %v9828_v29 = vadd.f32 %v9827_v28, %v9826_v27 }
 0x7cf   :  { %v9861_v30 = vpop.f32.mrb[8].mxu0 }
 0x7d0   :  { %v9862_v31 = vpop.f32.mrb[9].mxu0 }
 0x7d1   :  { %v9863_v32 = vadd.f32 %v9862_v31, %v9861_v30 }
 0x7d3   :  { %v1994_v33 = vadd.f32 %v9863_v32, %v9828_v29 }
 0x7eb   :  { %v9896_v34 = vpop.f32.mrb[10].mxu1 }
 0x7ec   :  { %v9897_v35 = vpop.f32.mrb[11].mxu1 }
 0x7ed   :  { %v9898_v36 = vadd.f32 %v9897_v35, %v9896_v34 }
 0x7ef   :  { %v2064_v42 = vadd.f32 %v9898_v36, %v1994_v33  ;;  %v9931_v43 = vpop.f32.mrb[10].mxu0 }
 0x7f0   :  { %v9932_v44 = vpop.f32.mrb[11].mxu0 }
 0x7f1   :  { %v9933_v45 = vadd.f32 %v9932_v44, %v9931_v43 }
 0x7f3   :  { %v15434_v46 = vadd.f32 %v9933_v45, %v2064_v42 }
 0x84a   :  { %v10451_v39 = vpop.f32.mrb[12].mxu1 }
 0x84b   :  { %v2245_v49 = vpop.f32.mrb[13].mxu1  ;;  %v2251_v53 = vadd.f32 %v10451_v39, %v9464_v48 }
 0x84c   :  { %v2246_v50 = vadd.f32 %v9464_v48, %v2245_v49 }
 0x84e   :  { %v10454_v51 = vpop.f32.mrb[14].mxu1  ;;  %9482 = vmatmul.mubr.msk.f32.vlgmr.msra.gmra.mrb[12].mxu0 %vm2425_vm2, %v2246_v50 }
 0x84f   :  { %v2255_v52 = vpop.f32.mrb[15].mxu1  ;;  %2520 = vmatprep.mubr.f32.mxu0 %v16979_v5  ;;  %v2261_v7 = vadd.f32 %v10454_v51, %v9464_v48 }
 0x850   :  { %v2256_v56 = vadd.f32 %v9464_v48, %v2255_v52 }
 0x852   :  { %v10457_v54 = vpop.f32.mrb[16].mxu1  ;;  %9483 = vmatmul.mubr.msk.f32.gmra.mrb[14].mxu0 %vm2425_vm2, %v2251_v53 }
 0x853   :  { %v2265_v55 = vpop.f32.mrb[17].mxu1  ;;  %2526 = vmatprep.mubr.f32.mxu0 %v16979_v5  ;;  %v2271_v24 = vadd.f32 %v10457_v54, %v9464_v48 }
 0x854   :  { %v2266_v20 = vadd.f32 %v9464_v48, %v2265_v55 }
 0x856   :  { %v10460_v57 = vpop.f32.mrb[18].mxu1  ;;  %9484 = vmatmul.mubr.msk.f32.gmra.mrb[16].mxu0 %vm2425_vm2, %v2256_v56 }
 0x857   :  { %v2275_v58 = vpop.f32.mrb[19].mxu1  ;;  %2532 = vmatprep.mubr.f32.mxu0 %v16979_v5  ;;  %v2281_v59 = vadd.f32 %v10460_v57, %v9464_v48 }
 0x858   :  { %v2276_v38 = vadd.f32 %v9464_v48, %v2275_v58 }
 0x85a   :  { %9485 = vmatmul.mubr.msk.f32.gmra.mrb[18].mxu0 %vm2425_vm2, %v2261_v7 }
 0x85b   :  { %2538 = vmatprep.mubr.f32.mxu0 %v16979_v5 }
 0x85e   :  { %9486 = vmatmul.mubr.msk.f32.gmra.mrb[20].mxu0 %vm2425_vm2, %v2266_v20 }
 0x85f   :  { %2544 = vmatprep.mubr.f32.mxu0 %v16979_v5 }
 0x862   :  { %9487 = vmatmul.mubr.msk.f32.gmra.mrb[22].mxu0 %vm2425_vm2, %v2271_v24 }
 0x863   :  { %2550 = vmatprep.mubr.f32.mxu0 %v16979_v5 }
 0x866   :  { %9488 = vmatmul.mubr.msk.f32.gmra.mrb[24].mxu0 %vm2425_vm2, %v2276_v38 }
 0x867   :  { %2556 = vmatprep.mubr.f32.mxu0 %v16979_v5 }
 0x86a   :  { %9489 = vmatmul.mubr.msk.f32.gmra.mrb[26].mxu0 %vm2425_vm2, %v2281_v59 }
 0x921   :  { %v2516_v0 = vpop.f32.mrb[12].mxu0 }
 0x922   :  { %v15453_v1 = vadd.f32 %v2516_v0, %v2418_v61  ;;  %v2518_v2 = vpop.f32.mrb[13].mxu0 }
 0x923   :  { %v15455_v3 = vadd.f32 %v2518_v2, %v2422_v63 }
 0x924   :  { %10491 = vmatprep.mubr.msk.f32.mxu1 %vm2588_vm3, %v15453_v1 }
 0x925   :  { %v2522_v6 = vpop.f32.mrb[14].mxu0 }
 0x926   :  { %v15459_v8 = vadd.f32 %v2522_v6, %v2418_v61  ;;  %v2524_v9 = vpop.f32.mrb[15].mxu0 }
 0x927   :  { %v15461_v10 = vadd.f32 %v2524_v9, %v2422_v63 }
 0x928   :  { %v15465_v11 = vpack.i.bf16 %v15459_v8, %v15453_v1 }
 0x929   :  { %v12358_v12 = vpack.i.bf16 %v15461_v10, %v15455_v3  ;;  %v11535_v13 = vpack.c.bf16 %v15461_v10, %v15455_v3  ;;  %v2528_v14 = vpop.f32.mrb[16].mxu0 }
 0x92a   :  { %v15471_v15 = vadd.f32 %v2528_v14, %v2418_v61  ;;  %v2530_v16 = vpop.f32.mrb[17].mxu0  ;;  %12309 = vrot.lane.b32.xlu0 %v15465_v11, %s14519_s1 }
 0x92b   :  { %v15475_v17 = vadd.f32 %v2530_v16, %v2422_v63  ;;  %11536 = vmatprep.subr.bf16.mxu0 %v11535_v13 }
 0x92c   :  { %11538 = vmatpush3.bf16.msra.mxu0 %v11535_v13 }
 0x92d   :  { %v2534_v21 = vpop.f32.mrb[18].mxu0 }
 0x92e   :  { %v15477_v22 = vadd.f32 %v2534_v21, %v2418_v61  ;;  %v2536_v23 = vpop.f32.mrb[19].mxu0 }
 0x92f   :  { %v15479_v25 = vadd.f32 %v2536_v23, %v2422_v63 }
 0x930   :  { %v15483_v27 = vpack.i.bf16 %v15477_v22, %v15471_v15 }
 0x931   :  { %v11539_v29 = vpack.c.bf16 %v15479_v25, %v15475_v17  ;;  %v2540_v30 = vpop.f32.mrb[20].mxu0 }
 0x932   :  { %v15489_v31 = vadd.f32 %v2540_v30, %v2418_v61  ;;  %v2542_v32 = vpop.f32.mrb[21].mxu0  ;;  %12314 = vrot.lane.b32.xlu1 %v15483_v27, %s14519_s1 }
 0x933   :  { %v15493_v33 = vadd.f32 %v2542_v32, %v2422_v63  ;;  %11540 = vmatprep.subr.bf16.mxu0 %v11539_v29 }
 0x934   :  { %11542 = vmatpush3.bf16.msra.mxu0 %v11539_v29  ;;  %v15563_v29 = vld [vmem:[#allocation33 + $0x8] sm:$0xff] }
 0x935   :  { %v2546_v34 = vpop.f32.mrb[22].mxu0 }
 0x936   :  { %v15495_v35 = vadd.f32 %v2546_v34, %v2418_v61  ;;  %v2548_v36 = vpop.f32.mrb[23].mxu0  ;;  %v15565_v34 = vld [vmem:[#allocation33] sm:$0xff] }
 0x937   :  { %v15497_v42 = vadd.f32 %v2548_v36, %v2422_v63 }
 0x938   :  { %v15501_v43 = vpack.i.bf16 %v15495_v35, %v15489_v31 }
 0x939   :  { %v11543_v45 = vpack.c.bf16 %v15497_v42, %v15493_v33  ;;  %v2552_v48 = vpop.f32.mrb[24].mxu0 }
 0x93a   :  { %v15507_v39 = vadd.f32 %v2552_v48, %v2418_v61  ;;  %v2554_v49 = vpop.f32.mrb[25].mxu0  ;;  %12319 = vrot.lane.b32.xlu0 %v15501_v43, %s14519_s1 }
 0x93b   :  { %v15511_v50 = vadd.f32 %v2554_v49, %v2422_v63  ;;  %11544 = vmatprep.subr.bf16.mxu0 %v11543_v45 }
 0x93c   :  { %11546 = vmatpush3.bf16.msra.mxu0 %v11543_v45 }
 0x93d   :  { %v2558_v51 = vpop.f32.mrb[26].mxu0 }
 0x93e   :  { %v15513_v52 = vadd.f32 %v2558_v51, %v2418_v61  ;;  %v2560_v53 = vpop.f32.mrb[27].mxu0 }
 0x93f   :  { %v15515_v54 = vadd.f32 %v2560_v53, %v2422_v63 }
 0x940   :  { %v15519_v55 = vpack.i.bf16 %v15513_v52, %v15507_v39 }
 0x941   :  { %v11547_v57 = vpack.c.bf16 %v15515_v54, %v15511_v50 }
 0x942   :  { %12324 = vrot.lane.b32.xlu1 %v15519_v55, %s14519_s1 }
 0x943   :  { %11548 = vmatprep.subr.bf16.mxu0 %v11547_v57 }
 0x944   :  { %11550 = vmatpush3.bf16.msra.mxu0 %v11547_v57 }
 0x99c   :  { %v12310_v58 = vpop.permute.xlu0 %12309 }
 0x99d   :  { %v12312_v7 = vunpack.i.h.bf16 %v12310_v58  ;;  %v12311_v20 = vunpack.i.l.bf16 %v12310_v58  ;;  %v15570_v58 = vld [vmem:[#allocation33 + $0x10] sm:$0xff] }
 0x99f   :  { %v11511_v38 = vpack.c.bf16 %v12312_v7, %v12311_v20 }
 0x9a1   :  { %11513 = vmatprep.subr.msk.bf16.mxu1 %vm15529_vm4, %v11511_v38 }
 0x9a2   :  { %11516 = vmatpush3.bf16.xpose.msk.msra.mxu1 %vm15529_vm4, %v11511_v38  ;;  %v15573_v38 = vld [vmem:[#allocation33 + $0x18] sm:$0xff] }
 0x9a4   :  { %v12315_v59 = vpop.permute.xlu1 %12314 }
 0x9a5   :  { %v12317_v60 = vunpack.i.h.bf16 %v12315_v59  ;;  %v12316_v61 = vunpack.i.l.bf16 %v12315_v59 }
 0x9a7   :  { %v11517_v63 = vpack.c.bf16 %v12317_v60, %v12316_v61 }
 0x9a9   :  { %11519 = vmatprep.subr.msk.bf16.mxu1 %vm15529_vm4, %v11517_v63 }
 0x9aa   :  { %11522 = vmatpush3.bf16.xpose.msk.msra.mxu1 %vm15529_vm4, %v11517_v63 }
 0x9ac   :  { %v12320_v0 = vpop.permute.xlu0 %12319 }
 0x9ad   :  { %v12322_v2 = vunpack.i.h.bf16 %v12320_v0  ;;  %v12321_v6 = vunpack.i.l.bf16 %v12320_v0  ;;  %v15577_v0 = vld [vmem:[#allocation33 + $0x20] sm:$0xff] }
 0x9af   :  { %v11523_v9 = vpack.c.bf16 %v12322_v2, %v12321_v6 }
 0x9b1   :  { %11525 = vmatprep.subr.msk.bf16.mxu1 %vm15529_vm4, %v11523_v9 }
 0x9b2   :  { %11528 = vmatpush3.bf16.xpose.msk.msra.mxu1 %vm15529_vm4, %v11523_v9 }
 0x9b4   :  { %v12325_v13 = vpop.permute.xlu1 %12324 }
 0x9b5   :  { %v12327_v14 = vunpack.i.h.bf16 %v12325_v13  ;;  %v12326_v16 = vunpack.i.l.bf16 %v12325_v13  ;;  %v15580_v13 = vld [vmem:[#allocation33 + $0x28] sm:$0xff] }
 0x9b7   :  { %v11529_v21 = vpack.c.bf16 %v12327_v14, %v12326_v16 }
 0x9b9   :  { %11531 = vmatprep.subr.msk.bf16.mxu1 %vm15529_vm4, %v11529_v21 }
 0x9ba   :  { %11534 = vmatpush3.bf16.xpose.msk.msra.mxu1 %vm15529_vm4, %v11529_v21 }
 0x9c1   :  { %10492 = vmatmul.mubr.msk.f32.vlgmr.msra.gmra.mrb[28].mxu1 %vm2588_vm3, %v15459_v8 }
 0x9c2   :  { %10494 = vmatprep.mubr.msk.f32.mxu1 %vm2588_vm3, %v15471_v15 }
 0x9c5   :  { %10495 = vmatmul.mubr.msk.f32.gmra.mrb[30].mxu1 %vm2588_vm3, %v15477_v22 }
 0x9c6   :  { %10497 = vmatprep.mubr.msk.f32.mxu1 %vm2588_vm3, %v15489_v31 }
 0x9c9   :  { %10498 = vmatmul.mubr.msk.f32.gmra.mrb[32].mxu1 %vm2588_vm3, %v15495_v35 }
 0x9ca   :  { %10500 = vmatprep.mubr.msk.f32.mxu1 %vm2588_vm3, %v15507_v39 }
 0x9cd   :  { %10501 = vmatmul.mubr.msk.f32.gmra.mrb[34].mxu1 %vm2588_vm3, %v15513_v52 }
 0xa94   :  { %v10493_v23 = vpop.f32.mrb[28].mxu1 }
 0xa95   :  { %v2727_v30 = vmul.f32 0.17677669, %v10493_v23  ;;  %v2687_v32 = vpop.f32.mrb[29].mxu1 }
 0xa96   :  { %v2726_v36 = vmul.f32 0.17677669, %v2687_v32 }
 0xa97   :  { %v2743_v45 = vadd.f32 %v15563_v29, %v2727_v30  ;;  %v15584_v30 = vld [vmem:[#allocation33 + $0x30] sm:$0xff] }
 0xa98   :  { %v10496_v48 = vpop.f32.mrb[30].mxu1  ;;  %v2742_v49 = vadd.f32 %v15565_v34, %v2726_v36 }
 0xa99   :  { %v2729_v51 = vmul.f32 0.17677669, %v10496_v48  ;;  %v2697_v53 = vpop.f32.mrb[31].mxu1  ;;  %v2753_v57 = vsel %vm2425_vm2, %v2743_v45, -inf }
 0xa9a   :  { %v2728_v7 = vmul.f32 0.17677669, %v2697_v53  ;;  %2754 = vmax.xlane.f32.xlu1 %v2753_v57  ;;  %v2750_v20 = vsel %vm2425_vm2, %v2742_v49, -inf  ;;  %v15588_v53 = vld [vmem:[#allocation33 + $0x38] sm:$0xff] }
 0xa9b   :  { %2751 = vmax.xlane.f32.xlu0 %v2750_v20  ;;  %v2745_v63 = vadd.f32 %v15573_v38, %v2729_v51 }
 0xa9c   :  { %v10499_v59 = vpop.f32.mrb[32].mxu1  ;;  %v2744_v60 = vadd.f32 %v15570_v58, %v2728_v7 }
 0xa9d   :  { %v2707_v61 = vpop.f32.mrb[33].mxu1  ;;  %v2731_v2 = vmul.f32 0.17677669, %v10499_v59  ;;  %v2759_v23 = vsel %vm2425_vm2, %v2745_v63, -inf }
 0xa9e   :  { %v2730_v6 = vmul.f32 0.17677669, %v2707_v61  ;;  %v2756_v9 = vsel %vm2425_vm2, %v2744_v60, -inf }
 0xa9f   :  { %2757 = vmax.xlane.f32.xlu0 %v2756_v9  ;;  %v2747_v51 = vadd.f32 %v15580_v13, %v2731_v2 }
 0xaa0   :  { %v10502_v14 = vpop.f32.mrb[34].mxu1  ;;  %v2746_v16 = vadd.f32 %v15577_v0, %v2730_v6 }
 0xaa1   :  { %v2717_v21 = vpop.f32.mrb[35].mxu1  ;;  %v2733_v32 = vmul.f32 0.17677669, %v10502_v14  ;;  %v2765_v7 = vsel %vm2425_vm2, %v2747_v51, -inf }
 0xaa2   :  { %v2732_v36 = vmul.f32 0.17677669, %v2717_v21  ;;  %v2762_v48 = vsel %vm2425_vm2, %v2746_v16, -inf }
 0xaa3   :  { %2760 = vmax.xlane.f32.xlu0 %v2759_v23  ;;  %2763 = vmax.xlane.f32.xlu1 %v2762_v48  ;;  %v2749_v59 = vadd.f32 %v15588_v53, %v2733_v32 }
 0xaa4   :  { %v2748_v57 = vadd.f32 %v15584_v30, %v2732_v36 }
 0xaa5   :  { %v2771_v61 = vsel %vm2425_vm2, %v2749_v59, -inf }
 0xaa6   :  { %v2768_v20 = vsel %vm2425_vm2, %v2748_v57, -inf }
 0xaa7   :  { %2766 = vmax.xlane.f32.xlu0 %v2765_v7  ;;  %2769 = vmax.xlane.f32.xlu1 %v2768_v20 }
 0xaab   :  { %2772 = vmax.xlane.f32.xlu0 %v2771_v61 }
 0xab8   :  { %12329 = vrot.lane.b32.xlu1 %v15465_v11, %s14520_s12 }
 0xb27   :  { %v2755_v2 = vpop.xlane.xlu1 %2754 }
 0xb28   :  { %v2775_v6 = vsub.f32 %v2743_v45, %v2755_v2  ;;  %v2752_v9 = vpop.xlane.xlu0 %2751 }
 0xb29   :  { %v2774_v14 = vsub.f32 %v2742_v49, %v2752_v9 }
 0xb2a   :  { %v2784_v21 = vmul.f32 1.442695, %v2775_v6 }
 0xb2b   :  { %v2782_v23 = vmul.f32 1.442695, %v2774_v14 }
 0xb2c   :  { %12572 = vpow2.f32 %v2784_v21  ;;  %v2758_v36 = vpop.xlane.xlu0 %2757 }
 0xb2d   :  { %12574 = vpow2.f32 %v2782_v23  ;;  %v2776_v48 = vsub.f32 %v2744_v60, %v2758_v36 }
 0xb2f   :  { %v2786_v32 = vmul.f32 1.442695, %v2776_v48 }
 0xb30   :  { %v2761_v7 = vpop.xlane.xlu0 %2760  ;;  %v2764_v20 = vpop.xlane.xlu1 %2763 }
 0xb31   :  { %12576 = vpow2.f32 %v2786_v32  ;;  %v2777_v4 = vsub.f32 %v2745_v63, %v2761_v7  ;;  %v2778_v61 = vsub.f32 %v2746_v16, %v2764_v20 }
 0xb33   :  { %v2788_v56 = vmul.f32 1.442695, %v2777_v4  ;;  %v2790_v44 = vmul.f32 1.442695, %v2778_v61 }
 0xb34   :  { %v2767_v28 = vpop.xlane.xlu0 %2766  ;;  %v2770_v11 = vpop.xlane.xlu1 %2769 }
 0xb35   :  { %12578 = vpow2.f32 %v2788_v56  ;;  %v2779_v45 = vsub.f32 %v2747_v51, %v2767_v28  ;;  %v2780_v9 = vsub.f32 %v2748_v57, %v2770_v11 }
 0xb36   :  { %v15597_v2 = vpop.eup %12572  ;;  %12580 = vpow2.f32 %v2790_v44 }
 0xb37   :  { %v15599_v49 = vpop.eup %12574  ;;  %v2792_v6 = vmul.f32 1.442695, %v2779_v45  ;;  %v2801_v60 = vsel %vm2425_vm2, %v15597_v2, 0.0  ;;  %v2794_v44 = vmul.f32 1.442695, %v2780_v9 }
 0xb38   :  { %2802 = vadd.xlane.f32.xlu0 %v2801_v60  ;;  %v2773_v14 = vpop.xlane.xlu0 %2772  ;;  %v12330_v63 = vpop.permute.xlu1 %12329  ;;  %v2798_v4 = vsel %vm2425_vm2, %v15599_v49, 0.0 }
 0xb39   :  { %12582 = vpow2.f32 %v2792_v6  ;;  %v2781_v16 = vsub.f32 %v2749_v59, %v2773_v14  ;;  %v12332_v56 = vunpack.i.h.bf16 %v12330_v63  ;;  %v12331_v28 = vunpack.i.l.bf16 %v12330_v63  ;;  %2799 = vadd.xlane.f32.xlu1 %v2798_v4 }
 0xb3b   :  { %v12577_v51 = vpop.eup %12576  ;;  %v2796_v21 = vmul.f32 1.442695, %v2781_v16  ;;  %v11559_v23 = vpack.c.bf16 %v12332_v56, %v12331_v28 }
 0xb3c   :  { %v2804_v57 = vsel %vm2425_vm2, %v12577_v51, 0.0 }
 0xb3d   :  { %12584 = vpow2.f32 %v2796_v21  ;;  %2805 = vadd.xlane.f32.xlu1 %v2804_v57  ;;  %11561 = vmatprep.subr.msk.bf16.mxu0 %vm15529_vm4, %v11559_v23 }
 0xb3e   :  { %12586 = vpow2.f32 %v2794_v44 }
 0xb3f   :  { %v12579_v36 = vpop.eup %12578 }
 0xb40   :  { %v12581_v48 = vpop.eup %12580  ;;  %v2807_v32 = vsel %vm2425_vm2, %v12579_v36, 0.0 }
 0xb41   :  { %2808 = vadd.xlane.f32.xlu0 %v2807_v32  ;;  %v2810_v59 = vsel %vm2425_vm2, %v12581_v48, 0.0 }
 0xb42   :  { %2811 = vadd.xlane.f32.xlu1 %v2810_v59 }
 0xb43   :  { %v12583_v7 = vpop.eup %12582 }
 0xb44   :  { %v2813_v20 = vsel %vm2425_vm2, %v12583_v7, 0.0 }
 0xb45   :  { %2814 = vadd.xlane.f32.xlu0 %v2813_v20 }
 0xb47   :  { %v15611_v61 = vpop.eup %12584 }
 0xb48   :  { %v2819_v11 = vsel %vm2425_vm2, %v15611_v61, 0.0  ;;  %v15615_v45 = vpop.eup %12586 }
 0xb49   :  { %2820 = vadd.xlane.f32.xlu0 %v2819_v11  ;;  %v2816_v6 = vsel %vm2425_vm2, %v15615_v45, 0.0 }
 0xb4d   :  { %2817 = vadd.xlane.f32.xlu0 %v2816_v6 }
 0xb53   :  { %12339 = vrot.lane.b32.xlu1 %v15501_v43, %s14520_s12 }
 0xb57   :  { %12344 = vrot.lane.b32.xlu1 %v15519_v55, %s14520_s12 }
 0xb5b   :  { %3126 = vrot.lane.b32.xlu1 %v15453_v1, %s14521_s24  ;;  %v12348_v1 = vpack.i.bf16 %v15404_v41, %v15402_v26 }
 0xb5f   :  { %3128 = vrot.lane.b32.xlu1 %v15459_v8, %s14521_s24  ;;  %v12353_v8 = vpack.i.bf16 %v15410_v62, %v15408_v47 }
 0xb63   :  { %3132 = vrot.lane.b32.xlu1 %v15477_v22, %s14521_s24  ;;  %12334 = vrot.lane.b32.xlu0 %v15483_v27, %s14520_s12 }
 0xb67   :  { %3136 = vrot.lane.b32.xlu1 %v15495_v35, %s14521_s24  ;;  %3130 = vrot.lane.b32.xlu0 %v15471_v15, %s14521_s24 }
 0xb6b   :  { %3140 = vrot.lane.b32.xlu1 %v15513_v52, %s14521_s24  ;;  %3134 = vrot.lane.b32.xlu0 %v15489_v31, %s14521_s24 }
 0xb6f   :  { %3138 = vrot.lane.b32.xlu0 %v15507_v39, %s14521_s24  ;;  %12349 = vrot.lane.b32.xlu1 %v12348_v1, %s14519_s1 }
 0xb73   :  { %12354 = vrot.lane.b32.xlu0 %v12353_v8, %s14519_s1 }
 0xbc5   :  { %v2803_v15 = vpop.xlane.xlu0 %2802 }
 0xbc6   :  { %12588 = vrcp.f32 %v2803_v15  ;;  %v2800_v22 = vpop.xlane.xlu1 %2799 }
 0xbc7   :  { %12590 = vrcp.f32 %v2800_v22 }
 0xbca   :  { %v2806_v27 = vpop.xlane.xlu1 %2805 }
 0xbcb   :  { %12592 = vrcp.f32 %v2806_v27 }
 0xbce   :  { %v2809_v31 = vpop.xlane.xlu0 %2808 }
 0xbcf   :  { %12594 = vrcp.f32 %v2809_v31  ;;  %v2812_v35 = vpop.xlane.xlu1 %2811 }
 0xbd0   :  { %v12589_v43 = vpop.eup %12588  ;;  %12596 = vrcp.f32 %v2812_v35 }
 0xbd1   :  { %v12591_v39 = vpop.eup %12590  ;;  %v2831_v47 = vmul.f32 %v12589_v43, %v15597_v2 }
 0xbd2   :  { %v2815_v26 = vpop.xlane.xlu0 %2814  ;;  %v2830_v41 = vmul.f32 %v12591_v39, %v15599_v49 }
 0xbd3   :  { %12598 = vrcp.f32 %v2815_v26  ;;  %v12340_v62 = vpop.permute.xlu1 %12339 }
 0xbd4   :  { %10519 = vmatprep.mubr.msk.f32.mxu0 %vm2425_vm2, %v2830_v41  ;;  %v12342_v44 = vunpack.i.h.bf16 %v12340_v62  ;;  %v12341_v21 = vunpack.i.l.bf16 %v12340_v62 }
 0xbd5   :  { %v12593_v52 = vpop.eup %12592  ;;  %10520 = vmatmul.mubr.msk.f32.vlgmr.msra.gmra.mrb[28].mxu0 %vm2425_vm2, %v2831_v47 }
 0xbd6   :  { %11564 = vmatpush3.bf16.xpose.msk.msra.mxu0 %vm15529_vm4, %v11559_v23  ;;  %v2821_v55 = vpop.xlane.xlu0 %2820  ;;  %v2832_v9 = vmul.f32 %v12593_v52, %v12577_v51  ;;  %v11571_v59 = vpack.c.bf16 %v12342_v44, %v12341_v21 }
 0xbd7   :  { %v12345_v14 = vpop.permute.xlu1 %12344  ;;  %12600 = vrcp.f32 %v2821_v55 }
 0xbd8   :  { %10522 = vmatprep.mubr.msk.f32.mxu0 %vm2425_vm2, %v2832_v9  ;;  %v12347_v11 = vunpack.i.h.bf16 %v12345_v14  ;;  %v12346_v6 = vunpack.i.l.bf16 %v12345_v14 }
 0xbd9   :  { %v12595_v60 = vpop.eup %12594 }
 0xbda   :  { %v12597_v63 = vpop.eup %12596  ;;  %v2818_v49 = vpop.xlane.xlu0 %2817  ;;  %v2833_v2 = vmul.f32 %v12595_v60, %v12579_v36  ;;  %v11577_v8 = vpack.c.bf16 %v12347_v11, %v12346_v6 }
 0xbdb   :  { %12602 = vrcp.f32 %v2818_v49  ;;  %v2834_v4 = vmul.f32 %v12597_v63, %v12581_v48  ;;  %v3127_v51 = vpop.permute.xlu1 %3126 }
 0xbdc   :  { %10523 = vmatmul.mubr.msk.f32.gmra.mrb[30].mxu0 %vm2425_vm2, %v2833_v2 }
 0xbdd   :  { %v12599_v16 = vpop.eup %12598  ;;  %10525 = vmatprep.mubr.msk.f32.mxu0 %vm2425_vm2, %v2834_v4 }
 0xbde   :  { %v12335_v56 = vpop.permute.xlu0 %12334  ;;  %v2835_v28 = vmul.f32 %v12599_v16, %v12583_v7 }
 0xbdf   :  { %v12337_v23 = vunpack.i.h.bf16 %v12335_v56  ;;  %v12336_v57 = vunpack.i.l.bf16 %v12335_v56  ;;  %v3129_v20 = vpop.permute.xlu1 %3128 }
 0xbe0   :  { %10526 = vmatmul.mubr.msk.f32.gmra.mrb[32].mxu0 %vm2425_vm2, %v2835_v28 }
 0xbe1   :  { %v11565_v32 = vpack.c.bf16 %v12337_v23, %v12336_v57  ;;  %v12601_v36 = vpop.eup %12600 }
 0xbe2   :  { %v2837_v1 = vmul.f32 %v12601_v36, %v15611_v61  ;;  %v3131_v15 = vpop.permute.xlu0 %3130 }
 0xbe3   :  { %11567 = vmatprep.subr.msk.bf16.mxu0 %vm15529_vm4, %v11565_v32  ;;  %v3133_v22 = vpop.permute.xlu1 %3132 }
 0xbe4   :  { %11570 = vmatpush3.bf16.xpose.msk.msra.mxu0 %vm15529_vm4, %v11565_v32 }
 0xbe5   :  { %v12603_v48 = vpop.eup %12602  ;;  %11573 = vmatprep.subr.msk.bf16.mxu0 %vm15529_vm4, %v11571_v59 }
 0xbe6   :  { %v2836_v7 = vmul.f32 %v12603_v48, %v15615_v45  ;;  %v3135_v45 = vpop.permute.xlu0 %3134 }
 0xbe7   :  { %v3137_v27 = vpop.permute.xlu1 %3136 }
 0xbe8   :  { %10528 = vmatprep.mubr.msk.f32.mxu0 %vm2425_vm2, %v2836_v7 }
 0xbe9   :  { %10529 = vmatmul.mubr.msk.f32.gmra.mrb[34].mxu0 %vm2425_vm2, %v2837_v1 }
 0xbea   :  { %10567 = vmatprep.mubr.msk.f32.mxu0 %vm2588_vm3, %v3127_v51  ;;  %v3139_v61 = vpop.permute.xlu0 %3138 }
 0xbeb   :  { %v3141_v31 = vpop.permute.xlu1 %3140 }
 0xbec   :  { %11576 = vmatpush3.bf16.xpose.msk.msra.mxu0 %vm15529_vm4, %v11571_v59 }
 0xbed   :  { %11579 = vmatprep.subr.msk.bf16.mxu0 %vm15529_vm4, %v11577_v8 }
 0xbee   :  { %v12355_v43 = vpop.permute.xlu0 %12354 }
 0xbef   :  { %v12350_v35 = vpop.permute.xlu1 %12349  ;;  %v12357_v41 = vunpack.i.h.bf16 %v12355_v43  ;;  %v12356_v47 = vunpack.i.l.bf16 %v12355_v43 }
 0xbf0   :  { %v12352_v39 = vunpack.i.h.bf16 %v12350_v35  ;;  %v12351_v26 = vunpack.i.l.bf16 %v12350_v35 }
 0xbf1   :  { %v11555_v52 = vpack.c.bf16 %v12357_v41, %v12356_v47 }
 0xbf2   :  { %v11551_v62 = vpack.c.bf16 %v12352_v39, %v12351_v26 }
 0xbf4   :  { %11582 = vmatpush3.bf16.xpose.msk.msra.mxu0 %vm15529_vm4, %v11577_v8  ;;  %11552 = vmatprep.subr.bf16.mxu1 %v11551_v62 }
 0xbf5   :  { %11554 = vmatpush3.bf16.msra.mxu1 %v11551_v62 }
 0xbf6   :  { %11556 = vmatprep.subr.bf16.mxu1 %v11555_v52 }
 0xbf9   :  { %11558 = vmatpush3.bf16.msra.mxu1 %v11555_v52 }
 0xbfb   :  { %10568 = vmatmul.mubr.msk.f32.vlgmr.msra.gmra.mrb[36].mxu0 %vm2588_vm3, %v3129_v20 }
 0xbfc   :  { %10570 = vmatprep.mubr.msk.f32.mxu0 %vm2588_vm3, %v3131_v15 }
 0xbff   :  { %10571 = vmatmul.mubr.msk.f32.gmra.mrb[38].mxu0 %vm2588_vm3, %v3133_v22 }
 0xc00   :  { %10573 = vmatprep.mubr.msk.f32.mxu0 %vm2588_vm3, %v3135_v45 }
 0xc03   :  { %10574 = vmatmul.mubr.msk.f32.gmra.mrb[40].mxu0 %vm2588_vm3, %v3137_v27 }
 0xc04   :  { %10576 = vmatprep.mubr.msk.f32.mxu0 %vm2588_vm3, %v3139_v61 }
 0xc07   :  { %10577 = vmatmul.mubr.msk.f32.gmra.mrb[42].mxu0 %vm2588_vm3, %v3141_v31 }
 0xc08   :  { %3829 = vmatprep.mubr.f32.mxu0 %v16979_v5 }
 0xca8   :  { %v10521_v55 = vpop.f32.mrb[28].mxu0 }
 0xca9   :  { %v2928_v9 = vpop.f32.mrb[29].mxu0 }
 0xcaa   :  { %10539 = vmatprep.mubr.msk.f32.mxu1 %vm2588_vm3, %v2928_v9 }
 0xcab   :  { %10540 = vmatmul.mubr.msk.f32.vlgmr.msra.gmra.mrb[36].mxu1 %vm2588_vm3, %v10521_v55 }
 0xcaf   :  { %v10524_v60 = vpop.f32.mrb[30].mxu0 }
 0xcb0   :  { %v2938_v14 = vpop.f32.mrb[31].mxu0 }
 0xcb1   :  { %10542 = vmatprep.mubr.msk.f32.mxu1 %vm2588_vm3, %v2938_v14 }
 0xcb2   :  { %10543 = vmatmul.mubr.msk.f32.gmra.mrb[38].mxu1 %vm2588_vm3, %v10524_v60 }
 0xcb3   :  { %v10527_v63 = vpop.f32.mrb[32].mxu0 }
 0xcb4   :  { %v2948_v49 = vpop.f32.mrb[33].mxu0 }
 0xcb5   :  { %10545 = vmatprep.mubr.msk.f32.mxu1 %vm2588_vm3, %v2948_v49 }
 0xcb6   :  { %10546 = vmatmul.mubr.msk.f32.gmra.mrb[40].mxu1 %vm2588_vm3, %v10527_v63 }
 0xcbc   :  { %v10530_v2 = vpop.f32.mrb[34].mxu0 }
 0xcbd   :  { %v2958_v4 = vpop.f32.mrb[35].mxu0 }
 0xcbe   :  { %10548 = vmatprep.mubr.msk.f32.mxu1 %vm2588_vm3, %v2958_v4 }
 0xcbf   :  { %10549 = vmatmul.mubr.msk.f32.gmra.mrb[42].mxu1 %vm2588_vm3, %v10530_v2 }
 0xcce   :  { %v10569_v16 = vpop.f32.mrb[36].mxu0 }
 0xccf   :  { %v3296_v56 = vmul.f32 0.17677669, %v10569_v16  ;;  %v3256_v28 = vpop.f32.mrb[37].mxu0 }
 0xcd0   :  { %v3295_v44 = vmul.f32 0.17677669, %v3256_v28 }
 0xcd1   :  { %v3304_v21 = vadd.f32 %v3296_v56, %v15563_v29 }
 0xcd2   :  { %v10572_v51 = vpop.f32.mrb[38].mxu0  ;;  %v3303_v23 = vadd.f32 %v3295_v44, %v15565_v34 }
 0xcd3   :  { %v3298_v57 = vmul.f32 0.17677669, %v10572_v51  ;;  %v3266_v32 = vpop.f32.mrb[39].mxu0  ;;  %v3314_v59 = vsel %vm2425_vm2, %v3304_v21, -inf }
 0xcd4   :  { %v3297_v36 = vmul.f32 0.17677669, %v3266_v32  ;;  %3315 = vmax.xlane.f32.xlu1 %v3314_v59  ;;  %v3311_v48 = vsel %vm2425_vm2, %v3303_v23, -inf }
 0xcd5   :  { %3312 = vmax.xlane.f32.xlu0 %v3311_v48  ;;  %v3306_v20 = vadd.f32 %v3298_v57, %v15573_v38 }
 0xcd6   :  { %v10575_v7 = vpop.f32.mrb[40].mxu0  ;;  %v3305_v29 = vadd.f32 %v3297_v36, %v15570_v58 }
 0xcd7   :  { %v3276_v11 = vpop.f32.mrb[41].mxu0  ;;  %v3320_v6 = vsel %vm2425_vm2, %v3306_v20, -inf  ;;  %v3300_v1 = vmul.f32 0.17677669, %v10575_v7 }
 0xcd8   :  { %v3299_v8 = vmul.f32 0.17677669, %v3276_v11  ;;  %v3317_v45 = vsel %vm2425_vm2, %v3305_v29, -inf }
 0xcd9   :  { %3321 = vmax.xlane.f32.xlu0 %v3320_v6  ;;  %v3308_v38 = vadd.f32 %v3300_v1, %v15580_v13  ;;  %v17110_v13 = vpack.i.bf16 %v15479_v25, %v15475_v17 }
 0xcda   :  { %v10578_v34 = vpop.f32.mrb[42].mxu0  ;;  %v3307_v15 = vadd.f32 %v3299_v8, %v15577_v0 }
 0xcdb   :  { %v3286_v22 = vpop.f32.mrb[43].mxu0  ;;  %v3302_v27 = vmul.f32 0.17677669, %v10578_v34  ;;  %v3326_v58 = vsel %vm2425_vm2, %v3308_v38, -inf }
 0xcdc   :  { %v3301_v61 = vmul.f32 0.17677669, %v3286_v22  ;;  %v3323_v31 = vsel %vm2425_vm2, %v3307_v15, -inf  ;;  %v17112_v22 = vpack.i.bf16 %v15515_v54, %v15511_v50  ;;  %v12796_v50 = vld [vmem:[#allocation21 + $0x48] sm:$0xff]  ;;  %v12797_v54 = vld [vmem:[#allocation21 + $0x58] sm:$0xff] }
 0xcdd   :  { %3318 = vmax.xlane.f32.xlu0 %v3317_v45  ;;  %3324 = vmax.xlane.f32.xlu1 %v3323_v31  ;;  %v15708_v0 = vadd.f32 %v3302_v27, %v15588_v53 }
 0xcde   :  { %v15702_v35 = vadd.f32 %v3301_v61, %v15584_v30 }
 0xcdf   :  { %v3332_v39 = vsel %vm2425_vm2, %v15708_v0, -inf }
 0xce0   :  { %v3329_v43 = vsel %vm2425_vm2, %v15702_v35, -inf }
 0xce1   :  { %3327 = vmax.xlane.f32.xlu0 %v3326_v58  ;;  %3330 = vmax.xlane.f32.xlu1 %v3329_v43  ;;  %v12383_v43 = vpack.i.bf16 %v15430_v19, %v15428_v18 }
 0xce5   :  { %3333 = vmax.xlane.f32.xlu0 %v3332_v39 }
 0xcf2   :  { %12359 = vrot.lane.b32.xlu1 %v12358_v12, %s14521_s24 }
 0xcfb   :  { %12364 = vrot.lane.b32.xlu0 %v17110_v13, %s14521_s24 }
 0xd61   :  { %v3316_v30 = vpop.xlane.xlu1 %3315 }
 0xd62   :  { %v3336_v26 = vsub.f32 %v3304_v21, %v3316_v30  ;;  %v3313_v53 = vpop.xlane.xlu0 %3312 }
 0xd63   :  { %v3335_v41 = vsub.f32 %v3303_v23, %v3313_v53 }
 0xd64   :  { %v3345_v47 = vmul.f32 1.442695, %v3336_v26 }
 0xd65   :  { %v3343_v62 = vmul.f32 1.442695, %v3335_v41 }
 0xd66   :  { %12604 = vpow2.f32 %v3345_v47  ;;  %v3322_v52 = vpop.xlane.xlu0 %3321 }
 0xd67   :  { %12606 = vpow2.f32 %v3343_v62  ;;  %v3338_v55 = vsub.f32 %v3306_v20, %v3322_v52 }
 0xd69   :  { %v3349_v9 = vmul.f32 1.442695, %v3338_v55 }
 0xd6a   :  { %v3319_v60 = vpop.xlane.xlu0 %3318  ;;  %v3325_v14 = vpop.xlane.xlu1 %3324 }
 0xd6b   :  { %12608 = vpow2.f32 %v3349_v9  ;;  %v3337_v3 = vsub.f32 %v3305_v29, %v3319_v60  ;;  %v3339_v10 = vsub.f32 %v3307_v15, %v3325_v14  ;;  %v17111_v15 = vpack.i.bf16 %v15497_v42, %v15493_v33 }
 0xd6d   :  { %v3347_v12 = vmul.f32 1.442695, %v3337_v3  ;;  %v3351_v63 = vmul.f32 1.442695, %v3339_v10 }
 0xd6e   :  { %v3328_v17 = vpop.xlane.xlu0 %3327  ;;  %v3331_v25 = vpop.xlane.xlu1 %3330 }
 0xd6f   :  { %12610 = vpow2.f32 %v3347_v12  ;;  %v3340_v49 = vsub.f32 %v3308_v38, %v3328_v17  ;;  %v3341_v45 = vsub.f32 %v15702_v35, %v3331_v25  ;;  %v12378_v35 = vpack.i.bf16 %v12797_v54, %v12796_v50  ;;  %v3721_v54 = vld [vmem:[#allocation26 + $0x40] sm:$0xff] }
 0xd70   :  { %v15720_v2 = vpop.eup %12604  ;;  %12612 = vpow2.f32 %v3351_v63 }
 0xd71   :  { %v12607_v4 = vpop.eup %12606  ;;  %v3353_v16 = vmul.f32 1.442695, %v3340_v49  ;;  %v3362_v56 = vsel %vm2425_vm2, %v15720_v2, 0.0  ;;  %v3355_v61 = vmul.f32 1.442695, %v3341_v45 }
 0xd72   :  { %3363 = vadd.xlane.f32.xlu0 %v3362_v56  ;;  %v3334_v28 = vpop.xlane.xlu0 %3333  ;;  %v12360_v44 = vpop.permute.xlu1 %12359  ;;  %v3359_v21 = vsel %vm2425_vm2, %v12607_v4, 0.0 }
 0xd73   :  { %12614 = vpow2.f32 %v3353_v16  ;;  %v12362_v51 = vunpack.i.h.bf16 %v12360_v44  ;;  %v12361_v23 = vunpack.i.l.bf16 %v12360_v44  ;;  %3360 = vadd.xlane.f32.xlu1 %v3359_v21  ;;  %v3342_v27 = vsub.f32 %v15708_v0, %v3334_v28 }
 0xd74   :  { %12616 = vpow2.f32 %v3355_v61  ;;  %v3717_v61 = vld [vmem:[#allocation26 + $0x20] sm:$0xff] }
 0xd75   :  { %v15725_v57 = vpop.eup %12608  ;;  %v11583_v32 = vpack.c.bf16 %v12362_v51, %v12361_v23  ;;  %v3357_v31 = vmul.f32 1.442695, %v3342_v27 }
 0xd76   :  { %v12365_v59 = vpop.permute.xlu0 %12364  ;;  %v3368_v36 = vsel %vm2425_vm2, %v15725_v57, 0.0 }
 0xd77   :  { %v12367_v48 = vunpack.i.h.bf16 %v12365_v59  ;;  %v12366_v20 = vunpack.i.l.bf16 %v12365_v59  ;;  %3369 = vadd.xlane.f32.xlu0 %v3368_v36  ;;  %11584 = vmatprep.subr.bf16.mxu1 %v11583_v32  ;;  %12618 = vpow2.f32 %v3357_v31  ;;  %v3719_v31 = vld [vmem:[#allocation26 + $0x30] sm:$0xff] }
 0xd78   :  { %11586 = vmatpush3.bf16.msra.mxu1 %v11583_v32 }
 0xd79   :  { %v15729_v7 = vpop.eup %12610  ;;  %v11587_v11 = vpack.c.bf16 %v12367_v48, %v12366_v20 }
 0xd7a   :  { %v3365_v6 = vsel %vm2425_vm2, %v15729_v7, 0.0  ;;  %v15733_v29 = vpop.eup %12612 }
 0xd7b   :  { %3366 = vadd.xlane.f32.xlu1 %v3365_v6  ;;  %11588 = vmatprep.subr.bf16.mxu1 %v11587_v11  ;;  %v3371_v34 = vsel %vm2425_vm2, %v15733_v29, 0.0  ;;  %v15778_v6 = vld [vmem:[#allocation26 + $0x8] sm:$0xff] }
 0xd7c   :  { %11590 = vmatpush3.bf16.msra.mxu1 %v11587_v11 }
 0xd7d   :  { %v15735_v1 = vpop.eup %12614 }
 0xd7e   :  { %v3374_v8 = vsel %vm2425_vm2, %v15735_v1, 0.0  ;;  %v15751_v38 = vpop.eup %12616 }
 0xd7f   :  { %3375 = vadd.xlane.f32.xlu0 %v3374_v8  ;;  %3372 = vadd.xlane.f32.xlu1 %v3371_v34  ;;  %v3377_v42 = vsel %vm2425_vm2, %v15751_v38, 0.0  ;;  %v3715_v34 = vld [vmem:[#allocation26 + $0x10] sm:$0xff] }
 0xd81   :  { %v15753_v58 = vpop.eup %12618 }
 0xd82   :  { %v3380_v33 = vsel %vm2425_vm2, %v15753_v58, 0.0 }
 0xd90   :  { %12369 = vrot.lane.b32.xlu1 %v17111_v15, %s14521_s24  ;;  %v15784_v15 = vld [vmem:[#allocation26 + $0x28] sm:$0xff] }
 0xd95   :  { %12374 = vrot.lane.b32.xlu0 %v17112_v22, %s14521_s24  ;;  %v15786_v22 = vld [vmem:[#allocation26 + $0x38] sm:$0xff] }
 0xd96   :  { %v11611_v27 = vpack.c.bf16 %v15786_v22, %v15784_v15 }
 0xdb4   :  { %3381 = vadd.xlane.f32.xlu0 %v3380_v33  ;;  %3378 = vadd.xlane.f32.xlu1 %v3377_v42  ;;  %v11613_v33 = vpack.c.bf16 %v3719_v31, %v3717_v61 }
 0xdc5   :  { %12379 = vrot.lane.b32.xlu1 %v12378_v35, %s14519_s1  ;;  %v3723_v35 = vld [vmem:[#allocation26 + $0x50] sm:$0xff] }
 0xdca   :  { %12384 = vrot.lane.b32.xlu0 %v12383_v43, %s14519_s1  ;;  %v11617_v43 = vpack.c.bf16 %v3723_v35, %v3721_v54 }
 0xdff   :  { %v3364_v39 = vpop.xlane.xlu0 %3363 }
 0xe00   :  { %v3361_v0 = vpop.xlane.xlu1 %3360 }
 0xe01   :  { %12620 = vrcp.f32 %v3361_v0 }
 0xe02   :  { %12622 = vrcp.f32 %v3364_v39 }
 0xe04   :  { %v3370_v13 = vpop.xlane.xlu0 %3369 }
 0xe08   :  { %v3367_v30 = vpop.xlane.xlu1 %3366 }
 0xe09   :  { %12624 = vrcp.f32 %v3367_v30 }
 0xe0a   :  { %12626 = vrcp.f32 %v3370_v13 }
 0xe0b   :  { %v12621_v26 = vpop.eup %12620 }
 0xe0c   :  { %v3376_v53 = vpop.xlane.xlu0 %3375  ;;  %v3373_v41 = vpop.xlane.xlu1 %3372  ;;  %v3391_v47 = vmul.f32 %v12621_v26, %v12607_v4 }
 0xe0d   :  { %12628 = vrcp.f32 %v3373_v41  ;;  %v12623_v3 = vpop.eup %12622 }
 0xe0e   :  { %10595 = vmatprep.mubr.msk.f32.mxu1 %vm2425_vm2, %v3391_v47  ;;  %12630 = vrcp.f32 %v3376_v53  ;;  %v3392_v12 = vmul.f32 %v12623_v3, %v15720_v2 }
 0xe10   :  { %v12375_v62 = vpop.permute.xlu0 %12374  ;;  %v12370_v52 = vpop.permute.xlu1 %12369 }
 0xe11   :  { %v12377_v18 = vunpack.i.h.bf16 %v12375_v62  ;;  %v12376_v19 = vunpack.i.l.bf16 %v12375_v62  ;;  %v12372_v55 = vunpack.i.h.bf16 %v12370_v52  ;;  %v12371_v9 = vunpack.i.l.bf16 %v12370_v52  ;;  %v15806_v62 = vld [vmem:[#allocation26 + $0x68] sm:$0xff]  ;;  %v15808_v52 = vld [vmem:[#allocation26 + $0x78] sm:$0xff] }
 0xe13   :  { %v11591_v60 = vpack.c.bf16 %v12372_v55, %v12371_v9  ;;  %v11595_v14 = vpack.c.bf16 %v12377_v18, %v12376_v19  ;;  %v12625_v10 = vpop.eup %12624  ;;  %v11619_v18 = vpack.c.bf16 %v15808_v52, %v15806_v62  ;;  %v3725_v19 = vld [vmem:[#allocation26 + $0x60] sm:$0xff]  ;;  %v3727_v55 = vld [vmem:[#allocation26 + $0x70] sm:$0xff] }
 0xe14   :  { %v12627_v63 = vpop.eup %12626  ;;  %v3393_v17 = vmul.f32 %v12625_v10, %v15729_v7  ;;  %v11621_v9 = vpack.c.bf16 %v3727_v55, %v3725_v19 }
 0xe15   :  { %11592 = vmatprep.subr.bf16.mxu1 %v11591_v60  ;;  %v3394_v49 = vmul.f32 %v12627_v63, %v15725_v57 }
 0xe16   :  { %11594 = vmatpush3.bf16.msra.mxu1 %v11591_v60 }
 0xe17   :  { %11596 = vmatprep.subr.bf16.mxu1 %v11595_v14  ;;  %v12629_v25 = vpop.eup %12628 }
 0xe18   :  { %v12631_v4 = vpop.eup %12630  ;;  %v3395_v16 = vmul.f32 %v12629_v25, %v15733_v29  ;;  %v15780_v29 = vld [vmem:[#allocation26 + $0x18] sm:$0xff] }
 0xe19   :  { %v3396_v56 = vmul.f32 %v12631_v4, %v15735_v1  ;;  %v3713_v1 = vld [vmem:[#allocation26] sm:$0xff]  ;;  %v11607_v8 = vpack.c.bf16 %v15780_v29, %v15778_v6 }
 0xe1a   :  { %11598 = vmatpush3.bf16.msra.mxu1 %v11595_v14  ;;  %v11609_v45 = vpack.c.bf16 %v3715_v34, %v3713_v1  ;;  %v9522_v14 = vld [vmem:[#allocation24] ss:$0 sm:$0xff] }
 0xe1b   :  { %11608 = vmatprep.subr.bf16.mxu0 %v11607_v8 }
 0xe1c   :  { %11610 = vmatpush1.bf16.msra.mxu0 %v11609_v45 }
 0xe1d   :  { %10596 = vmatmul.mubr.msk.f32.vlgmr.msra.gmra.mrb[44].mxu1 %vm2425_vm2, %v3392_v12  ;;  %11612 = vmatprep.subr.bf16.mxu0 %v11611_v27 }
 0xe1e   :  { %10598 = vmatprep.mubr.msk.f32.mxu1 %vm2425_vm2, %v3393_v17 }
 0xe20   :  { %11614 = vmatpush1.bf16.msra.mxu0 %v11613_v33 }
 0xe21   :  { %10599 = vmatmul.mubr.msk.f32.gmra.mrb[46].mxu1 %vm2425_vm2, %v3394_v49 }
 0xe22   :  { %10601 = vmatprep.mubr.msk.f32.mxu1 %vm2425_vm2, %v3395_v16 }
 0xe25   :  { %10602 = vmatmul.mubr.msk.f32.gmra.mrb[48].mxu1 %vm2425_vm2, %v3396_v56 }
 0xe41   :  { %v3382_v2 = vpop.xlane.xlu0 %3381  ;;  %v3379_v28 = vpop.xlane.xlu1 %3378 }
 0xe42   :  { %12632 = vrcp.f32 %v3382_v2 }
 0xe43   :  { %12634 = vrcp.f32 %v3379_v28 }
 0xe45   :  { %v12380_v44 = vpop.permute.xlu1 %12379  ;;  %v12385_v21 = vpop.permute.xlu0 %12384 }
 0xe46   :  { %v12382_v51 = vunpack.i.h.bf16 %v12380_v44  ;;  %v12381_v23 = vunpack.i.l.bf16 %v12380_v44  ;;  %v12387_v57 = vunpack.i.h.bf16 %v12385_v21  ;;  %v12386_v32 = vunpack.i.l.bf16 %v12385_v21 }
 0xe48   :  { %v11599_v59 = vpack.c.bf16 %v12382_v51, %v12381_v23  ;;  %v11603_v36 = vpack.c.bf16 %v12387_v57, %v12386_v32  ;;  %v3729_v57 = vld [vmem:[#allocation27] sm:$0x3] }
 0xe49   :  { %v3734_v32 = vrot.slane %v3729_v57, %v15353_v37 }
 0xe4a   :  { %11600 = vmatprep.subr.bf16.mxu1 %v11599_v59 }
 0xe4b   :  { %11602 = vmatpush3.bf16.msra.mxu1 %v11599_v59  ;;  %v3738_v59 = vrot.slane %v3729_v57, %v15356_v40 }
 0xe4c   :  { %v12633_v48 = vpop.eup %12632  ;;  %11604 = vmatprep.subr.bf16.mxu1 %v11603_v36 }
 0xe4d   :  { %v12635_v20 = vpop.eup %12634  ;;  %v3398_v7 = vmul.f32 %v12633_v48, %v15753_v58  ;;  %v15792_v58 = vld [vmem:[#allocation26 + $0x58] sm:$0xff] }
 0xe4e   :  { %v3397_v11 = vmul.f32 %v12635_v20, %v15751_v38  ;;  %v15790_v38 = vld [vmem:[#allocation26 + $0x48] sm:$0xff] }
 0xe4f   :  { %11606 = vmatpush3.bf16.msra.mxu1 %v11603_v36  ;;  %v11615_v50 = vpack.c.bf16 %v15792_v58, %v15790_v38 }
 0xe50   :  { %10604 = vmatprep.mubr.msk.f32.mxu1 %vm2425_vm2, %v3397_v11 }
 0xe51   :  { %10605 = vmatmul.mubr.msk.f32.gmra.mrb[50].mxu1 %vm2425_vm2, %v3398_v7  ;;  %11616 = vmatprep.subr.bf16.mxu0 %v11615_v50 }
 0xe52   :  { %11618 = vmatpush1.bf16.msra.mxu0 %v11617_v43 }
 0xe53   :  { %11620 = vmatprep.subr.bf16.mxu0 %v11619_v18 }
 0xe56   :  { %11622 = vmatpush1.bf16.msra.mxu0 %v11621_v9 }
 0xef0   :  { %v10597_v0 = vpop.f32.mrb[44].mxu1 }
 0xef1   :  { %v3521_v39 = vpop.f32.mrb[45].mxu1 }
 0xef2   :  { %10615 = vmatprep.mubr.msk.f32.mxu1 %vm2588_vm3, %v3521_v39 }
 0xef3   :  { %10616 = vmatmul.mubr.msk.f32.vlgmr.msra.gmra.mrb[36].mxu1 %vm2588_vm3, %v10597_v0 }
 0xef4   :  { %v10600_v13 = vpop.f32.mrb[46].mxu1 }
 0xef5   :  { %v3531_v30 = vpop.f32.mrb[47].mxu1 }
 0xef6   :  { %10618 = vmatprep.mubr.msk.f32.mxu1 %vm2588_vm3, %v3531_v30 }
 0xef7   :  { %10619 = vmatmul.mubr.msk.f32.gmra.mrb[38].mxu1 %vm2588_vm3, %v10600_v13 }
 0xef8   :  { %v10603_v26 = vpop.f32.mrb[48].mxu1 }
 0xef9   :  { %v3541_v53 = vpop.f32.mrb[49].mxu1 }
 0xefa   :  { %10621 = vmatprep.mubr.msk.f32.mxu1 %vm2588_vm3, %v3541_v53 }
 0xefb   :  { %10622 = vmatmul.mubr.msk.f32.gmra.mrb[40].mxu1 %vm2588_vm3, %v10603_v26 }
 0xf24   :  { %v10606_v41 = vpop.f32.mrb[50].mxu1 }
 0xf25   :  { %v3551_v47 = vpop.f32.mrb[51].mxu1 }
 0xf26   :  { %10624 = vmatprep.mubr.msk.f32.mxu1 %vm2588_vm3, %v3551_v47 }
 0xf27   :  { %10625 = vmatmul.mubr.msk.f32.gmra.mrb[42].mxu1 %vm2588_vm3, %v10606_v41 }
 0xfc6   :  { %v10617_v3 = vpop.f32.mrb[36].mxu1 }
 0xfc7   :  { %v3666_v10 = vpop.f32.mrb[37].mxu1  ;;  %v12083_v25 = vadd.f32 %v10617_v3, %v9522_v14 }
 0xfc8   :  { %v12084_v12 = vadd.f32 %v9522_v14, %v3666_v10 }
 0xfca   :  { %v10620_v63 = vpop.f32.mrb[38].mxu1  ;;  %9555 = vmatmul.mubr.msk.f32.vlgmr.msra.gmra.mrb[44].mxu0 %vm2425_vm2, %v12084_v12 }
 0xfcb   :  { %v3676_v17 = vpop.f32.mrb[39].mxu1  ;;  %3835 = vmatprep.mubr.f32.mxu0 %v16979_v5  ;;  %v12085_v56 = vadd.f32 %v10620_v63, %v9522_v14 }
 0xfcc   :  { %v12086_v16 = vadd.f32 %v9522_v14, %v3676_v17 }
 0xfce   :  { %v10623_v49 = vpop.f32.mrb[40].mxu1  ;;  %9556 = vmatmul.mubr.msk.f32.gmra.mrb[46].mxu0 %vm2425_vm2, %v12083_v25 }
 0xfcf   :  { %v3686_v4 = vpop.f32.mrb[41].mxu1  ;;  %3841 = vmatprep.mubr.f32.mxu0 %v16979_v5  ;;  %v12087_v28 = vadd.f32 %v10623_v49, %v9522_v14 }
 0xfd0   :  { %v12088_v2 = vadd.f32 %v9522_v14, %v3686_v4 }
 0xfd2   :  { %9557 = vmatmul.mubr.msk.f32.gmra.mrb[48].mxu0 %vm2425_vm2, %v12086_v16 }
 0xfd3   :  { %3847 = vmatprep.mubr.f32.mxu0 %v16979_v5 }
 0xfd6   :  { %9558 = vmatmul.mubr.msk.f32.gmra.mrb[50].mxu0 %vm2425_vm2, %v12085_v56 }
 0xfd7   :  { %3853 = vmatprep.mubr.f32.mxu0 %v16979_v5 }
 0xfda   :  { %9559 = vmatmul.mubr.msk.f32.gmra.mrb[52].mxu0 %vm2425_vm2, %v12088_v2 }
 0xfdb   :  { %3859 = vmatprep.mubr.f32.mxu0 %v16979_v5 }
 0xfde   :  { %9560 = vmatmul.mubr.msk.f32.gmra.mrb[54].mxu0 %vm2425_vm2, %v12087_v28 }
 0xfdf   :  { %3865 = vmatprep.mubr.f32.mxu0 %v16979_v5 }
 0xffa   :  { %v10626_v44 = vpop.f32.mrb[42].mxu1 }
 0xffb   :  { %v3696_v21 = vpop.f32.mrb[43].mxu1  ;;  %v12089_v23 = vadd.f32 %v10626_v44, %v9522_v14 }
 0xffc   :  { %v12090_v51 = vadd.f32 %v9522_v14, %v3696_v21 }
 0xffe   :  { %9561 = vmatmul.mubr.msk.f32.gmra.mrb[56].mxu0 %vm2425_vm2, %v12090_v51 }
 0xfff   :  { %3871 = vmatprep.mubr.f32.mxu0 %v16979_v5 }
0x1002   :  { %9562 = vmatmul.mubr.msk.f32.gmra.mrb[58].mxu0 %vm2425_vm2, %v12089_v23 }
0x109d   :  { %v3831_v36 = vpop.f32.mrb[44].mxu0 }
0x109e   :  { %v15831_v48 = vadd.f32 %v3831_v36, %v3734_v32  ;;  %v3833_v20 = vpop.f32.mrb[45].mxu0 }
0x109f   :  { %v15833_v7 = vadd.f32 %v3833_v20, %v3738_v59 }
0x10a0   :  { %10643 = vmatprep.mubr.msk.f32.mxu1 %vm2588_vm3, %v15831_v48 }
0x10a1   :  { %v3837_v11 = vpop.f32.mrb[46].mxu0 }
0x10a2   :  { %v15837_v1 = vadd.f32 %v3837_v11, %v3734_v32  ;;  %v3839_v8 = vpop.f32.mrb[47].mxu0 }
0x10a3   :  { %v15839_v34 = vadd.f32 %v3839_v8, %v3738_v59 }
0x10a4   :  { %v15843_v45 = vpack.i.bf16 %v15837_v1, %v15831_v48 }
0x10a5   :  { %v11647_v61 = vpack.c.bf16 %v15839_v34, %v15833_v7  ;;  %v3843_v31 = vpop.f32.mrb[48].mxu0 }
0x10a6   :  { %v15849_v33 = vadd.f32 %v3843_v31, %v3734_v32  ;;  %12389 = vrot.lane.b32.xlu1 %v15843_v45, %s14519_s1  ;;  %v3845_v50 = vpop.f32.mrb[49].mxu0 }
0x10a7   :  { %v15853_v54 = vadd.f32 %v3845_v50, %v3738_v59  ;;  %11648 = vmatprep.subr.bf16.mxu0 %v11647_v61 }
0x10a8   :  { %11650 = vmatpush3.bf16.msra.mxu0 %v11647_v61 }
0x10a9   :  { %v3849_v35 = vpop.f32.mrb[50].mxu0 }
0x10aa   :  { %v15855_v43 = vadd.f32 %v3849_v35, %v3734_v32  ;;  %v3851_v0 = vpop.f32.mrb[51].mxu0 }
0x10ab   :  { %v15857_v39 = vadd.f32 %v3851_v0, %v3738_v59 }
0x10ac   :  { %v15861_v13 = vpack.i.bf16 %v15855_v43, %v15849_v33 }
0x10ad   :  { %v11651_v26 = vpack.c.bf16 %v15857_v39, %v15853_v54  ;;  %v3855_v53 = vpop.f32.mrb[52].mxu0 }
0x10ae   :  { %v15867_v41 = vadd.f32 %v3855_v53, %v3734_v32  ;;  %12394 = vrot.lane.b32.xlu1 %v15861_v13, %s14519_s1  ;;  %v3857_v47 = vpop.f32.mrb[53].mxu0 }
0x10af   :  { %v15871_v18 = vadd.f32 %v3857_v47, %v3738_v59  ;;  %11652 = vmatprep.subr.bf16.mxu0 %v11651_v26 }
0x10b0   :  { %11654 = vmatpush3.bf16.msra.mxu0 %v11651_v26 }
0x10b1   :  { %v3861_v19 = vpop.f32.mrb[54].mxu0 }
0x10b2   :  { %v15873_v55 = vadd.f32 %v3861_v19, %v3734_v32  ;;  %v3863_v9 = vpop.f32.mrb[55].mxu0 }
0x10b3   :  { %v15875_v14 = vadd.f32 %v3863_v9, %v3738_v59 }
0x10b4   :  { %v15879_v3 = vpack.i.bf16 %v15873_v55, %v15867_v41 }
0x10b5   :  { %v11655_v12 = vpack.c.bf16 %v15875_v14, %v15871_v18 }
0x10b6   :  { %12399 = vrot.lane.b32.xlu0 %v15879_v3, %s14519_s1 }
0x10b7   :  { %11656 = vmatprep.subr.bf16.mxu0 %v11655_v12 }
0x10b8   :  { %11658 = vmatpush3.bf16.msra.mxu0 %v11655_v12 }
0x10d1   :  { %v3867_v63 = vpop.f32.mrb[56].mxu0 }
0x10d2   :  { %v15887_v17 = vadd.f32 %v3867_v63, %v3734_v32  ;;  %v3869_v25 = vpop.f32.mrb[57].mxu0  ;;  %v15935_v63 = vld [vmem:[#allocation33 + $0x8] sm:$0xff] }
0x10d3   :  { %v15889_v49 = vadd.f32 %v3869_v25, %v3738_v59 }
0x10d5   :  { %v3873_v4 = vpop.f32.mrb[58].mxu0 }
0x10d6   :  { %v15891_v16 = vadd.f32 %v3873_v4, %v3734_v32  ;;  %v3875_v56 = vpop.f32.mrb[59].mxu0 }
0x10d7   :  { %v15893_v2 = vadd.f32 %v3875_v56, %v3738_v59  ;;  %v15938_v56 = vld [vmem:[#allocation33] sm:$0xff] }
0x10d8   :  { %v15897_v28 = vpack.i.bf16 %v15891_v16, %v15887_v17 }
0x10d9   :  { %v11659_v21 = vpack.c.bf16 %v15893_v2, %v15889_v49 }
0x10da   :  { %12404 = vrot.lane.b32.xlu1 %v15897_v28, %s14519_s1 }
0x10db   :  { %11660 = vmatprep.subr.bf16.mxu0 %v11659_v21 }
0x10dc   :  { %11662 = vmatpush3.bf16.msra.mxu0 %v11659_v21 }
0x1118   :  { %v12390_v51 = vpop.permute.xlu1 %12389 }
0x1119   :  { %v12392_v23 = vunpack.i.h.bf16 %v12390_v51  ;;  %v12391_v57 = vunpack.i.l.bf16 %v12390_v51 }
0x111b   :  { %v11623_v32 = vpack.c.bf16 %v12392_v23, %v12391_v57 }
0x111d   :  { %11625 = vmatprep.subr.msk.bf16.mxu1 %vm15529_vm4, %v11623_v32 }
0x111e   :  { %11628 = vmatpush3.bf16.xpose.msk.msra.mxu1 %vm15529_vm4, %v11623_v32 }
0x1120   :  { %v12395_v59 = vpop.permute.xlu1 %12394 }
0x1121   :  { %v12397_v36 = vunpack.i.h.bf16 %v12395_v59  ;;  %v12396_v20 = vunpack.i.l.bf16 %v12395_v59 }
0x1123   :  { %v11629_v11 = vpack.c.bf16 %v12397_v36, %v12396_v20  ;;  %v15943_v20 = vld [vmem:[#allocation33 + $0x10] sm:$0xff] }
0x1125   :  { %11631 = vmatprep.subr.msk.bf16.mxu1 %vm15529_vm4, %v11629_v11 }
0x1126   :  { %11634 = vmatpush3.bf16.xpose.msk.msra.mxu1 %vm15529_vm4, %v11629_v11 }
0x1128   :  { %v12400_v8 = vpop.permute.xlu0 %12399 }
0x1129   :  { %v12402_v61 = vunpack.i.h.bf16 %v12400_v8  ;;  %v12401_v31 = vunpack.i.l.bf16 %v12400_v8 }
0x112b   :  { %v11635_v50 = vpack.c.bf16 %v12402_v61, %v12401_v31  ;;  %v15946_v61 = vld [vmem:[#allocation33 + $0x18] sm:$0xff] }
0x112d   :  { %11637 = vmatprep.subr.msk.bf16.mxu1 %vm15529_vm4, %v11635_v50 }
0x112e   :  { %11640 = vmatpush3.bf16.xpose.msk.msra.mxu1 %vm15529_vm4, %v11635_v50 }
0x114c   :  { %v12405_v35 = vpop.permute.xlu1 %12404 }
0x114d   :  { %v12407_v0 = vunpack.i.h.bf16 %v12405_v35  ;;  %v12406_v26 = vunpack.i.l.bf16 %v12405_v35 }
0x114f   :  { %v11641_v53 = vpack.c.bf16 %v12407_v0, %v12406_v26 }
0x1151   :  { %11643 = vmatprep.subr.msk.bf16.mxu1 %vm15529_vm4, %v11641_v53 }
0x1152   :  { %11646 = vmatpush3.bf16.xpose.msk.msra.mxu1 %vm15529_vm4, %v11641_v53  ;;  %v15950_v53 = vld [vmem:[#allocation33 + $0x20] sm:$0xff] }
0x1159   :  { %10644 = vmatmul.mubr.msk.f32.vlgmr.msra.gmra.mrb[52].mxu1 %vm2588_vm3, %v15837_v1 }
0x115a   :  { %10646 = vmatprep.mubr.msk.f32.mxu1 %vm2588_vm3, %v15849_v33 }
0x115d   :  { %10647 = vmatmul.mubr.msk.f32.gmra.mrb[54].mxu1 %vm2588_vm3, %v15855_v43 }
0x115e   :  { %10649 = vmatprep.mubr.msk.f32.mxu1 %vm2588_vm3, %v15867_v41 }
0x1161   :  { %10650 = vmatmul.mubr.msk.f32.gmra.mrb[56].mxu1 %vm2588_vm3, %v15873_v55 }
0x1162   :  { %10652 = vmatprep.mubr.msk.f32.mxu1 %vm2588_vm3, %v15887_v17 }
0x1165   :  { %10653 = vmatmul.mubr.msk.f32.gmra.mrb[58].mxu1 %vm2588_vm3, %v15891_v16 }
0x122c   :  { %v10645_v47 = vpop.f32.mrb[52].mxu1 }
0x122d   :  { %v4041_v19 = vmul.f32 0.17677669, %v10645_v47  ;;  %v4001_v9 = vpop.f32.mrb[53].mxu1 }
0x122e   :  { %v4040_v12 = vmul.f32 0.17677669, %v4001_v9 }
0x122f   :  { %v4049_v25 = vadd.f32 %v15935_v63, %v4041_v19 }
0x1230   :  { %v10648_v4 = vpop.f32.mrb[54].mxu1  ;;  %v4048_v21 = vadd.f32 %v15938_v56, %v4040_v12 }
0x1231   :  { %v4043_v51 = vmul.f32 0.17677669, %v10648_v4  ;;  %v4011_v23 = vpop.f32.mrb[55].mxu1  ;;  %v4059_v57 = vsel %vm2425_vm2, %v4049_v25, -inf }
0x1232   :  { %v4042_v32 = vmul.f32 0.17677669, %v4011_v23  ;;  %4060 = vmax.xlane.f32.xlu1 %v4059_v57  ;;  %v4056_v59 = vsel %vm2425_vm2, %v4048_v21, -inf  ;;  %v15955_v57 = vld [vmem:[#allocation33 + $0x28] sm:$0xff] }
0x1233   :  { %4057 = vmax.xlane.f32.xlu0 %v4056_v59  ;;  %v4051_v31 = vadd.f32 %v15946_v61, %v4043_v51 }
0x1234   :  { %v10651_v36 = vpop.f32.mrb[56].mxu1  ;;  %v4050_v11 = vadd.f32 %v15943_v20, %v4042_v32  ;;  %v15958_v32 = vld [vmem:[#allocation33 + $0x30] sm:$0xff] }
0x1235   :  { %v4021_v8 = vpop.f32.mrb[57].mxu1  ;;  %v4045_v50 = vmul.f32 0.17677669, %v10651_v36  ;;  %v4065_v9 = vsel %vm2425_vm2, %v4051_v31, -inf }
0x1236   :  { %v4044_v35 = vmul.f32 0.17677669, %v4021_v8  ;;  %v4062_v0 = vsel %vm2425_vm2, %v4050_v11, -inf }
0x1237   :  { %4063 = vmax.xlane.f32.xlu0 %v4062_v0  ;;  %v4053_v51 = vadd.f32 %v15955_v57, %v4045_v50 }
0x1238   :  { %v10654_v26 = vpop.f32.mrb[58].mxu1  ;;  %v4052_v47 = vadd.f32 %v15950_v53, %v4044_v35  ;;  %v15963_v35 = vld [vmem:[#allocation33 + $0x38] sm:$0xff] }
0x1239   :  { %v4031_v19 = vpop.f32.mrb[59].mxu1  ;;  %v4047_v12 = vmul.f32 0.17677669, %v10654_v26  ;;  %v4071_v36 = vsel %vm2425_vm2, %v4053_v51, -inf }
0x123a   :  { %v4046_v4 = vmul.f32 0.17677669, %v4031_v19  ;;  %v4068_v23 = vsel %vm2425_vm2, %v4052_v47, -inf }
0x123b   :  { %4066 = vmax.xlane.f32.xlu0 %v4065_v9  ;;  %4069 = vmax.xlane.f32.xlu1 %v4068_v23  ;;  %v4055_v0 = vadd.f32 %v15963_v35, %v4047_v12 }
0x123c   :  { %v4054_v59 = vadd.f32 %v15958_v32, %v4046_v4 }
0x123d   :  { %v4077_v26 = vsel %vm2425_vm2, %v4055_v0, -inf }
0x123e   :  { %v4074_v8 = vsel %vm2425_vm2, %v4054_v59, -inf }
0x123f   :  { %4072 = vmax.xlane.f32.xlu0 %v4071_v36  ;;  %4075 = vmax.xlane.f32.xlu1 %v4074_v8 }
0x1243   :  { %4078 = vmax.xlane.f32.xlu0 %v4077_v26 }
0x1250   :  { %12409 = vrot.lane.b32.xlu1 %v15843_v45, %s14520_s12 }
0x12bf   :  { %v4061_v50 = vpop.xlane.xlu1 %4060 }
0x12c0   :  { %v4081_v19 = vsub.f32 %v4049_v25, %v4061_v50  ;;  %v4058_v9 = vpop.xlane.xlu0 %4057 }
0x12c1   :  { %v4080_v4 = vsub.f32 %v4048_v21, %v4058_v9 }
0x12c2   :  { %v4090_v23 = vmul.f32 1.442695, %v4081_v19 }
0x12c3   :  { %v4088_v60 = vmul.f32 1.442695, %v4080_v4 }
0x12c4   :  { %12636 = vpow2.f32 %v4090_v23  ;;  %v4064_v42 = vpop.xlane.xlu0 %4063 }
0x12c5   :  { %12638 = vpow2.f32 %v4088_v60  ;;  %v4082_v44 = vsub.f32 %v4050_v11, %v4064_v42 }
0x12c7   :  { %v4092_v10 = vmul.f32 1.442695, %v4082_v44 }
0x12c8   :  { %v4067_v12 = vpop.xlane.xlu0 %4066  ;;  %v4070_v36 = vpop.xlane.xlu1 %4069 }
0x12c9   :  { %12640 = vpow2.f32 %v4092_v10  ;;  %v4083_v8 = vsub.f32 %v4051_v31, %v4067_v12  ;;  %v4084_v30 = vsub.f32 %v4052_v47, %v4070_v36 }
0x12cb   :  { %v4094_v26 = vmul.f32 1.442695, %v4083_v8  ;;  %v4096_v27 = vmul.f32 1.442695, %v4084_v30 }
0x12cc   :  { %v4073_v5 = vpop.xlane.xlu0 %4072  ;;  %v4076_v45 = vpop.xlane.xlu1 %4075 }
0x12cd   :  { %12642 = vpow2.f32 %v4094_v26  ;;  %v4085_v25 = vsub.f32 %v4053_v51, %v4073_v5  ;;  %v4086_v60 = vsub.f32 %v4054_v59, %v4076_v45 }
0x12ce   :  { %v15969_v50 = vpop.eup %12636  ;;  %12644 = vpow2.f32 %v4096_v27 }
0x12cf   :  { %v15971_v21 = vpop.eup %12638  ;;  %v4098_v19 = vmul.f32 1.442695, %v4085_v25  ;;  %v4107_v42 = vsel %vm2425_vm2, %v15969_v50, 0.0  ;;  %v4100_v27 = vmul.f32 1.442695, %v4086_v60 }
0x12d0   :  { %4108 = vadd.xlane.f32.xlu0 %v4107_v42  ;;  %v4079_v10 = vpop.xlane.xlu0 %4078  ;;  %v12410_v44 = vpop.permute.xlu1 %12409  ;;  %v4104_v30 = vsel %vm2425_vm2, %v15971_v21, 0.0 }
0x12d1   :  { %12646 = vpow2.f32 %v4098_v19  ;;  %v4087_v11 = vsub.f32 %v4055_v0, %v4079_v10  ;;  %v12412_v31 = vunpack.i.h.bf16 %v12410_v44  ;;  %v12411_v5 = vunpack.i.l.bf16 %v12410_v44  ;;  %4105 = vadd.xlane.f32.xlu1 %v4104_v30 }
0x12d3   :  { %v12641_v47 = vpop.eup %12640  ;;  %v4102_v51 = vmul.f32 1.442695, %v4087_v11  ;;  %v11671_v9 = vpack.c.bf16 %v12412_v31, %v12411_v5 }
0x12d4   :  { %v4110_v59 = vsel %vm2425_vm2, %v12641_v47, 0.0 }
0x12d5   :  { %12648 = vpow2.f32 %v4102_v51  ;;  %4111 = vadd.xlane.f32.xlu1 %v4110_v59  ;;  %11673 = vmatprep.subr.msk.bf16.mxu0 %vm15529_vm4, %v11671_v9 }
0x12d6   :  { %12650 = vpow2.f32 %v4100_v27 }
0x12d7   :  { %v12643_v4 = vpop.eup %12642 }
0x12d8   :  { %v12645_v23 = vpop.eup %12644  ;;  %v4113_v12 = vsel %vm2425_vm2, %v12643_v4, 0.0 }
0x12d9   :  { %4114 = vadd.xlane.f32.xlu0 %v4113_v12  ;;  %v4116_v0 = vsel %vm2425_vm2, %v12645_v23, 0.0 }
0x12da   :  { %4117 = vadd.xlane.f32.xlu1 %v4116_v0 }
0x12db   :  { %v12647_v36 = vpop.eup %12646 }
0x12dc   :  { %v4119_v8 = vsel %vm2425_vm2, %v12647_v36, 0.0 }
0x12dd   :  { %4120 = vadd.xlane.f32.xlu0 %v4119_v8 }
0x12df   :  { %v15983_v26 = vpop.eup %12648 }
0x12e0   :  { %v4125_v45 = vsel %vm2425_vm2, %v15983_v26, 0.0  ;;  %v15987_v25 = vpop.eup %12650 }
0x12e1   :  { %4126 = vadd.xlane.f32.xlu0 %v4125_v45  ;;  %v4122_v19 = vsel %vm2425_vm2, %v15987_v25, 0.0 }
0x12e5   :  { %4123 = vadd.xlane.f32.xlu0 %v4122_v19 }
0x12eb   :  { %12419 = vrot.lane.b32.xlu1 %v15879_v3, %s14520_s12 }
0x12ef   :  { %12424 = vrot.lane.b32.xlu1 %v15897_v28, %s14520_s12 }
0x12f3   :  { %4432 = vrot.lane.b32.xlu1 %v15831_v48, %s14521_s24  ;;  %v12428_v48 = vpack.i.bf16 %v15780_v29, %v15778_v6 }
0x12f7   :  { %4434 = vrot.lane.b32.xlu1 %v15837_v1, %s14521_s24  ;;  %v12433_v1 = vpack.i.bf16 %v15786_v22, %v15784_v15 }
0x12fb   :  { %4438 = vrot.lane.b32.xlu1 %v15855_v43, %s14521_s24  ;;  %12414 = vrot.lane.b32.xlu0 %v15861_v13, %s14520_s12 }
0x12ff   :  { %4442 = vrot.lane.b32.xlu1 %v15873_v55, %s14521_s24  ;;  %4436 = vrot.lane.b32.xlu0 %v15849_v33, %s14521_s24 }
0x1303   :  { %4446 = vrot.lane.b32.xlu1 %v15891_v16, %s14521_s24  ;;  %4440 = vrot.lane.b32.xlu0 %v15867_v41, %s14521_s24 }
0x1307   :  { %4444 = vrot.lane.b32.xlu0 %v15887_v17, %s14521_s24  ;;  %12429 = vrot.lane.b32.xlu1 %v12428_v48, %s14519_s1 }
0x130b   :  { %12434 = vrot.lane.b32.xlu0 %v12433_v1, %s14519_s1 }
0x135d   :  { %v4109_v33 = vpop.xlane.xlu0 %4108 }
0x135e   :  { %12652 = vrcp.f32 %v4109_v33  ;;  %v4106_v43 = vpop.xlane.xlu1 %4105 }
0x135f   :  { %12654 = vrcp.f32 %v4106_v43 }
0x1362   :  { %v4112_v13 = vpop.xlane.xlu1 %4111 }
0x1363   :  { %12656 = vrcp.f32 %v4112_v13 }
0x1366   :  { %v4115_v41 = vpop.xlane.xlu0 %4114 }
0x1367   :  { %12658 = vrcp.f32 %v4115_v41  ;;  %v4118_v55 = vpop.xlane.xlu1 %4117 }
0x1368   :  { %v12653_v3 = vpop.eup %12652  ;;  %12660 = vrcp.f32 %v4118_v55 }
0x1369   :  { %v12655_v17 = vpop.eup %12654  ;;  %v4137_v15 = vmul.f32 %v12653_v3, %v15969_v50 }
0x136a   :  { %v4121_v6 = vpop.xlane.xlu0 %4120  ;;  %v4136_v29 = vmul.f32 %v12655_v17, %v15971_v21 }
0x136b   :  { %12662 = vrcp.f32 %v4121_v6  ;;  %v12420_v22 = vpop.permute.xlu1 %12419 }
0x136c   :  { %10671 = vmatprep.mubr.msk.f32.mxu0 %vm2425_vm2, %v4136_v29  ;;  %v12422_v27 = vunpack.i.h.bf16 %v12420_v22  ;;  %v12421_v51 = vunpack.i.l.bf16 %v12420_v22 }
0x136d   :  { %v12657_v16 = vpop.eup %12656  ;;  %10672 = vmatmul.mubr.msk.f32.vlgmr.msra.gmra.mrb[60].mxu0 %vm2425_vm2, %v4137_v15 }
0x136e   :  { %11676 = vmatpush3.bf16.xpose.msk.msra.mxu0 %vm15529_vm4, %v11671_v9  ;;  %v4127_v28 = vpop.xlane.xlu0 %4126  ;;  %v4138_v60 = vmul.f32 %v12657_v16, %v12641_v47  ;;  %v11683_v0 = vpack.c.bf16 %v12422_v27, %v12421_v51 }
0x136f   :  { %v12425_v10 = vpop.permute.xlu1 %12424  ;;  %12664 = vrcp.f32 %v4127_v28  ;;  %v17113_v28 = vmov 0.0  }
0x1370   :  { %10674 = vmatprep.mubr.msk.f32.mxu0 %vm2425_vm2, %v4138_v60  ;;  %v12427_v45 = vunpack.i.h.bf16 %v12425_v10  ;;  %v12426_v19 = vunpack.i.l.bf16 %v12425_v10 }
0x1371   :  { %v12659_v42 = vpop.eup %12658 }
0x1372   :  { %v12661_v44 = vpop.eup %12660  ;;  %v4124_v21 = vpop.xlane.xlu0 %4123  ;;  %v4139_v50 = vmul.f32 %v12659_v42, %v12643_v4  ;;  %v11689_v1 = vpack.c.bf16 %v12427_v45, %v12426_v19 }
0x1373   :  { %12666 = vrcp.f32 %v4124_v21  ;;  %v4140_v30 = vmul.f32 %v12661_v44, %v12645_v23  ;;  %v4433_v47 = vpop.permute.xlu1 %4432 }
0x1374   :  { %10675 = vmatmul.mubr.msk.f32.gmra.mrb[62].mxu0 %vm2425_vm2, %v4139_v50 }
0x1375   :  { %v12663_v11 = vpop.eup %12662  ;;  %10677 = vmatprep.mubr.msk.f32.mxu0 %vm2425_vm2, %v4140_v30 }
0x1376   :  { %v12415_v31 = vpop.permute.xlu0 %12414  ;;  %v4141_v5 = vmul.f32 %v12663_v11, %v12647_v36 }
0x1377   :  { %v12417_v9 = vunpack.i.h.bf16 %v12415_v31  ;;  %v12416_v59 = vunpack.i.l.bf16 %v12415_v31  ;;  %v4435_v8 = vpop.permute.xlu1 %4434 }
0x1378   :  { %10678 = vmatmul.mubr.msk.f32.gmra.mrb[64].mxu0 %vm2425_vm2, %v4141_v5 }
0x1379   :  { %v11677_v12 = vpack.c.bf16 %v12417_v9, %v12416_v59  ;;  %v12665_v4 = vpop.eup %12664 }
0x137a   :  { %v4143_v48 = vmul.f32 %v12665_v4, %v15983_v26  ;;  %v4437_v33 = vpop.permute.xlu0 %4436 }
0x137b   :  { %11679 = vmatprep.subr.msk.bf16.mxu0 %vm15529_vm4, %v11677_v12  ;;  %v4439_v43 = vpop.permute.xlu1 %4438 }
0x137c   :  { %11682 = vmatpush3.bf16.xpose.msk.msra.mxu0 %vm15529_vm4, %v11677_v12 }
0x137d   :  { %v12667_v23 = vpop.eup %12666  ;;  %11685 = vmatprep.subr.msk.bf16.mxu0 %vm15529_vm4, %v11683_v0 }
0x137e   :  { %v4142_v36 = vmul.f32 %v12667_v23, %v15987_v25  ;;  %v4441_v25 = vpop.permute.xlu0 %4440 }
0x137f   :  { %v4443_v13 = vpop.permute.xlu1 %4442 }
0x1380   :  { %10680 = vmatprep.mubr.msk.f32.mxu0 %vm2425_vm2, %v4142_v36 }
0x1381   :  { %10681 = vmatmul.mubr.msk.f32.gmra.mrb[66].mxu0 %vm2425_vm2, %v4143_v48 }
0x1382   :  { %10719 = vmatprep.mubr.msk.f32.mxu0 %vm2588_vm3, %v4433_v47  ;;  %v4445_v26 = vpop.permute.xlu0 %4444 }
0x1383   :  { %v4447_v41 = vpop.permute.xlu1 %4446 }
0x1384   :  { %11688 = vmatpush3.bf16.xpose.msk.msra.mxu0 %vm15529_vm4, %v11683_v0 }
0x1385   :  { %11691 = vmatprep.subr.msk.bf16.mxu0 %vm15529_vm4, %v11689_v1 }
0x1386   :  { %v12435_v3 = vpop.permute.xlu0 %12434 }
0x1387   :  { %v12430_v55 = vpop.permute.xlu1 %12429  ;;  %v12437_v29 = vunpack.i.h.bf16 %v12435_v3  ;;  %v12436_v15 = vunpack.i.l.bf16 %v12435_v3 }
0x1388   :  { %v12432_v17 = vunpack.i.h.bf16 %v12430_v55  ;;  %v12431_v6 = vunpack.i.l.bf16 %v12430_v55 }
0x1389   :  { %v11667_v16 = vpack.c.bf16 %v12437_v29, %v12436_v15 }
0x138a   :  { %v11663_v22 = vpack.c.bf16 %v12432_v17, %v12431_v6  ;;  %v17114_v6 = vpack.i.bf16 %v15839_v34, %v15833_v7 }
0x138c   :  { %11694 = vmatpush3.bf16.xpose.msk.msra.mxu0 %vm15529_vm4, %v11689_v1  ;;  %11664 = vmatprep.subr.bf16.mxu1 %v11663_v22 }
0x138d   :  { %11666 = vmatpush3.bf16.msra.mxu1 %v11663_v22 }
0x138e   :  { %11668 = vmatprep.subr.bf16.mxu1 %v11667_v16 }
0x1391   :  { %11670 = vmatpush3.bf16.msra.mxu1 %v11667_v16 }
0x1393   :  { %10720 = vmatmul.mubr.msk.f32.vlgmr.msra.gmra.mrb[68].mxu0 %vm2588_vm3, %v4435_v8 }
0x1394   :  { %10722 = vmatprep.mubr.msk.f32.mxu0 %vm2588_vm3, %v4437_v33 }
0x1397   :  { %10723 = vmatmul.mubr.msk.f32.gmra.mrb[70].mxu0 %vm2588_vm3, %v4439_v43 }
0x1398   :  { %10725 = vmatprep.mubr.msk.f32.mxu0 %vm2588_vm3, %v4441_v25 }
0x139b   :  { %10726 = vmatmul.mubr.msk.f32.gmra.mrb[72].mxu0 %vm2588_vm3, %v4443_v13 }
0x139c   :  { %10728 = vmatprep.mubr.msk.f32.mxu0 %vm2588_vm3, %v4445_v26 }
0x139f   :  { %10729 = vmatmul.mubr.msk.f32.gmra.mrb[74].mxu0 %vm2588_vm3, %v4447_v41 }
0x13a0   :  { %5135 = vmatprep.mubr.f32.mxu0 %v17113_v28 }
0x1440   :  { %v10673_v60 = vpop.f32.mrb[60].mxu0 }
0x1441   :  { %v4234_v42 = vpop.f32.mrb[61].mxu0 }
0x1442   :  { %10691 = vmatprep.mubr.msk.f32.mxu1 %vm2588_vm3, %v4234_v42 }
0x1443   :  { %10692 = vmatmul.mubr.msk.f32.vlgmr.msra.gmra.mrb[60].mxu1 %vm2588_vm3, %v10673_v60 }
0x1447   :  { %v10676_v10 = vpop.f32.mrb[62].mxu0 }
0x1448   :  { %v4244_v44 = vpop.f32.mrb[63].mxu0 }
0x1449   :  { %10694 = vmatprep.mubr.msk.f32.mxu1 %vm2588_vm3, %v4244_v44 }
0x144a   :  { %10695 = vmatmul.mubr.msk.f32.gmra.mrb[62].mxu1 %vm2588_vm3, %v10676_v10 }
0x144b   :  { %v10679_v21 = vpop.f32.mrb[64].mxu0 }
0x144c   :  { %v4254_v50 = vpop.f32.mrb[65].mxu0 }
0x144d   :  { %10697 = vmatprep.mubr.msk.f32.mxu1 %vm2588_vm3, %v4254_v50 }
0x144e   :  { %10698 = vmatmul.mubr.msk.f32.gmra.mrb[64].mxu1 %vm2588_vm3, %v10679_v21 }
0x1454   :  { %v10682_v30 = vpop.f32.mrb[66].mxu0 }
0x1455   :  { %v4264_v11 = vpop.f32.mrb[67].mxu0 }
0x1456   :  { %10700 = vmatprep.mubr.msk.f32.mxu1 %vm2588_vm3, %v4264_v11 }
0x1457   :  { %10701 = vmatmul.mubr.msk.f32.gmra.mrb[66].mxu1 %vm2588_vm3, %v10682_v30 }
0x1466   :  { %v10721_v31 = vpop.f32.mrb[68].mxu0 }
0x1467   :  { %v4602_v5 = vmul.f32 0.17677669, %v10721_v31  ;;  %v4562_v27 = vpop.f32.mrb[69].mxu0 }
0x1468   :  { %v4601_v51 = vmul.f32 0.17677669, %v4562_v27 }
0x1469   :  { %v4610_v47 = vadd.f32 %v15935_v63, %v4602_v5 }
0x146a   :  { %v4609_v9 = vadd.f32 %v15938_v56, %v4601_v51  ;;  %v10724_v59 = vpop.f32.mrb[70].mxu0 }
0x146b   :  { %v4604_v12 = vmul.f32 0.17677669, %v10724_v59  ;;  %v4572_v0 = vpop.f32.mrb[71].mxu0  ;;  %v4620_v4 = vsel %vm2425_vm2, %v4610_v47, -inf }
0x146c   :  { %v4603_v23 = vmul.f32 0.17677669, %v4572_v0  ;;  %4621 = vmax.xlane.f32.xlu1 %v4620_v4  ;;  %v4617_v8 = vsel %vm2425_vm2, %v4609_v9, -inf }
0x146d   :  { %v4612_v36 = vadd.f32 %v15946_v61, %v4604_v12  ;;  %4618 = vmax.xlane.f32.xlu0 %v4617_v8 }
0x146e   :  { %v10727_v45 = vpop.f32.mrb[72].mxu0  ;;  %v4611_v19 = vadd.f32 %v15943_v20, %v4603_v23 }
0x146f   :  { %v4582_v48 = vpop.f32.mrb[73].mxu0  ;;  %v4626_v63 = vsel %vm2425_vm2, %v4612_v36, -inf  ;;  %v4606_v1 = vmul.f32 0.17677669, %v10727_v45 }
0x1470   :  { %v4605_v56 = vmul.f32 0.17677669, %v4582_v48  ;;  %v4623_v13 = vsel %vm2425_vm2, %v4611_v19, -inf }
0x1471   :  { %4627 = vmax.xlane.f32.xlu0 %v4626_v63  ;;  %v4614_v26 = vadd.f32 %v15955_v57, %v4606_v1 }
0x1472   :  { %v4613_v33 = vadd.f32 %v15950_v53, %v4605_v56  ;;  %v10730_v43 = vpop.f32.mrb[74].mxu0 }
0x1473   :  { %v4592_v25 = vpop.f32.mrb[75].mxu0  ;;  %v4608_v41 = vmul.f32 0.17677669, %v10730_v43  ;;  %v4632_v53 = vsel %vm2425_vm2, %v4614_v26, -inf }
0x1474   :  { %v4607_v61 = vmul.f32 0.17677669, %v4592_v25  ;;  %v4629_v55 = vsel %vm2425_vm2, %v4613_v33, -inf }
0x1475   :  { %4624 = vmax.xlane.f32.xlu0 %v4623_v13  ;;  %4630 = vmax.xlane.f32.xlu1 %v4629_v55  ;;  %v16077_v3 = vadd.f32 %v15963_v35, %v4608_v41  ;;  %v17117_v41 = vpack.i.bf16 %v15893_v2, %v15889_v49  ;;  %v17118_v49 = vpack.i.bf16 %v15792_v58, %v15790_v38 }
0x1476   :  { %v16074_v20 = vadd.f32 %v15958_v32, %v4607_v61  ;;  %v17115_v32 = vpack.i.bf16 %v15857_v39, %v15853_v54  ;;  %v17119_v2 = vpack.i.bf16 %v15808_v52, %v15806_v62 }
0x1477   :  { %v4638_v57 = vsel %vm2425_vm2, %v16077_v3, -inf }
0x1478   :  { %v4635_v17 = vsel %vm2425_vm2, %v16074_v20, -inf }
0x1479   :  { %4633 = vmax.xlane.f32.xlu0 %v4632_v53  ;;  %4636 = vmax.xlane.f32.xlu1 %v4635_v17 }
0x147d   :  { %4639 = vmax.xlane.f32.xlu0 %v4638_v57 }
0x148a   :  { %12439 = vrot.lane.b32.xlu1 %v17114_v6, %s14521_s24 }
0x1493   :  { %12444 = vrot.lane.b32.xlu0 %v17115_v32, %s14521_s24 }
0x14f9   :  { %v4622_v35 = vpop.xlane.xlu1 %4621 }
0x14fa   :  { %v4642_v29 = vsub.f32 %v4610_v47, %v4622_v35  ;;  %v4619_v15 = vpop.xlane.xlu0 %4618 }
0x14fb   :  { %v4641_v22 = vsub.f32 %v4609_v9, %v4619_v15 }
0x14fc   :  { %v4651_v16 = vmul.f32 1.442695, %v4642_v29 }
0x14fd   :  { %v4649_v60 = vmul.f32 1.442695, %v4641_v22 }
0x14fe   :  { %12668 = vpow2.f32 %v4651_v16  ;;  %v4628_v42 = vpop.xlane.xlu0 %4627 }
0x14ff   :  { %12670 = vpow2.f32 %v4649_v60  ;;  %v4644_v10 = vsub.f32 %v4612_v36, %v4628_v42 }
0x1501   :  { %v4655_v44 = vmul.f32 1.442695, %v4644_v10 }
0x1502   :  { %v4625_v21 = vpop.xlane.xlu0 %4624  ;;  %v4631_v50 = vpop.xlane.xlu1 %4630 }
0x1503   :  { %12672 = vpow2.f32 %v4655_v44  ;;  %v4643_v7 = vsub.f32 %v4611_v19, %v4625_v21  ;;  %v4645_v34 = vsub.f32 %v4613_v33, %v4631_v50 }
0x1505   :  { %v4653_v30 = vmul.f32 1.442695, %v4643_v7  ;;  %v4657_v11 = vmul.f32 1.442695, %v4645_v34 }
0x1506   :  { %v4634_v54 = vpop.xlane.xlu0 %4633  ;;  %v4637_v39 = vpop.xlane.xlu1 %4636 }
0x1507   :  { %12674 = vpow2.f32 %v4653_v30  ;;  %v4646_v31 = vsub.f32 %v4614_v26, %v4634_v54  ;;  %v17116_v26 = vpack.i.bf16 %v15875_v14, %v15871_v18  ;;  %v4647_v61 = vsub.f32 %v16074_v20, %v4637_v39 }
0x1508   :  { %v16092_v5 = vpop.eup %12668  ;;  %12676 = vpow2.f32 %v4657_v11 }
0x1509   :  { %v12671_v27 = vpop.eup %12670  ;;  %v4659_v51 = vmul.f32 1.442695, %v4646_v31  ;;  %v4668_v47 = vsel %vm2425_vm2, %v16092_v5, 0.0  ;;  %v4661_v53 = vmul.f32 1.442695, %v4647_v61 }
0x150a   :  { %4669 = vadd.xlane.f32.xlu0 %v4668_v47  ;;  %v4640_v9 = vpop.xlane.xlu0 %4639  ;;  %v12440_v59 = vpop.permute.xlu1 %12439  ;;  %v4665_v12 = vsel %vm2425_vm2, %v12671_v27, 0.0 }
0x150b   :  { %12678 = vpow2.f32 %v4659_v51  ;;  %v12442_v0 = vunpack.i.h.bf16 %v12440_v59  ;;  %v12441_v4 = vunpack.i.l.bf16 %v12440_v59  ;;  %4666 = vadd.xlane.f32.xlu1 %v4665_v12  ;;  %v4648_v55 = vsub.f32 %v16077_v3, %v4640_v9 }
0x150c   :  { %12680 = vpow2.f32 %v4661_v53  ;;  %v5023_v53 = vld [vmem:[%s17120_s25 + $0x20] sm:$0xff] }
0x150d   :  { %v16097_v23 = vpop.eup %12672  ;;  %v11695_v8 = vpack.c.bf16 %v12442_v0, %v12441_v4  ;;  %v4663_v17 = vmul.f32 1.442695, %v4648_v55 }
0x150e   :  { %v12445_v36 = vpop.permute.xlu0 %12444  ;;  %v4674_v45 = vsel %vm2425_vm2, %v16097_v23, 0.0 }
0x150f   :  { %v12447_v19 = vunpack.i.h.bf16 %v12445_v36  ;;  %v12446_v48 = vunpack.i.l.bf16 %v12445_v36  ;;  %4675 = vadd.xlane.f32.xlu0 %v4674_v45  ;;  %11696 = vmatprep.subr.bf16.mxu1 %v11695_v8  ;;  %12682 = vpow2.f32 %v4663_v17  ;;  %v5025_v17 = vld [vmem:[%s17120_s25 + $0x30] sm:$0xff] }
0x1510   :  { %11698 = vmatpush3.bf16.msra.mxu1 %v11695_v8 }
0x1511   :  { %v12675_v63 = vpop.eup %12674  ;;  %v11699_v1 = vpack.c.bf16 %v12447_v19, %v12446_v48 }
0x1512   :  { %v4671_v56 = vsel %vm2425_vm2, %v12675_v63, 0.0  ;;  %v12677_v33 = vpop.eup %12676 }
0x1513   :  { %4672 = vadd.xlane.f32.xlu1 %v4671_v56  ;;  %11700 = vmatprep.subr.bf16.mxu1 %v11699_v1  ;;  %v4677_v13 = vsel %vm2425_vm2, %v12677_v33, 0.0  ;;  %v5019_v56 = vld [vmem:[%s17120_s25] sm:$0xff] }
0x1514   :  { %11702 = vmatpush3.bf16.msra.mxu1 %v11699_v1  ;;  %v16146_v1 = vld [vmem:[%s17120_s25 + $0x18] sm:$0xff] }
0x1515   :  { %v12679_v43 = vpop.eup %12678 }
0x1516   :  { %v4680_v25 = vsel %vm2425_vm2, %v12679_v43, 0.0  ;;  %v16114_v57 = vpop.eup %12680 }
0x1517   :  { %4681 = vadd.xlane.f32.xlu0 %v4680_v25  ;;  %4678 = vadd.xlane.f32.xlu1 %v4677_v13  ;;  %v4683_v14 = vsel %vm2425_vm2, %v16114_v57, 0.0  ;;  %v5021_v25 = vld [vmem:[%s17120_s25 + $0x10] sm:$0xff]  ;;  %v16155_v13 = vld [vmem:[%s17120_s25 + $0x28] sm:$0xff] }
0x1519   :  { %v16116_v6 = vpop.eup %12682 }
0x151a   :  { %v4686_v18 = vsel %vm2425_vm2, %v16116_v6, 0.0 }
0x1528   :  { %12449 = vrot.lane.b32.xlu1 %v17116_v26, %s14521_s24  ;;  %v16158_v26 = vld [vmem:[%s17120_s25 + $0x38] sm:$0xff] }
0x1529   :  { %v11723_v55 = vpack.c.bf16 %v16158_v26, %v16155_v13 }
0x152d   :  { %12454 = vrot.lane.b32.xlu0 %v17117_v41, %s14521_s24  ;;  %v11721_v41 = vpack.c.bf16 %v5021_v25, %v5019_v56 }
0x154c   :  { %4687 = vadd.xlane.f32.xlu0 %v4686_v18  ;;  %4684 = vadd.xlane.f32.xlu1 %v4683_v14  ;;  %v11725_v18 = vpack.c.bf16 %v5025_v17, %v5023_v53 }
0x155d   :  { %12459 = vrot.lane.b32.xlu1 %v17118_v49, %s14519_s1 }
0x1562   :  { %12464 = vrot.lane.b32.xlu0 %v17119_v2, %s14519_s1  ;;  %v5027_v2 = vld [vmem:[%s17120_s25 + $0x40] sm:$0xff] }
0x1597   :  { %v4670_v3 = vpop.xlane.xlu0 %4669 }
0x1598   :  { %v4667_v20 = vpop.xlane.xlu1 %4666 }
0x1599   :  { %12684 = vrcp.f32 %v4667_v20  ;;  %v5029_v20 = vld [vmem:[%s17120_s25 + $0x50] sm:$0xff] }
0x159a   :  { %12686 = vrcp.f32 %v4670_v3  ;;  %v11729_v3 = vpack.c.bf16 %v5029_v20, %v5027_v2 }
0x159c   :  { %v4676_v32 = vpop.xlane.xlu0 %4675 }
0x15a0   :  { %v4673_v35 = vpop.xlane.xlu1 %4672 }
0x15a1   :  { %12688 = vrcp.f32 %v4673_v35 }
0x15a2   :  { %12690 = vrcp.f32 %v4676_v32 }
0x15a3   :  { %v12685_v29 = vpop.eup %12684 }
0x15a4   :  { %v4682_v15 = vpop.xlane.xlu0 %4681  ;;  %v4679_v22 = vpop.xlane.xlu1 %4678  ;;  %v4697_v16 = vmul.f32 %v12685_v29, %v12671_v27 }
0x15a5   :  { %12692 = vrcp.f32 %v4679_v22  ;;  %v12687_v21 = vpop.eup %12686 }
0x15a6   :  { %10747 = vmatprep.mubr.msk.f32.mxu1 %vm2425_vm2, %v4697_v16  ;;  %12694 = vrcp.f32 %v4682_v15  ;;  %v4698_v7 = vmul.f32 %v12687_v21, %v16092_v5 }
0x15a8   :  { %v12455_v38 = vpop.permute.xlu0 %12454  ;;  %v12450_v58 = vpop.permute.xlu1 %12449 }
0x15a9   :  { %v12457_v60 = vunpack.i.h.bf16 %v12455_v38  ;;  %v12456_v42 = vunpack.i.l.bf16 %v12455_v38  ;;  %v12452_v10 = vunpack.i.h.bf16 %v12450_v58  ;;  %v12451_v62 = vunpack.i.l.bf16 %v12450_v58 }
0x15ab   :  { %v11703_v52 = vpack.c.bf16 %v12452_v10, %v12451_v62  ;;  %v11707_v44 = vpack.c.bf16 %v12457_v60, %v12456_v42  ;;  %v12689_v50 = vpop.eup %12688  ;;  %v16187_v60 = vld [vmem:[%s17120_s25 + $0x68] sm:$0xff]  ;;  %v16190_v42 = vld [vmem:[%s17120_s25 + $0x78] sm:$0xff]  ;;  %v5031_v62 = vld [vmem:[%s17120_s25 + $0x60] sm:$0xff] }
0x15ac   :  { %v12691_v34 = vpop.eup %12690  ;;  %v4699_v30 = vmul.f32 %v12689_v50, %v12675_v63  ;;  %v16143_v63 = vld [vmem:[%s17120_s25 + $0x8] sm:$0xff]  ;;  %v11731_v10 = vpack.c.bf16 %v16190_v42, %v16187_v60  ;;  %v9595_v50 = vld [vmem:[#allocation29] ss:$0 sm:$0xff] }
0x15ad   :  { %11704 = vmatprep.subr.bf16.mxu1 %v11703_v52  ;;  %v4700_v54 = vmul.f32 %v12691_v34, %v16097_v23 }
0x15ae   :  { %11706 = vmatpush3.bf16.msra.mxu1 %v11703_v52  ;;  %v5033_v52 = vld [vmem:[%s17120_s25 + $0x70] sm:$0xff] }
0x15af   :  { %11708 = vmatprep.subr.bf16.mxu1 %v11707_v44  ;;  %v12693_v11 = vpop.eup %12692 }
0x15b0   :  { %v12695_v39 = vpop.eup %12694  ;;  %v4701_v31 = vmul.f32 %v12693_v11, %v12677_v33  ;;  %v12508_v33 = vpack.i.bf16 %v16146_v1, %v16143_v63 }
0x15b1   :  { %v4702_v27 = vmul.f32 %v12695_v39, %v12679_v43  ;;  %v11719_v43 = vpack.c.bf16 %v16146_v1, %v16143_v63 }
0x15b2   :  { %11710 = vmatpush3.bf16.msra.mxu1 %v11707_v44  ;;  %v11733_v44 = vpack.c.bf16 %v5033_v52, %v5031_v62 }
0x15b3   :  { %11720 = vmatprep.subr.bf16.mxu0 %v11719_v43 }
0x15b4   :  { %11722 = vmatpush1.bf16.msra.mxu0 %v11721_v41 }
0x15b5   :  { %10748 = vmatmul.mubr.msk.f32.vlgmr.msra.gmra.mrb[68].mxu1 %vm2425_vm2, %v4698_v7  ;;  %11724 = vmatprep.subr.bf16.mxu0 %v11723_v55 }
0x15b6   :  { %10750 = vmatprep.mubr.msk.f32.mxu1 %vm2425_vm2, %v4699_v30 }
0x15b8   :  { %11726 = vmatpush1.bf16.msra.mxu0 %v11725_v18 }
0x15b9   :  { %10751 = vmatmul.mubr.msk.f32.gmra.mrb[70].mxu1 %vm2425_vm2, %v4700_v54 }
0x15ba   :  { %10753 = vmatprep.mubr.msk.f32.mxu1 %vm2425_vm2, %v4701_v31 }
0x15bd   :  { %10754 = vmatmul.mubr.msk.f32.gmra.mrb[72].mxu1 %vm2425_vm2, %v4702_v27 }
0x15d9   :  { %v4688_v51 = vpop.xlane.xlu0 %4687  ;;  %v4685_v5 = vpop.xlane.xlu1 %4684 }
0x15da   :  { %12696 = vrcp.f32 %v4688_v51 }
0x15db   :  { %12698 = vrcp.f32 %v4685_v5 }
0x15dd   :  { %v12460_v47 = vpop.permute.xlu1 %12459  ;;  %v12465_v9 = vpop.permute.xlu0 %12464 }
0x15de   :  { %v12462_v59 = vunpack.i.h.bf16 %v12460_v47  ;;  %v12461_v12 = vunpack.i.l.bf16 %v12460_v47  ;;  %v12467_v0 = vunpack.i.h.bf16 %v12465_v9  ;;  %v12466_v4 = vunpack.i.l.bf16 %v12465_v9 }
0x15e0   :  { %v11711_v23 = vpack.c.bf16 %v12462_v59, %v12461_v12  ;;  %v11715_v8 = vpack.c.bf16 %v12467_v0, %v12466_v4 }
0x15e2   :  { %11712 = vmatprep.subr.bf16.mxu1 %v11711_v23 }
0x15e3   :  { %11714 = vmatpush3.bf16.msra.mxu1 %v11711_v23  ;;  %v5035_v23 = vld [vmem:[#allocation30] sm:$0x3] }
0x15e4   :  { %v12697_v36 = vpop.eup %12696  ;;  %11716 = vmatprep.subr.bf16.mxu1 %v11715_v8 }
0x15e5   :  { %v12699_v45 = vpop.eup %12698  ;;  %v4704_v19 = vmul.f32 %v12697_v36, %v16116_v6  ;;  %v16170_v6 = vld [vmem:[%s17120_s25 + $0x58] sm:$0xff]  ;;  %v5044_v36 = vrot.slane %v5035_v23, %v15356_v40 }
0x15e6   :  { %v4703_v48 = vmul.f32 %v12699_v45, %v16114_v57  ;;  %v16167_v57 = vld [vmem:[%s17120_s25 + $0x48] sm:$0xff] }
0x15e7   :  { %11718 = vmatpush3.bf16.msra.mxu1 %v11715_v8  ;;  %v11727_v49 = vpack.c.bf16 %v16170_v6, %v16167_v57  ;;  %v5040_v8 = vrot.slane %v5035_v23, %v15353_v37 }
0x15e8   :  { %10756 = vmatprep.mubr.msk.f32.mxu1 %vm2425_vm2, %v4703_v48 }
0x15e9   :  { %10757 = vmatmul.mubr.msk.f32.gmra.mrb[74].mxu1 %vm2425_vm2, %v4704_v19  ;;  %11728 = vmatprep.subr.bf16.mxu0 %v11727_v49 }
0x15ea   :  { %11730 = vmatpush1.bf16.msra.mxu0 %v11729_v3 }
0x15eb   :  { %11732 = vmatprep.subr.bf16.mxu0 %v11731_v10 }
0x15ee   :  { %11734 = vmatpush1.bf16.msra.mxu0 %v11733_v44 }
0x1688   :  { %v10749_v32 = vpop.f32.mrb[68].mxu1 }
0x1689   :  { %v4827_v35 = vpop.f32.mrb[69].mxu1 }
0x168a   :  { %10767 = vmatprep.mubr.msk.f32.mxu1 %vm2588_vm3, %v4827_v35 }
0x168b   :  { %10768 = vmatmul.mubr.msk.f32.vlgmr.msra.gmra.mrb[60].mxu1 %vm2588_vm3, %v10749_v32 }
0x168c   :  { %v10752_v29 = vpop.f32.mrb[70].mxu1 }
0x168d   :  { %v4837_v15 = vpop.f32.mrb[71].mxu1 }
0x168e   :  { %10770 = vmatprep.mubr.msk.f32.mxu1 %vm2588_vm3, %v4837_v15 }
0x168f   :  { %10771 = vmatmul.mubr.msk.f32.gmra.mrb[62].mxu1 %vm2588_vm3, %v10752_v29 }
0x1690   :  { %v10755_v22 = vpop.f32.mrb[72].mxu1 }
0x1691   :  { %v4847_v16 = vpop.f32.mrb[73].mxu1 }
0x1692   :  { %10773 = vmatprep.mubr.msk.f32.mxu1 %vm2588_vm3, %v4847_v16 }
0x1693   :  { %10774 = vmatmul.mubr.msk.f32.gmra.mrb[64].mxu1 %vm2588_vm3, %v10755_v22 }
0x16bc   :  { %v10758_v38 = vpop.f32.mrb[74].mxu1 }
0x16bd   :  { %v4857_v58 = vpop.f32.mrb[75].mxu1 }
0x16be   :  { %10776 = vmatprep.mubr.msk.f32.mxu1 %vm2588_vm3, %v4857_v58 }
0x16bf   :  { %10777 = vmatmul.mubr.msk.f32.gmra.mrb[66].mxu1 %vm2588_vm3, %v10758_v38 }
0x175e   :  { %v10769_v7 = vpop.f32.mrb[60].mxu1 }
0x175f   :  { %v4972_v34 = vpop.f32.mrb[61].mxu1  ;;  %v12091_v39 = vadd.f32 %v10769_v7, %v9595_v50 }
0x1760   :  { %v12092_v30 = vadd.f32 %v9595_v50, %v4972_v34 }
0x1762   :  { %v10772_v11 = vpop.f32.mrb[62].mxu1  ;;  %9628 = vmatmul.mubr.msk.f32.vlgmr.msra.gmra.mrb[76].mxu0 %vm2425_vm2, %v12092_v30 }
0x1763   :  { %v4982_v54 = vpop.f32.mrb[63].mxu1  ;;  %5141 = vmatprep.mubr.f32.mxu0 %v17113_v28  ;;  %v12093_v5 = vadd.f32 %v10772_v11, %v9595_v50 }
0x1764   :  { %v12094_v51 = vadd.f32 %v9595_v50, %v4982_v54 }
0x1766   :  { %v10775_v31 = vpop.f32.mrb[64].mxu1  ;;  %9629 = vmatmul.mubr.msk.f32.gmra.mrb[78].mxu0 %vm2425_vm2, %v12091_v39 }
0x1767   :  { %v4992_v27 = vpop.f32.mrb[65].mxu1  ;;  %5147 = vmatprep.mubr.f32.mxu0 %v17113_v28  ;;  %v12095_v9 = vadd.f32 %v10775_v31, %v9595_v50 }
0x1768   :  { %v12096_v47 = vadd.f32 %v9595_v50, %v4992_v27 }
0x176a   :  { %9630 = vmatmul.mubr.msk.f32.gmra.mrb[80].mxu0 %vm2425_vm2, %v12094_v51 }
0x176b   :  { %5153 = vmatprep.mubr.f32.mxu0 %v17113_v28 }
0x176e   :  { %9631 = vmatmul.mubr.msk.f32.gmra.mrb[82].mxu0 %vm2425_vm2, %v12093_v5 }
0x176f   :  { %5159 = vmatprep.mubr.f32.mxu0 %v17113_v28 }
0x1772   :  { %9632 = vmatmul.mubr.msk.f32.gmra.mrb[84].mxu0 %vm2425_vm2, %v12096_v47 }
0x1773   :  { %5165 = vmatprep.mubr.f32.mxu0 %v17113_v28 }
0x1776   :  { %9633 = vmatmul.mubr.msk.f32.gmra.mrb[86].mxu0 %vm2425_vm2, %v12095_v9 }
0x1777   :  { %5171 = vmatprep.mubr.f32.mxu0 %v17113_v28 }
0x1792   :  { %v10778_v59 = vpop.f32.mrb[66].mxu1 }
0x1793   :  { %v5002_v12 = vpop.f32.mrb[67].mxu1  ;;  %v12097_v4 = vadd.f32 %v10778_v59, %v9595_v50 }
0x1794   :  { %v12098_v0 = vadd.f32 %v9595_v50, %v5002_v12 }
0x1796   :  { %9634 = vmatmul.mubr.msk.f32.gmra.mrb[88].mxu0 %vm2425_vm2, %v12098_v0 }
0x1797   :  { %5177 = vmatprep.mubr.f32.mxu0 %v17113_v28 }
0x179a   :  { %9635 = vmatmul.mubr.msk.f32.gmra.mrb[90].mxu0 %vm2425_vm2, %v12097_v4 }
0x1835   :  { %v5137_v45 = vpop.f32.mrb[76].mxu0 }
0x1836   :  { %v16215_v19 = vadd.f32 %v5137_v45, %v5040_v8  ;;  %v5139_v48 = vpop.f32.mrb[77].mxu0 }
0x1837   :  { %v16217_v56 = vadd.f32 %v5139_v48, %v5044_v36 }
0x1838   :  { %10795 = vmatprep.mubr.msk.f32.mxu1 %vm2588_vm3, %v16215_v19 }
0x1839   :  { %v5143_v43 = vpop.f32.mrb[78].mxu0 }
0x183a   :  { %v16221_v25 = vadd.f32 %v5143_v43, %v5040_v8  ;;  %v5145_v41 = vpop.f32.mrb[79].mxu0 }
0x183b   :  { %v16223_v55 = vadd.f32 %v5145_v41, %v5044_v36 }
0x183c   :  { %v16227_v37 = vpack.i.bf16 %v16221_v25, %v16215_v19 }
0x183d   :  { %v11759_v53 = vpack.c.bf16 %v16223_v55, %v16217_v56  ;;  %v5149_v17 = vpop.f32.mrb[80].mxu0 }
0x183e   :  { %v16233_v18 = vadd.f32 %v5149_v17, %v5040_v8  ;;  %12469 = vrot.lane.b32.xlu1 %v16227_v37, %s14519_s1  ;;  %v5151_v49 = vpop.f32.mrb[81].mxu0 }
0x183f   :  { %v16237_v2 = vadd.f32 %v5151_v49, %v5044_v36  ;;  %11760 = vmatprep.subr.bf16.mxu0 %v11759_v53 }
0x1840   :  { %11762 = vmatpush3.bf16.msra.mxu0 %v11759_v53 }
0x1841   :  { %v5155_v20 = vpop.f32.mrb[82].mxu0 }
0x1842   :  { %v16239_v3 = vadd.f32 %v5155_v20, %v5040_v8  ;;  %v5157_v32 = vpop.f32.mrb[83].mxu0 }
0x1843   :  { %v16241_v35 = vadd.f32 %v5157_v32, %v5044_v36 }
0x1844   :  { %v16245_v29 = vpack.i.bf16 %v16239_v3, %v16233_v18 }
0x1845   :  { %v11763_v22 = vpack.c.bf16 %v16241_v35, %v16237_v2  ;;  %v5161_v16 = vpop.f32.mrb[84].mxu0 }
0x1846   :  { %v16251_v38 = vadd.f32 %v5161_v16, %v5040_v8  ;;  %12474 = vrot.lane.b32.xlu1 %v16245_v29, %s14519_s1  ;;  %v5163_v58 = vpop.f32.mrb[85].mxu0 }
0x1847   :  { %v16255_v10 = vadd.f32 %v5163_v58, %v5044_v36  ;;  %11764 = vmatprep.subr.bf16.mxu0 %v11763_v22 }
0x1848   :  { %11766 = vmatpush3.bf16.msra.mxu0 %v11763_v22 }
0x1849   :  { %v5167_v62 = vpop.f32.mrb[86].mxu0 }
0x184a   :  { %v16257_v52 = vadd.f32 %v5167_v62, %v5040_v8  ;;  %v5169_v44 = vpop.f32.mrb[87].mxu0 }
0x184b   :  { %v16259_v50 = vadd.f32 %v5169_v44, %v5044_v36 }
0x184c   :  { %v16263_v7 = vpack.i.bf16 %v16257_v52, %v16251_v38 }
0x184d   :  { %v11767_v30 = vpack.c.bf16 %v16259_v50, %v16255_v10 }
0x184e   :  { %12479 = vrot.lane.b32.xlu0 %v16263_v7, %s14519_s1 }
0x184f   :  { %11768 = vmatprep.subr.bf16.mxu0 %v11767_v30 }
0x1850   :  { %11770 = vmatpush3.bf16.msra.mxu0 %v11767_v30 }
0x1869   :  { %v5173_v11 = vpop.f32.mrb[88].mxu0 }
0x186a   :  { %v16271_v54 = vadd.f32 %v5173_v11, %v5040_v8  ;;  %v5175_v39 = vpop.f32.mrb[89].mxu0  ;;  %v16319_v11 = vld [vmem:[#allocation33 + $0x8] sm:$0xff] }
0x186b   :  { %v16273_v31 = vadd.f32 %v5175_v39, %v5044_v36 }
0x186d   :  { %v5179_v27 = vpop.f32.mrb[90].mxu0 }
0x186e   :  { %v16275_v51 = vadd.f32 %v5179_v27, %v5040_v8  ;;  %v5181_v5 = vpop.f32.mrb[91].mxu0  ;;  %v16322_v27 = vld [vmem:[#allocation33] sm:$0xff] }
0x186f   :  { %v16277_v47 = vadd.f32 %v5181_v5, %v5044_v36 }
0x1870   :  { %v16281_v9 = vpack.i.bf16 %v16275_v51, %v16271_v54 }
0x1871   :  { %v11771_v12 = vpack.c.bf16 %v16277_v47, %v16273_v31 }
0x1872   :  { %12484 = vrot.lane.b32.xlu1 %v16281_v9, %s14519_s1 }
0x1873   :  { %11772 = vmatprep.subr.bf16.mxu0 %v11771_v12 }
0x1874   :  { %11774 = vmatpush3.bf16.msra.mxu0 %v11771_v12 }
0x18b0   :  { %v12470_v0 = vpop.permute.xlu1 %12469 }
0x18b1   :  { %v12472_v4 = vunpack.i.h.bf16 %v12470_v0  ;;  %v12471_v23 = vunpack.i.l.bf16 %v12470_v0 }
0x18b3   :  { %v11735_v8 = vpack.c.bf16 %v12472_v4, %v12471_v23 }
0x18b5   :  { %11737 = vmatprep.subr.msk.bf16.mxu1 %vm15529_vm4, %v11735_v8 }
0x18b6   :  { %11740 = vmatpush3.bf16.xpose.msk.msra.mxu1 %vm15529_vm4, %v11735_v8 }
0x18b8   :  { %v12475_v36 = vpop.permute.xlu1 %12474 }
0x18b9   :  { %v12477_v45 = vunpack.i.h.bf16 %v12475_v36  ;;  %v12476_v48 = vunpack.i.l.bf16 %v12475_v36 }
0x18bb   :  { %v11741_v43 = vpack.c.bf16 %v12477_v45, %v12476_v48  ;;  %v16327_v45 = vld [vmem:[#allocation33 + $0x10] sm:$0xff] }
0x18bd   :  { %11743 = vmatprep.subr.msk.bf16.mxu1 %vm15529_vm4, %v11741_v43 }
0x18be   :  { %11746 = vmatpush3.bf16.xpose.msk.msra.mxu1 %vm15529_vm4, %v11741_v43 }
0x18c0   :  { %v12480_v41 = vpop.permute.xlu0 %12479 }
0x18c1   :  { %v12482_v53 = vunpack.i.h.bf16 %v12480_v41  ;;  %v12481_v17 = vunpack.i.l.bf16 %v12480_v41  ;;  %v16330_v41 = vld [vmem:[#allocation33 + $0x18] sm:$0xff] }
0x18c3   :  { %v11747_v49 = vpack.c.bf16 %v12482_v53, %v12481_v17 }
0x18c5   :  { %11749 = vmatprep.subr.msk.bf16.mxu1 %vm15529_vm4, %v11747_v49 }
0x18c6   :  { %11752 = vmatpush3.bf16.xpose.msk.msra.mxu1 %vm15529_vm4, %v11747_v49 }
0x18e4   :  { %v12485_v20 = vpop.permute.xlu1 %12484 }
0x18e5   :  { %v12487_v32 = vunpack.i.h.bf16 %v12485_v20  ;;  %v12486_v22 = vunpack.i.l.bf16 %v12485_v20 }
0x18e7   :  { %v11753_v16 = vpack.c.bf16 %v12487_v32, %v12486_v22  ;;  %v16334_v22 = vld [vmem:[#allocation33 + $0x20] sm:$0xff] }
0x18e9   :  { %11755 = vmatprep.subr.msk.bf16.mxu1 %vm15529_vm4, %v11753_v16 }
0x18ea   :  { %11758 = vmatpush3.bf16.xpose.msk.msra.mxu1 %vm15529_vm4, %v11753_v16 }
0x18f1   :  { %10796 = vmatmul.mubr.msk.f32.vlgmr.msra.gmra.mrb[76].mxu1 %vm2588_vm3, %v16221_v25 }
0x18f2   :  { %10798 = vmatprep.mubr.msk.f32.mxu1 %vm2588_vm3, %v16233_v18 }
0x18f5   :  { %10799 = vmatmul.mubr.msk.f32.gmra.mrb[78].mxu1 %vm2588_vm3, %v16239_v3 }
0x18f6   :  { %10801 = vmatprep.mubr.msk.f32.mxu1 %vm2588_vm3, %v16251_v38 }
0x18f9   :  { %10802 = vmatmul.mubr.msk.f32.gmra.mrb[80].mxu1 %vm2588_vm3, %v16257_v52 }
0x18fa   :  { %10804 = vmatprep.mubr.msk.f32.mxu1 %vm2588_vm3, %v16271_v54 }
0x18fd   :  { %10805 = vmatmul.mubr.msk.f32.gmra.mrb[82].mxu1 %vm2588_vm3, %v16275_v51 }
0x19c4   :  { %v10797_v58 = vpop.f32.mrb[76].mxu1 }
0x19c5   :  { %v5347_v62 = vmul.f32 0.17677669, %v10797_v58  ;;  %v5307_v44 = vpop.f32.mrb[77].mxu1 }
0x19c6   :  { %v5346_v30 = vmul.f32 0.17677669, %v5307_v44 }
0x19c7   :  { %v5355_v39 = vadd.f32 %v16319_v11, %v5347_v62 }
0x19c8   :  { %v5354_v5 = vadd.f32 %v16322_v27, %v5346_v30  ;;  %v10800_v12 = vpop.f32.mrb[78].mxu1  ;;  %v16338_v30 = vld [vmem:[#allocation33 + $0x28] sm:$0xff] }
0x19c9   :  { %v5349_v0 = vmul.f32 0.17677669, %v10800_v12  ;;  %v5317_v4 = vpop.f32.mrb[79].mxu1  ;;  %v5365_v23 = vsel %vm2425_vm2, %v5355_v39, -inf }
0x19ca   :  { %v5348_v8 = vmul.f32 0.17677669, %v5317_v4  ;;  %5366 = vmax.xlane.f32.xlu1 %v5365_v23  ;;  %v5362_v36 = vsel %vm2425_vm2, %v5354_v5, -inf }
0x19cb   :  { %5363 = vmax.xlane.f32.xlu0 %v5362_v36  ;;  %v5357_v53 = vadd.f32 %v16330_v41, %v5349_v0 }
0x19cc   :  { %v5356_v48 = vadd.f32 %v16327_v45, %v5348_v8  ;;  %v10803_v43 = vpop.f32.mrb[80].mxu1  ;;  %v16342_v8 = vld [vmem:[#allocation33 + $0x30] sm:$0xff] }
0x19cd   :  { %v5327_v17 = vpop.f32.mrb[81].mxu1  ;;  %v5351_v49 = vmul.f32 0.17677669, %v10803_v43  ;;  %v5371_v44 = vsel %vm2425_vm2, %v5357_v53, -inf  ;;  %v16345_v43 = vld [vmem:[#allocation33 + $0x38] sm:$0xff] }
0x19ce   :  { %v5350_v20 = vmul.f32 0.17677669, %v5327_v17  ;;  %v5368_v32 = vsel %vm2425_vm2, %v5356_v48, -inf }
0x19cf   :  { %5369 = vmax.xlane.f32.xlu0 %v5368_v32  ;;  %v5359_v12 = vadd.f32 %v16338_v30, %v5351_v49 }
0x19d0   :  { %v5358_v16 = vadd.f32 %v16334_v22, %v5350_v20  ;;  %v10806_v58 = vpop.f32.mrb[82].mxu1 }
0x19d1   :  { %v5337_v62 = vpop.f32.mrb[83].mxu1  ;;  %v5353_v4 = vmul.f32 0.17677669, %v10806_v58  ;;  %v5377_v20 = vsel %vm2425_vm2, %v5359_v12, -inf }
0x19d2   :  { %v5352_v0 = vmul.f32 0.17677669, %v5337_v62  ;;  %v5374_v23 = vsel %vm2425_vm2, %v5358_v16, -inf }
0x19d3   :  { %5372 = vmax.xlane.f32.xlu0 %v5371_v44  ;;  %5375 = vmax.xlane.f32.xlu1 %v5374_v23  ;;  %v5361_v17 = vadd.f32 %v16345_v43, %v5353_v4 }
0x19d4   :  { %v5360_v36 = vadd.f32 %v16342_v8, %v5352_v0 }
0x19d5   :  { %v5383_v49 = vsel %vm2425_vm2, %v5361_v17, -inf }
0x19d6   :  { %v5380_v32 = vsel %vm2425_vm2, %v5360_v36, -inf }
0x19d7   :  { %5378 = vmax.xlane.f32.xlu0 %v5377_v20  ;;  %5381 = vmax.xlane.f32.xlu1 %v5380_v32 }
0x19db   :  { %5384 = vmax.xlane.f32.xlu0 %v5383_v49 }
0x19e8   :  { %12489 = vrot.lane.b32.xlu1 %v16227_v37, %s14520_s12 }
0x1a57   :  { %v5367_v58 = vpop.xlane.xlu1 %5366 }
0x1a58   :  { %v5387_v62 = vsub.f32 %v5355_v39, %v5367_v58  ;;  %v5364_v44 = vpop.xlane.xlu0 %5363 }
0x1a59   :  { %v5386_v0 = vsub.f32 %v5354_v5, %v5364_v44 }
0x1a5a   :  { %v5396_v23 = vmul.f32 1.442695, %v5387_v62 }
0x1a5b   :  { %v5394_v34 = vmul.f32 1.442695, %v5386_v0 }
0x1a5c   :  { %12700 = vpow2.f32 %v5396_v23  ;;  %v5370_v4 = vpop.xlane.xlu0 %5369 }
0x1a5d   :  { %12702 = vpow2.f32 %v5394_v34  ;;  %v5388_v21 = vsub.f32 %v5356_v48, %v5370_v4 }
0x1a5f   :  { %v5398_v14 = vmul.f32 1.442695, %v5388_v21 }
0x1a60   :  { %v5373_v59 = vpop.xlane.xlu0 %5372  ;;  %v5376_v20 = vpop.xlane.xlu1 %5375 }
0x1a61   :  { %12704 = vpow2.f32 %v5398_v14  ;;  %v5389_v32 = vsub.f32 %v5357_v53, %v5373_v59  ;;  %v5390_v61 = vsub.f32 %v5358_v16, %v5376_v20 }
0x1a63   :  { %v5400_v49 = vmul.f32 1.442695, %v5389_v32  ;;  %v5402_v15 = vmul.f32 1.442695, %v5390_v61 }
0x1a64   :  { %v5379_v40 = vpop.xlane.xlu0 %5378  ;;  %v5382_v37 = vpop.xlane.xlu1 %5381 }
0x1a65   :  { %12706 = vpow2.f32 %v5400_v49  ;;  %v5391_v39 = vsub.f32 %v5359_v12, %v5379_v40  ;;  %v5392_v44 = vsub.f32 %v5360_v36, %v5382_v37 }
0x1a66   :  { %v16353_v58 = vpop.eup %12700  ;;  %12708 = vpow2.f32 %v5402_v15 }
0x1a67   :  { %v12703_v5 = vpop.eup %12702  ;;  %v5404_v62 = vmul.f32 1.442695, %v5391_v39  ;;  %v5413_v21 = vsel %vm2425_vm2, %v16353_v58, 0.0  ;;  %v5406_v16 = vmul.f32 1.442695, %v5392_v44 }
0x1a68   :  { %5414 = vadd.xlane.f32.xlu0 %v5413_v21  ;;  %v5385_v34 = vpop.xlane.xlu0 %5384  ;;  %v12490_v14 = vpop.permute.xlu1 %12489  ;;  %v5410_v59 = vsel %vm2425_vm2, %v12703_v5, 0.0 }
0x1a69   :  { %12710 = vpow2.f32 %v5404_v62  ;;  %v5393_v61 = vsub.f32 %v5361_v17, %v5385_v34  ;;  %v12492_v48 = vunpack.i.h.bf16 %v12490_v14  ;;  %v12491_v53 = vunpack.i.l.bf16 %v12490_v14  ;;  %5411 = vadd.xlane.f32.xlu1 %v5410_v59 }
0x1a6b   :  { %v12705_v40 = vpop.eup %12704  ;;  %v5408_v12 = vmul.f32 1.442695, %v5393_v61  ;;  %v11783_v15 = vpack.c.bf16 %v12492_v48, %v12491_v53 }
0x1a6c   :  { %v5416_v0 = vsel %vm2425_vm2, %v12705_v40, 0.0 }
0x1a6d   :  { %12712 = vpow2.f32 %v5408_v12  ;;  %5417 = vadd.xlane.f32.xlu1 %v5416_v0  ;;  %11785 = vmatprep.subr.msk.bf16.mxu0 %vm15529_vm4, %v11783_v15 }
0x1a6e   :  { %12714 = vpow2.f32 %v5406_v16 }
0x1a6f   :  { %v12707_v36 = vpop.eup %12706 }
0x1a70   :  { %v12709_v23 = vpop.eup %12708  ;;  %v5419_v4 = vsel %vm2425_vm2, %v12707_v36, 0.0 }
0x1a71   :  { %5420 = vadd.xlane.f32.xlu0 %v5419_v4  ;;  %v5422_v17 = vsel %vm2425_vm2, %v12709_v23, 0.0 }
0x1a72   :  { %5423 = vadd.xlane.f32.xlu1 %v5422_v17 }
0x1a73   :  { %v12711_v20 = vpop.eup %12710 }
0x1a74   :  { %v5425_v32 = vsel %vm2425_vm2, %v12711_v20, 0.0 }
0x1a75   :  { %5426 = vadd.xlane.f32.xlu0 %v5425_v32 }
0x1a77   :  { %v16364_v49 = vpop.eup %12712 }
0x1a78   :  { %v5431_v37 = vsel %vm2425_vm2, %v16364_v49, 0.0  ;;  %v16368_v39 = vpop.eup %12714 }
0x1a79   :  { %5432 = vadd.xlane.f32.xlu0 %v5431_v37  ;;  %v5428_v62 = vsel %vm2425_vm2, %v16368_v39, 0.0 }
0x1a7d   :  { %5429 = vadd.xlane.f32.xlu0 %v5428_v62 }
0x1a83   :  { %12499 = vrot.lane.b32.xlu1 %v16263_v7, %s14520_s12 }
0x1a87   :  { %12504 = vrot.lane.b32.xlu1 %v16281_v9, %s14520_s12 }
0x1a8b   :  { %5738 = vrot.lane.b32.xlu1 %v16215_v19, %s14521_s24 }
0x1a8f   :  { %5740 = vrot.lane.b32.xlu1 %v16221_v25, %s14521_s24 }
0x1a93   :  { %5744 = vrot.lane.b32.xlu1 %v16239_v3, %s14521_s24  ;;  %12494 = vrot.lane.b32.xlu0 %v16245_v29, %s14520_s12 }
0x1a97   :  { %5748 = vrot.lane.b32.xlu1 %v16257_v52, %s14521_s24  ;;  %5742 = vrot.lane.b32.xlu0 %v16233_v18, %s14521_s24 }
0x1a9b   :  { %5752 = vrot.lane.b32.xlu1 %v16275_v51, %s14521_s24  ;;  %5746 = vrot.lane.b32.xlu0 %v16251_v38, %s14521_s24 }
0x1a9f   :  { %5750 = vrot.lane.b32.xlu0 %v16271_v54, %s14521_s24 }
0x1af5   :  { %v5415_v19 = vpop.xlane.xlu0 %5414 }
0x1af6   :  { %12716 = vrcp.f32 %v5415_v19  ;;  %v5412_v25 = vpop.xlane.xlu1 %5411 }
0x1af7   :  { %12718 = vrcp.f32 %v5412_v25 }
0x1afa   :  { %v5418_v3 = vpop.xlane.xlu1 %5417 }
0x1afb   :  { %12720 = vrcp.f32 %v5418_v3 }
0x1afe   :  { %v5421_v29 = vpop.xlane.xlu0 %5420 }
0x1aff   :  { %12722 = vrcp.f32 %v5421_v29  ;;  %v5424_v52 = vpop.xlane.xlu1 %5423 }
0x1b00   :  { %v12717_v7 = vpop.eup %12716  ;;  %12724 = vrcp.f32 %v5424_v52 }
0x1b01   :  { %v12719_v18 = vpop.eup %12718  ;;  %v5443_v44 = vmul.f32 %v12717_v7, %v16353_v58 }
0x1b02   :  { %v5427_v9 = vpop.xlane.xlu0 %5426  ;;  %v5442_v51 = vmul.f32 %v12719_v18, %v12703_v5 }
0x1b03   :  { %12726 = vrcp.f32 %v5427_v9  ;;  %v12500_v61 = vpop.permute.xlu1 %12499 }
0x1b04   :  { %10823 = vmatprep.mubr.msk.f32.mxu0 %vm2425_vm2, %v5442_v51  ;;  %v12502_v12 = vunpack.i.h.bf16 %v12500_v61 }
0x1b05   :  { %v12721_v38 = vpop.eup %12720  ;;  %10824 = vmatmul.mubr.msk.f32.vlgmr.msra.gmra.mrb[92].mxu0 %vm2425_vm2, %v5443_v44 }
0x1b06   :  { %11788 = vmatpush3.bf16.xpose.msk.msra.mxu0 %vm15529_vm4, %v11783_v15  ;;  %v5433_v54 = vpop.xlane.xlu0 %5432  ;;  %v5444_v21 = vmul.f32 %v12721_v38, %v12705_v40  ;;  %v12501_v15 = vunpack.i.l.bf16 %v12500_v61 }
0x1b07   :  { %12728 = vrcp.f32 %v5433_v54  ;;  %v12505_v32 = vpop.permute.xlu1 %12504 }
0x1b08   :  { %10826 = vmatprep.mubr.msk.f32.mxu0 %vm2425_vm2, %v5444_v21  ;;  %v11795_v17 = vpack.c.bf16 %v12502_v12, %v12501_v15  ;;  %v12507_v37 = vunpack.i.h.bf16 %v12505_v32  ;;  %v12506_v62 = vunpack.i.l.bf16 %v12505_v32 }
0x1b09   :  { %v12723_v34 = vpop.eup %12722 }
0x1b0a   :  { %v12725_v14 = vpop.eup %12724  ;;  %v5430_v59 = vpop.xlane.xlu0 %5429  ;;  %v5445_v5 = vmul.f32 %v12723_v34, %v12707_v36  ;;  %v11801_v3 = vpack.c.bf16 %v12507_v37, %v12506_v62 }
0x1b0b   :  { %12730 = vrcp.f32 %v5430_v59  ;;  %v5446_v58 = vmul.f32 %v12725_v14, %v12709_v23  ;;  %v5739_v25 = vpop.permute.xlu1 %5738 }
0x1b0c   :  { %10827 = vmatmul.mubr.msk.f32.gmra.mrb[94].mxu0 %vm2425_vm2, %v5445_v5 }
0x1b0d   :  { %v12727_v48 = vpop.eup %12726  ;;  %10829 = vmatprep.mubr.msk.f32.mxu0 %vm2425_vm2, %v5446_v58 }
0x1b0e   :  { %v12495_v53 = vpop.permute.xlu0 %12494  ;;  %v5447_v16 = vmul.f32 %v12727_v48, %v12711_v20 }
0x1b0f   :  { %v12497_v40 = vunpack.i.h.bf16 %v12495_v53  ;;  %v12496_v0 = vunpack.i.l.bf16 %v12495_v53  ;;  %v5741_v29 = vpop.permute.xlu1 %5740 }
0x1b10   :  { %10830 = vmatmul.mubr.msk.f32.gmra.mrb[96].mxu0 %vm2425_vm2, %v5447_v16 }
0x1b11   :  { %v11789_v4 = vpack.c.bf16 %v12497_v40, %v12496_v0  ;;  %v12729_v36 = vpop.eup %12728 }
0x1b12   :  { %v5449_v19 = vmul.f32 %v12729_v36, %v16364_v49 }
0x1b13   :  { %11791 = vmatprep.subr.msk.bf16.mxu0 %vm15529_vm4, %v11789_v4  ;;  %v5745_v49 = vpop.permute.xlu1 %5744 }
0x1b14   :  { %11794 = vmatpush3.bf16.xpose.msk.msra.mxu0 %vm15529_vm4, %v11789_v4 }
0x1b15   :  { %v12731_v23 = vpop.eup %12730  ;;  %11797 = vmatprep.subr.msk.bf16.mxu0 %vm15529_vm4, %v11795_v17 }
0x1b16   :  { %v5448_v20 = vmul.f32 %v12731_v23, %v16368_v39  ;;  %v5743_v39 = vpop.permute.xlu0 %5742 }
0x1b17   :  { %v5749_v7 = vpop.permute.xlu1 %5748 }
0x1b18   :  { %10832 = vmatprep.mubr.msk.f32.mxu0 %vm2425_vm2, %v5448_v20 }
0x1b19   :  { %10833 = vmatmul.mubr.msk.f32.gmra.mrb[98].mxu0 %vm2425_vm2, %v5449_v19 }
0x1b1a   :  { %10871 = vmatprep.mubr.msk.f32.mxu0 %vm2588_vm3, %v5739_v25  ;;  %v5747_v52 = vpop.permute.xlu0 %5746 }
0x1b1b   :  { %v5753_v9 = vpop.permute.xlu1 %5752 }
0x1b1c   :  { %11800 = vmatpush3.bf16.xpose.msk.msra.mxu0 %vm15529_vm4, %v11795_v17 }
0x1b1d   :  { %11803 = vmatprep.subr.msk.bf16.mxu0 %vm15529_vm4, %v11801_v3 }
0x1b1e   :  { %v5751_v18 = vpop.permute.xlu0 %5750 }
0x1b24   :  { %11806 = vmatpush3.bf16.xpose.msk.msra.mxu0 %vm15529_vm4, %v11801_v3 }
0x1b2b   :  { %10872 = vmatmul.mubr.msk.f32.vlgmr.msra.gmra.mrb[100].mxu0 %vm2588_vm3, %v5741_v29 }
0x1b2c   :  { %10874 = vmatprep.mubr.msk.f32.mxu0 %vm2588_vm3, %v5743_v39 }
0x1b2f   :  { %10875 = vmatmul.mubr.msk.f32.gmra.mrb[102].mxu0 %vm2588_vm3, %v5745_v49 }
0x1b30   :  { %10877 = vmatprep.mubr.msk.f32.mxu0 %vm2588_vm3, %v5747_v52 }
0x1b33   :  { %10878 = vmatmul.mubr.msk.f32.gmra.mrb[104].mxu0 %vm2588_vm3, %v5749_v7 }
0x1b34   :  { %10880 = vmatprep.mubr.msk.f32.mxu0 %vm2588_vm3, %v5751_v18 }
0x1b37   :  { %10881 = vmatmul.mubr.msk.f32.gmra.mrb[106].mxu0 %vm2588_vm3, %v5753_v9 }
0x1b38   :  { %10947 = vmatprep.mubr.msk.f32.mxu0 %vm14523_vm5, %v17113_v28 }
0x1bd8   :  { %v16427_v24 = vpop.f32.mrb[92].mxu0 }
0x1bd9   :  { %v5540_v51 = vpop.f32.mrb[93].mxu0 }
0x1bda   :  { %10843 = vmatprep.mubr.msk.f32.mxu1 %vm2588_vm3, %v5540_v51 }
0x1bdf   :  { %v16430_v44 = vpop.f32.mrb[94].mxu0 }
0x1be0   :  { %v16432_v38 = vpop.f32.mrb[95].mxu0 }
0x1be3   :  { %v16434_v54 = vpop.f32.mrb[96].mxu0 }
0x1be4   :  { %v16436_v21 = vpop.f32.mrb[97].mxu0 }
0x1bec   :  { %v16438_v34 = vpop.f32.mrb[98].mxu0 }
0x1bed   :  { %v16440_v14 = vpop.f32.mrb[99].mxu0 }
0x1bfe   :  { %v10873_v59 = vpop.f32.mrb[100].mxu0 }
0x1bff   :  { %v5908_v5 = vmul.f32 0.17677669, %v10873_v59  ;;  %v5868_v58 = vpop.f32.mrb[101].mxu0 }
0x1c00   :  { %v5907_v61 = vmul.f32 0.17677669, %v5868_v58 }
0x1c01   :  { %v5916_v48 = vadd.f32 %v16319_v11, %v5908_v5 }
0x1c02   :  { %v5915_v53 = vadd.f32 %v16322_v27, %v5907_v61  ;;  %v10876_v16 = vpop.f32.mrb[102].mxu0 }
0x1c03   :  { %v5910_v12 = vmul.f32 0.17677669, %v10876_v16  ;;  %v5878_v15 = vpop.f32.mrb[103].mxu0  ;;  %v5926_v40 = vsel %vm2425_vm2, %v5916_v48, -inf }
0x1c04   :  { %v5909_v0 = vmul.f32 0.17677669, %v5878_v15  ;;  %5927 = vmax.xlane.f32.xlu1 %v5926_v40  ;;  %v5923_v4 = vsel %vm2425_vm2, %v5915_v53, -inf }
0x1c05   :  { %v5918_v17 = vadd.f32 %v16330_v41, %v5910_v12  ;;  %5924 = vmax.xlane.f32.xlu0 %v5923_v4 }
0x1c06   :  { %v10879_v32 = vpop.f32.mrb[104].mxu0  ;;  %v5917_v36 = vadd.f32 %v16327_v45, %v5909_v0 }
0x1c07   :  { %v5888_v23 = vpop.f32.mrb[105].mxu0  ;;  %v5932_v11 = vsel %vm2425_vm2, %v5918_v17, -inf  ;;  %v5912_v20 = vmul.f32 0.17677669, %v10879_v32 }
0x1c08   :  { %v5911_v27 = vmul.f32 0.17677669, %v5888_v23  ;;  %v5929_v25 = vsel %vm2425_vm2, %v5917_v36, -inf }
0x1c09   :  { %5933 = vmax.xlane.f32.xlu0 %v5932_v11  ;;  %v5920_v3 = vadd.f32 %v16338_v30, %v5912_v20  ;;  %v17121_v30 = vpack.i.bf16 %v16223_v55, %v16217_v56 }
0x1c0a   :  { %v5919_v37 = vadd.f32 %v16334_v22, %v5911_v27  ;;  %v10882_v62 = vpop.f32.mrb[106].mxu0 }
0x1c0b   :  { %v5898_v19 = vpop.f32.mrb[107].mxu0  ;;  %v5914_v29 = vmul.f32 0.17677669, %v10882_v62  ;;  %v5938_v52 = vsel %vm2425_vm2, %v5920_v3, -inf }
0x1c0c   :  { %v5913_v41 = vmul.f32 0.17677669, %v5898_v19  ;;  %v5935_v39 = vsel %vm2425_vm2, %v5919_v37, -inf }
0x1c0d   :  { %5930 = vmax.xlane.f32.xlu0 %v5929_v25  ;;  %5936 = vmax.xlane.f32.xlu1 %v5935_v39  ;;  %v5922_v49 = vadd.f32 %v16345_v43, %v5914_v29  ;;  %v17123_v43 = vpack.i.bf16 %v16158_v26, %v16155_v13 }
0x1c0e   :  { %v5921_v45 = vadd.f32 %v16342_v8, %v5913_v41  ;;  %v17122_v8 = vpack.i.bf16 %v16241_v35, %v16237_v2 }
0x1c0f   :  { %v5944_v7 = vsel %vm2425_vm2, %v5922_v49, -inf }
0x1c10   :  { %v5941_v22 = vsel %vm2425_vm2, %v5921_v45, -inf }
0x1c11   :  { %5939 = vmax.xlane.f32.xlu0 %v5938_v52  ;;  %5942 = vmax.xlane.f32.xlu1 %v5941_v22 }
0x1c15   :  { %5945 = vmax.xlane.f32.xlu0 %v5944_v7 }
0x1c22   :  { %12509 = vrot.lane.b32.xlu1 %v12508_v33, %s14519_s1 }
0x1c26   :  { %12519 = vrot.lane.b32.xlu1 %v17121_v30, %s14521_s24 }
0x1c2a   :  { %12524 = vrot.lane.b32.xlu1 %v17122_v8, %s14521_s24 }
0x1c2b   :  { %12514 = vrot.lane.b32.xlu0 %v17123_v43, %s14519_s1 }
0x1c91   :  { %v5928_v18 = vpop.xlane.xlu1 %5927 }
0x1c92   :  { %v5948_v9 = vsub.f32 %v5916_v48, %v5928_v18  ;;  %v5925_v51 = vpop.xlane.xlu0 %5924 }
0x1c93   :  { %v5947_v63 = vsub.f32 %v5915_v53, %v5925_v51 }
0x1c94   :  { %v5957_v1 = vmul.f32 1.442695, %v5948_v9 }
0x1c95   :  { %v5955_v33 = vmul.f32 1.442695, %v5947_v63 }
0x1c96   :  { %12732 = vpow2.f32 %v5957_v1  ;;  %v5934_v59 = vpop.xlane.xlu0 %5933 }
0x1c97   :  { %12734 = vpow2.f32 %v5955_v33  ;;  %v5950_v56 = vsub.f32 %v5918_v17, %v5934_v59 }
0x1c99   :  { %v5961_v55 = vmul.f32 1.442695, %v5950_v56 }
0x1c9a   :  { %v5931_v5 = vpop.xlane.xlu0 %5930  ;;  %v5937_v58 = vpop.xlane.xlu1 %5936 }
0x1c9b   :  { %12736 = vpow2.f32 %v5961_v55  ;;  %v5949_v2 = vsub.f32 %v5917_v36, %v5931_v5  ;;  %v5951_v35 = vsub.f32 %v5919_v37, %v5937_v58 }
0x1c9d   :  { %v5959_v61 = vmul.f32 1.442695, %v5949_v2  ;;  %v5963_v16 = vmul.f32 1.442695, %v5951_v35 }
0x1c9e   :  { %v5940_v13 = vpop.xlane.xlu0 %5939  ;;  %v5943_v26 = vpop.xlane.xlu1 %5942 }
0x1c9f   :  { %12738 = vpow2.f32 %v5959_v61  ;;  %v5952_v48 = vsub.f32 %v5920_v3, %v5940_v13  ;;  %v5953_v40 = vsub.f32 %v5921_v45, %v5943_v26 }
0x1ca0   :  { %v16474_v12 = vpop.eup %12732  ;;  %12740 = vpow2.f32 %v5963_v16 }
0x1ca1   :  { %v16476_v53 = vpop.eup %12734  ;;  %v5965_v15 = vmul.f32 1.442695, %v5952_v48  ;;  %v5974_v0 = vsel %vm2425_vm2, %v16474_v12, 0.0  ;;  %v5967_v27 = vmul.f32 1.442695, %v5953_v40 }
0x1ca2   :  { %5975 = vadd.xlane.f32.xlu0 %v5974_v0  ;;  %v5946_v4 = vpop.xlane.xlu0 %5945  ;;  %v12510_v17 = vpop.permute.xlu1 %12509  ;;  %v5971_v32 = vsel %vm2425_vm2, %v16476_v53, 0.0 }
0x1ca3   :  { %12742 = vpow2.f32 %v5965_v15  ;;  %v5954_v36 = vsub.f32 %v5922_v49, %v5946_v4  ;;  %v12512_v23 = vunpack.i.h.bf16 %v12510_v17  ;;  %v12511_v11 = vunpack.i.l.bf16 %v12510_v17  ;;  %5972 = vadd.xlane.f32.xlu1 %v5971_v32 }
0x1ca5   :  { %v16482_v20 = vpop.eup %12736  ;;  %v5969_v37 = vmul.f32 1.442695, %v5954_v36  ;;  %v11775_v62 = vpack.c.bf16 %v12512_v23, %v12511_v11 }
0x1ca6   :  { %v12515_v19 = vpop.permute.xlu0 %12514  ;;  %v12520_v25 = vpop.permute.xlu1 %12519  ;;  %v5980_v3 = vsel %vm2425_vm2, %v16482_v20, 0.0 }
0x1ca7   :  { %12744 = vpow2.f32 %v5969_v37  ;;  %v12517_v29 = vunpack.i.h.bf16 %v12515_v19  ;;  %v12516_v41 = vunpack.i.l.bf16 %v12515_v19  ;;  %v12522_v39 = vunpack.i.h.bf16 %v12520_v25  ;;  %5981 = vadd.xlane.f32.xlu0 %v5980_v3  ;;  %11776 = vmatprep.subr.bf16.mxu1 %v11775_v62 }
0x1ca8   :  { %v12521_v45 = vunpack.i.l.bf16 %v12520_v25  ;;  %11778 = vmatpush3.bf16.msra.mxu1 %v11775_v62  ;;  %12746 = vpow2.f32 %v5967_v27 }
0x1ca9   :  { %v16486_v49 = vpop.eup %12738  ;;  %v11779_v52 = vpack.c.bf16 %v12517_v29, %v12516_v41 }
0x1caa   :  { %v16488_v22 = vpop.eup %12740  ;;  %v12525_v7 = vpop.permute.xlu1 %12524  ;;  %v5977_v30 = vsel %vm2425_vm2, %v16486_v49, 0.0  ;;  %v11807_v8 = vpack.c.bf16 %v12522_v39, %v12521_v45  ;;  %v14522_v39 = vmov 0.0|0.0   ;;  %v6462_v45 = vld [vmem:[#allocation36] sm:$0xff] }
0x1cab   :  { %v12527_v43 = vunpack.i.h.bf16 %v12525_v7  ;;  %v12526_v18 = vunpack.i.l.bf16 %v12525_v7  ;;  %5978 = vadd.xlane.f32.xlu0 %v5977_v30  ;;  %v5983_v9 = vsel %vm2425_vm2, %v16488_v22, 0.0  ;;  %11780 = vmatprep.subr.bf16.mxu1 %v11779_v52  ;;  %v6464_v30 = vld [vmem:[#allocation36 + $0x10] sm:$0xff] }
0x1cac   :  { %5984 = vadd.xlane.f32.xlu1 %v5983_v9  ;;  %11782 = vmatpush3.bf16.msra.mxu1 %v11779_v52 }
0x1cad   :  { %v16494_v51 = vpop.eup %12742  ;;  %11808 = vmatprep.subr.bf16.mxu1 %v11807_v8  ;;  %v11811_v1 = vpack.c.bf16 %v12527_v43, %v12526_v18  ;;  %11831 = vmatprep.subr.bf16.mxu0 %v14522_v39 }
0x1cae   :  { %v5986_v63 = vsel %vm2425_vm2, %v16494_v51, 0.0 }
0x1caf   :  { %5987 = vadd.xlane.f32.xlu0 %v5986_v63  ;;  %10844 = vmatmul.mubr.msk.f32.vlgmr.msra.gmra.mrb[20].mxu1 %vm2588_vm3, %v16427_v24  ;;  %v6467_v63 = vld [vmem:[#allocation36 + $0x28] sm:$0xff] }
0x1cb0   :  { %10846 = vmatprep.mubr.msk.f32.mxu1 %vm2588_vm3, %v16432_v38  ;;  %11810 = vmatpush3.bf16.msra.mxu1 %v11807_v8  ;;  %v17125_v38 = vpack.i.bf16 %v16170_v6, %v16167_v57  ;;  %v6465_v8 = vld [vmem:[#allocation36 + $0x18] sm:$0xff] }
0x1cb1   :  { %v16502_v33 = vpop.eup %12744  ;;  %11812 = vmatprep.subr.bf16.mxu1 %v11811_v1  ;;  %v11847_v18 = vpack.c.bf16 %v6465_v8, %v6464_v30 }
0x1cb2   :  { %v5992_v59 = vsel %vm2425_vm2, %v16502_v33, 0.0  ;;  %v16506_v56 = vpop.eup %12746 }
0x1cb3   :  { %5993 = vadd.xlane.f32.xlu0 %v5992_v59  ;;  %10847 = vmatmul.mubr.msk.f32.gmra.mrb[22].mxu1 %vm2588_vm3, %v16430_v44  ;;  %v5989_v24 = vsel %vm2425_vm2, %v16506_v56, 0.0  ;;  %v17124_v44 = vpack.i.bf16 %v16277_v47, %v16273_v31 }
0x1cb4   :  { %10849 = vmatprep.mubr.msk.f32.mxu1 %vm2588_vm3, %v16436_v21  ;;  %11814 = vmatpush3.bf16.msra.mxu1 %v11811_v1  ;;  %v17127_v21 = vpack.i.bf16 %v16259_v50, %v16255_v10 }
0x1cb7   :  { %5990 = vadd.xlane.f32.xlu0 %v5989_v24  ;;  %10850 = vmatmul.mubr.msk.f32.gmra.mrb[24].mxu1 %vm2588_vm3, %v16434_v54  ;;  %v17126_v54 = vpack.i.bf16 %v16190_v42, %v16187_v60  ;;  %v6469_v24 = vld [vmem:[#allocation36 + $0x38] sm:$0xff] }
0x1cb8   :  { %10852 = vmatprep.mubr.msk.f32.mxu1 %vm2588_vm3, %v16440_v14 }
0x1cbb   :  { %10853 = vmatmul.mubr.msk.f32.gmra.mrb[26].mxu1 %vm2588_vm3, %v16438_v34 }
0x1cbd   :  { %12534 = vrot.lane.b32.xlu1 %v17124_v44, %s14521_s24 }
0x1cc1   :  { %12539 = vrot.lane.b32.xlu1 %v17125_v38, %s14519_s1 }
0x1cc5   :  { %12544 = vrot.lane.b32.xlu1 %v17126_v54, %s14519_s1 }
0x1ccd   :  { %12529 = vrot.lane.b32.xlu0 %v17127_v21, %s14521_s24  ;;  %v6640_v21 = vld [vmem:[#allocation42] sm:$0xff] }
0x1d2f   :  { %v5976_v34 = vpop.xlane.xlu0 %5975 }
0x1d30   :  { %v5973_v14 = vpop.xlane.xlu1 %5972 }
0x1d31   :  { %12748 = vrcp.f32 %v5973_v14 }
0x1d32   :  { %12750 = vrcp.f32 %v5976_v34  ;;  %v6641_v34 = vld [vmem:[#allocation42 + $0x8] sm:$0xff] }
0x1d33   :  { %v11868_v14 = vpack.c.bf16 %v6641_v34, %v6640_v21 }
0x1d34   :  { %v5982_v31 = vpop.xlane.xlu0 %5981 }
0x1d38   :  { %v5979_v47 = vpop.xlane.xlu0 %5978 }
0x1d39   :  { %v5985_v5 = vpop.xlane.xlu1 %5984  ;;  %12752 = vrcp.f32 %v5979_v47  ;;  %v6643_v47 = vld [vmem:[#allocation42 + $0x18] sm:$0xff] }
0x1d3a   :  { %12754 = vrcp.f32 %v5982_v31  ;;  %v6642_v31 = vld [vmem:[#allocation42 + $0x10] sm:$0xff] }
0x1d3b   :  { %v12749_v55 = vpop.eup %12748  ;;  %12756 = vrcp.f32 %v5985_v5  ;;  %v6644_v5 = vld [vmem:[#allocation42 + $0x20] sm:$0xff] }
0x1d3c   :  { %v5988_v58 = vpop.xlane.xlu0 %5987  ;;  %v6003_v57 = vmul.f32 %v12749_v55, %v16476_v53  ;;  %v12751_v17 = vpop.eup %12750  ;;  %v11871_v55 = vpack.c.bf16 %v6643_v47, %v6642_v31  ;;  %v6348_v31 = vld [vmem:[#allocation20 + $0x38] sm:$0xff] }
0x1d3d   :  { %v12535_v60 = vpop.permute.xlu1 %12534  ;;  %12758 = vrcp.f32 %v5988_v58  ;;  %v6004_v36 = vmul.f32 %v12751_v17, %v16474_v12  ;;  %v6645_v58 = vld [vmem:[#allocation42 + $0x28] sm:$0xff] }
0x1d3e   :  { %10899 = vmatprep.mubr.msk.f32.mxu1 %vm2425_vm2, %v6003_v57  ;;  %v12537_v50 = vunpack.i.h.bf16 %v12535_v60  ;;  %v12536_v35 = vunpack.i.l.bf16 %v12535_v60  ;;  %v11874_v57 = vpack.c.bf16 %v6645_v58, %v6644_v5  ;;  %v6647_v60 = vld [vmem:[#allocation42 + $0x38] sm:$0xff] }
0x1d3f   :  { %v6347_v5 = vld [vmem:[#allocation20 + $0x30] sm:$0xff] }
0x1d40   :  { %v5994_v6 = vpop.xlane.xlu0 %5993  ;;  %v11819_v53 = vpack.c.bf16 %v12537_v50, %v12536_v35  ;;  %v6817_v35 = vld [vmem:[#allocation48 + $0x10] sm:$0xff] }
0x1d41   :  { %v12540_v2 = vpop.permute.xlu1 %12539 }
0x1d42   :  { %v12542_v26 = vunpack.i.h.bf16 %v12540_v2  ;;  %v12541_v48 = vunpack.i.l.bf16 %v12540_v2  ;;  %v6815_v2 = vld [vmem:[#allocation48] sm:$0xff] }
0x1d43   :  { %v12753_v32 = vpop.eup %12752 }
0x1d44   :  { %v5991_v42 = vpop.xlane.xlu0 %5990  ;;  %v11823_v40 = vpack.c.bf16 %v12542_v26, %v12541_v48  ;;  %v12755_v11 = vpop.eup %12754  ;;  %v6005_v27 = vmul.f32 %v12753_v32, %v16486_v49  ;;  %v6463_v49 = vld [vmem:[#allocation36 + $0x8] sm:$0xff]  ;;  %v6820_v26 = vld [vmem:[#allocation48 + $0x28] sm:$0xff] }
0x1d45   :  { %v12545_v15 = vpop.permute.xlu1 %12544  ;;  %12760 = vrcp.f32 %v5991_v42  ;;  %v12757_v37 = vpop.eup %12756  ;;  %v6006_v62 = vmul.f32 %v12755_v11, %v16482_v20  ;;  %v6342_v11 = vld [vmem:[#allocation20 + $0x8] sm:$0xff] }
0x1d46   :  { %v12547_v0 = vunpack.i.h.bf16 %v12545_v15  ;;  %v12546_v4 = vunpack.i.l.bf16 %v12545_v15  ;;  %12762 = vrcp.f32 %v5994_v6  ;;  %v6007_v25 = vmul.f32 %v12757_v37, %v16488_v22  ;;  %v6646_v6 = vld [vmem:[#allocation42 + $0x30] sm:$0xff] }
0x1d47   :  { %v12759_v19 = vpop.eup %12758  ;;  %v11844_v22 = vpack.c.bf16 %v6463_v49, %v6462_v45  ;;  %v11877_v42 = vpack.c.bf16 %v6647_v60, %v6646_v6  ;;  %v6821_v15 = vld [vmem:[#allocation48 + $0x30] sm:$0xff] }
0x1d48   :  { %v12530_v10 = vpop.permute.xlu0 %12529  ;;  %v11827_v23 = vpack.c.bf16 %v12547_v0, %v12546_v4  ;;  %v6008_v12 = vmul.f32 %v12759_v19, %v16494_v51  ;;  %v6466_v51 = vld [vmem:[#allocation36 + $0x20] sm:$0xff]  ;;  %v9473_v0 = vld [vmem:[#allocation18] ss:$0 sm:$0xff]  ;;  %v9668_v4 = vld [vmem:[#allocation32] ss:$0 sm:$0xff] }
0x1d49   :  { %v12532_v61 = vunpack.i.h.bf16 %v12530_v10  ;;  %v12531_v16 = vunpack.i.l.bf16 %v12530_v10  ;;  %v6816_v10 = vld [vmem:[#allocation48 + $0x8] sm:$0xff]  ;;  %v12069_v17 = vadd.f32 %v9668_v4, %v9473_v0 }
0x1d4a   :  { %v11892_v50 = vpack.c.bf16 %v6816_v10, %v6815_v2 }
0x1d4b   :  { %v11815_v13 = vpack.c.bf16 %v12532_v61, %v12531_v16  ;;  %v6818_v61 = vld [vmem:[#allocation48 + $0x18] sm:$0xff] }
0x1d4c   :  { %v11895_v16 = vpack.c.bf16 %v6818_v61, %v6817_v35 }
0x1d4d   :  { %11816 = vmatprep.subr.bf16.mxu1 %v11815_v13 }
0x1d4e   :  { %11818 = vmatpush3.bf16.msra.mxu1 %v11815_v13  ;;  %v6819_v13 = vld [vmem:[#allocation48 + $0x20] sm:$0xff] }
0x1d4f   :  { %11820 = vmatprep.subr.bf16.mxu1 %v11819_v53  ;;  %v12761_v3 = vpop.eup %12760  ;;  %v11898_v48 = vpack.c.bf16 %v6820_v26, %v6819_v13 }
0x1d50   :  { %v12763_v29 = vpop.eup %12762  ;;  %v6009_v41 = vmul.f32 %v12761_v3, %v16506_v56  ;;  %v6468_v56 = vld [vmem:[#allocation36 + $0x30] sm:$0xff] }
0x1d51   :  { %v6010_v20 = vmul.f32 %v12763_v29, %v16502_v33  ;;  %v11850_v33 = vpack.c.bf16 %v6467_v63, %v6466_v51  ;;  %v11853_v38 = vpack.c.bf16 %v6469_v24, %v6468_v56  ;;  %v6346_v63 = vld [vmem:[#allocation20 + $0x28] sm:$0xff] }
0x1d52   :  { %11822 = vmatpush3.bf16.msra.mxu1 %v11819_v53  ;;  %v6822_v53 = vld [vmem:[#allocation48 + $0x38] sm:$0xff] }
0x1d53   :  { %11824 = vmatprep.subr.bf16.mxu1 %v11823_v40 }
0x1d55   :  { %10900 = vmatmul.mubr.msk.f32.vlgmr.msra.gmra.mrb[84].mxu1 %vm2425_vm2, %v6004_v36 }
0x1d56   :  { %10902 = vmatprep.mubr.msk.f32.mxu1 %vm2425_vm2, %v6005_v27  ;;  %11826 = vmatpush3.bf16.msra.mxu1 %v11823_v40  ;;  %v11901_v40 = vpack.c.bf16 %v6822_v53, %v6821_v15 }
0x1d57   :  { %11828 = vmatprep.subr.bf16.mxu1 %v11827_v23 }
0x1d59   :  { %10903 = vmatmul.mubr.msk.f32.gmra.mrb[86].mxu1 %vm2425_vm2, %v6006_v62  ;;  %v6341_v62 = vld [vmem:[#allocation20] sm:$0xff] }
0x1d5a   :  { %10905 = vmatprep.mubr.msk.f32.mxu1 %vm2425_vm2, %v6007_v25  ;;  %11830 = vmatpush3.bf16.msra.mxu1 %v11827_v23 }
0x1d5b   :  { %11843 = vmatprep.subr.bf16.mxu1 %v14522_v39 }
0x1d5d   :  { %10906 = vmatmul.mubr.msk.f32.gmra.mrb[88].mxu1 %vm2425_vm2, %v6008_v12 }
0x1d5e   :  { %10908 = vmatprep.mubr.msk.f32.mxu1 %vm2425_vm2, %v6009_v41 }
0x1d61   :  { %10909 = vmatmul.mubr.msk.f32.gmra.mrb[90].mxu1 %vm2425_vm2, %v6010_v20  ;;  %v6344_v20 = vld [vmem:[#allocation20 + $0x18] sm:$0xff] }
0x1e28   :  { %v10901_v52 = vpop.f32.mrb[84].mxu1 }
0x1e29   :  { %v6133_v7 = vpop.f32.mrb[85].mxu1 }
0x1e2a   :  { %10919 = vmatprep.mubr.msk.f32.mxu1 %vm2588_vm3, %v6133_v7 }
0x1e2b   :  { %10920 = vmatmul.mubr.msk.f32.vlgmr.msra.gmra.mrb[20].mxu1 %vm2588_vm3, %v10901_v52  ;;  %v6343_v52 = vld [vmem:[#allocation20 + $0x10] sm:$0xff] }
0x1e2c   :  { %11845 = vmatpush3.bf16.msra.mxu1 %v11844_v22  ;;  %v10904_v43 = vpop.f32.mrb[86].mxu1 }
0x1e2d   :  { %v6143_v9 = vpop.f32.mrb[87].mxu1  ;;  %11846 = vmatprep.subr.bf16.mxu1 %v14522_v39 }
0x1e2e   :  { %10922 = vmatprep.mubr.msk.f32.mxu1 %vm2588_vm3, %v6143_v9 }
0x1e2f   :  { %10923 = vmatmul.mubr.msk.f32.gmra.mrb[22].mxu1 %vm2588_vm3, %v10904_v43 }
0x1e30   :  { %11848 = vmatpush3.bf16.msra.mxu1 %v11847_v18  ;;  %v10907_v1 = vpop.f32.mrb[88].mxu1 }
0x1e31   :  { %v6153_v59 = vpop.f32.mrb[89].mxu1  ;;  %11849 = vmatprep.subr.bf16.mxu1 %v14522_v39 }
0x1e32   :  { %10925 = vmatprep.mubr.msk.f32.mxu1 %vm2588_vm3, %v6153_v59  ;;  %v6345_v59 = vld [vmem:[#allocation20 + $0x20] sm:$0xff] }
0x1e33   :  { %10926 = vmatmul.mubr.msk.f32.gmra.mrb[24].mxu1 %vm2588_vm3, %v10907_v1 }
0x1e34   :  { %11851 = vmatpush3.bf16.msra.mxu1 %v11850_v33  ;;  %v10910_v44 = vpop.f32.mrb[90].mxu1 }
0x1e35   :  { %v6163_v54 = vpop.f32.mrb[91].mxu1  ;;  %11852 = vmatprep.subr.bf16.mxu1 %v14522_v39 }
0x1e36   :  { %10928 = vmatprep.mubr.msk.f32.mxu1 %vm2588_vm3, %v6163_v54 }
0x1e37   :  { %10929 = vmatmul.mubr.msk.f32.gmra.mrb[26].mxu1 %vm2588_vm3, %v10910_v44 }
0x1e38   :  { %11854 = vmatpush3.bf16.msra.mxu1 %v11853_v38  ;;  %10966 = vmatprep.mubr.msk.f32.mxu1 %vm14523_vm5, %v17113_v28 }
0x1e39   :  { %11867 = vmatprep.subr.bf16.mxu1 %v14522_v39 }
0x1e3b   :  { %10967 = vmatmul.mubr.msk.f32.vlgmr.msra.gmra.mrb[92].mxu1 %vm2425_vm2, %v15434_v46 }
0x1e3c   :  { %11869 = vmatpush3.bf16.msra.mxu1 %v11868_v14  ;;  %11004 = vmatprep.mubr.msk.f32.mxu1 %vm14523_vm5, %v17113_v28 }
0x1e3d   :  { %11870 = vmatprep.subr.bf16.mxu1 %v14522_v39 }
0x1e40   :  { %11872 = vmatpush3.bf16.msra.mxu1 %v11871_v55 }
0x1e41   :  { %11873 = vmatprep.subr.bf16.mxu1 %v14522_v39 }
0x1e44   :  { %11875 = vmatpush3.bf16.msra.mxu1 %v11874_v57 }
0x1e45   :  { %11876 = vmatprep.subr.bf16.mxu1 %v14522_v39 }
0x1e48   :  { %11878 = vmatpush3.bf16.msra.mxu1 %v11877_v42 }
0x1e49   :  { %11891 = vmatprep.subr.bf16.mxu1 %v14522_v39 }
0x1e4b   :  { %11005 = vmatmul.mubr.msk.f32.vlgmr.msra.gmra.mrb[94].mxu1 %vm2425_vm2, %v15434_v46 }
0x1e4c   :  { %11893 = vmatpush3.bf16.msra.mxu1 %v11892_v50  ;;  %11042 = vmatprep.mubr.msk.f32.mxu1 %vm14523_vm5, %v17113_v28 }
0x1e4d   :  { %11894 = vmatprep.subr.bf16.mxu1 %v14522_v39 }
0x1e50   :  { %11896 = vmatpush3.bf16.msra.mxu1 %v11895_v16 }
0x1e51   :  { %11897 = vmatprep.subr.bf16.mxu1 %v14522_v39 }
0x1e54   :  { %11899 = vmatpush3.bf16.msra.mxu1 %v11898_v48 }
0x1e55   :  { %11900 = vmatprep.subr.bf16.mxu1 %v14522_v39 }
0x1e58   :  { %11902 = vmatpush3.bf16.msra.mxu1 %v11901_v40 }
0x1e59   :  { %11915 = vmatprep.subr.bf16.mxu1 %v14522_v39 }
0x1e5b   :  { %11043 = vmatmul.mubr.msk.f32.vlgmr.msra.gmra.mrb[96].mxu1 %vm2425_vm2, %v15434_v46 }
0x1e5c   :  { %11080 = vmatprep.mubr.msk.f32.mxu1 %vm14523_vm5, %v17113_v28 }
0x1efe   :  { %v10921_v32 = vpop.f32.mrb[20].mxu1 }
0x1eff   :  { %v12068_v36 = vadd.f32 %v12069_v17, %v10921_v32  ;;  %v6278_v23 = vpop.f32.mrb[21].mxu1 }
0x1f00   :  { %v12070_v27 = vadd.f32 %v12069_v17, %v6278_v23 }
0x1f01   :  { %v6334_v37 = vmax.f32 %v12068_v36, 0.0 }
0x1f02   :  { %v6333_v19 = vmax.f32 %v12070_v27, 0.0  ;;  %v10924_v25 = vpop.f32.mrb[22].mxu1  ;;  %v6551_v27 = vld [vmem:[#allocation39] sm:$0xff] }
0x1f03   :  { %v6350_v3 = vmul.f32 %v6342_v11, %v6334_v37  ;;  %v12072_v12 = vadd.f32 %v12069_v17, %v10924_v25  ;;  %v6288_v29 = vpop.f32.mrb[23].mxu1  ;;  %v6552_v37 = vld [vmem:[#allocation39 + $0x8] sm:$0xff] }
0x1f04   :  { %v6349_v41 = vmul.f32 %v6341_v62, %v6333_v19  ;;  %v12074_v45 = vadd.f32 %v12069_v17, %v6288_v29  ;;  %v6381_v19 = vld [vmem:[#allocation35] sm:$0xff]  ;;  %v11856_v25 = vpack.c.bf16 %v6552_v37, %v6551_v27  ;;  %v7033_v27 = vld [vmem:[#allocation54 + $0x18] sm:$0xff] }
0x1f05   :  { %v6336_v49 = vmax.f32 %v12072_v12, 0.0  ;;  %v6360_v22 = vsel %vm2425_vm2, %v6350_v3, 0.0  ;;  %v6553_v3 = vld [vmem:[#allocation39 + $0x10] sm:$0xff]  ;;  %v6554_v12 = vld [vmem:[#allocation39 + $0x18] sm:$0xff] }
0x1f06   :  { %v6335_v7 = vmax.f32 %v12074_v45, 0.0  ;;  %6361 = vadd.xlane.f32.xlu0 %v6360_v22  ;;  %v10927_v30 = vpop.f32.mrb[24].mxu1  ;;  %v6357_v8 = vsel %vm2425_vm2, %v6349_v41, 0.0  ;;  %v11859_v29 = vpack.c.bf16 %v6554_v12, %v6553_v3  ;;  %v6555_v41 = vld [vmem:[#allocation39 + $0x20] sm:$0xff]  ;;  %v9703_v22 = vld [vmem:[#allocation38] ss:$0 sm:$0xff] }
0x1f07   :  { %v6352_v43 = vmul.f32 %v6344_v20, %v6336_v49  ;;  %v12076_v18 = vadd.f32 %v12069_v17, %v10927_v30  ;;  %6358 = vadd.xlane.f32.xlu1 %v6357_v8  ;;  %v6298_v9 = vpop.f32.mrb[25].mxu1  ;;  %v6556_v20 = vld [vmem:[#allocation39 + $0x28] sm:$0xff]  ;;  %v6557_v49 = vld [vmem:[#allocation39 + $0x30] sm:$0xff]  ;;  %v7036_v3 = vld [vmem:[#allocation54 + $0x30] sm:$0xff] }
0x1f08   :  { %v6351_v51 = vmul.f32 %v6343_v52, %v6335_v7  ;;  %v12078_v1 = vadd.f32 %v12069_v17, %v6298_v9  ;;  %v11862_v45 = vpack.c.bf16 %v6556_v20, %v6555_v41  ;;  %v6558_v52 = vld [vmem:[#allocation39 + $0x38] sm:$0xff]  ;;  %v6726_v8 = vld [vmem:[#allocation45] sm:$0xff] }
0x1f09   :  { %v6338_v33 = vmax.f32 %v12076_v18, 0.0  ;;  %v6366_v56 = vsel %vm2425_vm2, %v6352_v43, 0.0  ;;  %v11865_v7 = vpack.c.bf16 %v6558_v52, %v6557_v49  ;;  %v6727_v43 = vld [vmem:[#allocation45 + $0x8] sm:$0xff]  ;;  %v7037_v12 = vld [vmem:[#allocation54 + $0x38] sm:$0xff] }
0x1f0a   :  { %v6337_v24 = vmax.f32 %v12078_v1, 0.0  ;;  %6367 = vadd.xlane.f32.xlu0 %v6366_v56  ;;  %v10930_v44 = vpop.f32.mrb[26].mxu1  ;;  %v6363_v38 = vsel %vm2425_vm2, %v6351_v51, 0.0  ;;  %v11880_v18 = vpack.c.bf16 %v6727_v43, %v6726_v8  ;;  %v6728_v51 = vld [vmem:[#allocation45 + $0x10] sm:$0xff] }
0x1f0b   :  { %v6354_v54 = vmul.f32 %v6346_v63, %v6338_v33  ;;  %v12080_v21 = vadd.f32 %v12069_v17, %v10930_v44  ;;  %6364 = vadd.xlane.f32.xlu1 %v6363_v38  ;;  %v6308_v34 = vpop.f32.mrb[27].mxu1  ;;  %v6729_v63 = vld [vmem:[#allocation45 + $0x18] sm:$0xff]  ;;  %v6730_v33 = vld [vmem:[#allocation45 + $0x20] sm:$0xff] }
0x1f0c   :  { %v6353_v14 = vmul.f32 %v6345_v59, %v6337_v24  ;;  %v12082_v47 = vadd.f32 %v12069_v17, %v6308_v34  ;;  %v11883_v1 = vpack.c.bf16 %v6729_v63, %v6728_v51  ;;  %v6731_v59 = vld [vmem:[#allocation45 + $0x28] sm:$0xff]  ;;  %v6732_v24 = vld [vmem:[#allocation45 + $0x30] sm:$0xff]  ;;  %v6733_v44 = vld [vmem:[#allocation45 + $0x38] sm:$0xff] }
0x1f0d   :  { %v6340_v55 = vmax.f32 %v12080_v21, 0.0  ;;  %v6372_v58 = vsel %vm2425_vm2, %v6354_v54, 0.0  ;;  %v11886_v56 = vpack.c.bf16 %v6731_v59, %v6730_v33  ;;  %v9707_v38 = vld [vmem:[#allocation44] ss:$0 sm:$0xff]  ;;  %v11889_v54 = vpack.c.bf16 %v6733_v44, %v6732_v24  ;;  %v6944_v34 = vld [vmem:[#allocation51] sm:$0xff]  ;;  %v7248_v8 = vld [vmem:[#allocation60 + $0x8] sm:$0xff] }
0x1f0e   :  { %v6339_v57 = vmax.f32 %v12082_v47, 0.0  ;;  %6373 = vadd.xlane.f32.xlu0 %v6372_v58  ;;  %v6546_v6 = vpop.f32.mrb[92].mxu1  ;;  %v6369_v60 = vsel %vm2425_vm2, %v6353_v14, 0.0  ;;  %v6945_v14 = vld [vmem:[#allocation51 + $0x8] sm:$0xff]  ;;  %v7250_v33 = vld [vmem:[#allocation60 + $0x18] sm:$0xff] }
0x1f0f   :  { %v6356_v42 = vmul.f32 %v6348_v31, %v6340_v55  ;;  %6370 = vadd.xlane.f32.xlu1 %v6369_v60  ;;  %v10968_v2 = vpop.f32.mrb[93].mxu1  ;;  %v6547_v30 = vadd.f32 %v9703_v22, %v6546_v6  ;;  %v11904_v31 = vpack.c.bf16 %v6945_v14, %v6944_v34  ;;  %v6946_v55 = vld [vmem:[#allocation51 + $0x10] sm:$0xff]  ;;  %v6949_v6 = vld [vmem:[#allocation51 + $0x28] sm:$0xff] }
0x1f10   :  { %v6355_v10 = vmul.f32 %v6347_v5, %v6339_v57  ;;  %v6947_v5 = vld [vmem:[#allocation51 + $0x18] sm:$0xff]  ;;  %v6948_v57 = vld [vmem:[#allocation51 + $0x20] sm:$0xff]  ;;  %v7252_v24 = vld [vmem:[#allocation60 + $0x28] sm:$0xff] }
0x1f11   :  { %v6378_v50 = vsel %vm2425_vm2, %v6356_v42, 0.0  ;;  %v6550_v9 = vmax.f32 %v6547_v30, 0.0  ;;  %v11907_v58 = vpack.c.bf16 %v6947_v5, %v6946_v55  ;;  %v11910_v60 = vpack.c.bf16 %v6949_v6, %v6948_v57  ;;  %v6950_v42 = vld [vmem:[#allocation51 + $0x30] sm:$0xff]  ;;  %v6951_v2 = vld [vmem:[#allocation51 + $0x38] sm:$0xff]  ;;  %v7247_v30 = vld [vmem:[#allocation60] sm:$0xff] }
0x1f12   :  { %6379 = vadd.xlane.f32.xlu0 %v6378_v50  ;;  %v6375_v35 = vsel %vm2425_vm2, %v6355_v10, 0.0  ;;  %v11913_v10 = vpack.c.bf16 %v6951_v2, %v6950_v42  ;;  %v7119_v50 = vld [vmem:[#allocation57] sm:$0xff]  ;;  %v11940_v51 = vpack.c.bf16 %v7248_v8, %v7247_v30 }
0x1f13   :  { %6376 = vadd.xlane.f32.xlu1 %v6375_v35  ;;  %v7120_v35 = vld [vmem:[#allocation57 + $0x8] sm:$0xff]  ;;  %v9719_v55 = vld [vmem:[#allocation62] ss:$0 sm:$0xff] }
0x1f1e   :  { %v16598_v61 = vpop.f32.mrb[94].mxu1 }
0x1f1f   :  { %v11006_v16 = vpop.f32.mrb[95].mxu1  ;;  %v6722_v21 = vadd.f32 %v9707_v38, %v16598_v61  ;;  %v11928_v61 = vpack.c.bf16 %v7120_v35, %v7119_v50  ;;  %v7253_v38 = vld [vmem:[#allocation60 + $0x30] sm:$0xff]  ;;  %v14524_v35 = vmov 1  }
0x1f20   :  { %v7121_v16 = vld [vmem:[#allocation57 + $0x10] sm:$0xff]  ;;  %12548 = vset.pattern.permute.xlu1 %v14524_v35 }
0x1f21   :  { %v6725_v47 = vmax.f32 %v6722_v21, 0.0 }
0x1f2e   :  { %v16600_v13 = vpop.f32.mrb[96].mxu1 }
0x1f2f   :  { %v11044_v26 = vpop.f32.mrb[97].mxu1 }
0x1f30   :  { %v7122_v26 = vld [vmem:[#allocation57 + $0x18] sm:$0xff] }
0x1f93   :  { %v6362_v48 = vpop.xlane.xlu0 %6361 }
0x1f94   :  { %v6359_v15 = vpop.xlane.xlu1 %6358 }
0x1f95   :  { %v11832_v53 = vpack.c.bf16 %v6362_v48, %v6359_v15  ;;  %v11931_v48 = vpack.c.bf16 %v7122_v26, %v7121_v16  ;;  %v7123_v15 = vld [vmem:[#allocation57 + $0x20] sm:$0xff] }
0x1f97   :  { %11833 = vmatpush3.bf16.msra.mxu0 %v11832_v53  ;;  %v6368_v40 = vpop.xlane.xlu0 %6367  ;;  %v7124_v53 = vld [vmem:[#allocation57 + $0x28] sm:$0xff] }
0x1f98   :  { %v6365_v0 = vpop.xlane.xlu1 %6364  ;;  %11834 = vmatprep.subr.bf16.mxu0 %v14522_v39 }
0x1f99   :  { %v11835_v4 = vpack.c.bf16 %v6368_v40, %v6365_v0  ;;  %v11934_v40 = vpack.c.bf16 %v7124_v53, %v7123_v15  ;;  %v7125_v0 = vld [vmem:[#allocation57 + $0x30] sm:$0xff]  ;;  %v17128_v15 = vmov 0   ;;  %v14526_v53 = vmov 5  }
0x1f9b   :  { %11836 = vmatpush3.bf16.msra.mxu0 %v11835_v4  ;;  %v6374_v17 = vpop.xlane.xlu0 %6373  ;;  %v7126_v4 = vld [vmem:[#allocation57 + $0x38] sm:$0xff] }
0x1f9c   :  { %v6371_v32 = vpop.xlane.xlu1 %6370  ;;  %11837 = vmatprep.subr.bf16.mxu0 %v14522_v39 }
0x1f9d   :  { %v11838_v36 = vpack.c.bf16 %v6374_v17, %v6371_v32  ;;  %v11937_v17 = vpack.c.bf16 %v7126_v4, %v7125_v0  ;;  %v7030_v32 = vld [vmem:[#allocation54] sm:$0xff]  ;;  %v14528_v0 = vmov 4   ;;  %v9711_v4 = vld [vmem:[#allocation50] ss:$0 sm:$0xff] }
0x1f9f   :  { %11839 = vmatpush3.bf16.msra.mxu0 %v11838_v36  ;;  %v6380_v23 = vpop.xlane.xlu0 %6379  ;;  %v7031_v36 = vld [vmem:[#allocation54 + $0x8] sm:$0xff] }
0x1fa0   :  { %v6377_v11 = vpop.xlane.xlu1 %6376  ;;  %11840 = vmatprep.subr.bf16.mxu0 %v14522_v39 }
0x1fa1   :  { %v11841_v62 = vpack.c.bf16 %v6380_v23, %v6377_v11  ;;  %v7032_v23 = vld [vmem:[#allocation54 + $0x10] sm:$0xff]  ;;  %v11916_v11 = vpack.c.bf16 %v7031_v36, %v7030_v32  ;;  %v7392_v36 = vld [vmem:[#allocation63] sm:$0xff] }
0x1fa2   :  { %v11919_v37 = vpack.c.bf16 %v7033_v27, %v7032_v23  ;;  %v7393_v23 = vld [vmem:[#allocation63 + $0x8] sm:$0xff]  ;;  %v9709_v27 = vld [vmem:[#allocation47] ss:$0 sm:$0xff] }
0x1fa3   :  { %11842 = vmatpush3.bf16.msra.mxu0 %v11841_v62  ;;  %11917 = vmatpush3.bf16.msra.mxu1 %v11916_v11  ;;  %v7034_v62 = vld [vmem:[#allocation54 + $0x20] sm:$0xff]  ;;  %v11952_v11 = vpack.c.bf16 %v7393_v23, %v7392_v36 }
0x1fa4   :  { %11855 = vmatprep.subr.bf16.mxu0 %v14522_v39  ;;  %11918 = vmatprep.subr.bf16.mxu1 %v14522_v39  ;;  %v9721_v36 = vld [vmem:[#allocation65] ss:$0 sm:$0xff] }
0x1fa6   :  { %10948 = vmatmul.mubr.msk.f32.vlgmr.msra.gmra.mrb[108].mxu0 %vm2425_vm2, %v6381_v19  ;;  %v7035_v19 = vld [vmem:[#allocation54 + $0x28] sm:$0xff] }
0x1fa7   :  { %11857 = vmatpush3.bf16.msra.mxu0 %v11856_v25  ;;  %10985 = vmatprep.mubr.msk.f32.mxu0 %vm14523_vm5, %v17113_v28  ;;  %v11922_v25 = vpack.c.bf16 %v7035_v19, %v7034_v62  ;;  %v7395_v62 = vld [vmem:[#allocation63 + $0x18] sm:$0xff] }
0x1fa8   :  { %11858 = vmatprep.subr.bf16.mxu0 %v14522_v39  ;;  %11920 = vmatpush3.bf16.msra.mxu1 %v11919_v37  ;;  %v7394_v37 = vld [vmem:[#allocation63 + $0x10] sm:$0xff] }
0x1fa9   :  { %11921 = vmatprep.subr.bf16.mxu1 %v14522_v39 }
0x1fab   :  { %11860 = vmatpush3.bf16.msra.mxu0 %v11859_v29  ;;  %v11925_v29 = vpack.c.bf16 %v7037_v12, %v7036_v3 }
0x1fac   :  { %11861 = vmatprep.subr.bf16.mxu0 %v14522_v39  ;;  %11923 = vmatpush3.bf16.msra.mxu1 %v11922_v25  ;;  %v11955_v25 = vpack.c.bf16 %v7395_v62, %v7394_v37  ;;  %v7566_v37 = vld [vmem:[#allocation69] sm:$0xff]  ;;  %v7567_v62 = vld [vmem:[#allocation69 + $0x8] sm:$0xff] }
0x1fad   :  { %11924 = vmatprep.subr.bf16.mxu1 %v14522_v39 }
0x1faf   :  { %11863 = vmatpush3.bf16.msra.mxu0 %v11862_v45 }
0x1fb0   :  { %11864 = vmatprep.subr.bf16.mxu0 %v14522_v39  ;;  %11926 = vmatpush3.bf16.msra.mxu1 %v11925_v29  ;;  %v9705_v29 = vld [vmem:[#allocation41] ss:$0 sm:$0xff] }
0x1fb1   :  { %11939 = vmatprep.subr.bf16.mxu1 %v14522_v39 }
0x1fb3   :  { %11866 = vmatpush3.bf16.msra.mxu0 %v11865_v7  ;;  %v9713_v7 = vld [vmem:[#allocation53] ss:$0 sm:$0xff] }
0x1fb4   :  { %11879 = vmatprep.subr.bf16.mxu0 %v14522_v39 }
0x1fb6   :  { %10986 = vmatmul.mubr.msk.f32.vlgmr.msra.gmra.mrb[110].mxu0 %vm2425_vm2, %v6550_v9 }
0x1fb7   :  { %11881 = vmatpush3.bf16.msra.mxu0 %v11880_v18  ;;  %11023 = vmatprep.mubr.msk.f32.mxu0 %vm14523_vm5, %v17113_v28 }
0x1fb8   :  { %11882 = vmatprep.subr.bf16.mxu0 %v14522_v39 }
0x1fbb   :  { %11884 = vmatpush3.bf16.msra.mxu0 %v11883_v1  ;;  %v7249_v1 = vld [vmem:[#allocation60 + $0x10] sm:$0xff] }
0x1fbc   :  { %11885 = vmatprep.subr.bf16.mxu0 %v14522_v39  ;;  %v11943_v59 = vpack.c.bf16 %v7250_v33, %v7249_v1 }
0x1fbf   :  { %11887 = vmatpush3.bf16.msra.mxu0 %v11886_v56  ;;  %v7251_v56 = vld [vmem:[#allocation60 + $0x20] sm:$0xff] }
0x1fc0   :  { %11888 = vmatprep.subr.bf16.mxu0 %v14522_v39  ;;  %v11946_v44 = vpack.c.bf16 %v7252_v24, %v7251_v56  ;;  %v7477_v56 = vld [vmem:[#allocation66] sm:$0xff]  ;;  %v7478_v24 = vld [vmem:[#allocation66 + $0x8] sm:$0xff] }
0x1fc3   :  { %11890 = vmatpush3.bf16.msra.mxu0 %v11889_v54  ;;  %v7254_v54 = vld [vmem:[#allocation60 + $0x38] sm:$0xff] }
0x1fc4   :  { %11903 = vmatprep.subr.bf16.mxu0 %v14522_v39  ;;  %v11949_v21 = vpack.c.bf16 %v7254_v54, %v7253_v38  ;;  %v11958_v38 = vpack.c.bf16 %v7478_v24, %v7477_v56  ;;  %v7480_v54 = vld [vmem:[#allocation66 + $0x18] sm:$0xff] }
0x1fc6   :  { %11024 = vmatmul.mubr.msk.f32.vlgmr.msra.gmra.mrb[112].mxu0 %vm2425_vm2, %v6725_v47 }
0x1fc7   :  { %11905 = vmatpush3.bf16.msra.mxu0 %v11904_v31  ;;  %11061 = vmatprep.mubr.msk.f32.mxu0 %vm14523_vm5, %v17113_v28 }
0x1fc8   :  { %11906 = vmatprep.subr.bf16.mxu0 %v14522_v39 }
0x1fcb   :  { %11908 = vmatpush3.bf16.msra.mxu0 %v11907_v58 }
0x1fcc   :  { %11909 = vmatprep.subr.bf16.mxu0 %v14522_v39 }
0x1fcf   :  { %11911 = vmatpush3.bf16.msra.mxu0 %v11910_v60 }
0x1fd0   :  { %11912 = vmatprep.subr.bf16.mxu0 %v14522_v39 }
0x1fd3   :  { %11914 = vmatpush3.bf16.msra.mxu0 %v11913_v10 }
0x1fd4   :  { %11927 = vmatprep.subr.bf16.mxu0 %v14522_v39 }
0x1fd6   :  { %11062 = vmatmul.mubr.msk.f32.vlgmr.msra.gmra.mrb[114].mxu0 %vm2425_vm2, %v15434_v46 }
0x1fd7   :  { %11929 = vmatpush3.bf16.msra.mxu0 %v11928_v61  ;;  %11099 = vmatprep.mubr.msk.f32.mxu0 %vm14523_vm5, %v17113_v28  ;;  %v14525_v61 = vmov 3  }
0x1fd8   :  { %11930 = vmatprep.subr.bf16.mxu0 %v14522_v39  ;;  %12549 = vset.pattern.permute.xlu0 %v14525_v61 }
0x1fdb   :  { %11932 = vmatpush3.bf16.msra.mxu0 %v11931_v48 }
0x1fdc   :  { %11933 = vmatprep.subr.bf16.mxu0 %v14522_v39 }
0x1fdf   :  { %11935 = vmatpush3.bf16.msra.mxu0 %v11934_v40  ;;  %v14527_v40 = vmov 2  }
0x1fe0   :  { %11936 = vmatprep.subr.bf16.mxu0 %v14522_v39 }
0x1fe3   :  { %11938 = vmatpush3.bf16.msra.mxu0 %v11937_v17  ;;  %v6897_v17 = vadd.f32 %v9711_v4, %v16600_v13  ;;  %v9715_v13 = vld [vmem:[#allocation56] ss:$0 sm:$0xff] }
0x1fe4   :  { %11951 = vmatprep.subr.bf16.mxu0 %v14522_v39 }
0x1fe5   :  { %v6901_v32 = vsel %vm6900_vm7, %v6897_v17, -inf }
0x1fe6   :  { %11100 = vmatmul.mubr.msk.f32.vlgmr.msra.gmra.mrb[116].mxu0 %vm2425_vm2, %v15434_v46 }
0x1fe7   :  { %11129 = vmatprep.mubr.msk.f32.mxu0 %vm14523_vm5, %v17113_v28  ;;  %11953 = vmatpush3.bf16.msra.mxu0 %v11952_v11 }
0x1fe8   :  { %11954 = vmatprep.subr.bf16.mxu0 %v14522_v39 }
0x1feb   :  { %11956 = vmatpush3.bf16.msra.mxu0 %v11955_v25 }
0x1fec   :  { %11969 = vmatprep.subr.bf16.mxu0 %v14522_v39 }
0x2079   :  { %v16644_v41 = vpop.f32.mrb[108].mxu0 }
0x207a   :  { %v10949_v20 = vpop.f32.mrb[109].mxu0 }
0x2089   :  { %v16646_v45 = vpop.f32.mrb[110].mxu0 }
0x208a   :  { %v10987_v49 = vpop.f32.mrb[111].mxu0 }
0x2099   :  { %v16648_v52 = vpop.f32.mrb[112].mxu0 }
0x209a   :  { %v11025_v22 = vpop.f32.mrb[113].mxu0  ;;  %v6811_v19 = vadd.f32 %v9709_v27, %v16648_v52 }
0x209c   :  { %v16674_v3 = vmax.f32 %v6811_v19, 0.0  ;;  %v7740_v19 = vld [vmem:[#allocation74] sm:$0xff] }
0x20a9   :  { %v7025_v43 = vpop.f32.mrb[114].mxu0 }
0x20aa   :  { %v7026_v18 = vadd.f32 %v9713_v7, %v7025_v43  ;;  %v11063_v9 = vpop.f32.mrb[115].mxu0  ;;  %v6636_v7 = vadd.f32 %v9705_v29, %v16646_v45 }
0x20ac   :  { %v7029_v63 = vmax.f32 %v7026_v18, 0.0  ;;  %v16682_v43 = vmax.f32 %v6636_v7, 0.0 }
0x20ae   :  { %11081 = vmatmul.mubr.msk.f32.vlgmr.msra.gmra.mrb[98].mxu1 %vm2425_vm2, %v7029_v63 }
0x20af   :  { %11941 = vmatpush3.bf16.msra.mxu1 %v11940_v51  ;;  %11118 = vmatprep.mubr.msk.f32.mxu1 %vm14523_vm5, %v17113_v28 }
0x20b0   :  { %11942 = vmatprep.subr.bf16.mxu1 %v14522_v39 }
0x20b3   :  { %11944 = vmatpush3.bf16.msra.mxu1 %v11943_v59 }
0x20b4   :  { %11945 = vmatprep.subr.bf16.mxu1 %v14522_v39 }
0x20b7   :  { %11947 = vmatpush3.bf16.msra.mxu1 %v11946_v44  ;;  %v7479_v44 = vld [vmem:[#allocation66 + $0x10] sm:$0xff] }
0x20b8   :  { %11948 = vmatprep.subr.bf16.mxu1 %v14522_v39 }
0x20b9   :  { %v16656_v34 = vpop.f32.mrb[116].mxu0 }
0x20ba   :  { %v11101_v14 = vpop.f32.mrb[117].mxu0 }
0x20bb   :  { %11950 = vmatpush3.bf16.msra.mxu1 %v11949_v21 }
0x20bc   :  { %11957 = vmatprep.subr.bf16.mxu1 %v14522_v39 }
0x20be   :  { %11119 = vmatmul.mubr.msk.f32.vlgmr.msra.gmra.mrb[100].mxu1 %vm2425_vm2, %v15434_v46 }
0x20bf   :  { %11148 = vmatprep.mubr.msk.f32.mxu1 %vm14523_vm5, %v17113_v28  ;;  %11959 = vmatpush3.bf16.msra.mxu1 %v11958_v38 }
0x20c0   :  { %11960 = vmatprep.subr.bf16.mxu1 %v14522_v39 }
0x2181   :  { %v7114_v31 = vpop.f32.mrb[98].mxu1 }
0x2182   :  { %v11082_v47 = vpop.f32.mrb[99].mxu1  ;;  %v7115_v12 = vadd.f32 %v9715_v13, %v7114_v31  ;;  %v11961_v31 = vpack.c.bf16 %v7480_v54, %v7479_v44  ;;  %v11970_v13 = vpack.c.bf16 %v7567_v62, %v7566_v37 }
0x2184   :  { %v16678_v30 = vmax.f32 %v7115_v12, 0.0  ;;  %11962 = vmatpush3.bf16.msra.mxu1 %v11961_v31  ;;  %v7741_v12 = vld [vmem:[#allocation74 + $0x8] sm:$0xff] }
0x2185   :  { %11963 = vmatprep.subr.bf16.mxu1 %v14522_v39  ;;  %v11988_v29 = vpack.c.bf16 %v7741_v12, %v7740_v19  ;;  %v9729_v12 = vld [vmem:[#allocation75] ss:$0 sm:$0xff] }
0x2191   :  { %v7328_v5 = vpop.f32.mrb[100].mxu1 }
0x2192   :  { %v7329_v58 = vadd.f32 %v9719_v55, %v7328_v5  ;;  %v11120_v57 = vpop.f32.mrb[101].mxu1  ;;  %v7481_v5 = vld [vmem:[#allocation66 + $0x20] sm:$0xff] }
0x2194   :  { %v7333_v6 = vsel %vm7332_vm6, %v7329_v58, -inf }
0x2195   :  { %7334 = vmax.xlane.f32.xlu1 %v7333_v6 }
0x2222   :  { %v7335_v60 = vpop.xlane.xlu1 %7334 }
0x2223   :  { %v7336_v42 = vsub.f32 %v7329_v58, %v7335_v60  ;;  %v7482_v58 = vld [vmem:[#allocation66 + $0x28] sm:$0xff] }
0x2225   :  { %v7337_v2 = vmul.f32 1.442695, %v7336_v42  ;;  %v11964_v42 = vpack.c.bf16 %v7482_v58, %v7481_v5  ;;  %v7653_v58 = vld [vmem:[%s17129_s0 + $0x10] sm:$0xff] }
0x2227   :  { %12764 = vpow2.f32 %v7337_v2  ;;  %11965 = vmatpush3.bf16.msra.mxu1 %v11964_v42 }
0x2228   :  { %11966 = vmatprep.subr.bf16.mxu1 %v14522_v39 }
0x2231   :  { %v12765_v10 = vpop.eup %12764 }
0x2232   :  { %v7339_v50 = vsel %vm7332_vm6, %v12765_v10, 0.0 }
0x2233   :  { %7340 = vadd.xlane.f32.xlu0 %v7339_v50 }
0x22c0   :  { %v7341_v16 = vpop.xlane.xlu0 %7340 }
0x22c1   :  { %12766 = vrcp.f32 %v7341_v16 }
0x22cb   :  { %v12767_v26 = vpop.eup %12766 }
0x22cc   :  { %v7343_v48 = vmul.f32 %v12767_v26, %v12765_v10 }
0x22ce   :  { %7367 = vperm.xlu0 %12549, %v7343_v48   ;;  %7351 = vperm.xlu1 %12548, %v7343_v48  }
0x22d2   :  { %12551 = vset.pattern.permute.xlu0 %v17128_v15  ;;  %12550 = vset.pattern.permute.xlu1 %v14526_v53  ;;  %v7484_v53 = vld [vmem:[#allocation66 + $0x38] sm:$0xff] }
0x22d3   :  { %7346 = vperm.xlu0 %12551, %v7343_v48   ;;  %7383 = vperm.xlu1 %12550, %v7343_v48  }
0x22d7   :  { %12552 = vset.pattern.permute.xlu0 %v14527_v40  ;;  %12553 = vset.pattern.permute.xlu1 %v14528_v0 }
0x22d8   :  { %7361 = vperm.xlu0 %12552, %v7343_v48  }
0x22dc   :  { %12554 = vset.pattern.permute.xlu0 %v14524_v35 }
0x22f7   :  { %6902 = vmax.xlane.f32.xlu1 %v6901_v32 }
0x2308   :  { %7377 = vperm.xlu1 %12553, %v7343_v48   ;;  %v7483_v48 = vld [vmem:[#allocation66 + $0x30] sm:$0xff] }
0x2309   :  { %v11967_v0 = vpack.c.bf16 %v7484_v53, %v7483_v48  ;;  %v7656_v48 = vld [vmem:[%s17129_s0 + $0x28] sm:$0xff] }
0x230b   :  { %11968 = vmatpush3.bf16.msra.mxu1 %v11967_v0  ;;  %v7657_v0 = vld [vmem:[%s17129_s0 + $0x30] sm:$0xff] }
0x230c   :  { %12559 = vset.pattern.permute.xlu1 %v14525_v61  ;;  %11987 = vmatprep.subr.bf16.mxu1 %v14522_v39 }
0x234d   :  { %v7352_v20 = vpop.permute.xlu1 %7351  ;;  %v7368_v22 = vpop.permute.xlu0 %7367 }
0x234e   :  { %v7354_v49 = vmul.f32 %v7352_v20, %v16674_v3  ;;  %v7370_v52 = vmul.f32 %v7368_v22, %v16678_v30  ;;  %v7568_v20 = vld [vmem:[#allocation69 + $0x10] sm:$0xff] }
0x234f   :  { %v7742_v22 = vld [vmem:[#allocation74 + $0x10] sm:$0xff] }
0x2350   :  { %7356 = vrot.lane.b32.xlu0 %v7354_v49, %s14521_s24  ;;  %v7569_v49 = vld [vmem:[#allocation69 + $0x18] sm:$0xff] }
0x2351   :  { %v11973_v7 = vpack.c.bf16 %v7569_v49, %v7568_v20  ;;  %v7864_v49 = vld [vmem:[#allocation77] sm:$0xff] }
0x2352   :  { %v7384_v8 = vpop.permute.xlu1 %7383  ;;  %v7347_v33 = vpop.permute.xlu0 %7346 }
0x2353   :  { %v7386_v18 = vmul.f32 %v7384_v8, %v16682_v43  ;;  %v7349_v21 = vmul.f32 %v7347_v33, %v16674_v3 }
0x2354   :  { %7372 = vrot.lane.b32.xlu0 %v7370_v52, %s14521_s24  ;;  %v7743_v52 = vld [vmem:[#allocation74 + $0x18] sm:$0xff] }
0x2355   :  { %v11991_v8 = vpack.c.bf16 %v7743_v52, %v7742_v22  ;;  %v7865_v22 = vld [vmem:[#allocation77 + $0x8] sm:$0xff]  ;;  %v7866_v52 = vld [vmem:[#allocation77 + $0x10] sm:$0xff] }
0x2357   :  { %v7362_v59 = vpop.permute.xlu0 %7361 }
0x2358   :  { %7388 = vrot.lane.b32.xlu0 %v7386_v18, %s14521_s24  ;;  %v7364_v47 = vmul.f32 %v7362_v59, %v16678_v30 }
0x2384   :  { %v6903_v9 = vpop.xlane.xlu1 %6902 }
0x2385   :  { %v6904_v51 = vsub.f32 %v6897_v17, %v6903_v9 }
0x2387   :  { %v6905_v63 = vmul.f32 1.442695, %v6904_v51 }
0x2388   :  { %v7378_v57 = vpop.permute.xlu1 %7377 }
0x2389   :  { %12768 = vpow2.f32 %v6905_v63  ;;  %v7380_v2 = vmul.f32 %v7378_v57, %v16682_v43 }
0x2393   :  { %v12769_v45 = vpop.eup %12768 }
0x2394   :  { %v6907_v1 = vsel %vm6900_vm7, %v12769_v45, 0.0 }
0x2395   :  { %6908 = vadd.xlane.f32.xlu1 %v6907_v1 }
0x23c2   :  { %v7357_v14 = vpop.permute.xlu0 %7356 }
0x23c3   :  { %v7359_v55 = vadd.f32 %v7357_v14, %v7349_v21  ;;  %v7651_v21 = vld [vmem:[%s17129_s0] sm:$0xff]  ;;  %v7652_v14 = vld [vmem:[%s17129_s0 + $0x8] sm:$0xff] }
0x23c5   :  { %v7365_v6 = vadd.f32 %v7364_v47, %v7359_v55  ;;  %v11976_v55 = vpack.c.bf16 %v7652_v14, %v7651_v21  ;;  %v7950_v21 = vld [vmem:[%s17130_s5 + $0x8] sm:$0xff]  ;;  %v7951_v14 = vld [vmem:[%s17130_s5 + $0x10] sm:$0xff] }
0x23c6   :  { %v7373_v60 = vpop.permute.xlu0 %7372 }
0x23c7   :  { %v7375_v10 = vadd.f32 %v7373_v60, %v7365_v6 }
0x23c9   :  { %v7381_v50 = vadd.f32 %v7380_v2, %v7375_v10 }
0x23ca   :  { %v7389_v16 = vpop.permute.xlu0 %7388 }
0x23cb   :  { %v16693_v26 = vadd.f32 %v7389_v16, %v7381_v50  ;;  %v7655_v16 = vld [vmem:[%s17129_s0 + $0x20] sm:$0xff] }
0x23cc   :  { %v11982_v53 = vpack.c.bf16 %v7656_v48, %v7655_v16  ;;  %v8039_v16 = vld [vmem:[#allocation81 + $0x8] sm:$0xff] }
0x23cd   :  { %11130 = vmatmul.mubr.msk.f32.vlgmr.msra.gmra.mrb[118].mxu0 %vm2588_vm3, %v16693_v26 }
0x23ce   :  { %11159 = vmatprep.mubr.msk.f32.mxu0 %vm14523_vm5, %v17113_v28  ;;  %11971 = vmatpush3.bf16.msra.mxu0 %v11970_v13 }
0x23cf   :  { %11972 = vmatprep.subr.bf16.mxu0 %v14522_v39 }
0x23d2   :  { %11974 = vmatpush3.bf16.msra.mxu0 %v11973_v7  ;;  %v11994_v7 = vpack.c.bf16 %v7865_v22, %v7864_v49 }
0x23d3   :  { %11975 = vmatprep.subr.bf16.mxu0 %v14522_v39 }
0x2422   :  { %v6909_v4 = vpop.xlane.xlu1 %6908 }
0x2423   :  { %12770 = vrcp.f32 %v6909_v4  ;;  %v7658_v4 = vld [vmem:[%s17129_s0 + $0x38] sm:$0xff] }
0x242d   :  { %v12771_v17 = vpop.eup %12770 }
0x242e   :  { %v6911_v32 = vmul.f32 %v12771_v17, %v12769_v45  ;;  %v9717_v45 = vld [vmem:[#allocation59] ss:$0 sm:$0xff]  ;;  %v11985_v17 = vpack.c.bf16 %v7658_v4, %v7657_v0 }
0x242f   :  { %v7201_v1 = vadd.f32 %v9717_v45, %v16656_v34  ;;  %v7654_v34 = vld [vmem:[%s17129_s0 + $0x18] sm:$0xff] }
0x2430   :  { %6919 = vperm.xlu0 %12554, %v6911_v32   ;;  %v11979_v57 = vpack.c.bf16 %v7654_v34, %v7653_v58  ;;  %v7953_v58 = vld [vmem:[%s17130_s5 + $0x20] sm:$0xff]  ;;  %v7954_v34 = vld [vmem:[%s17130_s5 + $0x28] sm:$0xff] }
0x2431   :  { %v7204_v33 = vsel %vm6900_vm7, %v7201_v1, -inf }
0x2434   :  { %12555 = vset.pattern.permute.xlu0 %v14525_v61 }
0x2435   :  { %6935 = vperm.xlu0 %12555, %v6911_v32  }
0x2439   :  { %12556 = vset.pattern.permute.xlu0 %v17128_v15 }
0x243a   :  { %6914 = vperm.xlu0 %12556, %v6911_v32  }
0x243e   :  { %12557 = vset.pattern.permute.xlu0 %v14527_v40 }
0x243f   :  { %6929 = vperm.xlu0 %12557, %v6911_v32  }
0x2443   :  { %12558 = vset.pattern.permute.xlu0 %v14524_v35 }
0x24a0   :  { %v7472_v23 = vpop.f32.mrb[118].mxu0 }
0x24a1   :  { %v7473_v11 = vadd.f32 %v9721_v36, %v7472_v23  ;;  %v11131_v27 = vpop.f32.mrb[119].mxu0  ;;  %v9725_v36 = vld [vmem:[#allocation71] ss:$0 sm:$0xff] }
0x24a3   :  { %v7476_v25 = vmax.f32 %v7473_v11, 0.0 }
0x24a5   :  { %11149 = vmatmul.mubr.msk.f32.vlgmr.msra.gmra.mrb[102].mxu1 %vm2425_vm2, %v7476_v25 }
0x24a6   :  { %11989 = vmatpush3.bf16.msra.mxu1 %v11988_v29  ;;  %11189 = vmatprep.mubr.msk.f32.mxu1 %vm14523_vm5, %v17113_v28 }
0x24a7   :  { %11990 = vmatprep.subr.bf16.mxu1 %v14522_v39 }
0x24aa   :  { %11992 = vmatpush3.bf16.msra.mxu1 %v11991_v8  ;;  %v7867_v8 = vld [vmem:[#allocation77 + $0x18] sm:$0xff] }
0x24ab   :  { %11993 = vmatprep.subr.bf16.mxu1 %v14522_v39 }
0x24af   :  { %v6920_v18 = vpop.permute.xlu0 %6919 }
0x24b0   :  { %v6922_v9 = vmul.f32 %v6920_v18, %v16674_v3  ;;  %v11997_v18 = vpack.c.bf16 %v7867_v8, %v7866_v52  ;;  %v8272_v52 = vld [vmem:[#allocation87 + $0x8] sm:$0xff] }
0x24b2   :  { %6924 = vrot.lane.b32.xlu0 %v6922_v9, %s14521_s24 }
0x24b4   :  { %v6936_v51 = vpop.permute.xlu0 %6935 }
0x24b5   :  { %v6938_v63 = vmul.f32 %v6936_v51, %v16682_v43 }
0x24b7   :  { %6940 = vrot.lane.b32.xlu1 %v6938_v63, %s14521_s24 }
0x24b9   :  { %v6915_v59 = vpop.permute.xlu0 %6914 }
0x24ba   :  { %v6917_v24 = vmul.f32 %v6915_v59, %v16674_v3 }
0x24be   :  { %v6930_v56 = vpop.permute.xlu0 %6929 }
0x24bf   :  { %v6932_v38 = vmul.f32 %v6930_v56, %v16682_v43 }
0x24d1   :  { %7205 = vmax.xlane.f32.xlu0 %v7204_v33 }
0x2524   :  { %v6925_v44 = vpop.permute.xlu0 %6924 }
0x2525   :  { %v6927_v54 = vadd.f32 %v6925_v44, %v6917_v24 }
0x2527   :  { %v6933_v31 = vadd.f32 %v6932_v38, %v6927_v54  ;;  %v7949_v54 = vld [vmem:[%s17130_s5] sm:$0xff] }
0x2529   :  { %v6941_v47 = vpop.permute.xlu1 %6940 }
0x252a   :  { %v6943_v5 = vadd.f32 %v6941_v47, %v6933_v31  ;;  %v12000_v31 = vpack.c.bf16 %v7950_v21, %v7949_v54  ;;  %v7952_v47 = vld [vmem:[%s17130_s5 + $0x18] sm:$0xff] }
0x252c   :  { %11160 = vmatmul.mubr.msk.f32.vlgmr.msra.gmra.mrb[120].mxu0 %vm2588_vm3, %v6943_v5  ;;  %11190 = vmatmul.mubr.msk.f32.vlgmr.msra.gmra.mrb[104].mxu1 %vm2588_vm3, %v6943_v5  ;;  %v12003_v5 = vpack.c.bf16 %v7952_v47, %v7951_v14 }
0x252d   :  { %11977 = vmatpush3.bf16.msra.mxu0 %v11976_v55  ;;  %11178 = vmatprep.mubr.msk.f32.mxu0 %vm14523_vm5, %v17113_v28 }
0x252e   :  { %11978 = vmatprep.subr.bf16.mxu0 %v14522_v39  ;;  %11200 = vmatprep.mubr.msk.f32.mxu1 %vm14523_vm5, %v17113_v28 }
0x252f   :  { %11995 = vmatpush3.bf16.msra.mxu1 %v11994_v7  ;;  %v8271_v7 = vld [vmem:[#allocation87] sm:$0xff] }
0x2530   :  { %11996 = vmatprep.subr.bf16.mxu1 %v14522_v39  ;;  %v12024_v8 = vpack.c.bf16 %v8272_v52, %v8271_v7 }
0x2531   :  { %11980 = vmatpush3.bf16.msra.mxu0 %v11979_v57  ;;  %v12006_v57 = vpack.c.bf16 %v7954_v34, %v7953_v58 }
0x2532   :  { %11981 = vmatprep.subr.bf16.mxu0 %v14522_v39 }
0x2533   :  { %11998 = vmatpush3.bf16.msra.mxu1 %v11997_v18 }
0x2534   :  { %12011 = vmatprep.subr.bf16.mxu1 %v14522_v39 }
0x2535   :  { %11983 = vmatpush3.bf16.msra.mxu0 %v11982_v53 }
0x2536   :  { %11984 = vmatprep.subr.bf16.mxu0 %v14522_v39 }
0x2539   :  { %11986 = vmatpush3.bf16.msra.mxu0 %v11985_v17  ;;  %v8040_v17 = vld [vmem:[#allocation81 + $0x10] sm:$0xff] }
0x253a   :  { %11999 = vmatprep.subr.bf16.mxu0 %v14522_v39 }
0x255e   :  { %v7206_v3 = vpop.xlane.xlu0 %7205 }
0x255f   :  { %v7207_v6 = vsub.f32 %v7201_v1, %v7206_v3 }
0x2561   :  { %v7208_v60 = vmul.f32 1.442695, %v7207_v6 }
0x2563   :  { %12772 = vpow2.f32 %v7208_v60 }
0x256d   :  { %v12773_v42 = vpop.eup %12772 }
0x256e   :  { %v7210_v2 = vsel %vm6900_vm7, %v12773_v42, 0.0 }
0x256f   :  { %7211 = vadd.xlane.f32.xlu1 %v7210_v2 }
0x2578   :  { %v16733_v10 = vpop.f32.mrb[102].mxu1 }
0x2579   :  { %v11150_v50 = vpop.f32.mrb[103].mxu1 }
0x257a   :  { %v8038_v50 = vld [vmem:[#allocation81] sm:$0xff] }
0x257b   :  { %v12012_v0 = vpack.c.bf16 %v8039_v16, %v8038_v50  ;;  %v8441_v50 = vld [vmem:[%s17131_s13] sm:$0xff]  ;;  %v8442_v16 = vld [vmem:[%s17131_s13 + $0x8] sm:$0xff] }
0x25fc   :  { %v7212_v32 = vpop.xlane.xlu1 %7211 }
0x25fd   :  { %12774 = vrcp.f32 %v7212_v32  ;;  %v8041_v32 = vld [vmem:[#allocation81 + $0x18] sm:$0xff] }
0x25ff   :  { %v7646_v23 = vpop.f32.mrb[120].mxu0  ;;  %v7817_v11 = vpop.f32.mrb[104].mxu1 }
0x2600   :  { %v7647_v27 = vadd.f32 %v9725_v36, %v7646_v23  ;;  %v11161_v37 = vpop.f32.mrb[121].mxu0  ;;  %v11191_v62 = vpop.f32.mrb[105].mxu1  ;;  %v7818_v29 = vadd.f32 %v9729_v12, %v7817_v11  ;;  %v12015_v36 = vpack.c.bf16 %v8041_v32, %v8040_v17  ;;  %v8164_v11 = vld [vmem:[#allocation84 + $0x10] sm:$0xff] }
0x2601   :  { %v7955_v62 = vld [vmem:[%s17130_s5 + $0x30] sm:$0xff]  ;;  %v8444_v32 = vld [vmem:[%s17131_s13 + $0x18] sm:$0xff] }
0x2602   :  { %v7650_v19 = vmax.f32 %v7647_v27, 0.0  ;;  %v7821_v20 = vsel %vm6900_vm7, %v7818_v29, -inf  ;;  %v8165_v27 = vld [vmem:[#allocation84 + $0x18] sm:$0xff]  ;;  %v8443_v17 = vld [vmem:[%s17131_s13 + $0x10] sm:$0xff] }
0x2603   :  { %v12021_v37 = vpack.c.bf16 %v8165_v27, %v8164_v11 }
0x2604   :  { %11179 = vmatmul.mubr.msk.f32.vlgmr.msra.gmra.mrb[122].mxu0 %vm2425_vm2, %v7650_v19  ;;  %v7956_v19 = vld [vmem:[%s17130_s5 + $0x38] sm:$0xff] }
0x2605   :  { %11219 = vmatprep.mubr.msk.f32.mxu0 %vm14523_vm5, %v17113_v28  ;;  %12001 = vmatpush3.bf16.msra.mxu0 %v12000_v31 }
0x2606   :  { %12002 = vmatprep.subr.bf16.mxu0 %v14522_v39 }
0x2607   :  { %v12775_v25 = vpop.eup %12774 }
0x2608   :  { %v7214_v13 = vmul.f32 %v12775_v25, %v12773_v42 }
0x2609   :  { %12004 = vmatpush3.bf16.msra.mxu0 %v12003_v5 }
0x260a   :  { %7238 = vperm.xlu1 %12559, %v7214_v13   ;;  %7222 = vperm.xlu0 %12558, %v7214_v13  }
0x260b   :  { %12005 = vmatprep.subr.bf16.mxu0 %v14522_v39 }
0x260d   :  { %12007 = vmatpush3.bf16.msra.mxu0 %v12006_v57 }
0x260e   :  { %12560 = vset.pattern.permute.xlu0 %v17128_v15  ;;  %12562 = vset.pattern.permute.xlu1 %v14524_v35 }
0x260f   :  { %7217 = vperm.xlu0 %12560, %v7214_v13   ;;  %12008 = vmatprep.subr.bf16.mxu0 %v14522_v39 }
0x2613   :  { %12561 = vset.pattern.permute.xlu0 %v14527_v40 }
0x2614   :  { %7232 = vperm.xlu0 %12561, %v7214_v13   ;;  %v12009_v13 = vpack.c.bf16 %v7956_v19, %v7955_v62 }
0x2616   :  { %12010 = vmatpush3.bf16.msra.mxu0 %v12009_v13 }
0x2617   :  { %12023 = vmatprep.subr.bf16.mxu0 %v14522_v39 }
0x262e   :  { %7822 = vmax.xlane.f32.xlu1 %v7821_v20 }
0x2689   :  { %v7223_v9 = vpop.permute.xlu0 %7222  ;;  %v7239_v63 = vpop.permute.xlu1 %7238 }
0x268a   :  { %v7225_v51 = vmul.f32 %v7223_v9, %v16678_v30  ;;  %v7241_v45 = vmul.f32 %v7239_v63, %v16682_v43  ;;  %v8273_v9 = vld [vmem:[#allocation87 + $0x10] sm:$0xff] }
0x268b   :  { %v9727_v63 = vld [vmem:[#allocation72] ss:$0 sm:$0xff] }
0x268c   :  { %7227 = vrot.lane.b32.xlu0 %v7225_v51, %s14521_s24  ;;  %v8274_v51 = vld [vmem:[#allocation87 + $0x18] sm:$0xff] }
0x268e   :  { %v7218_v55 = vpop.permute.xlu0 %7217 }
0x268f   :  { %v7220_v6 = vmul.f32 %v7218_v55, %v16678_v30  ;;  %v8162_v30 = vld [vmem:[#allocation84] sm:$0xff] }
0x2690   :  { %7243 = vrot.lane.b32.xlu0 %v7241_v45, %s14521_s24 }
0x2693   :  { %v7233_v3 = vpop.permute.xlu0 %7232 }
0x2694   :  { %v7235_v42 = vmul.f32 %v7233_v3, %v16682_v43  ;;  %v8163_v43 = vld [vmem:[#allocation84 + $0x8] sm:$0xff] }
0x2695   :  { %v12018_v23 = vpack.c.bf16 %v8163_v43, %v8162_v30 }
0x26bb   :  { %v7823_v1 = vpop.xlane.xlu1 %7822 }
0x26bc   :  { %v7824_v33 = vsub.f32 %v7818_v29, %v7823_v1 }
0x26be   :  { %v7825_v59 = vmul.f32 1.442695, %v7824_v33  ;;  %v9723_v33 = vld [vmem:[#allocation68] ss:$0 sm:$0xff] }
0x26c0   :  { %12776 = vpow2.f32 %v7825_v59 }
0x26ca   :  { %v16754_v56 = vpop.eup %12776 }
0x26cb   :  { %v7827_v24 = vsel %vm6900_vm7, %v16754_v56, 0.0 }
0x26cc   :  { %7828 = vadd.xlane.f32.xlu0 %v7827_v24 }
0x26d7   :  { %v16758_v44 = vpop.f32.mrb[122].mxu0 }
0x26d8   :  { %v11180_v38 = vpop.f32.mrb[123].mxu0  ;;  %v7736_v45 = vadd.f32 %v9727_v63, %v16758_v44 }
0x26d9   :  { %v9737_v38 = vld [vmem:[#allocation86] ss:$0 sm:$0xff] }
0x26da   :  { %v7739_v59 = vmax.f32 %v7736_v45, 0.0 }
0x26fe   :  { %v7228_v60 = vpop.permute.xlu0 %7227 }
0x26ff   :  { %v7230_v2 = vadd.f32 %v7228_v60, %v7220_v6 }
0x2701   :  { %v7236_v48 = vadd.f32 %v7235_v42, %v7230_v2 }
0x2702   :  { %v7244_v53 = vpop.permute.xlu0 %7243 }
0x2703   :  { %v7246_v4 = vadd.f32 %v7244_v53, %v7236_v48 }
0x2705   :  { %11201 = vmatmul.mubr.msk.f32.vlgmr.msra.gmra.mrb[106].mxu1 %vm2588_vm3, %v7246_v4 }
0x2706   :  { %12013 = vmatpush3.bf16.msra.mxu1 %v12012_v0  ;;  %11230 = vmatprep.mubr.msk.f32.mxu1 %vm14523_vm5, %v17113_v28  ;;  %v12036_v0 = vpack.c.bf16 %v8442_v16, %v8441_v50  ;;  %v9463_v50 = vld [vmem:[#allocation2] ss:$0 sm:$0xff]  ;;  %v9701_v16 = vld [vmem:[#allocation3] ss:$0 sm:$0xff] }
0x2707   :  { %12014 = vmatprep.subr.bf16.mxu1 %v14522_v39 }
0x270a   :  { %12016 = vmatpush3.bf16.msra.mxu1 %v12015_v36  ;;  %v12039_v36 = vpack.c.bf16 %v8444_v32, %v8443_v17 }
0x270b   :  { %12017 = vmatprep.subr.bf16.mxu1 %v14522_v39 }
0x270d   :  { %11231 = vmatmul.mubr.msk.f32.vlgmr.msra.gmra.mrb[108].mxu1 %vm2588_vm3, %v7246_v4 }
0x270e   :  { %12019 = vmatpush3.bf16.msra.mxu1 %v12018_v23  ;;  %11241 = vmatprep.mubr.msk.f32.mxu1 %vm14523_vm5, %v17113_v28 }
0x270f   :  { %12020 = vmatprep.subr.bf16.mxu1 %v14522_v39 }
0x2712   :  { %12022 = vmatpush3.bf16.msra.mxu1 %v12021_v37 }
0x2713   :  { %12029 = vmatprep.subr.bf16.mxu1 %v14522_v39 }
0x2715   :  { %11242 = vmatmul.mubr.msk.f32.vlgmr.msra.gmra.mrb[110].mxu1 %vm2588_vm3, %v16693_v26  ;;  %v9731_v26 = vld [vmem:[#allocation78] ss:$0 sm:$0xff] }
0x2716   :  { %11263 = vmatprep.mubr.msk.f32.mxu1 %vm14523_vm5, %v17113_v28 }
0x2759   :  { %v7829_v25 = vpop.xlane.xlu0 %7828 }
0x275a   :  { %12778 = vrcp.f32 %v7829_v25 }
0x2764   :  { %v12779_v12 = vpop.eup %12778 }
0x2765   :  { %v7831_v29 = vmul.f32 %v12779_v12, %v16754_v56  ;;  %v7562_v56 = vadd.f32 %v9723_v33, %v16733_v10  ;;  %v9735_v10 = vld [vmem:[#allocation83] ss:$0 sm:$0xff] }
0x2767   :  { %7849 = vperm.xlu0 %12561, %v7831_v29   ;;  %7839 = vperm.xlu1 %12562, %v7831_v29   ;;  %v16801_v47 = vmax.f32 %v7562_v56, 0.0 }
0x276b   :  { %12563 = vset.pattern.permute.xlu1 %v14525_v61  ;;  %12566 = vset.pattern.permute.xlu0 %v14525_v61  ;;  %v12027_v61 = vpack.c.bf16 %v8274_v51, %v8273_v9 }
0x276c   :  { %7855 = vperm.xlu1 %12563, %v7831_v29  }
0x2770   :  { %12564 = vset.pattern.permute.xlu1 %v17128_v15 }
0x2771   :  { %7834 = vperm.xlu1 %12564, %v7831_v29  }
0x2775   :  { %12565 = vset.pattern.permute.xlu1 %v14524_v35 }
0x27d8   :  { %v7944_v20 = vpop.f32.mrb[106].mxu1 }
0x27d9   :  { %v7945_v49 = vadd.f32 %v9731_v26, %v7944_v20  ;;  %v11202_v22 = vpop.f32.mrb[107].mxu1  ;;  %v8723_v26 = vld [vmem:[#allocation99] sm:$0xff]  ;;  %v8724_v20 = vld [vmem:[#allocation99 + $0x8] sm:$0xff] }
0x27da   :  { %v9739_v22 = vld [vmem:[#allocation89] ss:$0 sm:$0xff] }
0x27db   :  { %v7948_v18 = vmax.f32 %v7945_v49, 0.0  ;;  %v12051_v49 = vpack.c.bf16 %v8724_v20, %v8723_v26 }
0x27dd   :  { %11220 = vmatmul.mubr.msk.f32.vlgmr.msra.gmra.mrb[124].mxu0 %vm2425_vm2, %v7948_v18 }
0x27de   :  { %12025 = vmatpush3.bf16.msra.mxu0 %v12024_v8  ;;  %11252 = vmatprep.mubr.msk.f32.mxu0 %vm14523_vm5, %v17113_v28 }
0x27df   :  { %12026 = vmatprep.subr.bf16.mxu0 %v14522_v39 }
0x27e0   :  { %v8115_v35 = vpop.f32.mrb[108].mxu1 }
0x27e1   :  { %v11232_v1 = vpop.f32.mrb[109].mxu1  ;;  %v8116_v58 = vadd.f32 %v9735_v10, %v8115_v35 }
0x27e2   :  { %12028 = vmatpush3.bf16.msra.mxu0 %v12027_v61 }
0x27e3   :  { %12035 = vmatprep.subr.bf16.mxu0 %v14522_v39  ;;  %v8119_v34 = vsel %vm6900_vm7, %v8116_v58, -inf }
0x27e6   :  { %v7840_v24 = vpop.permute.xlu1 %7839  ;;  %v7850_v3 = vpop.permute.xlu0 %7849 }
0x27e7   :  { %v7842_v54 = vmul.f32 %v7840_v24, %v7739_v59  ;;  %v7852_v42 = vmul.f32 %v7850_v3, %v16801_v47 }
0x27e8   :  { %v8239_v21 = vpop.f32.mrb[110].mxu1 }
0x27e9   :  { %v8240_v14 = vadd.f32 %v9737_v38, %v8239_v21  ;;  %v11243_v31 = vpop.f32.mrb[111].mxu1  ;;  %7844 = vrot.lane.b32.xlu1 %v7842_v54, %s14521_s24  ;;  %v9733_v54 = vld [vmem:[#allocation80] ss:$0 sm:$0xff] }
0x27ea   :  { %v8357_v31 = vld [vmem:[#allocation90 + $0x8] sm:$0xff] }
0x27eb   :  { %v7856_v44 = vpop.permute.xlu1 %7855  ;;  %v8244_v55 = vsel %vm8243_vm8, %v8240_v14, -inf }
0x27ec   :  { %v7858_v5 = vmul.f32 %v7856_v44, %v16801_v47  ;;  %8245 = vmax.xlane.f32.xlu0 %v8244_v55 }
0x27ee   :  { %7860 = vrot.lane.b32.xlu1 %v7858_v5, %s14521_s24 }
0x27f0   :  { %v7835_v57 = vpop.permute.xlu1 %7834 }
0x27f1   :  { %v7837_v6 = vmul.f32 %v7835_v57, %v7739_v59  ;;  %v9743_v59 = vld [vmem:[#allocation4] ss:$0 sm:$0xff] }
0x2812   :  { %8120 = vmax.xlane.f32.xlu1 %v8119_v34 }
0x285b   :  { %v7845_v60 = vpop.permute.xlu1 %7844 }
0x285c   :  { %v7847_v2 = vadd.f32 %v7845_v60, %v7837_v6  ;;  %v8358_v6 = vld [vmem:[#allocation90 + $0x10] sm:$0xff]  ;;  %v8359_v60 = vld [vmem:[#allocation90 + $0x18] sm:$0xff] }
0x285e   :  { %v7853_v48 = vadd.f32 %v7852_v42, %v7847_v2  ;;  %v12033_v42 = vpack.c.bf16 %v8359_v60, %v8358_v6  ;;  %v9100_v6 = vld [vmem:[%s17137_s4 + $0x8] sm:$0xff] }
0x2860   :  { %v7861_v53 = vpop.permute.xlu1 %7860 }
0x2861   :  { %v7863_v4 = vadd.f32 %v7861_v53, %v7853_v48  ;;  %v14529_v48 = vmov 64   ;;  %v6459_v53 = vadd.f32 %v9701_v16, %v16644_v41 }
0x2863   :  { %11253 = vmatmul.mubr.msk.f32.vlgmr.msra.gmra.mrb[126].mxu0 %vm2588_vm3, %v7863_v4 }
0x2864   :  { %12037 = vmatpush3.bf16.msra.mxu0 %v12036_v0  ;;  %11274 = vmatprep.mubr.msk.f32.mxu0 %vm14523_vm5, %v17113_v28 }
0x2865   :  { %12038 = vmatprep.subr.bf16.mxu0 %v14522_v39 }
0x2868   :  { %12040 = vmatpush3.bf16.msra.mxu0 %v12039_v36 }
0x2869   :  { %12050 = vmatprep.subr.bf16.mxu0 %v14522_v39 }
0x286b   :  { %11275 = vmatmul.mubr.msk.f32.vlgmr.msra.gmra.mrb[128].mxu0 %vm2588_vm3, %v7863_v4 }
0x286c   :  { %11299 = vmatprep.mubr.msk.f32.mxu0 %vm14523_vm5, %v17113_v28  ;;  %12052 = vmatpush3.bf16.msra.mxu0 %v12051_v49  ;;  %v8536_v49 = vld [vmem:[%s17132_s26 + $0x10] sm:$0xff] }
0x286d   :  { %11302 = vmatprep.subr.mxu0 %v17113_v28 }
0x2879   :  { %v8246_v30 = vpop.xlane.xlu0 %8245 }
0x287a   :  { %v8247_v43 = vsub.f32 %v8240_v14, %v8246_v30  ;;  %v8356_v14 = vld [vmem:[#allocation90] sm:$0xff] }
0x287b   :  { %v12030_v44 = vpack.c.bf16 %v8357_v31, %v8356_v14 }
0x287c   :  { %v8248_v27 = vmul.f32 1.442695, %v8247_v43 }
0x287d   :  { %12031 = vmatpush3.bf16.msra.mxu1 %v12030_v44 }
0x287e   :  { %12032 = vmatprep.subr.bf16.mxu1 %v14522_v39 }
0x2881   :  { %12034 = vmatpush3.bf16.msra.mxu1 %v12033_v42 }
0x2882   :  { %12041 = vmatprep.subr.bf16.mxu1 %v14522_v39 }
0x289f   :  { %v8121_v23 = vpop.xlane.xlu1 %8120 }
0x28a0   :  { %v8122_v11 = vsub.f32 %v8116_v58, %v8121_v23 }
0x28a2   :  { %v8123_v37 = vmul.f32 1.442695, %v8122_v11 }
0x28a4   :  { %12780 = vpow2.f32 %v8123_v37  ;;  %v8539_v37 = vld [vmem:[#allocation93 + $0x8] sm:$0xff] }
0x28a5   :  { %12782 = vpow2.f32 %v8248_v27  ;;  %v8538_v27 = vld [vmem:[#allocation93] sm:$0xff] }
0x28ae   :  { %v12781_v62 = vpop.eup %12780 }
0x28af   :  { %v8125_v19 = vsel %vm6900_vm7, %v12781_v62, 0.0  ;;  %v12783_v25 = vpop.eup %12782 }
0x28b0   :  { %v8033_v13 = vpop.f32.mrb[124].mxu0  ;;  %8126 = vadd.xlane.f32.xlu1 %v8125_v19  ;;  %v8250_v29 = vsel %vm8243_vm8, %v12783_v25, 0.0  ;;  %v12042_v19 = vpack.c.bf16 %v8539_v37, %v8538_v27  ;;  %v9753_v37 = vld [vmem:[#allocation5] ss:$0 sm:$0xff] }
0x28b1   :  { %v11221_v12 = vpop.f32.mrb[125].mxu0  ;;  %v8034_v55 = vadd.f32 %v9733_v54, %v8033_v13  ;;  %v8534_v13 = vld [vmem:[%s17132_s26] sm:$0xff] }
0x28b2   :  { %v8535_v12 = vld [vmem:[%s17132_s26 + $0x8] sm:$0xff] }
0x28b3   :  { %v8037_v5 = vmax.f32 %v8034_v55, 0.0  ;;  %v12045_v26 = vpack.c.bf16 %v8535_v12, %v8534_v13 }
0x28b4   :  { %8251 = vadd.xlane.f32.xlu1 %v8250_v29 }
0x2936   :  { %v8351_v7 = vpop.f32.mrb[126].mxu0 }
0x2937   :  { %v16823_v52 = vadd.f32 %v9739_v22, %v8351_v7  ;;  %v11254_v8 = vpop.f32.mrb[127].mxu0  ;;  %v8537_v22 = vld [vmem:[%s17132_s26 + $0x18] sm:$0xff] }
0x2938   :  { %v12048_v8 = vpack.c.bf16 %v8537_v22, %v8536_v49  ;;  %v9759_v22 = vld [vmem:[%s17143_s2] ss:$0 sm:$0xff] }
0x2939   :  { %v8355_v18 = vmax.f32 %v16823_v52, 0.0 }
0x293b   :  { %11300 = vmatmul.mubr.msk.f32.vlgmr.msra.gmra.mrb[130].mxu0 %vm8540_vm9, %v8355_v18 }
0x293c   :  { %11304 = vmatprep.mubr.msk.f32.mxu0 %vm14523_vm5, %v17113_v28 }
0x293d   :  { %v8127_v9 = vpop.xlane.xlu1 %8126 }
0x293e   :  { %v8518_v51 = vpop.f32.mrb[128].mxu0  ;;  %12784 = vrcp.f32 %v8127_v9 }
0x293f   :  { %v11276_v63 = vpop.f32.mrb[129].mxu0  ;;  %v8519_v56 = vadd.f32 %v9743_v59, %v8518_v51  ;;  %v9749_v59 = vld [vmem:[#allocation96] ss:$0 sm:$0xff] }
0x2940   :  { %v8912_v63 = vld [vmem:[#allocation104 + $0x8] sm:$0xff] }
0x2941   :  { %v8252_v61 = vpop.xlane.xlu1 %8251  ;;  %v9745_v24 = vmul.f32 -1.442695, %v8519_v56  ;;  %v9763_v56 = vld [vmem:[%s17136_s3] ss:$0 sm:$0xff] }
0x2942   :  { %12786 = vrcp.f32 %v8252_v61 }
0x2943   :  { %12788 = vpow2.f32 %v9745_v24 }
0x2948   :  { %v12785_v35 = vpop.eup %12784 }
0x2949   :  { %v8129_v45 = vmul.f32 %v12785_v35, %v12781_v62  ;;  %v9750_v35 = vld [vmem:[#allocation98] ss:$0 sm:$0xff] }
0x294b   :  { %8153 = vperm.xlu0 %12566, %v8129_v45   ;;  %8137 = vperm.xlu1 %12565, %v8129_v45  }
0x294c   :  { %v12787_v1 = vpop.eup %12786 }
0x294d   :  { %v8254_v33 = vmul.f32 %v12787_v1, %v12783_v25  ;;  %v12789_v38 = vpop.eup %12788  ;;  %v9764_v1 = vld [vmem:[%s17134_s8] ss:$0 sm:$0xff] }
0x294e   :  { %v8525_v21 = vadd.f32 1.0, %v12789_v38 }
0x294f   :  { %8262 = vperm.xlu1 %12565, %v8254_v33   ;;  %12570 = vset.pattern.permute.xlu0 %v14529_v48 }
0x2950   :  { %12790 = vrcp.f32 %v8525_v21 }
0x2953   :  { %12567 = vset.pattern.permute.xlu1 %v17128_v15 }
0x2954   :  { %8132 = vperm.xlu1 %12567, %v8129_v45  }
0x2958   :  { %12568 = vset.pattern.permute.xlu1 %v14527_v40 }
0x2959   :  { %8147 = vperm.xlu1 %12568, %v8129_v45   ;;  %v9757_v45 = vld [vmem:[%s17133_s14] ss:$0 sm:$0xff] }
0x295a   :  { %v12791_v57 = vpop.eup %12790 }
0x295d   :  { %12569 = vset.pattern.permute.xlu1 %v17128_v15 }
0x29ca   :  { %v8138_v40 = vpop.permute.xlu1 %8137  ;;  %v8154_v3 = vpop.permute.xlu0 %8153 }
0x29cb   :  { %v8140_v10 = vmul.f32 %v8138_v40, %v8037_v5  ;;  %v8156_v2 = vmul.f32 %v8154_v3, %v16801_v47  ;;  %v9099_v3 = vld [vmem:[%s17137_s4] sm:$0xff] }
0x29cd   :  { %8142 = vrot.lane.b32.xlu1 %v8140_v10, %s14521_s24  ;;  %v9752_v10 = vld [vmem:[#allocation101] ss:$0 sm:$0xff] }
0x29ce   :  { %v8263_v58 = vpop.permute.xlu1 %8262 }
0x29cf   :  { %v8265_v34 = vmul.f32 %v8263_v58, %v16801_v47 }
0x29d1   :  { %8530 = vperm.xlu1 %12569, %v12791_v57   ;;  %8267 = vrot.lane.b32.xlu0 %v8265_v34, %s14521_s24  ;;  %v9741_v57 = vld [vmem:[#allocation92] ss:$0 sm:$0xff] }
0x29d3   :  { %v8133_v17 = vpop.permute.xlu1 %8132 }
0x29d4   :  { %v8135_v30 = vmul.f32 %v8133_v17, %v8037_v5 }
0x29d5   :  { %8158 = vrot.lane.b32.xlu1 %v8156_v2, %s14521_s24 }
0x29d8   :  { %v8148_v32 = vpop.permute.xlu1 %8147 }
0x29d9   :  { %8257 = vperm.xlu1 %12569, %v8254_v33   ;;  %v8150_v11 = vmul.f32 %v8148_v32, %v16801_v47 }
0x29dd   :  { %2143 = vrot.lane.b32.xlu1 %v9463_v50, %s14519_s1  ;;  %v12061_v50 = vpack.c.bf16 %v9100_v6, %v9099_v3 }
0x29e1   :  { %8712 = vperm.xlu1 %12569, %v6459_v53  }
0x2a0e   :  { %v16843_v0 = vpop.f32.mrb[130].mxu0 }
0x2a0f   :  { %v11301_v4 = vpop.f32.mrb[131].mxu0 }
0x2a10   :  { %v9748_v4 = vld [vmem:[#allocation95] ss:$0 sm:$0xff] }
0x2a3f   :  { %v8143_v36 = vpop.permute.xlu1 %8142 }
0x2a40   :  { %v8145_v43 = vadd.f32 %v8143_v36, %v8135_v30 }
0x2a42   :  { %v8151_v62 = vadd.f32 %v8150_v11, %v8145_v43  ;;  %v8995_v43 = vld [vmem:[%s17138_s16] sm:$0xff] }
0x2a43   :  { %v8268_v52 = vpop.permute.xlu0 %8267 }
0x2a50   :  { %v8531_v23 = vpop.permute.xlu1 %8530 }
0x2a51   :  { %v8533_v20 = vmul.f32 %v8531_v23, %v8355_v18  ;;  %v8996_v23 = vld [vmem:[%s17138_s16 + $0x8] sm:$0x1] }
0x2a52   :  { %v12057_v11 = vpack.c.bf16 %v8996_v23, %v8995_v43 }
0x2a54   :  { %v8159_v41 = vpop.permute.xlu1 %8158 }
0x2a55   :  { %v8161_v25 = vadd.f32 %v8159_v41, %v8151_v62 }
0x2a57   :  { %11264 = vmatmul.mubr.msk.f32.vlgmr.msra.gmra.mrb[112].mxu1 %vm2588_vm3, %v8161_v25 }
0x2a58   :  { %12043 = vmatpush3.bf16.msra.mxu1 %v12042_v19  ;;  %v8258_v29 = vpop.permute.xlu1 %8257  ;;  %11281 = vmatprep.mubr.msk.f32.mxu1 %vm14523_vm5, %v17113_v28 }
0x2a59   :  { %12044 = vmatprep.subr.bf16.mxu1 %v14522_v39  ;;  %v8260_v9 = vmul.f32 %v8258_v29, %v16801_v47  ;;  %v8911_v47 = vld [vmem:[#allocation104] sm:$0xff] }
0x2a5a   :  { %v12054_v61 = vpack.c.bf16 %v8912_v63, %v8911_v47  ;;  %v9760_v63 = vld [vmem:[%s17145_s7] ss:$0 sm:$0xff] }
0x2a5b   :  { %11282 = vmatmul.mubr.msk.f32.vlgmr.msra.gmra.mrb[114].mxu1 %vm8540_vm9, %v8533_v20  ;;  %v8270_v18 = vadd.f32 %v8268_v52, %v8260_v9  ;;  %v9184_v20 = vld [vmem:[%s17140_s22 + $0x8] sm:$0x1]  ;;  %v9766_v52 = vld [vmem:[%s17144_s29] ss:$0 sm:$0xff] }
0x2a5c   :  { %12046 = vmatpush3.bf16.msra.mxu1 %v12045_v26  ;;  %v2144_v7 = vpop.permute.xlu1 %2143  ;;  %11292 = vmatprep.mubr.msk.f32.mxu1 %vm14523_vm5, %v17113_v28  ;;  %v9183_v26 = vld [vmem:[%s17140_s22] sm:$0xff] }
0x2a5d   :  { %v2146_v51 = vadd.f32 %v2144_v7, %v15434_v46  ;;  %12047 = vmatprep.subr.bf16.mxu1 %v14522_v39  ;;  %v8807_v46 = vld [vmem:[#allocation102] sm:$0xff] }
0x2a5e   :  { %11303 = vmatpush3.msra.mxu0 %v8807_v46 }
0x2a5f   :  { %8699 = vperm.xlu0 %12570, %v2146_v51   ;;  %12056 = vmatprep.subr.bf16.mxu0 %v14522_v39 }
0x2a60   :  { %12049 = vmatpush3.bf16.msra.mxu1 %v12048_v8  ;;  %v8713_v33 = vpop.permute.xlu1 %8712  ;;  %v12064_v8 = vpack.c.bf16 %v9184_v20, %v9183_v26 }
0x2a61   :  { %12053 = vmatprep.subr.bf16.mxu1 %v14522_v39  ;;  %v8721_v24 = vmul.f32 %v9750_v35, %v8713_v33  ;;  %v8909_v38 = vmul.f32 %v9757_v45, %v8713_v33  ;;  %v9097_v21 = vmul.f32 %v9764_v1, %v8713_v33 }
0x2a63   :  { %11293 = vmatmul.mubr.msk.f32.vlgmr.msra.gmra.mrb[116].mxu1 %vm2588_vm3, %v8270_v18  ;;  %12571 = vset.pattern.permute.xlu0 %v17128_v15  ;;  %v9756_v15 = vld [vmem:[%s17135_s9] ss:$0 sm:$0xff] }
0x2a64   :  { %11311 = vmatprep.mubr.msk.f32.mxu1 %vm14523_vm5, %v17113_v28  ;;  %12055 = vmatpush3.bf16.msra.mxu1 %v12054_v61 }
0x2a65   :  { %12060 = vmatprep.subr.bf16.mxu1 %v14522_v39 }
0x2ade   :  { %v8700_v54 = vpop.permute.xlu0 %8699 }
0x2adf   :  { %v8708_v14 = vmul.f32 %v9749_v59, %v8700_v54  ;;  %v8901_v31 = vmul.f32 %v9756_v15, %v8700_v54  ;;  %v9089_v44 = vmul.f32 %v9763_v56, %v8700_v54 }
0x2ae1   :  { %v8722_v55 = vadd.f32 %v8721_v24, %v8708_v14  ;;  %v8910_v5 = vadd.f32 %v8909_v38, %v8901_v31  ;;  %v9098_v40 = vadd.f32 %v9097_v21, %v9089_v44 }
0x2ae3   :  { %v8798_v58 = vadd.f32 %v16843_v0, %v8722_v55 }
0x2ae5   :  { %v8806_v34 = vadd.f32 %v9752_v10, %v8798_v58 }
0x2ae7   :  { %11305 = vmatmul.mubr.msk.f32.vlgmr.msra.gmra.mrb[132].mxu0 %vm1359_vm0, %v8806_v34  ;;  %vm9008_vm0 = vcmask 1040384  }
0x2ae8   :  { %11318 = vmatprep.mubr.msk.f32.mxu0 %vm14523_vm5, %v17113_v28  ;;  %vm16885_vm11 = vmpackc.low %vm9008_vm0, %vm14530_vm10 }
0x2ae9   :  { %12059 = vmatpush3.bf16.msk.msra.mxu0 %vm16885_vm11, %v12057_v11 }
0x2aea   :  { %12063 = vmatprep.subr.bf16.mxu0 %v14522_v39 }
0x2b2a   :  { %v8436_v60 = vpop.f32.mrb[112].mxu1 }
0x2b2b   :  { %v8437_v42 = vadd.f32 %v9741_v57, %v8436_v60  ;;  %v11265_v2 = vpop.f32.mrb[113].mxu1 }
0x2b2d   :  { %v8440_v16 = vmax.f32 %v8437_v42, 0.0 }
0x2b2e   :  { %v8610_v48 = vpop.f32.mrb[114].mxu1 }
0x2b2f   :  { %v11283_v53 = vpop.f32.mrb[115].mxu1  ;;  %11312 = vmatmul.mubr.msk.f32.vlgmr.msra.gmra.mrb[118].mxu1 %vm8540_vm9, %v8440_v16 }
0x2b30   :  { %12062 = vmatpush3.bf16.msra.mxu1 %v12061_v50  ;;  %11325 = vmatprep.mubr.msk.f32.mxu1 %vm14523_vm5, %v17113_v28 }
0x2b36   :  { %v8683_v0 = vpop.f32.mrb[116].mxu1 }
0x2b37   :  { %v8684_v17 = vadd.f32 %v8683_v0, %v8610_v48  ;;  %v11294_v32 = vpop.f32.mrb[117].mxu1 }
0x2b39   :  { %v8694_v36 = vadd.f32 %v9748_v4, %v8684_v17 }
0x2b3b   :  { %v8695_v30 = vmax.f32 %v8694_v36, 0.0 }
0x2b3d   :  { %11326 = vmatmul.mubr.msk.f32.vlgmr.msra.gmra.mrb[120].mxu1 %vm8540_vm9, %v8695_v30 }
0x2bba   :  { %v8884_v62 = vpop.f32.mrb[132].mxu0 }
0x2bbb   :  { %v8885_v41 = vadd.f32 %v9753_v37, %v8884_v62  ;;  %v11306_v19 = vpop.f32.mrb[133].mxu0 }
0x2bbd   :  { %v9755_v25 = vmul.f32 -1.442695, %v8885_v41 }
0x2bbf   :  { %12792 = vpow2.f32 %v9755_v25 }
0x2bc9   :  { %v12793_v13 = vpop.eup %12792 }
0x2bca   :  { %v8891_v12 = vadd.f32 1.0, %v12793_v13 }
0x2bcc   :  { %12794 = vrcp.f32 %v8891_v12 }
0x2bd6   :  { %v12795_v29 = vpop.eup %12794 }
0x2bd7   :  { %9269 = vst.msk [vmem:[%s17139_s18] sm:$0xff] %vm9268_vm12, %v12795_v29 }
0x2c02   :  { %v8982_v49 = vpop.f32.mrb[118].mxu1 }
0x2c03   :  { %v8986_v39 = vadd.f32 %v8982_v49, %v8910_v5  ;;  %v11313_v7 = vpop.f32.mrb[119].mxu1 }
0x2c05   :  { %v8994_v9 = vadd.f32 %v9759_v22, %v8986_v39 }
0x2c07   :  { %11319 = vmatmul.mubr.msk.f32.vlgmr.msra.gmra.mrb[134].mxu0 %vm9004_vm13, %v8994_v9 }
0x2c08   :  { %12066 = vmatpush3.bf16.msk.msra.mxu0 %vm16885_vm11, %v12064_v8  ;;  %11332 = vmatprep.mubr.msk.f32.mxu0 %vm14523_vm5, %v17113_v28 }
0x2c10   :  { %v9170_v51 = vpop.f32.mrb[120].mxu1 }
0x2c11   :  { %v9174_v18 = vadd.f32 %v9170_v51, %v9098_v40  ;;  %v11327_v46 = vpop.f32.mrb[121].mxu1 }
0x2c13   :  { %v9182_v47 = vadd.f32 %v9766_v52, %v9174_v18 }
0x2c15   :  { %11333 = vmatmul.mubr.msk.f32.vlgmr.msra.gmra.mrb[136].mxu0 %vm9004_vm13, %v9182_v47 }
0x2cda   :  { %v9078_v61 = vpop.f32.mrb[134].mxu0 }
0x2cdb   :  { %v9079_v35 = vadd.f32 %v9760_v63, %v9078_v61  ;;  %v11320_v45 = vpop.f32.mrb[135].mxu0 }
0x2cdd   :  { %9270 = vst.msk [vmem:[#allocation105] sm:$0xff] %vm9004_vm13, %v9079_v35 }
0x2cde   :  { %14255 = shalt.err (!%p14252_p6)
}
0x2cdf   :  { %s14256_s23 = scalar_lea.hbm %s14964_s21, 128 }
0x2ce0   :  { %p14257_p7 = scmp.ne.s32.totalorder %s14964_s21, %s14256_s23  ;;  %p14260_p8 = scmp.lt.u32.totalorder %s14256_s23, %s14964_s21 }
0x2ce2   :  { %p14262_p9 = pnand %p14260_p8, %p14257_p7 }
0x2ce4   :  { %14265 = shalt.err (!%p14262_p9)
}
0x2ce5   :  { %s17146_s28 = sld [smem:[#allocation212_spill]]  ;;  %s14532_s30 = smov [#allocation106]  }
0x2ce6   :  { %9284 = dma.vmem_to_hbm [thread:$0]  %s9282_s20, 128, %s14964_s21, [#allocation8]  }
0x2ce7   :  { %s9291_s27 = sshll.u32 %s14532_s30, 4  ;;  %s9292_s27 = int_to_ptr.vmem [resolvable:$true] %s9291_s27 }
0x2ce8   :  { %v9264_v1 = vpop.f32.mrb[136].mxu0  ;;  %s14266_s6 = scalar_lea.vmem %s9292_s27, 128  ;;  %p14271_p11 = scmp.lt.s32.totalorder %s9292_s27, %s9292_s27 }
0x2ce9   :  { %v11334_v59 = vpop.f32.mrb[137].mxu0  ;;  %p14267_p10 = scmp.ne.s32.totalorder %s9292_s27, %s14266_s6  ;;  %p14272_p12 = scmp.lt.s32.totalorder %s14266_s6, %s14266_s6 }
0x2ceb   :  { %v9767_v28 = vld [vmem:[%s17146_s28] ss:$0 sm:$0xff]  ;;  %p14273_p13 = por %p14272_p12, %p14271_p11 }
0x2cec   :  { %v9265_v33 = vadd.f32 %v9767_v28, %v9264_v1 }
0x2ced   :  { %p14274_p0 = pnand %p14273_p13, %p14267_p10 }
0x2cee   :  { %v9271_v15 = vsub.f32 %v9079_v35, %v9265_v33 }
0x2cf0   :  { %9272 = vst.msk [vmem:[#allocation106] sm:$0xff] %vm9004_vm13, %v9271_v15 }
0x2cf1   :  { %14277 = shalt.err (!%p14274_p0)
}
0x2cf2   :  { %s14278_s21 = scalar_lea.hbm %s14969_s11, 128 }
0x2cf3   :  { %p14279_p1 = scmp.ne.s32.totalorder %s14969_s11, %s14278_s21  ;;  %p14282_p2 = scmp.lt.u32.totalorder %s14278_s21, %s14969_s11 }
0x2cf5   :  { %p14284_p3 = pnand %p14282_p2, %p14279_p1 }
0x2cf7   :  { %14287 = shalt.err (!%p14284_p3)
}
0x2cf8   :  { %9294 = dma.vmem_to_hbm [thread:$0]  %s9292_s27, 128, %s14969_s11, [#allocation107]  }
0x2cf9   :  { %14354 = dma.done.wait [#allocation8], 128  }
0x2cfa   :  { %14355 = vsyncadd [#allocation8], 4294967168 }
0x2cfb   :  { %14356 = dma.done.wait [#allocation107], 128  }
0x2cfc   :  { %14357 = vsyncadd [#allocation107], 4294967168 }
0x2cfd   :  { %9303 = vsyncpa [#allocation7], 1 }
0x2cfe   :  { %9304 = vsyncpa [#allocation10], 1 }
0x2cff   :  { %9305 = vsyncpa [#allocation13], 1 }
0x2d00   :  { %9306 = vsyncpa [#allocation16], 1 }
0x2d01   :  { %9307 = vsyncpa [#allocation19], 1 }
0x2d02   :  { %9308 = vsyncpa [#allocation22], 1 }
0x2d03   :  { %9309 = vsyncpa [#allocation25], 1 }
0x2d04   :  { %9310 = vsyncpa [#allocation28], 1 }
0x2d05   :  { %9311 = vsyncpa [#allocation31], 1 }
0x2d06   :  { %9312 = vsyncpa [#allocation34], 1 }
0x2d07   :  { %9313 = vsyncpa [#allocation37], 1 }
0x2d08   :  { %9314 = vsyncpa [#allocation40], 1 }
0x2d09   :  { %9315 = vsyncpa [#allocation43], 1 }
0x2d0a   :  { %9316 = vsyncpa [#allocation46], 1 }
0x2d0b   :  { %9317 = vsyncpa [#allocation49], 1 }
0x2d0c   :  { %9318 = vsyncpa [#allocation52], 1 }
0x2d0d   :  { %9319 = vsyncpa [#allocation55], 1 }
0x2d0e   :  { %9320 = vsyncpa [#allocation58], 1 }
0x2d0f   :  { %9321 = vsyncpa [#allocation61], 1 }
0x2d10   :  { %9322 = vsyncpa [#allocation64], 1 }
0x2d11   :  { %9323 = vsyncpa [#allocation67], 1 }
0x2d12   :  { %9324 = vsyncpa [#allocation70], 1 }
0x2d13   :  { %9325 = vsyncpa [#allocation73], 1 }
0x2d14   :  { %9326 = vsyncpa [#allocation76], 1 }
0x2d15   :  { %9327 = vsyncpa [#allocation79], 1 }
0x2d16   :  { %9328 = vsyncpa [#allocation82], 1 }
0x2d17   :  { %9329 = vsyncpa [#allocation85], 1 }
0x2d18   :  { %9330 = vsyncpa [#allocation88], 1 }
0x2d19   :  { %9331 = vsyncpa [#allocation91], 1 }
0x2d1a   :  { %9332 = vsyncpa [#allocation94], 1 }
0x2d1b   :  { %9333 = vsyncpa [#allocation97], 1 }
0x2d1c   :  { %9334 = vsyncpa [#allocation100], 1 }
0x2d1d   :  { %9335 = vsyncpa [#allocation103], 1 }
0x2d1e   :  { %9336 = vsyncpa [#allocation8], 1 }
0x2d1f   :  { %9337 = vsyncpa [#allocation107], 1 }

</bundles_post_ra>
